<compile_context>
chip_gen: v7x
topology: tpu7x:2x2x1
jax: 0.10.0
libtpu: 0.0.40
codegen_flags: <defaults>
</compile_context>

<pallas_src>
import functools
import math

import jax
import jax.numpy as jnp
from jax import lax
from jax.experimental import pallas as pl
from jax.experimental.pallas import tpu as pltpu

# ----------------------------- problem sizes -------------------------------
B, N, D = 2, 64, 32          # batch, tokens, dim
H, HD = 4, 8                 # num_attention_heads, attention_head_dim (H*HD == D)
M, DC = 8, 64                # encoder tokens, cross_attention_dim
F = 4 * D                    # feed-forward inner dim (diffusers default mult=4)
EPS = 1e-5                   # norm_eps
SCALE = 1.0 / math.sqrt(HD)  # attention scale = head_dim ** -0.5


# ----------------------------- kernel helpers -------------------------------
def _layernorm(x, g, b):
    mu = jnp.mean(x, axis=-1, keepdims=True)
    xc = x - mu
    var = jnp.mean(xc * xc, axis=-1, keepdims=True)
    return xc * lax.rsqrt(var + EPS) * g + b


def _softmax(s):
    s = s - jnp.max(s, axis=-1, keepdims=True)
    e = jnp.exp(s)
    return e * pl.reciprocal(jnp.sum(e, axis=-1, keepdims=True), approx=True)


def _erf(x):
    # Abramowitz & Stegun 7.1.26 (abs err < 1.5e-7): matches PyTorch's exact-erf GELU.
    a1, a2, a3, a4, a5 = 0.254829592, -0.284496736, 1.421413741, -1.453152027, 1.061405429
    p = 0.3275911
    ax = jnp.abs(x)
    t = pl.reciprocal(1.0 + p * ax, approx=True)
    poly = ((((a5 * t + a4) * t + a3) * t + a2) * t + a1) * t
    y = 1.0 - poly * jnp.exp(-ax * ax)
    return jnp.where(x < 0, -y, y)


def _gelu_exact(x):
    return 0.5 * x * (1.0 + _erf(x * (1.0 / math.sqrt(2.0))))


def _attention(q_all, k_all, v_all, wo, bo, bb, nq, nkv):
    """q_all: (bb*nq, H*HD) f32; k_all/v_all: (bb*nkv, H*HD) f32; wo: (H*HD, D) bf16."""
    outs = []
    for b in range(bb):                                  # static, tiny
        qb = q_all[b * nq:(b + 1) * nq].astype(jnp.bfloat16)
        kb = k_all[b * nkv:(b + 1) * nkv].astype(jnp.bfloat16)
        vb = v_all[b * nkv:(b + 1) * nkv].astype(jnp.bfloat16)
        head_outs = []
        for h in range(H):                               # static, H == 4
            qh = qb[:, h * HD:(h + 1) * HD]
            kh = kb[:, h * HD:(h + 1) * HD]
            vh = vb[:, h * HD:(h + 1) * HD]
            s = jnp.einsum("nd,md->nm", qh, kh,
                           preferred_element_type=jnp.float32) * SCALE     # (nq, nkv)
            p = _softmax(s)
            head_outs.append(jnp.dot(p.astype(jnp.bfloat16), vh,
                                     preferred_element_type=jnp.float32))  # (nq, HD)
        outs.append(jnp.concatenate(head_outs, axis=-1))                   # (nq, H*HD)
    o_all = jnp.concatenate(outs, axis=0)                                  # (bb*nq, H*HD)
    return jnp.dot(o_all.astype(jnp.bfloat16), wo,
                   preferred_element_type=jnp.float32) + bo


# ------------------------------- the kernel ---------------------------------
def _block_kernel(x_ref, ctx_ref, wqkv1_ref, wsq_ref, wkv2_ref,
                  wff1_ref, wff2_ref, vec_ref, bff_ref, out_ref, *, bb):
    x = x_ref[...].astype(jnp.float32)          # (bb*N, D)
    ctx = ctx_ref[...]                          # (bb*M, DC) f32

    vec = vec_ref[...]                          # (9, D) f32
    g1, b1, bo1 = vec[0:1], vec[1:2], vec[2:3]
    g2, b2, bo2 = vec[3:4], vec[4:5], vec[5:6]
    g3, b3, bf2 = vec[6:7], vec[7:8], vec[8:9]

    # ---- 1) self-attention block -------------------------------------------
    xn = _layernorm(x, g1, b1)
    qkv = jnp.dot(xn.astype(jnp.bfloat16), wqkv1_ref[...],
                  preferred_element_type=jnp.float32)                      # (bb*N, 3D)
    x = x + _attention(qkv[:, :D], qkv[:, D:2 * D], qkv[:, 2 * D:],
                       wsq_ref[0], bo1, bb, N, N)

    # ---- 2) cross-attention block ------------------------------------------
    xn = _layernorm(x, g2, b2)
    q = jnp.dot(xn.astype(jnp.bfloat16), wsq_ref[1],
                preferred_element_type=jnp.float32)                        # (bb*N, D)
    kv = jnp.dot(ctx.astype(jnp.bfloat16), wkv2_ref[...],
                 preferred_element_type=jnp.float32)                       # (bb*M, 2D)
    x = x + _attention(q, kv[:, :D], kv[:, D:], wsq_ref[2], bo2, bb, N, M)

    # ---- 3) GEGLU feed-forward block ---------------------------------------
    xn = _layernorm(x, g3, b3)
    hvg = jnp.dot(xn.astype(jnp.bfloat16), wff1_ref[...],
                  preferred_element_type=jnp.float32) + bff_ref[...]       # (bb*N, 2F)
    hf = hvg[:, :F] * _gelu_exact(hvg[:, F:])                              # split at lane 128
    x = x + jnp.dot(hf.astype(jnp.bfloat16), wff2_ref[...],
                    preferred_element_type=jnp.float32) + bf2

    out_ref[...] = x.astype(out_ref.dtype)


# ----------------------------- param packing --------------------------------
def pack_params(params):
    (g1, b1, wq1, wk1, wv1, wo1, bo1,
     g2, b2, wq2, wk2, wv2, wo2, bo2,
     g3, b3, wfa, bfa, wfg, bfg, wf2, bf2) = params

    def heads_to_cols(w):                    # (H, Din, HD) -> (Din, H*HD)
        return jnp.transpose(w, (1, 0, 2)).reshape(w.shape[1], -1)

    w_qkv1 = jnp.concatenate(
        [heads_to_cols(wq1), heads_to_cols(wk1), heads_to_cols(wv1)],
        axis=-1).astype(jnp.bfloat16)                                      # (D, 3D)
    w_sq = jnp.stack([wo1.reshape(H * HD, D),                              # self out-proj
                      heads_to_cols(wq2),                                  # cross q-proj
                      wo2.reshape(H * HD, D)]).astype(jnp.bfloat16)        # (3, D, D)
    w_kv2 = jnp.concatenate([heads_to_cols(wk2), heads_to_cols(wv2)],
                            axis=-1).astype(jnp.bfloat16)                  # (DC, 2D)
    w_ff1 = jnp.concatenate([wfa, wfg], axis=-1).astype(jnp.bfloat16)      # (D, 2F)
    w_ff2 = wf2.astype(jnp.bfloat16)                                       # (F, D)
    vec_d = jnp.concatenate([g1, b1, bo1, g2, b2, bo2, g3, b3, bf2],
                            axis=0).astype(jnp.float32)                    # (9, D)
    b_ff1 = jnp.concatenate([bfa, bfg], axis=-1).astype(jnp.float32)       # (1, 2F)
    return (w_qkv1, w_sq, w_kv2, w_ff1, w_ff2, vec_d, b_ff1)


# ------------------------------- wrapper -------------------------------------
def basic_transformer_mobile_block(hidden_states, encoder_hidden_states, packed,
                                   *, batches_per_step=None):
    """batches_per_step=None processes the whole batch in one grid step (best for
    single-TC v5e/v6e); set batches_per_step=1 on v7x to shard the batch axis
    across its 2 TensorCores."""
    bb = B if batches_per_step is None else batches_per_step
    assert B % bb == 0
    grid = (B // bb,)

    x2 = hidden_states.reshape(B * N, D)
    c2 = encoder_hidden_states.reshape(B * M, DC)
    w_qkv1, w_sq, w_kv2, w_ff1, w_ff2, vec_d, b_ff1 = packed

    def rep(shape):
        return pl.BlockSpec(shape, lambda i, _z=(0,) * len(shape): _z)

    in_specs = [
        pl.BlockSpec((bb * N, D), lambda i: (i, 0)),
        pl.BlockSpec((bb * M, DC), lambda i: (i, 0)),
        rep(w_qkv1.shape), rep(w_sq.shape), rep(w_kv2.shape),
        rep(w_ff1.shape), rep(w_ff2.shape), rep(vec_d.shape), rep(b_ff1.shape),
    ]

    out = pl.pallas_call(
        functools.partial(_block_kernel, bb=bb),
        out_shape=jax.ShapeDtypeStruct((B * N, D), hidden_states.dtype),
        grid_spec=pltpu.PrefetchScalarGridSpec(
            num_scalar_prefetch=0,
            grid=grid,
            in_specs=in_specs,
            out_specs=pl.BlockSpec((bb * N, D), lambda i: (i, 0)),
        ),
        compiler_params=pltpu.CompilerParams(
            dimension_semantics=("parallel",)),
    )(x2, c2, w_qkv1, w_sq, w_kv2, w_ff1, w_ff2, vec_d, b_ff1)
    return out.reshape(B, N, D)


# --------------------------- pure-JAX reference ------------------------------
def reference(x, ctx, params):
    (g1, b1, wq1, wk1, wv1, wo1, bo1,
     g2, b2, wq2, wk2, wv2, wo2, bo2,
     g3, b3, wfa, bfa, wfg, bfg, wf2, bf2) = params
    hp = jax.lax.Precision.HIGHEST

    def ln(x, g, b):
        mu = jnp.mean(x, -1, keepdims=True)
        xc = x - mu
        var = jnp.mean(xc * xc, -1, keepdims=True)
        return xc * lax.rsqrt(var + EPS) * g + b

    def mha(xn, c, wq, wk, wv, wo, bo):
        q = jnp.einsum("bnd,hde->bhne", xn, wq, precision=hp)
        k = jnp.einsum("bmd,hde->bhme", c, wk, precision=hp)
        v = jnp.einsum("bmd,hde->bhme", c, wv, precision=hp)
        s = jnp.einsum("bhne,bhme->bhnm", q, k, precision=hp) * SCALE
        p = jax.nn.softmax(s, axis=-1)
        o = jnp.einsum("bhnm,bhme->bhne", p, v, precision=hp)
        return jnp.einsum("bhne,hed->bnd", o, wo, precision=hp) + bo

    xn = ln(x, g1, b1)
    x = x + mha(xn, xn, wq1, wk1, wv1, wo1, bo1)
    xn = ln(x, g2, b2)
    x = x + mha(xn, ctx, wq2, wk2, wv2, wo2, bo2)
    xn = ln(x, g3, b3)
    hv = jnp.einsum("bnd,df->bnf", xn, wfa, precision=hp) + bfa
    hg = jnp.einsum("bnd,df->bnf", xn, wfg, precision=hp) + bfg
    hf = hv * jax.nn.gelu(hg, approximate=False)   # exact erf GELU (PyTorch default)
    x = x + jnp.einsum("bnf,fd->bnd", hf, wf2, precision=hp) + bf2
    return x


# ---------------------------------- main -------------------------------------
if __name__ == "__main__":
    keys = iter(jax.random.split(jax.random.PRNGKey(0), 32))

    def w(shape, scale=0.05):
        return (scale * jax.random.normal(next(keys), shape)).astype(jnp.float32)

    def ln_params():
        g = (1.0 + 0.1 * jax.random.normal(next(keys), (1, D))).astype(jnp.float32)
        b = (0.1 * jax.random.normal(next(keys), (1, D))).astype(jnp.float32)
        return g, b

    # norm1 / attn1 (self-attention, attention_bias=False, out_bias=True)
    g1, b1 = ln_params()
    wq1, wk1, wv1 = w((H, D, HD)), w((H, D, HD)), w((H, D, HD))
    wo1, bo1 = w((H, HD, D)), w((1, D))
    # norm2 / attn2 (cross-attention to encoder_hidden_states)
    g2, b2 = ln_params()
    wq2 = w((H, D, HD))
    wk2, wv2 = w((H, DC, HD)), w((H, DC, HD))
    wo2, bo2 = w((H, HD, D)), w((1, D))
    # norm3 / GEGLU feed-forward
    g3, b3 = ln_params()
    wfa, bfa = w((D, F)), w((1, F))
    wfg, bfg = w((D, F)), w((1, F))
    wf2, bf2 = w((F, D)), w((1, D))

    params = [g1, b1, wq1, wk1, wv1, wo1, bo1,
              g2, b2, wq2, wk2, wv2, wo2, bo2,
              g3, b3, wfa, bfa, wfg, bfg, wf2, bf2]

    hidden_states = jax.random.normal(next(keys), (B, N, D), jnp.float32)
    encoder_hidden_states = jax.random.normal(next(keys), (B, M, DC), jnp.float32)

    packed = pack_params(params)
    out = basic_transformer_mobile_block(hidden_states, encoder_hidden_states, packed)
    out = jax.block_until_ready(out)

    ref = reference(hidden_states, encoder_hidden_states, params)
    assert out.shape == (B, N, D)
    # bf16 MXU operands (f32 accumulate) + approx reciprocals => bf16-level tolerance.
    err = float(jnp.max(jnp.abs(out - ref)))
    assert jnp.allclose(out, ref, atol=1e-2, rtol=1e-2), err

    print("KERNEL_OK")
</pallas_src>

<mosaic_0001>
module attributes {stable_mosaic.version = 11 : i64} {
  func.func @_block_kernel(%arg0: i32, %arg1: memref<128x32xf32, #tpu.memory_space<vmem>>, %arg2: memref<16x64xf32, #tpu.memory_space<vmem>>, %arg3: memref<32x96xbf16, #tpu.memory_space<vmem>>, %arg4: memref<3x32x32xbf16, #tpu.memory_space<vmem>>, %arg5: memref<64x64xbf16, #tpu.memory_space<vmem>>, %arg6: memref<32x256xbf16, #tpu.memory_space<vmem>>, %arg7: memref<128x32xbf16, #tpu.memory_space<vmem>>, %arg8: memref<9x32xf32, #tpu.memory_space<vmem>>, %arg9: memref<1x256xf32, #tpu.memory_space<vmem>>, %arg10: memref<128x32xf32, #tpu.memory_space<vmem>>) attributes {dimension_semantics = [#tpu.dimension_semantics<parallel>], iteration_bounds = array<i64: 1>, scalar_prefetch = 0 : i64, scratch_operands = 0 : i64, tpu.core_type = #tpu.core_type<tc>, window_params = [{transform_indices = @transform_0, window_bounds = array<i64: 128, 32>}, {transform_indices = @transform_1, window_bounds = array<i64: 16, 64>}, {pipeline_mode = #tpu.pipeline_mode<synchronous>, transform_indices = @transform_2, window_bounds = array<i64: 32, 96>}, {pipeline_mode = #tpu.pipeline_mode<synchronous>, transform_indices = @transform_3, window_bounds = array<i64: 3, 32, 32>}, {pipeline_mode = #tpu.pipeline_mode<synchronous>, transform_indices = @transform_4, window_bounds = array<i64: 64, 64>}, {pipeline_mode = #tpu.pipeline_mode<synchronous>, transform_indices = @transform_5, window_bounds = array<i64: 32, 256>}, {pipeline_mode = #tpu.pipeline_mode<synchronous>, transform_indices = @transform_6, window_bounds = array<i64: 128, 32>}, {pipeline_mode = #tpu.pipeline_mode<synchronous>, transform_indices = @transform_7, window_bounds = array<i64: 9, 32>}, {pipeline_mode = #tpu.pipeline_mode<synchronous>, transform_indices = @transform_8, window_bounds = array<i64: 1, 256>}, {transform_indices = @transform_9, window_bounds = array<i64: 128, 32>}]} {
    %c0 = arith.constant 0 : index
    %c0_0 = arith.constant 0 : index
    %0 = vector.load %arg1[%c0, %c0_0] : memref<128x32xf32, #tpu.memory_space<vmem>>, vector<128x32xf32>
    %c0_1 = arith.constant 0 : index
    %c0_2 = arith.constant 0 : index
    %1 = vector.load %arg2[%c0_1, %c0_2] : memref<16x64xf32, #tpu.memory_space<vmem>>, vector<16x64xf32>
    %c0_3 = arith.constant 0 : index
    %c0_4 = arith.constant 0 : index
    %2 = vector.load %arg8[%c0_3, %c0_4] : memref<9x32xf32, #tpu.memory_space<vmem>>, vector<9x32xf32>
    %3 = vector.extract_strided_slice %2 {offsets = [0, 0], sizes = [1, 32], strides = [1, 1]} : vector<9x32xf32> to vector<1x32xf32>
    %4 = vector.extract_strided_slice %2 {offsets = [1, 0], sizes = [1, 32], strides = [1, 1]} : vector<9x32xf32> to vector<1x32xf32>
    %5 = vector.extract_strided_slice %2 {offsets = [2, 0], sizes = [1, 32], strides = [1, 1]} : vector<9x32xf32> to vector<1x32xf32>
    %6 = vector.extract_strided_slice %2 {offsets = [3, 0], sizes = [1, 32], strides = [1, 1]} : vector<9x32xf32> to vector<1x32xf32>
    %7 = vector.extract_strided_slice %2 {offsets = [4, 0], sizes = [1, 32], strides = [1, 1]} : vector<9x32xf32> to vector<1x32xf32>
    %8 = vector.extract_strided_slice %2 {offsets = [5, 0], sizes = [1, 32], strides = [1, 1]} : vector<9x32xf32> to vector<1x32xf32>
    %9 = vector.extract_strided_slice %2 {offsets = [6, 0], sizes = [1, 32], strides = [1, 1]} : vector<9x32xf32> to vector<1x32xf32>
    %10 = vector.extract_strided_slice %2 {offsets = [7, 0], sizes = [1, 32], strides = [1, 1]} : vector<9x32xf32> to vector<1x32xf32>
    %11 = vector.extract_strided_slice %2 {offsets = [8, 0], sizes = [1, 32], strides = [1, 1]} : vector<9x32xf32> to vector<1x32xf32>
    %cst = arith.constant dense<0.000000e+00> : vector<128xf32>
    %12 = vector.multi_reduction <add>, %0, %cst [1] : vector<128x32xf32> to vector<128xf32>
    %13 = vector.shape_cast %12 : vector<128xf32> to vector<128x1xf32>
    %cst_5 = arith.constant 3.200000e+01 : f32
    %14 = vector.broadcast %cst_5 : f32 to vector<128x1xf32>
    %15 = arith.divf %13, %14 : vector<128x1xf32>
    %16 = vector.broadcast %15 : vector<128x1xf32> to vector<128x32xf32>
    %17 = arith.subf %0, %16 : vector<128x32xf32>
    %18 = arith.mulf %17, %17 : vector<128x32xf32>
    %cst_6 = arith.constant dense<0.000000e+00> : vector<128xf32>
    %19 = vector.multi_reduction <add>, %18, %cst_6 [1] : vector<128x32xf32> to vector<128xf32>
    %20 = vector.shape_cast %19 : vector<128xf32> to vector<128x1xf32>
    %cst_7 = arith.constant 3.200000e+01 : f32
    %21 = vector.broadcast %cst_7 : f32 to vector<128x1xf32>
    %22 = arith.divf %20, %21 : vector<128x1xf32>
    %cst_8 = arith.constant 9.99999974E-6 : f32
    %23 = vector.broadcast %cst_8 : f32 to vector<128x1xf32>
    %24 = arith.addf %22, %23 : vector<128x1xf32>
    %25 = math.rsqrt %24 : vector<128x1xf32>
    %26 = vector.broadcast %25 : vector<128x1xf32> to vector<128x32xf32>
    %27 = arith.mulf %17, %26 : vector<128x32xf32>
    %28 = vector.broadcast %3 : vector<1x32xf32> to vector<128x32xf32>
    %29 = arith.mulf %27, %28 : vector<128x32xf32>
    %30 = vector.broadcast %4 : vector<1x32xf32> to vector<128x32xf32>
    %31 = arith.addf %29, %30 : vector<128x32xf32>
    %32 = arith.truncf %31 : vector<128x32xf32> to vector<128x32xbf16>
    %c0_9 = arith.constant 0 : index
    %c0_10 = arith.constant 0 : index
    %33 = vector.load %arg3[%c0_9, %c0_10] : memref<32x96xbf16, #tpu.memory_space<vmem>>, vector<32x96xbf16>
    %cst_11 = arith.constant dense<0.000000e+00> : vector<128x96xf32>
    %34 = tpu.matmul %32, %33, %cst_11 {dimension_numbers = #tpu.dot_dimension_numbers<[1], [0], [0], [1], [0, 0, 1, 1], [], []>} : vector<128x32xbf16>, vector<32x96xbf16>, vector<128x96xf32> -> vector<128x96xf32>
    %35 = vector.extract_strided_slice %34 {offsets = [0, 0], sizes = [128, 32], strides = [1, 1]} : vector<128x96xf32> to vector<128x32xf32>
    %36 = vector.extract_strided_slice %34 {offsets = [0, 32], sizes = [128, 32], strides = [1, 1]} : vector<128x96xf32> to vector<128x32xf32>
    %37 = vector.extract_strided_slice %34 {offsets = [0, 64], sizes = [128, 32], strides = [1, 1]} : vector<128x96xf32> to vector<128x32xf32>
    %c0_12 = arith.constant 0 : index
    %c0_13 = arith.constant 0 : index
    %c0_14 = arith.constant 0 : index
    %38 = vector.load %arg4[%c0_12, %c0_13, %c0_14] : memref<3x32x32xbf16, #tpu.memory_space<vmem>>, vector<1x32x32xbf16>
    %39 = vector.shape_cast %38 : vector<1x32x32xbf16> to vector<32x32xbf16>
    %40 = vector.extract_strided_slice %35 {offsets = [0, 0], sizes = [64, 32], strides = [1, 1]} : vector<128x32xf32> to vector<64x32xf32>
    %41 = arith.truncf %40 : vector<64x32xf32> to vector<64x32xbf16>
    %42 = vector.extract_strided_slice %36 {offsets = [0, 0], sizes = [64, 32], strides = [1, 1]} : vector<128x32xf32> to vector<64x32xf32>
    %43 = arith.truncf %42 : vector<64x32xf32> to vector<64x32xbf16>
    %44 = vector.extract_strided_slice %37 {offsets = [0, 0], sizes = [64, 32], strides = [1, 1]} : vector<128x32xf32> to vector<64x32xf32>
    %45 = arith.truncf %44 : vector<64x32xf32> to vector<64x32xbf16>
    %46 = vector.extract_strided_slice %41 {offsets = [0, 0], sizes = [64, 8], strides = [1, 1]} : vector<64x32xbf16> to vector<64x8xbf16>
    %47 = vector.extract_strided_slice %43 {offsets = [0, 0], sizes = [64, 8], strides = [1, 1]} : vector<64x32xbf16> to vector<64x8xbf16>
    %48 = vector.extract_strided_slice %45 {offsets = [0, 0], sizes = [64, 8], strides = [1, 1]} : vector<64x32xbf16> to vector<64x8xbf16>
    "tpu.trace_start"() <{level = 10 : i32, message = "nd,md->nm"}> : () -> ()
    %cst_15 = arith.constant dense<0.000000e+00> : vector<64x64xf32>
    %49 = tpu.matmul %46, %47, %cst_15 {dimension_numbers = #tpu.dot_dimension_numbers<[1], [1], [0], [0], [0, 0, 1, 0], [], []>} : vector<64x8xbf16>, vector<64x8xbf16>, vector<64x64xf32> -> vector<64x64xf32>
    "tpu.trace_stop"() : () -> ()
    %cst_16 = arith.constant 0.353553385 : f32
    %50 = vector.broadcast %cst_16 : f32 to vector<64x64xf32>
    %51 = arith.mulf %49, %50 : vector<64x64xf32>
    %cst_17 = arith.constant dense<0xFF800000> : vector<64xf32>
    %52 = vector.multi_reduction <maximumf>, %51, %cst_17 [1] : vector<64x64xf32> to vector<64xf32>
    %53 = vector.shape_cast %52 : vector<64xf32> to vector<64x1xf32>
    %54 = vector.broadcast %53 : vector<64x1xf32> to vector<64x64xf32>
    %55 = arith.subf %51, %54 : vector<64x64xf32>
    %56 = math.exp %55 : vector<64x64xf32>
    %cst_18 = arith.constant dense<0.000000e+00> : vector<64xf32>
    %57 = vector.multi_reduction <add>, %56, %cst_18 [1] : vector<64x64xf32> to vector<64xf32>
    %58 = vector.shape_cast %57 : vector<64xf32> to vector<64x1xf32>
    %59 = tpu.reciprocal %58 {approx = true} : vector<64x1xf32> -> vector<64x1xf32>
    %60 = vector.broadcast %59 : vector<64x1xf32> to vector<64x64xf32>
    %61 = arith.mulf %56, %60 : vector<64x64xf32>
    %62 = arith.truncf %61 : vector<64x64xf32> to vector<64x64xbf16>
    %cst_19 = arith.constant dense<0.000000e+00> : vector<64x8xf32>
    %63 = tpu.matmul %62, %48, %cst_19 {dimension_numbers = #tpu.dot_dimension_numbers<[1], [0], [0], [1], [0, 0, 1, 1], [], []>} : vector<64x64xbf16>, vector<64x8xbf16>, vector<64x8xf32> -> vector<64x8xf32>
    %64 = vector.extract_strided_slice %41 {offsets = [0, 8], sizes = [64, 8], strides = [1, 1]} : vector<64x32xbf16> to vector<64x8xbf16>
    %65 = vector.extract_strided_slice %43 {offsets = [0, 8], sizes = [64, 8], strides = [1, 1]} : vector<64x32xbf16> to vector<64x8xbf16>
    %66 = vector.extract_strided_slice %45 {offsets = [0, 8], sizes = [64, 8], strides = [1, 1]} : vector<64x32xbf16> to vector<64x8xbf16>
    "tpu.trace_start"() <{level = 10 : i32, message = "nd,md->nm"}> : () -> ()
    %cst_20 = arith.constant dense<0.000000e+00> : vector<64x64xf32>
    %67 = tpu.matmul %64, %65, %cst_20 {dimension_numbers = #tpu.dot_dimension_numbers<[1], [1], [0], [0], [0, 0, 1, 0], [], []>} : vector<64x8xbf16>, vector<64x8xbf16>, vector<64x64xf32> -> vector<64x64xf32>
    "tpu.trace_stop"() : () -> ()
    %cst_21 = arith.constant 0.353553385 : f32
    %68 = vector.broadcast %cst_21 : f32 to vector<64x64xf32>
    %69 = arith.mulf %67, %68 : vector<64x64xf32>
    %cst_22 = arith.constant dense<0xFF800000> : vector<64xf32>
    %70 = vector.multi_reduction <maximumf>, %69, %cst_22 [1] : vector<64x64xf32> to vector<64xf32>
    %71 = vector.shape_cast %70 : vector<64xf32> to vector<64x1xf32>
    %72 = vector.broadcast %71 : vector<64x1xf32> to vector<64x64xf32>
    %73 = arith.subf %69, %72 : vector<64x64xf32>
    %74 = math.exp %73 : vector<64x64xf32>
    %cst_23 = arith.constant dense<0.000000e+00> : vector<64xf32>
    %75 = vector.multi_reduction <add>, %74, %cst_23 [1] : vector<64x64xf32> to vector<64xf32>
    %76 = vector.shape_cast %75 : vector<64xf32> to vector<64x1xf32>
    %77 = tpu.reciprocal %76 {approx = true} : vector<64x1xf32> -> vector<64x1xf32>
    %78 = vector.broadcast %77 : vector<64x1xf32> to vector<64x64xf32>
    %79 = arith.mulf %74, %78 : vector<64x64xf32>
    %80 = arith.truncf %79 : vector<64x64xf32> to vector<64x64xbf16>
    %cst_24 = arith.constant dense<0.000000e+00> : vector<64x8xf32>
    %81 = tpu.matmul %80, %66, %cst_24 {dimension_numbers = #tpu.dot_dimension_numbers<[1], [0], [0], [1], [0, 0, 1, 1], [], []>} : vector<64x64xbf16>, vector<64x8xbf16>, vector<64x8xf32> -> vector<64x8xf32>
    %82 = vector.extract_strided_slice %41 {offsets = [0, 16], sizes = [64, 8], strides = [1, 1]} : vector<64x32xbf16> to vector<64x8xbf16>
    %83 = vector.extract_strided_slice %43 {offsets = [0, 16], sizes = [64, 8], strides = [1, 1]} : vector<64x32xbf16> to vector<64x8xbf16>
    %84 = vector.extract_strided_slice %45 {offsets = [0, 16], sizes = [64, 8], strides = [1, 1]} : vector<64x32xbf16> to vector<64x8xbf16>
    "tpu.trace_start"() <{level = 10 : i32, message = "nd,md->nm"}> : () -> ()
    %cst_25 = arith.constant dense<0.000000e+00> : vector<64x64xf32>
    %85 = tpu.matmul %82, %83, %cst_25 {dimension_numbers = #tpu.dot_dimension_numbers<[1], [1], [0], [0], [0, 0, 1, 0], [], []>} : vector<64x8xbf16>, vector<64x8xbf16>, vector<64x64xf32> -> vector<64x64xf32>
    "tpu.trace_stop"() : () -> ()
    %cst_26 = arith.constant 0.353553385 : f32
    %86 = vector.broadcast %cst_26 : f32 to vector<64x64xf32>
    %87 = arith.mulf %85, %86 : vector<64x64xf32>
    %cst_27 = arith.constant dense<0xFF800000> : vector<64xf32>
    %88 = vector.multi_reduction <maximumf>, %87, %cst_27 [1] : vector<64x64xf32> to vector<64xf32>
    %89 = vector.shape_cast %88 : vector<64xf32> to vector<64x1xf32>
    %90 = vector.broadcast %89 : vector<64x1xf32> to vector<64x64xf32>
    %91 = arith.subf %87, %90 : vector<64x64xf32>
    %92 = math.exp %91 : vector<64x64xf32>
    %cst_28 = arith.constant dense<0.000000e+00> : vector<64xf32>
    %93 = vector.multi_reduction <add>, %92, %cst_28 [1] : vector<64x64xf32> to vector<64xf32>
    %94 = vector.shape_cast %93 : vector<64xf32> to vector<64x1xf32>
    %95 = tpu.reciprocal %94 {approx = true} : vector<64x1xf32> -> vector<64x1xf32>
    %96 = vector.broadcast %95 : vector<64x1xf32> to vector<64x64xf32>
    %97 = arith.mulf %92, %96 : vector<64x64xf32>
    %98 = arith.truncf %97 : vector<64x64xf32> to vector<64x64xbf16>
    %cst_29 = arith.constant dense<0.000000e+00> : vector<64x8xf32>
    %99 = tpu.matmul %98, %84, %cst_29 {dimension_numbers = #tpu.dot_dimension_numbers<[1], [0], [0], [1], [0, 0, 1, 1], [], []>} : vector<64x64xbf16>, vector<64x8xbf16>, vector<64x8xf32> -> vector<64x8xf32>
    %100 = vector.extract_strided_slice %41 {offsets = [0, 24], sizes = [64, 8], strides = [1, 1]} : vector<64x32xbf16> to vector<64x8xbf16>
    %101 = vector.extract_strided_slice %43 {offsets = [0, 24], sizes = [64, 8], strides = [1, 1]} : vector<64x32xbf16> to vector<64x8xbf16>
    %102 = vector.extract_strided_slice %45 {offsets = [0, 24], sizes = [64, 8], strides = [1, 1]} : vector<64x32xbf16> to vector<64x8xbf16>
    "tpu.trace_start"() <{level = 10 : i32, message = "nd,md->nm"}> : () -> ()
    %cst_30 = arith.constant dense<0.000000e+00> : vector<64x64xf32>
    %103 = tpu.matmul %100, %101, %cst_30 {dimension_numbers = #tpu.dot_dimension_numbers<[1], [1], [0], [0], [0, 0, 1, 0], [], []>} : vector<64x8xbf16>, vector<64x8xbf16>, vector<64x64xf32> -> vector<64x64xf32>
    "tpu.trace_stop"() : () -> ()
    %cst_31 = arith.constant 0.353553385 : f32
    %104 = vector.broadcast %cst_31 : f32 to vector<64x64xf32>
    %105 = arith.mulf %103, %104 : vector<64x64xf32>
    %cst_32 = arith.constant dense<0xFF800000> : vector<64xf32>
    %106 = vector.multi_reduction <maximumf>, %105, %cst_32 [1] : vector<64x64xf32> to vector<64xf32>
    %107 = vector.shape_cast %106 : vector<64xf32> to vector<64x1xf32>
    %108 = vector.broadcast %107 : vector<64x1xf32> to vector<64x64xf32>
    %109 = arith.subf %105, %108 : vector<64x64xf32>
    %110 = math.exp %109 : vector<64x64xf32>
    %cst_33 = arith.constant dense<0.000000e+00> : vector<64xf32>
    %111 = vector.multi_reduction <add>, %110, %cst_33 [1] : vector<64x64xf32> to vector<64xf32>
    %112 = vector.shape_cast %111 : vector<64xf32> to vector<64x1xf32>
    %113 = tpu.reciprocal %112 {approx = true} : vector<64x1xf32> -> vector<64x1xf32>
    %114 = vector.broadcast %113 : vector<64x1xf32> to vector<64x64xf32>
    %115 = arith.mulf %110, %114 : vector<64x64xf32>
    %116 = arith.truncf %115 : vector<64x64xf32> to vector<64x64xbf16>
    %cst_34 = arith.constant dense<0.000000e+00> : vector<64x8xf32>
    %117 = tpu.matmul %116, %102, %cst_34 {dimension_numbers = #tpu.dot_dimension_numbers<[1], [0], [0], [1], [0, 0, 1, 1], [], []>} : vector<64x64xbf16>, vector<64x8xbf16>, vector<64x8xf32> -> vector<64x8xf32>
    %118 = tpu.concatenate %63, %81, %99, %117 in 1 : vector<64x8xf32>, vector<64x8xf32>, vector<64x8xf32>, vector<64x8xf32> -> vector<64x32xf32>
    %119 = vector.extract_strided_slice %35 {offsets = [64, 0], sizes = [64, 32], strides = [1, 1]} : vector<128x32xf32> to vector<64x32xf32>
    %120 = arith.truncf %119 : vector<64x32xf32> to vector<64x32xbf16>
    %121 = vector.extract_strided_slice %36 {offsets = [64, 0], sizes = [64, 32], strides = [1, 1]} : vector<128x32xf32> to vector<64x32xf32>
    %122 = arith.truncf %121 : vector<64x32xf32> to vector<64x32xbf16>
    %123 = vector.extract_strided_slice %37 {offsets = [64, 0], sizes = [64, 32], strides = [1, 1]} : vector<128x32xf32> to vector<64x32xf32>
    %124 = arith.truncf %123 : vector<64x32xf32> to vector<64x32xbf16>
    %125 = vector.extract_strided_slice %120 {offsets = [0, 0], sizes = [64, 8], strides = [1, 1]} : vector<64x32xbf16> to vector<64x8xbf16>
    %126 = vector.extract_strided_slice %122 {offsets = [0, 0], sizes = [64, 8], strides = [1, 1]} : vector<64x32xbf16> to vector<64x8xbf16>
    %127 = vector.extract_strided_slice %124 {offsets = [0, 0], sizes = [64, 8], strides = [1, 1]} : vector<64x32xbf16> to vector<64x8xbf16>
    "tpu.trace_start"() <{level = 10 : i32, message = "nd,md->nm"}> : () -> ()
    %cst_35 = arith.constant dense<0.000000e+00> : vector<64x64xf32>
    %128 = tpu.matmul %125, %126, %cst_35 {dimension_numbers = #tpu.dot_dimension_numbers<[1], [1], [0], [0], [0, 0, 1, 0], [], []>} : vector<64x8xbf16>, vector<64x8xbf16>, vector<64x64xf32> -> vector<64x64xf32>
    "tpu.trace_stop"() : () -> ()
    %cst_36 = arith.constant 0.353553385 : f32
    %129 = vector.broadcast %cst_36 : f32 to vector<64x64xf32>
    %130 = arith.mulf %128, %129 : vector<64x64xf32>
    %cst_37 = arith.constant dense<0xFF800000> : vector<64xf32>
    %131 = vector.multi_reduction <maximumf>, %130, %cst_37 [1] : vector<64x64xf32> to vector<64xf32>
    %132 = vector.shape_cast %131 : vector<64xf32> to vector<64x1xf32>
    %133 = vector.broadcast %132 : vector<64x1xf32> to vector<64x64xf32>
    %134 = arith.subf %130, %133 : vector<64x64xf32>
    %135 = math.exp %134 : vector<64x64xf32>
    %cst_38 = arith.constant dense<0.000000e+00> : vector<64xf32>
    %136 = vector.multi_reduction <add>, %135, %cst_38 [1] : vector<64x64xf32> to vector<64xf32>
    %137 = vector.shape_cast %136 : vector<64xf32> to vector<64x1xf32>
    %138 = tpu.reciprocal %137 {approx = true} : vector<64x1xf32> -> vector<64x1xf32>
    %139 = vector.broadcast %138 : vector<64x1xf32> to vector<64x64xf32>
    %140 = arith.mulf %135, %139 : vector<64x64xf32>
    %141 = arith.truncf %140 : vector<64x64xf32> to vector<64x64xbf16>
    %cst_39 = arith.constant dense<0.000000e+00> : vector<64x8xf32>
    %142 = tpu.matmul %141, %127, %cst_39 {dimension_numbers = #tpu.dot_dimension_numbers<[1], [0], [0], [1], [0, 0, 1, 1], [], []>} : vector<64x64xbf16>, vector<64x8xbf16>, vector<64x8xf32> -> vector<64x8xf32>
    %143 = vector.extract_strided_slice %120 {offsets = [0, 8], sizes = [64, 8], strides = [1, 1]} : vector<64x32xbf16> to vector<64x8xbf16>
    %144 = vector.extract_strided_slice %122 {offsets = [0, 8], sizes = [64, 8], strides = [1, 1]} : vector<64x32xbf16> to vector<64x8xbf16>
    %145 = vector.extract_strided_slice %124 {offsets = [0, 8], sizes = [64, 8], strides = [1, 1]} : vector<64x32xbf16> to vector<64x8xbf16>
    "tpu.trace_start"() <{level = 10 : i32, message = "nd,md->nm"}> : () -> ()
    %cst_40 = arith.constant dense<0.000000e+00> : vector<64x64xf32>
    %146 = tpu.matmul %143, %144, %cst_40 {dimension_numbers = #tpu.dot_dimension_numbers<[1], [1], [0], [0], [0, 0, 1, 0], [], []>} : vector<64x8xbf16>, vector<64x8xbf16>, vector<64x64xf32> -> vector<64x64xf32>
    "tpu.trace_stop"() : () -> ()
    %cst_41 = arith.constant 0.353553385 : f32
    %147 = vector.broadcast %cst_41 : f32 to vector<64x64xf32>
    %148 = arith.mulf %146, %147 : vector<64x64xf32>
    %cst_42 = arith.constant dense<0xFF800000> : vector<64xf32>
    %149 = vector.multi_reduction <maximumf>, %148, %cst_42 [1] : vector<64x64xf32> to vector<64xf32>
    %150 = vector.shape_cast %149 : vector<64xf32> to vector<64x1xf32>
    %151 = vector.broadcast %150 : vector<64x1xf32> to vector<64x64xf32>
    %152 = arith.subf %148, %151 : vector<64x64xf32>
    %153 = math.exp %152 : vector<64x64xf32>
    %cst_43 = arith.constant dense<0.000000e+00> : vector<64xf32>
    %154 = vector.multi_reduction <add>, %153, %cst_43 [1] : vector<64x64xf32> to vector<64xf32>
    %155 = vector.shape_cast %154 : vector<64xf32> to vector<64x1xf32>
    %156 = tpu.reciprocal %155 {approx = true} : vector<64x1xf32> -> vector<64x1xf32>
    %157 = vector.broadcast %156 : vector<64x1xf32> to vector<64x64xf32>
    %158 = arith.mulf %153, %157 : vector<64x64xf32>
    %159 = arith.truncf %158 : vector<64x64xf32> to vector<64x64xbf16>
    %cst_44 = arith.constant dense<0.000000e+00> : vector<64x8xf32>
    %160 = tpu.matmul %159, %145, %cst_44 {dimension_numbers = #tpu.dot_dimension_numbers<[1], [0], [0], [1], [0, 0, 1, 1], [], []>} : vector<64x64xbf16>, vector<64x8xbf16>, vector<64x8xf32> -> vector<64x8xf32>
    %161 = vector.extract_strided_slice %120 {offsets = [0, 16], sizes = [64, 8], strides = [1, 1]} : vector<64x32xbf16> to vector<64x8xbf16>
    %162 = vector.extract_strided_slice %122 {offsets = [0, 16], sizes = [64, 8], strides = [1, 1]} : vector<64x32xbf16> to vector<64x8xbf16>
    %163 = vector.extract_strided_slice %124 {offsets = [0, 16], sizes = [64, 8], strides = [1, 1]} : vector<64x32xbf16> to vector<64x8xbf16>
    "tpu.trace_start"() <{level = 10 : i32, message = "nd,md->nm"}> : () -> ()
    %cst_45 = arith.constant dense<0.000000e+00> : vector<64x64xf32>
    %164 = tpu.matmul %161, %162, %cst_45 {dimension_numbers = #tpu.dot_dimension_numbers<[1], [1], [0], [0], [0, 0, 1, 0], [], []>} : vector<64x8xbf16>, vector<64x8xbf16>, vector<64x64xf32> -> vector<64x64xf32>
    "tpu.trace_stop"() : () -> ()
    %cst_46 = arith.constant 0.353553385 : f32
    %165 = vector.broadcast %cst_46 : f32 to vector<64x64xf32>
    %166 = arith.mulf %164, %165 : vector<64x64xf32>
    %cst_47 = arith.constant dense<0xFF800000> : vector<64xf32>
    %167 = vector.multi_reduction <maximumf>, %166, %cst_47 [1] : vector<64x64xf32> to vector<64xf32>
    %168 = vector.shape_cast %167 : vector<64xf32> to vector<64x1xf32>
    %169 = vector.broadcast %168 : vector<64x1xf32> to vector<64x64xf32>
    %170 = arith.subf %166, %169 : vector<64x64xf32>
    %171 = math.exp %170 : vector<64x64xf32>
    %cst_48 = arith.constant dense<0.000000e+00> : vector<64xf32>
    %172 = vector.multi_reduction <add>, %171, %cst_48 [1] : vector<64x64xf32> to vector<64xf32>
    %173 = vector.shape_cast %172 : vector<64xf32> to vector<64x1xf32>
    %174 = tpu.reciprocal %173 {approx = true} : vector<64x1xf32> -> vector<64x1xf32>
    %175 = vector.broadcast %174 : vector<64x1xf32> to vector<64x64xf32>
    %176 = arith.mulf %171, %175 : vector<64x64xf32>
    %177 = arith.truncf %176 : vector<64x64xf32> to vector<64x64xbf16>
    %cst_49 = arith.constant dense<0.000000e+00> : vector<64x8xf32>
    %178 = tpu.matmul %177, %163, %cst_49 {dimension_numbers = #tpu.dot_dimension_numbers<[1], [0], [0], [1], [0, 0, 1, 1], [], []>} : vector<64x64xbf16>, vector<64x8xbf16>, vector<64x8xf32> -> vector<64x8xf32>
    %179 = vector.extract_strided_slice %120 {offsets = [0, 24], sizes = [64, 8], strides = [1, 1]} : vector<64x32xbf16> to vector<64x8xbf16>
    %180 = vector.extract_strided_slice %122 {offsets = [0, 24], sizes = [64, 8], strides = [1, 1]} : vector<64x32xbf16> to vector<64x8xbf16>
    %181 = vector.extract_strided_slice %124 {offsets = [0, 24], sizes = [64, 8], strides = [1, 1]} : vector<64x32xbf16> to vector<64x8xbf16>
    "tpu.trace_start"() <{level = 10 : i32, message = "nd,md->nm"}> : () -> ()
    %cst_50 = arith.constant dense<0.000000e+00> : vector<64x64xf32>
    %182 = tpu.matmul %179, %180, %cst_50 {dimension_numbers = #tpu.dot_dimension_numbers<[1], [1], [0], [0], [0, 0, 1, 0], [], []>} : vector<64x8xbf16>, vector<64x8xbf16>, vector<64x64xf32> -> vector<64x64xf32>
    "tpu.trace_stop"() : () -> ()
    %cst_51 = arith.constant 0.353553385 : f32
    %183 = vector.broadcast %cst_51 : f32 to vector<64x64xf32>
    %184 = arith.mulf %182, %183 : vector<64x64xf32>
    %cst_52 = arith.constant dense<0xFF800000> : vector<64xf32>
    %185 = vector.multi_reduction <maximumf>, %184, %cst_52 [1] : vector<64x64xf32> to vector<64xf32>
    %186 = vector.shape_cast %185 : vector<64xf32> to vector<64x1xf32>
    %187 = vector.broadcast %186 : vector<64x1xf32> to vector<64x64xf32>
    %188 = arith.subf %184, %187 : vector<64x64xf32>
    %189 = math.exp %188 : vector<64x64xf32>
    %cst_53 = arith.constant dense<0.000000e+00> : vector<64xf32>
    %190 = vector.multi_reduction <add>, %189, %cst_53 [1] : vector<64x64xf32> to vector<64xf32>
    %191 = vector.shape_cast %190 : vector<64xf32> to vector<64x1xf32>
    %192 = tpu.reciprocal %191 {approx = true} : vector<64x1xf32> -> vector<64x1xf32>
    %193 = vector.broadcast %192 : vector<64x1xf32> to vector<64x64xf32>
    %194 = arith.mulf %189, %193 : vector<64x64xf32>
    %195 = arith.truncf %194 : vector<64x64xf32> to vector<64x64xbf16>
    %cst_54 = arith.constant dense<0.000000e+00> : vector<64x8xf32>
    %196 = tpu.matmul %195, %181, %cst_54 {dimension_numbers = #tpu.dot_dimension_numbers<[1], [0], [0], [1], [0, 0, 1, 1], [], []>} : vector<64x64xbf16>, vector<64x8xbf16>, vector<64x8xf32> -> vector<64x8xf32>
    %197 = tpu.concatenate %142, %160, %178, %196 in 1 : vector<64x8xf32>, vector<64x8xf32>, vector<64x8xf32>, vector<64x8xf32> -> vector<64x32xf32>
    %198 = tpu.concatenate %118, %197 in 0 : vector<64x32xf32>, vector<64x32xf32> -> vector<128x32xf32>
    %199 = arith.truncf %198 : vector<128x32xf32> to vector<128x32xbf16>
    %cst_55 = arith.constant dense<0.000000e+00> : vector<128x32xf32>
    %200 = tpu.matmul %199, %39, %cst_55 {dimension_numbers = #tpu.dot_dimension_numbers<[1], [0], [0], [1], [0, 0, 1, 1], [], []>} : vector<128x32xbf16>, vector<32x32xbf16>, vector<128x32xf32> -> vector<128x32xf32>
    %201 = vector.broadcast %5 : vector<1x32xf32> to vector<128x32xf32>
    %202 = arith.addf %200, %201 : vector<128x32xf32>
    %203 = arith.addf %0, %202 : vector<128x32xf32>
    %cst_56 = arith.constant dense<0.000000e+00> : vector<128xf32>
    %204 = vector.multi_reduction <add>, %203, %cst_56 [1] : vector<128x32xf32> to vector<128xf32>
    %205 = vector.shape_cast %204 : vector<128xf32> to vector<128x1xf32>
    %cst_57 = arith.constant 3.200000e+01 : f32
    %206 = vector.broadcast %cst_57 : f32 to vector<128x1xf32>
    %207 = arith.divf %205, %206 : vector<128x1xf32>
    %208 = vector.broadcast %207 : vector<128x1xf32> to vector<128x32xf32>
    %209 = arith.subf %203, %208 : vector<128x32xf32>
    %210 = arith.mulf %209, %209 : vector<128x32xf32>
    %cst_58 = arith.constant dense<0.000000e+00> : vector<128xf32>
    %211 = vector.multi_reduction <add>, %210, %cst_58 [1] : vector<128x32xf32> to vector<128xf32>
    %212 = vector.shape_cast %211 : vector<128xf32> to vector<128x1xf32>
    %cst_59 = arith.constant 3.200000e+01 : f32
    %213 = vector.broadcast %cst_59 : f32 to vector<128x1xf32>
    %214 = arith.divf %212, %213 : vector<128x1xf32>
    %cst_60 = arith.constant 9.99999974E-6 : f32
    %215 = vector.broadcast %cst_60 : f32 to vector<128x1xf32>
    %216 = arith.addf %214, %215 : vector<128x1xf32>
    %217 = math.rsqrt %216 : vector<128x1xf32>
    %218 = vector.broadcast %217 : vector<128x1xf32> to vector<128x32xf32>
    %219 = arith.mulf %209, %218 : vector<128x32xf32>
    %220 = vector.broadcast %6 : vector<1x32xf32> to vector<128x32xf32>
    %221 = arith.mulf %219, %220 : vector<128x32xf32>
    %222 = vector.broadcast %7 : vector<1x32xf32> to vector<128x32xf32>
    %223 = arith.addf %221, %222 : vector<128x32xf32>
    %224 = arith.truncf %223 : vector<128x32xf32> to vector<128x32xbf16>
    %c1 = arith.constant 1 : index
    %c0_61 = arith.constant 0 : index
    %c0_62 = arith.constant 0 : index
    %225 = vector.load %arg4[%c1, %c0_61, %c0_62] : memref<3x32x32xbf16, #tpu.memory_space<vmem>>, vector<1x32x32xbf16>
    %226 = vector.shape_cast %225 : vector<1x32x32xbf16> to vector<32x32xbf16>
    %cst_63 = arith.constant dense<0.000000e+00> : vector<128x32xf32>
    %227 = tpu.matmul %224, %226, %cst_63 {dimension_numbers = #tpu.dot_dimension_numbers<[1], [0], [0], [1], [0, 0, 1, 1], [], []>} : vector<128x32xbf16>, vector<32x32xbf16>, vector<128x32xf32> -> vector<128x32xf32>
    %228 = arith.truncf %1 : vector<16x64xf32> to vector<16x64xbf16>
    %c0_64 = arith.constant 0 : index
    %c0_65 = arith.constant 0 : index
    %229 = vector.load %arg5[%c0_64, %c0_65] : memref<64x64xbf16, #tpu.memory_space<vmem>>, vector<64x64xbf16>
    %cst_66 = arith.constant dense<0.000000e+00> : vector<16x64xf32>
    %230 = tpu.matmul %228, %229, %cst_66 {dimension_numbers = #tpu.dot_dimension_numbers<[1], [0], [0], [1], [0, 0, 1, 1], [], []>} : vector<16x64xbf16>, vector<64x64xbf16>, vector<16x64xf32> -> vector<16x64xf32>
    %231 = vector.extract_strided_slice %230 {offsets = [0, 0], sizes = [16, 32], strides = [1, 1]} : vector<16x64xf32> to vector<16x32xf32>
    %232 = vector.extract_strided_slice %230 {offsets = [0, 32], sizes = [16, 32], strides = [1, 1]} : vector<16x64xf32> to vector<16x32xf32>
    %c2 = arith.constant 2 : index
    %c0_67 = arith.constant 0 : index
    %c0_68 = arith.constant 0 : index
    %233 = vector.load %arg4[%c2, %c0_67, %c0_68] : memref<3x32x32xbf16, #tpu.memory_space<vmem>>, vector<1x32x32xbf16>
    %234 = vector.shape_cast %233 : vector<1x32x32xbf16> to vector<32x32xbf16>
    %235 = vector.extract_strided_slice %227 {offsets = [0, 0], sizes = [64, 32], strides = [1, 1]} : vector<128x32xf32> to vector<64x32xf32>
    %236 = arith.truncf %235 : vector<64x32xf32> to vector<64x32xbf16>
    %237 = vector.extract_strided_slice %231 {offsets = [0, 0], sizes = [8, 32], strides = [1, 1]} : vector<16x32xf32> to vector<8x32xf32>
    %238 = arith.truncf %237 : vector<8x32xf32> to vector<8x32xbf16>
    %239 = vector.extract_strided_slice %232 {offsets = [0, 0], sizes = [8, 32], strides = [1, 1]} : vector<16x32xf32> to vector<8x32xf32>
    %240 = arith.truncf %239 : vector<8x32xf32> to vector<8x32xbf16>
    %241 = vector.extract_strided_slice %236 {offsets = [0, 0], sizes = [64, 8], strides = [1, 1]} : vector<64x32xbf16> to vector<64x8xbf16>
    %242 = vector.extract_strided_slice %238 {offsets = [0, 0], sizes = [8, 8], strides = [1, 1]} : vector<8x32xbf16> to vector<8x8xbf16>
    %243 = vector.extract_strided_slice %240 {offsets = [0, 0], sizes = [8, 8], strides = [1, 1]} : vector<8x32xbf16> to vector<8x8xbf16>
    "tpu.trace_start"() <{level = 10 : i32, message = "nd,md->nm"}> : () -> ()
    %cst_69 = arith.constant dense<0.000000e+00> : vector<64x8xf32>
    %244 = tpu.matmul %241, %242, %cst_69 {dimension_numbers = #tpu.dot_dimension_numbers<[1], [1], [0], [0], [0, 0, 1, 0], [], []>} : vector<64x8xbf16>, vector<8x8xbf16>, vector<64x8xf32> -> vector<64x8xf32>
    "tpu.trace_stop"() : () -> ()
    %cst_70 = arith.constant 0.353553385 : f32
    %245 = vector.broadcast %cst_70 : f32 to vector<64x8xf32>
    %246 = arith.mulf %244, %245 : vector<64x8xf32>
    %cst_71 = arith.constant dense<0xFF800000> : vector<64xf32>
    %247 = vector.multi_reduction <maximumf>, %246, %cst_71 [1] : vector<64x8xf32> to vector<64xf32>
    %248 = vector.shape_cast %247 : vector<64xf32> to vector<64x1xf32>
    %249 = vector.broadcast %248 : vector<64x1xf32> to vector<64x8xf32>
    %250 = arith.subf %246, %249 : vector<64x8xf32>
    %251 = math.exp %250 : vector<64x8xf32>
    %cst_72 = arith.constant dense<0.000000e+00> : vector<64xf32>
    %252 = vector.multi_reduction <add>, %251, %cst_72 [1] : vector<64x8xf32> to vector<64xf32>
    %253 = vector.shape_cast %252 : vector<64xf32> to vector<64x1xf32>
    %254 = tpu.reciprocal %253 {approx = true} : vector<64x1xf32> -> vector<64x1xf32>
    %255 = vector.broadcast %254 : vector<64x1xf32> to vector<64x8xf32>
    %256 = arith.mulf %251, %255 : vector<64x8xf32>
    %257 = arith.truncf %256 : vector<64x8xf32> to vector<64x8xbf16>
    %cst_73 = arith.constant dense<0.000000e+00> : vector<64x8xf32>
    %258 = tpu.matmul %257, %243, %cst_73 {dimension_numbers = #tpu.dot_dimension_numbers<[1], [0], [0], [1], [0, 0, 1, 1], [], []>} : vector<64x8xbf16>, vector<8x8xbf16>, vector<64x8xf32> -> vector<64x8xf32>
    %259 = vector.extract_strided_slice %236 {offsets = [0, 8], sizes = [64, 8], strides = [1, 1]} : vector<64x32xbf16> to vector<64x8xbf16>
    %260 = vector.extract_strided_slice %238 {offsets = [0, 8], sizes = [8, 8], strides = [1, 1]} : vector<8x32xbf16> to vector<8x8xbf16>
    %261 = vector.extract_strided_slice %240 {offsets = [0, 8], sizes = [8, 8], strides = [1, 1]} : vector<8x32xbf16> to vector<8x8xbf16>
    "tpu.trace_start"() <{level = 10 : i32, message = "nd,md->nm"}> : () -> ()
    %cst_74 = arith.constant dense<0.000000e+00> : vector<64x8xf32>
    %262 = tpu.matmul %259, %260, %cst_74 {dimension_numbers = #tpu.dot_dimension_numbers<[1], [1], [0], [0], [0, 0, 1, 0], [], []>} : vector<64x8xbf16>, vector<8x8xbf16>, vector<64x8xf32> -> vector<64x8xf32>
    "tpu.trace_stop"() : () -> ()
    %cst_75 = arith.constant 0.353553385 : f32
    %263 = vector.broadcast %cst_75 : f32 to vector<64x8xf32>
    %264 = arith.mulf %262, %263 : vector<64x8xf32>
    %cst_76 = arith.constant dense<0xFF800000> : vector<64xf32>
    %265 = vector.multi_reduction <maximumf>, %264, %cst_76 [1] : vector<64x8xf32> to vector<64xf32>
    %266 = vector.shape_cast %265 : vector<64xf32> to vector<64x1xf32>
    %267 = vector.broadcast %266 : vector<64x1xf32> to vector<64x8xf32>
    %268 = arith.subf %264, %267 : vector<64x8xf32>
    %269 = math.exp %268 : vector<64x8xf32>
    %cst_77 = arith.constant dense<0.000000e+00> : vector<64xf32>
    %270 = vector.multi_reduction <add>, %269, %cst_77 [1] : vector<64x8xf32> to vector<64xf32>
    %271 = vector.shape_cast %270 : vector<64xf32> to vector<64x1xf32>
    %272 = tpu.reciprocal %271 {approx = true} : vector<64x1xf32> -> vector<64x1xf32>
    %273 = vector.broadcast %272 : vector<64x1xf32> to vector<64x8xf32>
    %274 = arith.mulf %269, %273 : vector<64x8xf32>
    %275 = arith.truncf %274 : vector<64x8xf32> to vector<64x8xbf16>
    %cst_78 = arith.constant dense<0.000000e+00> : vector<64x8xf32>
    %276 = tpu.matmul %275, %261, %cst_78 {dimension_numbers = #tpu.dot_dimension_numbers<[1], [0], [0], [1], [0, 0, 1, 1], [], []>} : vector<64x8xbf16>, vector<8x8xbf16>, vector<64x8xf32> -> vector<64x8xf32>
    %277 = vector.extract_strided_slice %236 {offsets = [0, 16], sizes = [64, 8], strides = [1, 1]} : vector<64x32xbf16> to vector<64x8xbf16>
    %278 = vector.extract_strided_slice %238 {offsets = [0, 16], sizes = [8, 8], strides = [1, 1]} : vector<8x32xbf16> to vector<8x8xbf16>
    %279 = vector.extract_strided_slice %240 {offsets = [0, 16], sizes = [8, 8], strides = [1, 1]} : vector<8x32xbf16> to vector<8x8xbf16>
    "tpu.trace_start"() <{level = 10 : i32, message = "nd,md->nm"}> : () -> ()
    %cst_79 = arith.constant dense<0.000000e+00> : vector<64x8xf32>
    %280 = tpu.matmul %277, %278, %cst_79 {dimension_numbers = #tpu.dot_dimension_numbers<[1], [1], [0], [0], [0, 0, 1, 0], [], []>} : vector<64x8xbf16>, vector<8x8xbf16>, vector<64x8xf32> -> vector<64x8xf32>
    "tpu.trace_stop"() : () -> ()
    %cst_80 = arith.constant 0.353553385 : f32
    %281 = vector.broadcast %cst_80 : f32 to vector<64x8xf32>
    %282 = arith.mulf %280, %281 : vector<64x8xf32>
    %cst_81 = arith.constant dense<0xFF800000> : vector<64xf32>
    %283 = vector.multi_reduction <maximumf>, %282, %cst_81 [1] : vector<64x8xf32> to vector<64xf32>
    %284 = vector.shape_cast %283 : vector<64xf32> to vector<64x1xf32>
    %285 = vector.broadcast %284 : vector<64x1xf32> to vector<64x8xf32>
    %286 = arith.subf %282, %285 : vector<64x8xf32>
    %287 = math.exp %286 : vector<64x8xf32>
    %cst_82 = arith.constant dense<0.000000e+00> : vector<64xf32>
    %288 = vector.multi_reduction <add>, %287, %cst_82 [1] : vector<64x8xf32> to vector<64xf32>
    %289 = vector.shape_cast %288 : vector<64xf32> to vector<64x1xf32>
    %290 = tpu.reciprocal %289 {approx = true} : vector<64x1xf32> -> vector<64x1xf32>
    %291 = vector.broadcast %290 : vector<64x1xf32> to vector<64x8xf32>
    %292 = arith.mulf %287, %291 : vector<64x8xf32>
    %293 = arith.truncf %292 : vector<64x8xf32> to vector<64x8xbf16>
    %cst_83 = arith.constant dense<0.000000e+00> : vector<64x8xf32>
    %294 = tpu.matmul %293, %279, %cst_83 {dimension_numbers = #tpu.dot_dimension_numbers<[1], [0], [0], [1], [0, 0, 1, 1], [], []>} : vector<64x8xbf16>, vector<8x8xbf16>, vector<64x8xf32> -> vector<64x8xf32>
    %295 = vector.extract_strided_slice %236 {offsets = [0, 24], sizes = [64, 8], strides = [1, 1]} : vector<64x32xbf16> to vector<64x8xbf16>
    %296 = vector.extract_strided_slice %238 {offsets = [0, 24], sizes = [8, 8], strides = [1, 1]} : vector<8x32xbf16> to vector<8x8xbf16>
    %297 = vector.extract_strided_slice %240 {offsets = [0, 24], sizes = [8, 8], strides = [1, 1]} : vector<8x32xbf16> to vector<8x8xbf16>
    "tpu.trace_start"() <{level = 10 : i32, message = "nd,md->nm"}> : () -> ()
    %cst_84 = arith.constant dense<0.000000e+00> : vector<64x8xf32>
    %298 = tpu.matmul %295, %296, %cst_84 {dimension_numbers = #tpu.dot_dimension_numbers<[1], [1], [0], [0], [0, 0, 1, 0], [], []>} : vector<64x8xbf16>, vector<8x8xbf16>, vector<64x8xf32> -> vector<64x8xf32>
    "tpu.trace_stop"() : () -> ()
    %cst_85 = arith.constant 0.353553385 : f32
    %299 = vector.broadcast %cst_85 : f32 to vector<64x8xf32>
    %300 = arith.mulf %298, %299 : vector<64x8xf32>
    %cst_86 = arith.constant dense<0xFF800000> : vector<64xf32>
    %301 = vector.multi_reduction <maximumf>, %300, %cst_86 [1] : vector<64x8xf32> to vector<64xf32>
    %302 = vector.shape_cast %301 : vector<64xf32> to vector<64x1xf32>
    %303 = vector.broadcast %302 : vector<64x1xf32> to vector<64x8xf32>
    %304 = arith.subf %300, %303 : vector<64x8xf32>
    %305 = math.exp %304 : vector<64x8xf32>
    %cst_87 = arith.constant dense<0.000000e+00> : vector<64xf32>
    %306 = vector.multi_reduction <add>, %305, %cst_87 [1] : vector<64x8xf32> to vector<64xf32>
    %307 = vector.shape_cast %306 : vector<64xf32> to vector<64x1xf32>
    %308 = tpu.reciprocal %307 {approx = true} : vector<64x1xf32> -> vector<64x1xf32>
    %309 = vector.broadcast %308 : vector<64x1xf32> to vector<64x8xf32>
    %310 = arith.mulf %305, %309 : vector<64x8xf32>
    %311 = arith.truncf %310 : vector<64x8xf32> to vector<64x8xbf16>
    %cst_88 = arith.constant dense<0.000000e+00> : vector<64x8xf32>
    %312 = tpu.matmul %311, %297, %cst_88 {dimension_numbers = #tpu.dot_dimension_numbers<[1], [0], [0], [1], [0, 0, 1, 1], [], []>} : vector<64x8xbf16>, vector<8x8xbf16>, vector<64x8xf32> -> vector<64x8xf32>
    %313 = tpu.concatenate %258, %276, %294, %312 in 1 : vector<64x8xf32>, vector<64x8xf32>, vector<64x8xf32>, vector<64x8xf32> -> vector<64x32xf32>
    %314 = vector.extract_strided_slice %227 {offsets = [64, 0], sizes = [64, 32], strides = [1, 1]} : vector<128x32xf32> to vector<64x32xf32>
    %315 = arith.truncf %314 : vector<64x32xf32> to vector<64x32xbf16>
    %316 = vector.extract_strided_slice %231 {offsets = [8, 0], sizes = [8, 32], strides = [1, 1]} : vector<16x32xf32> to vector<8x32xf32>
    %317 = arith.truncf %316 : vector<8x32xf32> to vector<8x32xbf16>
    %318 = vector.extract_strided_slice %232 {offsets = [8, 0], sizes = [8, 32], strides = [1, 1]} : vector<16x32xf32> to vector<8x32xf32>
    %319 = arith.truncf %318 : vector<8x32xf32> to vector<8x32xbf16>
    %320 = vector.extract_strided_slice %315 {offsets = [0, 0], sizes = [64, 8], strides = [1, 1]} : vector<64x32xbf16> to vector<64x8xbf16>
    %321 = vector.extract_strided_slice %317 {offsets = [0, 0], sizes = [8, 8], strides = [1, 1]} : vector<8x32xbf16> to vector<8x8xbf16>
    %322 = vector.extract_strided_slice %319 {offsets = [0, 0], sizes = [8, 8], strides = [1, 1]} : vector<8x32xbf16> to vector<8x8xbf16>
    "tpu.trace_start"() <{level = 10 : i32, message = "nd,md->nm"}> : () -> ()
    %cst_89 = arith.constant dense<0.000000e+00> : vector<64x8xf32>
    %323 = tpu.matmul %320, %321, %cst_89 {dimension_numbers = #tpu.dot_dimension_numbers<[1], [1], [0], [0], [0, 0, 1, 0], [], []>} : vector<64x8xbf16>, vector<8x8xbf16>, vector<64x8xf32> -> vector<64x8xf32>
    "tpu.trace_stop"() : () -> ()
    %cst_90 = arith.constant 0.353553385 : f32
    %324 = vector.broadcast %cst_90 : f32 to vector<64x8xf32>
    %325 = arith.mulf %323, %324 : vector<64x8xf32>
    %cst_91 = arith.constant dense<0xFF800000> : vector<64xf32>
    %326 = vector.multi_reduction <maximumf>, %325, %cst_91 [1] : vector<64x8xf32> to vector<64xf32>
    %327 = vector.shape_cast %326 : vector<64xf32> to vector<64x1xf32>
    %328 = vector.broadcast %327 : vector<64x1xf32> to vector<64x8xf32>
    %329 = arith.subf %325, %328 : vector<64x8xf32>
    %330 = math.exp %329 : vector<64x8xf32>
    %cst_92 = arith.constant dense<0.000000e+00> : vector<64xf32>
    %331 = vector.multi_reduction <add>, %330, %cst_92 [1] : vector<64x8xf32> to vector<64xf32>
    %332 = vector.shape_cast %331 : vector<64xf32> to vector<64x1xf32>
    %333 = tpu.reciprocal %332 {approx = true} : vector<64x1xf32> -> vector<64x1xf32>
    %334 = vector.broadcast %333 : vector<64x1xf32> to vector<64x8xf32>
    %335 = arith.mulf %330, %334 : vector<64x8xf32>
    %336 = arith.truncf %335 : vector<64x8xf32> to vector<64x8xbf16>
    %cst_93 = arith.constant dense<0.000000e+00> : vector<64x8xf32>
    %337 = tpu.matmul %336, %322, %cst_93 {dimension_numbers = #tpu.dot_dimension_numbers<[1], [0], [0], [1], [0, 0, 1, 1], [], []>} : vector<64x8xbf16>, vector<8x8xbf16>, vector<64x8xf32> -> vector<64x8xf32>
    %338 = vector.extract_strided_slice %315 {offsets = [0, 8], sizes = [64, 8], strides = [1, 1]} : vector<64x32xbf16> to vector<64x8xbf16>
    %339 = vector.extract_strided_slice %317 {offsets = [0, 8], sizes = [8, 8], strides = [1, 1]} : vector<8x32xbf16> to vector<8x8xbf16>
    %340 = vector.extract_strided_slice %319 {offsets = [0, 8], sizes = [8, 8], strides = [1, 1]} : vector<8x32xbf16> to vector<8x8xbf16>
    "tpu.trace_start"() <{level = 10 : i32, message = "nd,md->nm"}> : () -> ()
    %cst_94 = arith.constant dense<0.000000e+00> : vector<64x8xf32>
    %341 = tpu.matmul %338, %339, %cst_94 {dimension_numbers = #tpu.dot_dimension_numbers<[1], [1], [0], [0], [0, 0, 1, 0], [], []>} : vector<64x8xbf16>, vector<8x8xbf16>, vector<64x8xf32> -> vector<64x8xf32>
    "tpu.trace_stop"() : () -> ()
    %cst_95 = arith.constant 0.353553385 : f32
    %342 = vector.broadcast %cst_95 : f32 to vector<64x8xf32>
    %343 = arith.mulf %341, %342 : vector<64x8xf32>
    %cst_96 = arith.constant dense<0xFF800000> : vector<64xf32>
    %344 = vector.multi_reduction <maximumf>, %343, %cst_96 [1] : vector<64x8xf32> to vector<64xf32>
    %345 = vector.shape_cast %344 : vector<64xf32> to vector<64x1xf32>
    %346 = vector.broadcast %345 : vector<64x1xf32> to vector<64x8xf32>
    %347 = arith.subf %343, %346 : vector<64x8xf32>
    %348 = math.exp %347 : vector<64x8xf32>
    %cst_97 = arith.constant dense<0.000000e+00> : vector<64xf32>
    %349 = vector.multi_reduction <add>, %348, %cst_97 [1] : vector<64x8xf32> to vector<64xf32>
    %350 = vector.shape_cast %349 : vector<64xf32> to vector<64x1xf32>
    %351 = tpu.reciprocal %350 {approx = true} : vector<64x1xf32> -> vector<64x1xf32>
    %352 = vector.broadcast %351 : vector<64x1xf32> to vector<64x8xf32>
    %353 = arith.mulf %348, %352 : vector<64x8xf32>
    %354 = arith.truncf %353 : vector<64x8xf32> to vector<64x8xbf16>
    %cst_98 = arith.constant dense<0.000000e+00> : vector<64x8xf32>
    %355 = tpu.matmul %354, %340, %cst_98 {dimension_numbers = #tpu.dot_dimension_numbers<[1], [0], [0], [1], [0, 0, 1, 1], [], []>} : vector<64x8xbf16>, vector<8x8xbf16>, vector<64x8xf32> -> vector<64x8xf32>
    %356 = vector.extract_strided_slice %315 {offsets = [0, 16], sizes = [64, 8], strides = [1, 1]} : vector<64x32xbf16> to vector<64x8xbf16>
    %357 = vector.extract_strided_slice %317 {offsets = [0, 16], sizes = [8, 8], strides = [1, 1]} : vector<8x32xbf16> to vector<8x8xbf16>
    %358 = vector.extract_strided_slice %319 {offsets = [0, 16], sizes = [8, 8], strides = [1, 1]} : vector<8x32xbf16> to vector<8x8xbf16>
    "tpu.trace_start"() <{level = 10 : i32, message = "nd,md->nm"}> : () -> ()
    %cst_99 = arith.constant dense<0.000000e+00> : vector<64x8xf32>
    %359 = tpu.matmul %356, %357, %cst_99 {dimension_numbers = #tpu.dot_dimension_numbers<[1], [1], [0], [0], [0, 0, 1, 0], [], []>} : vector<64x8xbf16>, vector<8x8xbf16>, vector<64x8xf32> -> vector<64x8xf32>
    "tpu.trace_stop"() : () -> ()
    %cst_100 = arith.constant 0.353553385 : f32
    %360 = vector.broadcast %cst_100 : f32 to vector<64x8xf32>
    %361 = arith.mulf %359, %360 : vector<64x8xf32>
    %cst_101 = arith.constant dense<0xFF800000> : vector<64xf32>
    %362 = vector.multi_reduction <maximumf>, %361, %cst_101 [1] : vector<64x8xf32> to vector<64xf32>
    %363 = vector.shape_cast %362 : vector<64xf32> to vector<64x1xf32>
    %364 = vector.broadcast %363 : vector<64x1xf32> to vector<64x8xf32>
    %365 = arith.subf %361, %364 : vector<64x8xf32>
    %366 = math.exp %365 : vector<64x8xf32>
    %cst_102 = arith.constant dense<0.000000e+00> : vector<64xf32>
    %367 = vector.multi_reduction <add>, %366, %cst_102 [1] : vector<64x8xf32> to vector<64xf32>
    %368 = vector.shape_cast %367 : vector<64xf32> to vector<64x1xf32>
    %369 = tpu.reciprocal %368 {approx = true} : vector<64x1xf32> -> vector<64x1xf32>
    %370 = vector.broadcast %369 : vector<64x1xf32> to vector<64x8xf32>
    %371 = arith.mulf %366, %370 : vector<64x8xf32>
    %372 = arith.truncf %371 : vector<64x8xf32> to vector<64x8xbf16>
    %cst_103 = arith.constant dense<0.000000e+00> : vector<64x8xf32>
    %373 = tpu.matmul %372, %358, %cst_103 {dimension_numbers = #tpu.dot_dimension_numbers<[1], [0], [0], [1], [0, 0, 1, 1], [], []>} : vector<64x8xbf16>, vector<8x8xbf16>, vector<64x8xf32> -> vector<64x8xf32>
    %374 = vector.extract_strided_slice %315 {offsets = [0, 24], sizes = [64, 8], strides = [1, 1]} : vector<64x32xbf16> to vector<64x8xbf16>
    %375 = vector.extract_strided_slice %317 {offsets = [0, 24], sizes = [8, 8], strides = [1, 1]} : vector<8x32xbf16> to vector<8x8xbf16>
    %376 = vector.extract_strided_slice %319 {offsets = [0, 24], sizes = [8, 8], strides = [1, 1]} : vector<8x32xbf16> to vector<8x8xbf16>
    "tpu.trace_start"() <{level = 10 : i32, message = "nd,md->nm"}> : () -> ()
    %cst_104 = arith.constant dense<0.000000e+00> : vector<64x8xf32>
    %377 = tpu.matmul %374, %375, %cst_104 {dimension_numbers = #tpu.dot_dimension_numbers<[1], [1], [0], [0], [0, 0, 1, 0], [], []>} : vector<64x8xbf16>, vector<8x8xbf16>, vector<64x8xf32> -> vector<64x8xf32>
    "tpu.trace_stop"() : () -> ()
    %cst_105 = arith.constant 0.353553385 : f32
    %378 = vector.broadcast %cst_105 : f32 to vector<64x8xf32>
    %379 = arith.mulf %377, %378 : vector<64x8xf32>
    %cst_106 = arith.constant dense<0xFF800000> : vector<64xf32>
    %380 = vector.multi_reduction <maximumf>, %379, %cst_106 [1] : vector<64x8xf32> to vector<64xf32>
    %381 = vector.shape_cast %380 : vector<64xf32> to vector<64x1xf32>
    %382 = vector.broadcast %381 : vector<64x1xf32> to vector<64x8xf32>
    %383 = arith.subf %379, %382 : vector<64x8xf32>
    %384 = math.exp %383 : vector<64x8xf32>
    %cst_107 = arith.constant dense<0.000000e+00> : vector<64xf32>
    %385 = vector.multi_reduction <add>, %384, %cst_107 [1] : vector<64x8xf32> to vector<64xf32>
    %386 = vector.shape_cast %385 : vector<64xf32> to vector<64x1xf32>
    %387 = tpu.reciprocal %386 {approx = true} : vector<64x1xf32> -> vector<64x1xf32>
    %388 = vector.broadcast %387 : vector<64x1xf32> to vector<64x8xf32>
    %389 = arith.mulf %384, %388 : vector<64x8xf32>
    %390 = arith.truncf %389 : vector<64x8xf32> to vector<64x8xbf16>
    %cst_108 = arith.constant dense<0.000000e+00> : vector<64x8xf32>
    %391 = tpu.matmul %390, %376, %cst_108 {dimension_numbers = #tpu.dot_dimension_numbers<[1], [0], [0], [1], [0, 0, 1, 1], [], []>} : vector<64x8xbf16>, vector<8x8xbf16>, vector<64x8xf32> -> vector<64x8xf32>
    %392 = tpu.concatenate %337, %355, %373, %391 in 1 : vector<64x8xf32>, vector<64x8xf32>, vector<64x8xf32>, vector<64x8xf32> -> vector<64x32xf32>
    %393 = tpu.concatenate %313, %392 in 0 : vector<64x32xf32>, vector<64x32xf32> -> vector<128x32xf32>
    %394 = arith.truncf %393 : vector<128x32xf32> to vector<128x32xbf16>
    %cst_109 = arith.constant dense<0.000000e+00> : vector<128x32xf32>
    %395 = tpu.matmul %394, %234, %cst_109 {dimension_numbers = #tpu.dot_dimension_numbers<[1], [0], [0], [1], [0, 0, 1, 1], [], []>} : vector<128x32xbf16>, vector<32x32xbf16>, vector<128x32xf32> -> vector<128x32xf32>
    %396 = vector.broadcast %8 : vector<1x32xf32> to vector<128x32xf32>
    %397 = arith.addf %395, %396 : vector<128x32xf32>
    %398 = arith.addf %203, %397 : vector<128x32xf32>
    %cst_110 = arith.constant dense<0.000000e+00> : vector<128xf32>
    %399 = vector.multi_reduction <add>, %398, %cst_110 [1] : vector<128x32xf32> to vector<128xf32>
    %400 = vector.shape_cast %399 : vector<128xf32> to vector<128x1xf32>
    %cst_111 = arith.constant 3.200000e+01 : f32
    %401 = vector.broadcast %cst_111 : f32 to vector<128x1xf32>
    %402 = arith.divf %400, %401 : vector<128x1xf32>
    %403 = vector.broadcast %402 : vector<128x1xf32> to vector<128x32xf32>
    %404 = arith.subf %398, %403 : vector<128x32xf32>
    %405 = arith.mulf %404, %404 : vector<128x32xf32>
    %cst_112 = arith.constant dense<0.000000e+00> : vector<128xf32>
    %406 = vector.multi_reduction <add>, %405, %cst_112 [1] : vector<128x32xf32> to vector<128xf32>
    %407 = vector.shape_cast %406 : vector<128xf32> to vector<128x1xf32>
    %cst_113 = arith.constant 3.200000e+01 : f32
    %408 = vector.broadcast %cst_113 : f32 to vector<128x1xf32>
    %409 = arith.divf %407, %408 : vector<128x1xf32>
    %cst_114 = arith.constant 9.99999974E-6 : f32
    %410 = vector.broadcast %cst_114 : f32 to vector<128x1xf32>
    %411 = arith.addf %409, %410 : vector<128x1xf32>
    %412 = math.rsqrt %411 : vector<128x1xf32>
    %413 = vector.broadcast %412 : vector<128x1xf32> to vector<128x32xf32>
    %414 = arith.mulf %404, %413 : vector<128x32xf32>
    %415 = vector.broadcast %9 : vector<1x32xf32> to vector<128x32xf32>
    %416 = arith.mulf %414, %415 : vector<128x32xf32>
    %417 = vector.broadcast %10 : vector<1x32xf32> to vector<128x32xf32>
    %418 = arith.addf %416, %417 : vector<128x32xf32>
    %419 = arith.truncf %418 : vector<128x32xf32> to vector<128x32xbf16>
    %c0_115 = arith.constant 0 : index
    %c0_116 = arith.constant 0 : index
    %420 = vector.load %arg6[%c0_115, %c0_116] : memref<32x256xbf16, #tpu.memory_space<vmem>>, vector<32x256xbf16>
    %cst_117 = arith.constant dense<0.000000e+00> : vector<128x256xf32>
    %421 = tpu.matmul %419, %420, %cst_117 {dimension_numbers = #tpu.dot_dimension_numbers<[1], [0], [0], [1], [0, 0, 1, 1], [], []>} : vector<128x32xbf16>, vector<32x256xbf16>, vector<128x256xf32> -> vector<128x256xf32>
    %c0_118 = arith.constant 0 : index
    %c0_119 = arith.constant 0 : index
    %422 = vector.load %arg9[%c0_118, %c0_119] : memref<1x256xf32, #tpu.memory_space<vmem>>, vector<1x256xf32>
    %423 = vector.broadcast %422 : vector<1x256xf32> to vector<128x256xf32>
    %424 = arith.addf %421, %423 : vector<128x256xf32>
    %425 = vector.extract_strided_slice %424 {offsets = [0, 0], sizes = [128, 128], strides = [1, 1]} : vector<128x256xf32> to vector<128x128xf32>
    %426 = vector.extract_strided_slice %424 {offsets = [0, 128], sizes = [128, 128], strides = [1, 1]} : vector<128x256xf32> to vector<128x128xf32>
    %cst_120 = arith.constant 5.000000e-01 : f32
    %427 = vector.broadcast %cst_120 : f32 to vector<128x128xf32>
    %428 = arith.mulf %427, %426 : vector<128x128xf32>
    %cst_121 = arith.constant 0.707106769 : f32
    %429 = vector.broadcast %cst_121 : f32 to vector<128x128xf32>
    %430 = arith.mulf %426, %429 : vector<128x128xf32>
    %431 = math.absf %430 : vector<128x128xf32>
    %cst_122 = arith.constant 0.327591091 : f32
    %432 = vector.broadcast %cst_122 : f32 to vector<128x128xf32>
    %433 = arith.mulf %432, %431 : vector<128x128xf32>
    %cst_123 = arith.constant 1.000000e+00 : f32
    %434 = vector.broadcast %cst_123 : f32 to vector<128x128xf32>
    %435 = arith.addf %434, %433 : vector<128x128xf32>
    %436 = tpu.reciprocal %435 {approx = true} : vector<128x128xf32> -> vector<128x128xf32>
    %cst_124 = arith.constant 1.06140542 : f32
    %437 = vector.broadcast %cst_124 : f32 to vector<128x128xf32>
    %438 = arith.mulf %437, %436 : vector<128x128xf32>
    %cst_125 = arith.constant -1.45315206 : f32
    %439 = vector.broadcast %cst_125 : f32 to vector<128x128xf32>
    %440 = arith.addf %438, %439 : vector<128x128xf32>
    %441 = arith.mulf %440, %436 : vector<128x128xf32>
    %cst_126 = arith.constant 1.42141378 : f32
    %442 = vector.broadcast %cst_126 : f32 to vector<128x128xf32>
    %443 = arith.addf %441, %442 : vector<128x128xf32>
    %444 = arith.mulf %443, %436 : vector<128x128xf32>
    %cst_127 = arith.constant -0.284496725 : f32
    %445 = vector.broadcast %cst_127 : f32 to vector<128x128xf32>
    %446 = arith.addf %444, %445 : vector<128x128xf32>
    %447 = arith.mulf %446, %436 : vector<128x128xf32>
    %cst_128 = arith.constant 0.254829586 : f32
    %448 = vector.broadcast %cst_128 : f32 to vector<128x128xf32>
    %449 = arith.addf %447, %448 : vector<128x128xf32>
    %450 = arith.mulf %449, %436 : vector<128x128xf32>
    %cst_129 = arith.constant 0.000000e+00 : f32
    %451 = vector.broadcast %cst_129 : f32 to vector<128x128xf32>
    %452 = arith.subf %451, %431 : vector<128x128xf32>
    %453 = arith.mulf %452, %431 : vector<128x128xf32>
    %454 = math.exp %453 : vector<128x128xf32>
    %455 = arith.mulf %450, %454 : vector<128x128xf32>
    %cst_130 = arith.constant 1.000000e+00 : f32
    %456 = vector.broadcast %cst_130 : f32 to vector<128x128xf32>
    %457 = arith.subf %456, %455 : vector<128x128xf32>
    %cst_131 = arith.constant 0.000000e+00 : f32
    %458 = vector.broadcast %cst_131 : f32 to vector<128x128xf32>
    %459 = arith.cmpf olt, %430, %458 : vector<128x128xf32>
    %cst_132 = arith.constant 0.000000e+00 : f32
    %460 = vector.broadcast %cst_132 : f32 to vector<128x128xf32>
    %461 = arith.subf %460, %457 : vector<128x128xf32>
    %462 = arith.select %459, %461, %457 : vector<128x128xi1>, vector<128x128xf32>
    %cst_133 = arith.constant 1.000000e+00 : f32
    %463 = vector.broadcast %cst_133 : f32 to vector<128x128xf32>
    %464 = arith.addf %463, %462 : vector<128x128xf32>
    %465 = arith.mulf %428, %464 : vector<128x128xf32>
    %466 = arith.mulf %425, %465 : vector<128x128xf32>
    %467 = arith.truncf %466 : vector<128x128xf32> to vector<128x128xbf16>
    %c0_134 = arith.constant 0 : index
    %c0_135 = arith.constant 0 : index
    %468 = vector.load %arg7[%c0_134, %c0_135] : memref<128x32xbf16, #tpu.memory_space<vmem>>, vector<128x32xbf16>
    %cst_136 = arith.constant dense<0.000000e+00> : vector<128x32xf32>
    %469 = tpu.matmul %467, %468, %cst_136 {dimension_numbers = #tpu.dot_dimension_numbers<[1], [0], [0], [1], [0, 0, 1, 1], [], []>} : vector<128x128xbf16>, vector<128x32xbf16>, vector<128x32xf32> -> vector<128x32xf32>
    %470 = arith.addf %398, %469 : vector<128x32xf32>
    %471 = vector.broadcast %11 : vector<1x32xf32> to vector<128x32xf32>
    %472 = arith.addf %470, %471 : vector<128x32xf32>
    %c0_137 = arith.constant 0 : index
    %c0_138 = arith.constant 0 : index
    %473 = vector.load %arg10[%c0_137, %c0_138] : memref<128x32xf32, #tpu.memory_space<vmem>>, vector<128x32xf32>
    tpu.vector_store %arg10[%c0_137, %c0_138], %472 {strides = array<i32>} : memref<128x32xf32, #tpu.memory_space<vmem>>, vector<128x32xf32>,
    return
  }
  func.func @transform_0(%arg0: i32) -> (i32, i32) {
    %c0_i32 = arith.constant 0 : i32
    %c0_i32_0 = arith.constant 0 : i32
    return %arg0, %c0_i32 : i32, i32
  }
  func.func @transform_1(%arg0: i32) -> (i32, i32) {
    %c0_i32 = arith.constant 0 : i32
    %c0_i32_0 = arith.constant 0 : i32
    return %arg0, %c0_i32 : i32, i32
  }
  func.func @transform_2(%arg0: i32) -> (i32, i32) {
    %c0_i32 = arith.constant 0 : i32
    %c0_i32_0 = arith.constant 0 : i32
    %c0_i32_1 = arith.constant 0 : i32
    return %c0_i32, %c0_i32_0 : i32, i32
  }
  func.func @transform_3(%arg0: i32) -> (i32, i32, i32) {
    %c0_i32 = arith.constant 0 : i32
    %c0_i32_0 = arith.constant 0 : i32
    %c0_i32_1 = arith.constant 0 : i32
    %c0_i32_2 = arith.constant 0 : i32
    return %c0_i32, %c0_i32_0, %c0_i32_1 : i32, i32, i32
  }
  func.func @transform_4(%arg0: i32) -> (i32, i32) {
    %c0_i32 = arith.constant 0 : i32
    %c0_i32_0 = arith.constant 0 : i32
    %c0_i32_1 = arith.constant 0 : i32
    return %c0_i32, %c0_i32_0 : i32, i32
  }
  func.func @transform_5(%arg0: i32) -> (i32, i32) {
    %c0_i32 = arith.constant 0 : i32
    %c0_i32_0 = arith.constant 0 : i32
    %c0_i32_1 = arith.constant 0 : i32
    return %c0_i32, %c0_i32_0 : i32, i32
  }
  func.func @transform_6(%arg0: i32) -> (i32, i32) {
    %c0_i32 = arith.constant 0 : i32
    %c0_i32_0 = arith.constant 0 : i32
    %c0_i32_1 = arith.constant 0 : i32
    return %c0_i32, %c0_i32_0 : i32, i32
  }
  func.func @transform_7(%arg0: i32) -> (i32, i32) {
    %c0_i32 = arith.constant 0 : i32
    %c0_i32_0 = arith.constant 0 : i32
    %c0_i32_1 = arith.constant 0 : i32
    return %c0_i32, %c0_i32_0 : i32, i32
  }
  func.func @transform_8(%arg0: i32) -> (i32, i32) {
    %c0_i32 = arith.constant 0 : i32
    %c0_i32_0 = arith.constant 0 : i32
    %c0_i32_1 = arith.constant 0 : i32
    return %c0_i32, %c0_i32_0 : i32, i32
  }
  func.func @transform_9(%arg0: i32) -> (i32, i32) {
    %c0_i32 = arith.constant 0 : i32
    %c0_i32_0 = arith.constant 0 : i32
    return %arg0, %c0_i32 : i32, i32
  }
}

</mosaic_0001>

<bundles_post_ra>
// kernel: tpu_custom_call.1
= control target key start
LH: loop header
LB: loop body
LE: loop exit
PB: predicated region body
PF: predicated region fallthrough
CT: control target
= control target key end

     0   :  { %vm53_vm0 = vcmask 261120   ;;  %v263_v63 = vlaneseq  ;;  %vm468_vm1 = vcmask 64512   ;;  %s9381_s30 = smov 96   ;;  %s9382_s10 = smov 88   ;;  %vm566_vm2 = vcmask 523264   ;;  %s12884_s0 = inlined_call_operand.vmem [shape: f32[128,32], index: 0, kind: input, shape index: {}]   ;;  %s12885_s2 = inlined_call_operand.vmem [shape: bf16[32,96], index: 2, kind: input, shape index: {}]   ;;  %s12886_s7 = inlined_call_operand.vmem [shape: f32[9,32], index: 7, kind: input, shape index: {}]   ;;  %s12887_s3 = inlined_call_operand.vmem [shape: bf16[3,32,32], index: 3, kind: input, shape index: {}]   ;;  %s12888_s4 = inlined_call_operand.vmem [shape: bf16[64,64], index: 4, kind: input, shape index: {}]   ;;  %s12889_s1 = inlined_call_operand.vmem [shape: f32[16,64], index: 1, kind: input, shape index: {}]   ;;  %s12890_s5 = inlined_call_operand.vmem [shape: bf16[32,256], index: 5, kind: input, shape index: {}]   ;;  %s12891_s6 = inlined_call_operand.vmem [shape: bf16[128,32], index: 6, kind: input, shape index: {}]   ;;  %s12892_s8 = inlined_call_operand.vmem [shape: f32[1,256], index: 8, kind: input, shape index: {}]   ;;  %s12893_s9 = inlined_call_operand.vmem [shape: f32[128,32], index: 9, kind: output, shape index: {}]  }
   0x1   :  { %v33_v0 = vld [vmem:[%s12884_s0] sm:$0xff]  ;;  %v35_v1 = vld [vmem:[%s12884_s0 + $0x10] sm:$0xff]  ;;  %v34_v2 = vld [vmem:[%s12884_s0 + $0x8] sm:$0xff]  ;;  %s9383_s11 = smov 120   ;;  %s9384_s28 = smov 64   ;;  %vm1734_vm3 = vcmask 130048  }
   0x2   :  { %v54_v3 = vsel %vm53_vm0, %v33_v0, 0.0  ;;  %v60_v4 = vsel %vm53_vm0, %v35_v1, 0.0  ;;  %v36_v5 = vld [vmem:[%s12884_s0 + $0x18] sm:$0xff]  ;;  %v57_v6 = vsel %vm53_vm0, %v34_v2, 0.0  ;;  %v37_v8 = vld [vmem:[%s12884_s0 + $0x20] sm:$0xff]  ;;  %v38_v9 = vld [vmem:[%s12884_s0 + $0x28] sm:$0xff] }
   0x3   :  { %55 = vadd.xlane.f32.xlu0 %v54_v3  ;;  %61 = vadd.xlane.f32.xlu1 %v60_v4  ;;  %v63_v7 = vsel %vm53_vm0, %v36_v5, 0.0  ;;  %v66_v10 = vsel %vm53_vm0, %v37_v8, 0.0  ;;  %v69_v11 = vsel %vm53_vm0, %v38_v9, 0.0  ;;  %v39_v12 = vld [vmem:[%s12884_s0 + $0x30] sm:$0xff]  ;;  %v40_v13 = vld [vmem:[%s12884_s0 + $0x38] sm:$0xff]  ;;  %v8665_v56 = vld [vmem:[%s12885_s2] sm:$0xff]  }
   0x4   :  { %v72_v14 = vsel %vm53_vm0, %v39_v12, 0.0  ;;  %v75_v15 = vsel %vm53_vm0, %v40_v13, 0.0  ;;  %v8666_v57 = vld [vmem:[%s12885_s2 + $0x8] sm:$0xff]   ;;  %7820 = vmatprep.subr.bf16.mxu0 %v8665_v56  ;;  %s9385_s2 = smov 56   ;;  %s9386_s29 = smov 80   ;;  %vm1743_vm4 = vcmask 195584  }
   0x5   :  { %7821 = vmatpush3.bf16.msra.mxu0 %v8665_v56  ;;  %s9387_s12 = smov 112   ;;  %s9388_s13 = smov 48   ;;  %vm9396_vm5 = vmmov 0   ;;  %vm3885_vm6 = vcmask 1043456  }
   0x6   :  { %7822 = vmatprep.subr.bf16.mxu0 %v8666_v57  ;;  %s9389_s14 = smov 72   ;;  %s9390_s15 = smov 104  }
   0x7   :  { %58 = vadd.xlane.f32.xlu0 %v57_v6  ;;  %64 = vadd.xlane.f32.xlu1 %v63_v7  ;;  %v9526_v6 = vshrl.u32 %v263_v63, 7  ;;  %s9391_s16 = smov 40   ;;  %s9392_s17 = smov 8  }
   0x8   :  { %s9393_s18 = smov 16   ;;  %s9394_s19 = smov 24  }
   0x9   :  { %7823 = vmatpush3.bf16.msra.mxu0 %v8666_v57  ;;  %12947 = vst [vmem:[#allocation2_spill] sm:$0xff] %v9526_v6 }
   0xb   :  { %67 = vadd.xlane.f32.xlu0 %v66_v10  ;;  %70 = vadd.xlane.f32.xlu1 %v69_v11 }
   0xf   :  { %73 = vadd.xlane.f32.xlu0 %v72_v14  ;;  %76 = vadd.xlane.f32.xlu1 %v75_v15 }
  0x90   :  { %v56_v16 = vpop.xlane.xlu0 %55  ;;  %v62_v17 = vpop.xlane.xlu1 %61 }
  0x91   :  { %v103_v18 = vmul.f32 0.03125, %v56_v16  ;;  %v105_v19 = vmul.f32 0.03125, %v62_v17  ;;  %v51_v16 = vld [vmem:[%s12886_s7] sm:$0xff] }
  0x93   :  { %v9480_v20 = vsub.f32 %v33_v0, %v103_v18  ;;  %v9482_v21 = vsub.f32 %v35_v1, %v105_v19 }
  0x94   :  { %v59_v22 = vpop.xlane.xlu0 %58  ;;  %v65_v23 = vpop.xlane.xlu1 %64 }
  0x95   :  { %v104_v24 = vmul.f32 0.03125, %v59_v22  ;;  %v106_v25 = vmul.f32 0.03125, %v65_v23  ;;  %v135_v26 = vmul.f32 %v9480_v20, %v9480_v20  ;;  %v137_v27 = vmul.f32 %v9482_v21, %v9482_v21 }
  0x97   :  { %v9488_v28 = vsub.f32 %v34_v2, %v104_v24  ;;  %v9490_v29 = vsub.f32 %v36_v5, %v106_v25  ;;  %v151_v30 = vsel %vm53_vm0, %v135_v26, 0.0  ;;  %v157_v33 = vsel %vm53_vm0, %v137_v27, 0.0 }
  0x98   :  { %152 = vadd.xlane.f32.xlu0 %v151_v30  ;;  %v68_v31 = vpop.xlane.xlu0 %67  ;;  %v71_v32 = vpop.xlane.xlu1 %70  ;;  %v12895_v25 = vsub.s32 1, %v9526_v6 }
  0x99   :  { %v107_v34 = vmul.f32 0.03125, %v68_v31  ;;  %v108_v35 = vmul.f32 0.03125, %v71_v32  ;;  %v136_v36 = vmul.f32 %v9488_v28, %v9488_v28  ;;  %v138_v37 = vmul.f32 %v9490_v29, %v9490_v29 }
  0x9b   :  { %v9498_v38 = vsub.f32 %v37_v8, %v107_v34  ;;  %v9500_v39 = vsub.f32 %v38_v9, %v108_v35  ;;  %v154_v40 = vsel %vm53_vm0, %v136_v36, 0.0  ;;  %v160_v43 = vsel %vm53_vm0, %v138_v37, 0.0 }
  0x9c   :  { %158 = vadd.xlane.f32.xlu0 %v157_v33  ;;  %155 = vadd.xlane.f32.xlu1 %v154_v40  ;;  %v74_v41 = vpop.xlane.xlu0 %73  ;;  %v77_v42 = vpop.xlane.xlu1 %76  ;;  %v9542_v34 = vrot.slane %v51_v16, %v12895_v25 }
  0x9d   :  { %v109_v44 = vmul.f32 0.03125, %v74_v41  ;;  %v110_v45 = vmul.f32 0.03125, %v77_v42  ;;  %v139_v46 = vmul.f32 %v9498_v38, %v9498_v38  ;;  %v140_v47 = vmul.f32 %v9500_v39, %v9500_v39 }
  0x9f   :  { %v9508_v48 = vsub.f32 %v39_v12, %v109_v44  ;;  %v9510_v49 = vsub.f32 %v40_v13, %v110_v45  ;;  %v163_v50 = vsel %vm53_vm0, %v139_v46, 0.0  ;;  %v166_v51 = vsel %vm53_vm0, %v140_v47, 0.0 }
  0xa0   :  { %161 = vadd.xlane.f32.xlu1 %v160_v43  ;;  %164 = vadd.xlane.f32.xlu0 %v163_v50  ;;  %v12894_v13 = vsub.s32 0, %v9526_v6 }
  0xa1   :  { %v141_v52 = vmul.f32 %v9508_v48, %v9508_v48  ;;  %v142_v53 = vmul.f32 %v9510_v49, %v9510_v49 }
  0xa2   :  { %v9535_v24 = vrot.slane %v51_v16, %v12894_v13 }
  0xa3   :  { %v169_v54 = vsel %vm53_vm0, %v141_v52, 0.0  ;;  %v172_v55 = vsel %vm53_vm0, %v142_v53, 0.0 }
  0xa4   :  { %167 = vadd.xlane.f32.xlu1 %v166_v51  ;;  %170 = vadd.xlane.f32.xlu0 %v169_v54 }
  0xa8   :  { %173 = vadd.xlane.f32.xlu1 %v172_v55 }
 0x125   :  { %v153_v58 = vpop.xlane.xlu0 %152 }
 0x126   :  { %v199_v59 = vmul.f32 0.03125, %v153_v58 }
 0x128   :  { %v215_v60 = vadd.f32 1e-05, %v199_v59 }
 0x129   :  { %v156_v61 = vpop.xlane.xlu1 %155  ;;  %v159_v62 = vpop.xlane.xlu0 %158 }
 0x12a   :  { %8691 = vrsqrt.f32 %v215_v60  ;;  %v200_v0 = vmul.f32 0.03125, %v156_v61  ;;  %v201_v1 = vmul.f32 0.03125, %v159_v62 }
 0x12c   :  { %v216_v2 = vadd.f32 1e-05, %v200_v0  ;;  %v217_v3 = vadd.f32 1e-05, %v201_v1 }
 0x12d   :  { %v162_v4 = vpop.xlane.xlu1 %161  ;;  %v165_v5 = vpop.xlane.xlu0 %164 }
 0x12e   :  { %8693 = vrsqrt.f32 %v216_v2  ;;  %v202_v7 = vmul.f32 0.03125, %v162_v4  ;;  %v203_v8 = vmul.f32 0.03125, %v165_v5 }
 0x12f   :  { %8695 = vrsqrt.f32 %v217_v3 }
 0x130   :  { %v218_v9 = vadd.f32 1e-05, %v202_v7  ;;  %v219_v10 = vadd.f32 1e-05, %v203_v8 }
 0x131   :  { %v168_v11 = vpop.xlane.xlu1 %167  ;;  %v171_v12 = vpop.xlane.xlu0 %170 }
 0x132   :  { %8697 = vrsqrt.f32 %v218_v9  ;;  %v204_v14 = vmul.f32 0.03125, %v168_v11  ;;  %v205_v15 = vmul.f32 0.03125, %v171_v12  ;;  %v9613_v12 = vld [vmem:[%s12884_s0 + $0x50] sm:$0xff] }
 0x133   :  { %8699 = vrsqrt.f32 %v219_v10  ;;  %v9606_v10 = vld [vmem:[%s12884_s0 + $0x40] sm:$0xff] }
 0x134   :  { %v8692_v17 = vpop.eup %8691  ;;  %v220_v18 = vadd.f32 1e-05, %v204_v14  ;;  %v221_v19 = vadd.f32 1e-05, %v205_v15  ;;  %v78_v11 = vsel %vm53_vm0, %v9606_v10, 0.0  ;;  %v84_v14 = vsel %vm53_vm0, %v9613_v12, 0.0 }
 0x135   :  { %v174_v22 = vpop.xlane.xlu1 %173  ;;  %v247_v23 = vmul.f32 %v8692_v17, %v9480_v20  ;;  %v9620_v15 = vld [vmem:[%s12884_s0 + $0x58] sm:$0xff]  ;;  %v9627_v17 = vld [vmem:[%s12884_s0 + $0x60] sm:$0xff] }
 0x136   :  { %8701 = vrsqrt.f32 %v220_v18  ;;  %v206_v26 = vmul.f32 0.03125, %v174_v22  ;;  %v87_v16 = vsel %vm53_vm0, %v9620_v15, 0.0  ;;  %v90_v18 = vsel %vm53_vm0, %v9627_v17, 0.0  ;;  %v9639_v22 = vld [vmem:[%s12884_s0 + $0x48] sm:$0xff] }
 0x137   :  { %8703 = vrsqrt.f32 %v221_v19  ;;  %v267_v33 = vmul.f32 %v9535_v24, %v247_v23  ;;  %v9634_v19 = vld [vmem:[%s12884_s0 + $0x70] sm:$0xff] }
 0x138   :  { %v8694_v27 = vpop.eup %8693  ;;  %v222_v30 = vadd.f32 1e-05, %v206_v26  ;;  %v96_v23 = vsel %vm53_vm0, %v9634_v19, 0.0  ;;  %v81_v26 = vsel %vm53_vm0, %v9639_v22, 0.0 }
 0x139   :  { %v8696_v31 = vpop.eup %8695  ;;  %v248_v32 = vmul.f32 %v8694_v27, %v9488_v28  ;;  %v287_v40 = vadd.f32 %v9542_v34, %v267_v33  ;;  %v9648_v27 = vld [vmem:[%s12884_s0 + $0x68] sm:$0xff] }
 0x13a   :  { %8705 = vrsqrt.f32 %v222_v30  ;;  %v249_v20 = vmul.f32 %v8696_v31, %v9482_v21  ;;  %v93_v30 = vsel %vm53_vm0, %v9648_v27, 0.0  ;;  %v9655_v31 = vld [vmem:[%s12884_s0 + $0x78] sm:$0xff] }
 0x13b   :  { %v268_v35 = vmul.f32 %v9535_v24, %v248_v32  ;;  %v99_v32 = vsel %vm53_vm0, %v9655_v31, 0.0 }
 0x13c   :  { %v8698_v36 = vpop.eup %8697  ;;  %v269_v28 = vmul.f32 %v9535_v24, %v249_v20 }
 0x13d   :  { %v8700_v37 = vpop.eup %8699  ;;  %v288_v41 = vadd.f32 %v9542_v34, %v268_v35  ;;  %v250_v42 = vmul.f32 %v8698_v36, %v9490_v29 }
 0x13e   :  { %v251_v43 = vmul.f32 %v8700_v37, %v9498_v38  ;;  %v289_v21 = vadd.f32 %v9542_v34, %v269_v28 }
 0x13f   :  { %v303_v44 = vpack.c.bf16 %v288_v41, %v287_v40  ;;  %v270_v45 = vmul.f32 %v9535_v24, %v250_v42 }
 0x140   :  { %v8702_v46 = vpop.eup %8701  ;;  %v271_v52 = vmul.f32 %v9535_v24, %v251_v43 }
 0x141   :  { %v8704_v47 = vpop.eup %8703  ;;  %7824 = vmatprep.mubr.msk.bf16.mxu0 %vm53_vm0, %v303_v44  ;;  %v290_v50 = vadd.f32 %v9542_v34, %v270_v45  ;;  %v252_v51 = vmul.f32 %v8702_v46, %v9500_v39 }
 0x142   :  { %v253_v29 = vmul.f32 %v8704_v47, %v9508_v48  ;;  %v291_v55 = vadd.f32 %v9542_v34, %v271_v52 }
 0x143   :  { %v304_v53 = vpack.c.bf16 %v290_v50, %v289_v21  ;;  %v272_v38 = vmul.f32 %v9535_v24, %v252_v51 }
 0x144   :  { %v8706_v54 = vpop.eup %8705  ;;  %v273_v58 = vmul.f32 %v9535_v24, %v253_v29 }
 0x145   :  { %7825 = vmatmul.mubr.msk.bf16.vlgmr.msra.gmra.mrb[0].mxu0 %vm53_vm0, %v304_v53  ;;  %v292_v56 = vadd.f32 %v9542_v34, %v272_v38  ;;  %v254_v57 = vmul.f32 %v8706_v54, %v9510_v49 }
 0x146   :  { %v293_v48 = vadd.f32 %v9542_v34, %v273_v58 }
 0x147   :  { %v305_v59 = vpack.c.bf16 %v292_v56, %v291_v55  ;;  %v274_v39 = vmul.f32 %v9535_v24, %v254_v57 }
 0x149   :  { %7828 = vmatprep.mubr.msk.bf16.mxu0 %vm53_vm0, %v305_v59  ;;  %v294_v60 = vadd.f32 %v9542_v34, %v274_v39 }
 0x14b   :  { %v306_v61 = vpack.c.bf16 %v294_v60, %v293_v48 }
 0x14d   :  { %7829 = vmatmul.mubr.msk.bf16.gmra.mrb[4].mxu0 %vm53_vm0, %v306_v61 }
 0x218   :  { %v7826_v62 = vpop.f32.mrb[0].mxu0 }
 0x219   :  { %v385_v63 = vpop.f32.mrb[1].mxu0 }
 0x21a   :  { %v7827_v0 = vpop.f32.mrb[2].mxu0 }
 0x21b   :  { %v9569_v1 = vpack.c.bf16 %v7827_v0, %v7826_v62  ;;  %v388_v49 = vpop.f32.mrb[3].mxu0 }
 0x21c   :  { %v9571_v2 = vpack.c.bf16 %v388_v49, %v385_v63 }
 0x21d   :  { %462 = vrot.lane.b32.xlu1 %v9569_v1, %s9381_s30 }
 0x21e   :  { %460 = vrot.lane.b32.xlu0 %v9571_v2, %s9381_s30  ;;  %7848 = vmatprep.mubr.msk.bf16.mxu1 %vm468_vm1, %v9571_v2 }
 0x220   :  { %v7830_v3 = vpop.f32.mrb[4].mxu0 }
 0x221   :  { %v401_v4 = vpop.f32.mrb[5].mxu0 }
 0x222   :  { %756 = vrot.lane.b32.xlu0 %v9571_v2, %s9382_s10  ;;  %v7831_v5 = vpop.f32.mrb[6].mxu0 }
 0x223   :  { %v9581_v7 = vpack.c.bf16 %v7831_v5, %v7830_v3  ;;  %v404_v8 = vpop.f32.mrb[7].mxu0 }
 0x224   :  { %v9583_v9 = vpack.c.bf16 %v404_v8, %v401_v4 }
 0x226   :  { %760 = vrot.lane.b32.xlu0 %v9583_v9, %s9382_s10  ;;  %464 = vrot.lane.b32.xlu1 %v9583_v9, %s9381_s30 }
 0x22a   :  { %748 = vrot.lane.b32.xlu0 %v9571_v2, %s9383_s11  ;;  %466 = vrot.lane.b32.xlu1 %v9581_v7, %s9381_s30 }
 0x22e   :  { %752 = vrot.lane.b32.xlu0 %v9583_v9, %s9383_s11  ;;  %758 = vrot.lane.b32.xlu1 %v9569_v1, %s9382_s10 }
 0x232   :  { %762 = vrot.lane.b32.xlu1 %v9581_v7, %s9382_s10 }
 0x236   :  { %750 = vrot.lane.b32.xlu1 %v9569_v1, %s9383_s11 }
 0x23a   :  { %754 = vrot.lane.b32.xlu1 %v9581_v7, %s9383_s11 }
 0x24d   :  { %79 = vadd.xlane.f32.xlu0 %v78_v11 }
 0x251   :  { %85 = vadd.xlane.f32.xlu0 %v84_v14 }
 0x255   :  { %88 = vadd.xlane.f32.xlu0 %v87_v16 }
 0x259   :  { %91 = vadd.xlane.f32.xlu0 %v90_v18 }
 0x25d   :  { %97 = vadd.xlane.f32.xlu0 %v96_v23 }
 0x25e   :  { %82 = vadd.xlane.f32.xlu1 %v81_v26 }
 0x262   :  { %94 = vadd.xlane.f32.xlu1 %v93_v30 }
 0x266   :  { %100 = vadd.xlane.f32.xlu1 %v99_v32 }
 0x28f   :  { %v463_v35 = vpop.permute.xlu1 %462 }
 0x290   :  { %v461_v33 = vpop.permute.xlu0 %460  ;;  %v485_v36 = vsel %vm468_vm1, %v463_v35, 0 }
 0x291   :  { %8360 = vmatprep.subr.msk.bf16.mxu1 %vm468_vm1, %v461_v33  ;;  %v482_v20 = vsel %vm468_vm1, %v461_v33, 0 }
 0x292   :  { %7841 = vmatpush3.bf16.xpose.msra.mxu1 %v482_v20 }
 0x293   :  { %8361 = vmatprep.subr.msk.bf16.mxu1 %vm468_vm1, %v463_v35 }
 0x294   :  { %v757_v28 = vpop.permute.xlu0 %756 }
 0x295   :  { %v777_v43 = vsel %vm468_vm1, %v757_v28, 0 }
 0x298   :  { %v465_v37 = vpop.permute.xlu1 %464  ;;  %v761_v45 = vpop.permute.xlu0 %760 }
 0x299   :  { %v488_v40 = vsel %vm468_vm1, %v465_v37, 0  ;;  %v783_v21 = vsel %vm468_vm1, %v761_v45, 0 }
 0x29a   :  { %7843 = vmatpush3.bf16.xpose.msra.mxu1 %v485_v36 }
 0x29b   :  { %8362 = vmatprep.subr.msk.bf16.mxu1 %vm468_vm1, %v465_v37 }
 0x29c   :  { %v467_v41 = vpop.permute.xlu1 %466  ;;  %v749_v46 = vpop.permute.xlu0 %748 }
 0x29d   :  { %v491_v42 = vsel %vm468_vm1, %v467_v41, 0 }
 0x2a0   :  { %v759_v44 = vpop.permute.xlu1 %758  ;;  %v753_v29 = vpop.permute.xlu0 %752 }
 0x2a1   :  { %v780_v47 = vsel %vm468_vm1, %v759_v44, 0 }
 0x2a2   :  { %7845 = vmatpush3.bf16.xpose.msra.mxu1 %v488_v40 }
 0x2a3   :  { %8363 = vmatprep.subr.msk.bf16.mxu1 %vm468_vm1, %v467_v41 }
 0x2a4   :  { %v763_v50 = vpop.permute.xlu1 %762 }
 0x2a5   :  { %v786_v51 = vsel %vm468_vm1, %v763_v50, 0 }
 0x2a8   :  { %v751_v52 = vpop.permute.xlu1 %750 }
 0x2aa   :  { %7847 = vmatpush3.bf16.xpose.msra.mxu1 %v491_v42 }
 0x2ab   :  { %8364 = vmatprep.subr.msk.bf16.mxu1 %vm468_vm1, %v757_v28 }
 0x2ac   :  { %v755_v53 = vpop.permute.xlu1 %754 }
 0x2b1   :  { %7849 = vmatmul.mubr.msk.bf16.vlgmr.msra.gmra.mrb[0].mxu1 %vm468_vm1, %v9569_v1 }
 0x2b2   :  { %7852 = vmatprep.mubr.msk.bf16.mxu1 %vm468_vm1, %v9583_v9  ;;  %7873 = vmatpush3.bf16.xpose.msra.mxu1 %v777_v43 }
 0x2b3   :  { %8365 = vmatprep.subr.msk.bf16.mxu1 %vm468_vm1, %v759_v44 }
 0x2b9   :  { %7853 = vmatmul.mubr.msk.bf16.gmra.mrb[4].mxu1 %vm468_vm1, %v9581_v7 }
 0x2ba   :  { %7875 = vmatpush3.bf16.xpose.msra.mxu1 %v780_v47  ;;  %7880 = vmatprep.mubr.msk.bf16.mxu1 %vm468_vm1, %v749_v46 }
 0x2bb   :  { %8366 = vmatprep.subr.msk.bf16.mxu1 %vm468_vm1, %v761_v45 }
 0x2c2   :  { %7877 = vmatpush3.bf16.xpose.msra.mxu1 %v783_v21 }
 0x2c3   :  { %8367 = vmatprep.subr.msk.bf16.mxu1 %vm468_vm1, %v763_v50 }
 0x2ca   :  { %7879 = vmatpush3.bf16.xpose.msra.mxu1 %v786_v51 }
 0x2d1   :  { %7881 = vmatmul.mubr.msk.bf16.vlgmr.msra.gmra.mrb[8].mxu1 %vm468_vm1, %v751_v52 }
 0x2d2   :  { %7884 = vmatprep.mubr.msk.bf16.mxu1 %vm468_vm1, %v753_v29 }
 0x2d9   :  { %7885 = vmatmul.mubr.msk.bf16.gmra.mrb[12].mxu1 %vm468_vm1, %v755_v53 }
 0x2da   :  { %v80_v38 = vpop.xlane.xlu0 %79 }
 0x2db   :  { %v111_v54 = vmul.f32 0.03125, %v80_v38 }
 0x2dd   :  { %v9686_v55 = vsub.f32 %v9606_v10, %v111_v54 }
 0x2de   :  { %v86_v56 = vpop.xlane.xlu0 %85 }
 0x2df   :  { %v113_v57 = vmul.f32 0.03125, %v86_v56  ;;  %v143_v58 = vmul.f32 %v9686_v55, %v9686_v55 }
 0x2e1   :  { %v9691_v59 = vsub.f32 %v9613_v12, %v113_v57  ;;  %v175_v39 = vsel %vm53_vm0, %v143_v58, 0.0 }
 0x2e2   :  { %176 = vadd.xlane.f32.xlu0 %v175_v39  ;;  %v89_v48 = vpop.xlane.xlu0 %88 }
 0x2e3   :  { %v145_v60 = vmul.f32 %v9691_v59, %v9691_v59  ;;  %v114_v0 = vmul.f32 0.03125, %v89_v48 }
 0x2e5   :  { %v181_v61 = vsel %vm53_vm0, %v145_v60, 0.0  ;;  %v9703_v10 = vsub.f32 %v9620_v15, %v114_v0 }
 0x2e6   :  { %182 = vadd.xlane.f32.xlu0 %v181_v61  ;;  %v92_v62 = vpop.xlane.xlu0 %91 }
 0x2e7   :  { %v115_v63 = vmul.f32 0.03125, %v92_v62  ;;  %v146_v15 = vmul.f32 %v9703_v10, %v9703_v10 }
 0x2e9   :  { %v9698_v49 = vsub.f32 %v9627_v17, %v115_v63  ;;  %v184_v20 = vsel %vm53_vm0, %v146_v15, 0.0 }
 0x2ea   :  { %v98_v3 = vpop.xlane.xlu0 %97 }
 0x2eb   :  { %v117_v4 = vmul.f32 0.03125, %v98_v3  ;;  %v83_v5 = vpop.xlane.xlu1 %82  ;;  %v147_v8 = vmul.f32 %v9698_v49, %v9698_v49 }
 0x2ec   :  { %v112_v11 = vmul.f32 0.03125, %v83_v5 }
 0x2ed   :  { %v9706_v12 = vsub.f32 %v9634_v19, %v117_v4  ;;  %v187_v14 = vsel %vm53_vm0, %v147_v8, 0.0 }
 0x2ee   :  { %v9710_v16 = vsub.f32 %v9639_v22, %v112_v11  ;;  %188 = vadd.xlane.f32.xlu0 %v187_v14 }
 0x2ef   :  { %v149_v17 = vmul.f32 %v9706_v12, %v9706_v12  ;;  %v95_v18 = vpop.xlane.xlu1 %94 }
 0x2f0   :  { %v144_v23 = vmul.f32 %v9710_v16, %v9710_v16  ;;  %v116_v26 = vmul.f32 0.03125, %v95_v18 }
 0x2f1   :  { %v193_v19 = vsel %vm53_vm0, %v149_v17, 0.0 }
 0x2f2   :  { %194 = vadd.xlane.f32.xlu0 %v193_v19  ;;  %v178_v30 = vsel %vm53_vm0, %v144_v23, 0.0  ;;  %v9721_v22 = vsub.f32 %v9648_v27, %v116_v26 }
 0x2f3   :  { %179 = vadd.xlane.f32.xlu1 %v178_v30  ;;  %v101_v32 = vpop.xlane.xlu1 %100 }
 0x2f4   :  { %v118_v33 = vmul.f32 0.03125, %v101_v32  ;;  %v148_v35 = vmul.f32 %v9721_v22, %v9721_v22 }
 0x2f6   :  { %v9727_v36 = vsub.f32 %v9655_v31, %v118_v33  ;;  %v190_v37 = vsel %vm53_vm0, %v148_v35, 0.0 }
 0x2f7   :  { %185 = vadd.xlane.f32.xlu1 %v184_v20 }
 0x2f8   :  { %v150_v40 = vmul.f32 %v9727_v36, %v9727_v36 }
 0x2fa   :  { %v196_v27 = vsel %vm53_vm0, %v150_v40, 0.0 }
 0x2fb   :  { %191 = vadd.xlane.f32.xlu1 %v190_v37 }
 0x2ff   :  { %197 = vadd.xlane.f32.xlu1 %v196_v27 }
 0x308   :  { %659 = vrot.lane.b32.xlu0 %v9571_v2, %s9384_s28 }
 0x30c   :  { %663 = vrot.lane.b32.xlu0 %v9583_v9, %s9384_s28 }
 0x310   :  { %661 = vrot.lane.b32.xlu1 %v9569_v1, %s9384_s28 }
 0x314   :  { %665 = vrot.lane.b32.xlu1 %v9581_v7, %s9384_s28 }
 0x36f   :  { %v177_v31 = vpop.xlane.xlu0 %176 }
 0x370   :  { %v207_v41 = vmul.f32 0.03125, %v177_v31 }
 0x372   :  { %v223_v43 = vadd.f32 1e-05, %v207_v41 }
 0x373   :  { %v183_v42 = vpop.xlane.xlu0 %182 }
 0x374   :  { %v209_v28 = vmul.f32 0.03125, %v183_v42  ;;  %8707 = vrsqrt.f32 %v223_v43 }
 0x376   :  { %v225_v45 = vadd.f32 1e-05, %v209_v28 }
 0x378   :  { %8709 = vrsqrt.f32 %v225_v45 }
 0x37b   :  { %v189_v44 = vpop.xlane.xlu0 %188 }
 0x37c   :  { %v211_v46 = vmul.f32 0.03125, %v189_v44 }
 0x37e   :  { %v227_v52 = vadd.f32 1e-05, %v211_v46  ;;  %v8708_v4 = vpop.eup %8707 }
 0x37f   :  { %v195_v47 = vpop.xlane.xlu0 %194  ;;  %v255_v15 = vmul.f32 %v8708_v4, %v9686_v55 }
 0x380   :  { %v180_v21 = vpop.xlane.xlu1 %179  ;;  %v213_v51 = vmul.f32 0.03125, %v195_v47 }
 0x381   :  { %v208_v50 = vmul.f32 0.03125, %v180_v21  ;;  %v275_v43 = vmul.f32 %v9535_v24, %v255_v15 }
 0x382   :  { %v229_v39 = vadd.f32 1e-05, %v213_v51  ;;  %v8710_v18 = vpop.eup %8709 }
 0x383   :  { %v224_v29 = vadd.f32 1e-05, %v208_v50  ;;  %v660_v53 = vpop.permute.xlu0 %659  ;;  %v257_v41 = vmul.f32 %v8710_v18, %v9691_v59  ;;  %v295_v51 = vadd.f32 %v9542_v34, %v275_v43 }
 0x384   :  { %v7850_v38 = vpop.f32.mrb[0].mxu1  ;;  %v186_v54 = vpop.xlane.xlu1 %185  ;;  %7856 = vmatprep.subr.bf16.mxu0 %v660_v53 }
 0x385   :  { %8711 = vrsqrt.f32 %v224_v29  ;;  %v9741_v56 = vmul.f32 0.35355338, %v7850_v38  ;;  %v210_v57 = vmul.f32 0.03125, %v186_v54  ;;  %v527_v58 = vpop.f32.mrb[1].mxu1  ;;  %7857 = vmatpush3.bf16.msra.mxu0 %v660_v53  ;;  %v277_v50 = vmul.f32 %v9535_v24, %v257_v41 }
 0x386   :  { %v9743_v48 = vmul.f32 0.35355338, %v527_v58  ;;  %v7851_v60 = vpop.f32.mrb[2].mxu1  ;;  %8713 = vrsqrt.f32 %v227_v52 }
 0x387   :  { %v226_v61 = vadd.f32 1e-05, %v210_v57  ;;  %v9745_v62 = vmul.f32 0.35355338, %v7851_v60  ;;  %v530_v63 = vpop.f32.mrb[3].mxu1  ;;  %v573_v0 = vsel %vm566_vm2, %v9741_v56, -inf  ;;  %v664_v47 = vpop.permute.xlu0 %663 }
 0x388   :  { %v192_v3 = vpop.xlane.xlu1 %191  ;;  %574 = vmax.xlane.f32.xlu0 %v573_v0  ;;  %v9749_v5 = vmul.f32 0.35355338, %v530_v63  ;;  %v567_v17 = vsel %vm566_vm2, %v9743_v48, -inf }
 0x389   :  { %8715 = vrsqrt.f32 %v226_v61  ;;  %v212_v8 = vmul.f32 0.03125, %v192_v3  ;;  %v576_v11 = vsel %vm566_vm2, %v9745_v62, -inf  ;;  %v297_v61 = vadd.f32 %v9542_v34, %v277_v50 }
 0x38a   :  { %577 = vmax.xlane.f32.xlu1 %v576_v11  ;;  %8717 = vrsqrt.f32 %v229_v39  ;;  %v570_v33 = vsel %vm566_vm2, %v9749_v5, -inf }
 0x38b   :  { %v228_v14 = vadd.f32 1e-05, %v212_v8 }
 0x38c   :  { %v7854_v23 = vpop.f32.mrb[4].mxu1  ;;  %v198_v26 = vpop.xlane.xlu1 %197  ;;  %568 = vmax.xlane.f32.xlu0 %v567_v17 }
 0x38d   :  { %8719 = vrsqrt.f32 %v228_v14  ;;  %v9756_v19 = vmul.f32 0.35355338, %v7854_v23  ;;  %v214_v30 = vmul.f32 0.03125, %v198_v26  ;;  %v543_v32 = vpop.f32.mrb[5].mxu1 }
 0x38e   :  { %v9760_v20 = vmul.f32 0.35355338, %v543_v32  ;;  %v7855_v35 = vpop.f32.mrb[6].mxu1  ;;  %571 = vmax.xlane.f32.xlu1 %v570_v33 }
 0x38f   :  { %v8712_v37 = vpop.eup %8711  ;;  %v230_v40 = vadd.f32 1e-05, %v214_v30  ;;  %v9762_v27 = vmul.f32 0.35355338, %v7855_v35  ;;  %v546_v31 = vpop.f32.mrb[7].mxu1  ;;  %v585_v55 = vsel %vm566_vm2, %v9756_v19, -inf }
 0x390   :  { %v662_v42 = vpop.permute.xlu1 %661  ;;  %586 = vmax.xlane.f32.xlu0 %v585_v55  ;;  %v256_v28 = vmul.f32 %v8712_v37, %v9710_v16  ;;  %v8714_v44 = vpop.eup %8713  ;;  %v9769_v45 = vmul.f32 0.35355338, %v546_v31  ;;  %v579_v16 = vsel %vm566_vm2, %v9760_v20, -inf }
 0x391   :  { %8721 = vrsqrt.f32 %v230_v40  ;;  %7858 = vmatprep.subr.bf16.mxu0 %v662_v42  ;;  %v588_v46 = vsel %vm566_vm2, %v9762_v27, -inf  ;;  %v259_v53 = vmul.f32 %v8714_v44, %v9698_v49 }
 0x392   :  { %589 = vmax.xlane.f32.xlu1 %v588_v46  ;;  %7859 = vmatpush3.bf16.msra.mxu0 %v662_v42  ;;  %v276_v21 = vmul.f32 %v9535_v24, %v256_v28  ;;  %v582_v54 = vsel %vm566_vm2, %v9769_v45, -inf }
 0x393   :  { %v8716_v59 = vpop.eup %8715  ;;  %7860 = vmatprep.subr.bf16.mxu0 %v664_v47  ;;  %v279_v63 = vmul.f32 %v9535_v24, %v259_v53 }
 0x394   :  { %580 = vmax.xlane.f32.xlu0 %v579_v16  ;;  %v296_v52 = vadd.f32 %v9542_v34, %v276_v21  ;;  %v258_v29 = vmul.f32 %v8716_v59, %v9703_v10  ;;  %v8718_v38 = vpop.eup %8717  ;;  %v666_v57 = vpop.permute.xlu1 %665 }
 0x395   :  { %v261_v0 = vmul.f32 %v8718_v38, %v9706_v12  ;;  %v299_v11 = vadd.f32 %v9542_v34, %v279_v63 }
 0x396   :  { %583 = vmax.xlane.f32.xlu1 %v582_v54  ;;  %7861 = vmatpush3.bf16.msra.mxu0 %v664_v47  ;;  %v307_v58 = vpack.c.bf16 %v296_v52, %v295_v51  ;;  %v278_v39 = vmul.f32 %v9535_v24, %v258_v29 }
 0x397   :  { %v8720_v60 = vpop.eup %8719  ;;  %7862 = vmatprep.subr.bf16.mxu0 %v666_v57  ;;  %v281_v18 = vmul.f32 %v9535_v24, %v261_v0 }
 0x398   :  { %7832 = vmatprep.mubr.msk.bf16.mxu0 %vm53_vm0, %v307_v58  ;;  %v298_v10 = vadd.f32 %v9542_v34, %v278_v39  ;;  %v260_v49 = vmul.f32 %v8720_v60, %v9721_v22 }
 0x399   :  { %v301_v12 = vadd.f32 %v9542_v34, %v281_v18 }
 0x39a   :  { %7863 = vmatpush3.bf16.msra.mxu0 %v666_v57  ;;  %v308_v3 = vpack.c.bf16 %v298_v10, %v297_v61  ;;  %v280_v4 = vmul.f32 %v9535_v24, %v260_v49 }
 0x39b   :  { %v8722_v8 = vpop.eup %8721 }
 0x39c   :  { %7833 = vmatmul.mubr.msk.bf16.gmra.mrb[8].mxu0 %vm53_vm0, %v308_v3  ;;  %v300_v14 = vadd.f32 %v9542_v34, %v280_v4  ;;  %v262_v17 = vmul.f32 %v8722_v8, %v9727_v36 }
 0x39e   :  { %v309_v22 = vpack.c.bf16 %v300_v14, %v299_v11  ;;  %v282_v23 = vmul.f32 %v9535_v24, %v262_v17 }
 0x3a0   :  { %7836 = vmatprep.mubr.msk.bf16.mxu0 %vm53_vm0, %v309_v22  ;;  %v302_v26 = vadd.f32 %v9542_v34, %v282_v23 }
 0x3a2   :  { %v310_v15 = vpack.c.bf16 %v302_v26, %v301_v12 }
 0x3a4   :  { %7837 = vmatmul.mubr.msk.bf16.gmra.mrb[12].mxu0 %vm53_vm0, %v310_v15  ;;  %v7882_v30 = vpop.f32.mrb[8].mxu1 }
 0x3a5   :  { %v9801_v32 = vmul.f32 0.35355338, %v7882_v30  ;;  %v822_v33 = vpop.f32.mrb[9].mxu1 }
 0x3a6   :  { %v7883_v35 = vpop.f32.mrb[10].mxu1  ;;  %v9803_v36 = vmul.f32 0.35355338, %v822_v33 }
 0x3a7   :  { %v9805_v37 = vmul.f32 0.35355338, %v7883_v35  ;;  %v825_v40 = vpop.f32.mrb[11].mxu1  ;;  %v867_v24 = vsel %vm566_vm2, %v9801_v32, -inf }
 0x3a8   :  { %868 = vmax.xlane.f32.xlu0 %v867_v24  ;;  %v9809_v31 = vmul.f32 0.35355338, %v825_v40  ;;  %v861_v55 = vsel %vm566_vm2, %v9803_v36, -inf }
 0x3a9   :  { %v870_v34 = vsel %vm566_vm2, %v9805_v37, -inf }
 0x3aa   :  { %871 = vmax.xlane.f32.xlu1 %v870_v34  ;;  %v864_v43 = vsel %vm566_vm2, %v9809_v31, -inf }
 0x3ac   :  { %v7886_v41 = vpop.f32.mrb[12].mxu1  ;;  %862 = vmax.xlane.f32.xlu0 %v861_v55 }
 0x3ad   :  { %v9815_v42 = vmul.f32 0.35355338, %v7886_v41  ;;  %v838_v28 = vpop.f32.mrb[13].mxu1 }
 0x3ae   :  { %v7887_v44 = vpop.f32.mrb[14].mxu1  ;;  %865 = vmax.xlane.f32.xlu1 %v864_v43  ;;  %v9819_v46 = vmul.f32 0.35355338, %v838_v28 }
 0x3af   :  { %v841_v47 = vpop.f32.mrb[15].mxu1  ;;  %v879_v21 = vsel %vm566_vm2, %v9815_v42, -inf  ;;  %v9831_v16 = vmul.f32 0.35355338, %v7887_v44 }
 0x3b0   :  { %880 = vmax.xlane.f32.xlu0 %v879_v21  ;;  %v873_v59 = vsel %vm566_vm2, %v9819_v46, -inf  ;;  %v9833_v50 = vmul.f32 0.35355338, %v841_v47 }
 0x3b1   :  { %v882_v51 = vsel %vm566_vm2, %v9831_v16, -inf }
 0x3b2   :  { %v876_v52 = vsel %vm566_vm2, %v9833_v50, -inf }
 0x3b4   :  { %874 = vmax.xlane.f32.xlu0 %v873_v59 }
 0x3bf   :  { %955 = vrot.lane.b32.xlu1 %v9569_v1, %s9385_s2 }
 0x3c3   :  { %957 = vrot.lane.b32.xlu1 %v9583_v9, %s9385_s2 }
 0x3ca   :  { %953 = vrot.lane.b32.xlu0 %v9571_v2, %s9385_s2 }
 0x3e7   :  { %883 = vmax.xlane.f32.xlu1 %v882_v51 }
 0x3eb   :  { %877 = vmax.xlane.f32.xlu1 %v876_v52 }
 0x3fc   :  { %959 = vrot.lane.b32.xlu1 %v9581_v7, %s9385_s2 }
 0x415   :  { %v575_v29 = vpop.xlane.xlu0 %574 }
 0x416   :  { %v593_v53 = vsub.f32 %v9741_v56, %v575_v29 }
 0x417   :  { %v578_v38 = vpop.xlane.xlu1 %577 }
 0x418   :  { %v603_v54 = vmul.f32 1.442695, %v593_v53  ;;  %v594_v57 = vsub.f32 %v9745_v62, %v578_v38 }
 0x419   :  { %v569_v58 = vpop.xlane.xlu0 %568 }
 0x41a   :  { %8723 = vpow2.f32 %v603_v54  ;;  %v605_v39 = vmul.f32 1.442695, %v594_v57  ;;  %v591_v60 = vsub.f32 %v9743_v48, %v569_v58 }
 0x41b   :  { %v572_v61 = vpop.xlane.xlu1 %571 }
 0x41c   :  { %8725 = vpow2.f32 %v605_v39  ;;  %v599_v10 = vmul.f32 1.442695, %v591_v60  ;;  %v592_v49 = vsub.f32 %v9749_v5, %v572_v61 }
 0x41d   :  { %v587_v63 = vpop.xlane.xlu0 %586 }
 0x41e   :  { %8727 = vpow2.f32 %v599_v10  ;;  %v601_v0 = vmul.f32 1.442695, %v592_v49  ;;  %v597_v3 = vsub.f32 %v9756_v19, %v587_v63 }
 0x41f   :  { %v590_v56 = vpop.xlane.xlu1 %589 }
 0x420   :  { %8729 = vpow2.f32 %v601_v0  ;;  %v611_v4 = vmul.f32 1.442695, %v597_v3  ;;  %v598_v62 = vsub.f32 %v9762_v27, %v590_v56 }
 0x421   :  { %v581_v8 = vpop.xlane.xlu0 %580 }
 0x422   :  { %8731 = vpow2.f32 %v611_v4  ;;  %v613_v11 = vmul.f32 1.442695, %v598_v62  ;;  %v595_v48 = vsub.f32 %v9760_v20, %v581_v8 }
 0x423   :  { %v584_v14 = vpop.xlane.xlu1 %583 }
 0x424   :  { %v9848_v17 = vpop.eup %8723  ;;  %v607_v18 = vmul.f32 1.442695, %v595_v48  ;;  %v596_v5 = vsub.f32 %v9769_v45, %v584_v14  ;;  %8733 = vpow2.f32 %v613_v11 }
 0x425   :  { %v621_v19 = vsel %vm566_vm2, %v9848_v17, 0.0 }
 0x426   :  { %v9853_v22 = vpop.eup %8725  ;;  %8735 = vpow2.f32 %v607_v18  ;;  %v609_v23 = vmul.f32 1.442695, %v596_v5  ;;  %622 = vadd.xlane.f32.xlu0 %v621_v19 }
 0x427   :  { %v624_v27 = vsel %vm566_vm2, %v9853_v22, 0.0 }
 0x428   :  { %v9857_v12 = vpop.eup %8727  ;;  %625 = vadd.xlane.f32.xlu1 %v624_v27  ;;  %8737 = vpow2.f32 %v609_v23 }
 0x429   :  { %v615_v20 = vsel %vm566_vm2, %v9857_v12, 0.0 }
 0x42a   :  { %v9861_v26 = vpop.eup %8729  ;;  %616 = vadd.xlane.f32.xlu0 %v615_v20 }
 0x42b   :  { %v618_v45 = vsel %vm566_vm2, %v9861_v26, 0.0 }
 0x42c   :  { %v9865_v15 = vpop.eup %8731  ;;  %619 = vadd.xlane.f32.xlu1 %v618_v45 }
 0x42d   :  { %v633_v33 = vsel %vm566_vm2, %v9865_v15, 0.0 }
 0x42e   :  { %v9867_v30 = vpop.eup %8733 }
 0x42f   :  { %v636_v24 = vsel %vm566_vm2, %v9867_v30, 0.0 }
 0x430   :  { %v9871_v35 = vpop.eup %8735  ;;  %634 = vadd.xlane.f32.xlu1 %v633_v33 }
 0x431   :  { %v627_v40 = vsel %vm566_vm2, %v9871_v35, 0.0 }
 0x432   :  { %628 = vadd.xlane.f32.xlu0 %v627_v40  ;;  %v9877_v34 = vpop.eup %8737 }
 0x433   :  { %v630_v43 = vsel %vm566_vm2, %v9877_v34, 0.0 }
 0x434   :  { %637 = vadd.xlane.f32.xlu1 %v636_v24 }
 0x435   :  { %v869_v55 = vpop.xlane.xlu0 %868 }
 0x436   :  { %v887_v41 = vsub.f32 %v9801_v32, %v869_v55 }
 0x437   :  { %v872_v28 = vpop.xlane.xlu1 %871 }
 0x438   :  { %v897_v44 = vmul.f32 1.442695, %v887_v41  ;;  %v888_v47 = vsub.f32 %v9805_v37, %v872_v28  ;;  %631 = vadd.xlane.f32.xlu1 %v630_v43 }
 0x439   :  { %v863_v21 = vpop.xlane.xlu0 %862 }
 0x43a   :  { %8739 = vpow2.f32 %v897_v44  ;;  %v899_v59 = vmul.f32 1.442695, %v888_v47  ;;  %v885_v51 = vsub.f32 %v9803_v36, %v863_v21 }
 0x43b   :  { %v866_v52 = vpop.xlane.xlu1 %865 }
 0x43c   :  { %8741 = vpow2.f32 %v899_v59  ;;  %v893_v29 = vmul.f32 1.442695, %v885_v51  ;;  %v886_v53 = vsub.f32 %v9809_v31, %v866_v52 }
 0x43d   :  { %v881_v38 = vpop.xlane.xlu0 %880 }
 0x43e   :  { %8743 = vpow2.f32 %v893_v29  ;;  %v895_v32 = vmul.f32 1.442695, %v886_v53  ;;  %v891_v54 = vsub.f32 %v9815_v42, %v881_v38 }
 0x43f   :  { %v9918_v62 = vpop.permute.xlu1 %955 }
 0x440   :  { %8745 = vpow2.f32 %v895_v32  ;;  %v905_v57 = vmul.f32 1.442695, %v891_v54 }
 0x441   :  { %v875_v58 = vpop.xlane.xlu0 %874 }
 0x442   :  { %v889_v37 = vsub.f32 %v9819_v46, %v875_v58  ;;  %8747 = vpow2.f32 %v905_v57 }
 0x443   :  { %v9920_v11 = vpop.permute.xlu1 %957 }
 0x444   :  { %v9887_v39 = vpop.eup %8739  ;;  %v901_v60 = vmul.f32 1.442695, %v889_v37 }
 0x445   :  { %v9889_v36 = vpop.permute.xlu0 %953  ;;  %v915_v61 = vsel %vm566_vm2, %v9887_v39, 0.0 }
 0x446   :  { %v9893_v31 = vpop.eup %8741  ;;  %916 = vadd.xlane.f32.xlu0 %v915_v61  ;;  %7888 = vmatprep.subr.bf16.mxu0 %v9889_v36  ;;  %8749 = vpow2.f32 %v901_v60 }
 0x447   :  { %v918_v46 = vsel %vm566_vm2, %v9893_v31, 0.0 }
 0x448   :  { %v9896_v42 = vpop.eup %8743 }
 0x449   :  { %v909_v10 = vsel %vm566_vm2, %v9896_v42, 0.0 }
 0x44a   :  { %v9902_v49 = vpop.eup %8745  ;;  %919 = vadd.xlane.f32.xlu0 %v918_v46  ;;  %910 = vadd.xlane.f32.xlu1 %v909_v10 }
 0x44b   :  { %v912_v63 = vsel %vm566_vm2, %v9902_v49, 0.0 }
 0x44c   :  { %v9906_v0 = vpop.eup %8747 }
 0x44d   :  { %v927_v3 = vsel %vm566_vm2, %v9906_v0, 0.0 }
 0x44e   :  { %913 = vadd.xlane.f32.xlu0 %v912_v63 }
 0x450   :  { %v9910_v56 = vpop.eup %8749 }
 0x451   :  { %v921_v4 = vsel %vm566_vm2, %v9910_v56, 0.0 }
 0x452   :  { %928 = vadd.xlane.f32.xlu0 %v927_v3 }
 0x456   :  { %922 = vadd.xlane.f32.xlu0 %v921_v4 }
 0x45b   :  { %1052 = vrot.lane.b32.xlu1 %v9569_v1, %s9386_s29 }
 0x45f   :  { %1054 = vrot.lane.b32.xlu1 %v9583_v9, %s9386_s29 }
 0x46f   :  { %v7834_v8 = vpop.f32.mrb[8].mxu0 }
 0x470   :  { %v417_v48 = vpop.f32.mrb[9].mxu0 }
 0x471   :  { %v7835_v14 = vpop.f32.mrb[10].mxu0 }
 0x472   :  { %v9922_v18 = vpack.c.bf16 %v7835_v14, %v7834_v8  ;;  %v420_v5 = vpop.f32.mrb[11].mxu0 }
 0x473   :  { %v9924_v19 = vpack.c.bf16 %v420_v5, %v417_v48 }
 0x474   :  { %v884_v23 = vpop.xlane.xlu1 %883 }
 0x475   :  { %v892_v27 = vsub.f32 %v9831_v16, %v884_v23 }
 0x477   :  { %v907_v20 = vmul.f32 1.442695, %v892_v27  ;;  %v7838_v45 = vpop.f32.mrb[12].mxu0 }
 0x478   :  { %v878_v33 = vpop.xlane.xlu1 %877  ;;  %v433_v40 = vpop.f32.mrb[13].mxu0 }
 0x479   :  { %8751 = vpow2.f32 %v907_v20  ;;  %v890_v24 = vsub.f32 %v9833_v50, %v878_v33  ;;  %v7839_v55 = vpop.f32.mrb[14].mxu0 }
 0x47a   :  { %v9928_v41 = vpack.c.bf16 %v7839_v55, %v7838_v45  ;;  %v436_v28 = vpop.f32.mrb[15].mxu0 }
 0x47b   :  { %v903_v43 = vmul.f32 1.442695, %v890_v24  ;;  %v9930_v44 = vpack.c.bf16 %v436_v28, %v433_v40 }
 0x47c   :  { %v960_v50 = vpop.permute.xlu1 %959 }
 0x47d   :  { %8753 = vpow2.f32 %v903_v43 }
 0x483   :  { %v9932_v47 = vpop.eup %8751 }
 0x484   :  { %v930_v16 = vsel %vm566_vm2, %v9932_v47, 0.0 }
 0x485   :  { %931 = vadd.xlane.f32.xlu0 %v930_v16 }
 0x487   :  { %v9936_v21 = vpop.eup %8753 }
 0x488   :  { %v924_v59 = vsel %vm566_vm2, %v9936_v21, 0.0 }
 0x489   :  { %925 = vadd.xlane.f32.xlu1 %v924_v59 }
 0x49a   :  { %1056 = vrot.lane.b32.xlu1 %v9581_v7, %s9386_s29 }
 0x49b   :  { %1050 = vrot.lane.b32.xlu0 %v9571_v2, %s9386_s29 }
 0x49e   :  { %1044 = vrot.lane.b32.xlu1 %v9569_v1, %s9387_s12 }
 0x49f   :  { %1042 = vrot.lane.b32.xlu0 %v9571_v2, %s9387_s12 }
 0x4a2   :  { %1048 = vrot.lane.b32.xlu1 %v9581_v7, %s9387_s12 }
 0x4a3   :  { %1046 = vrot.lane.b32.xlu0 %v9583_v9, %s9387_s12 }
 0x4b3   :  { %v623_v51 = vpop.xlane.xlu0 %622 }
 0x4b5   :  { %v626_v52 = vpop.xlane.xlu1 %625 }
 0x4b6   :  { %8755 = vrcp.f32 %v626_v52 }
 0x4b7   :  { %v617_v29 = vpop.xlane.xlu0 %616 }
 0x4b8   :  { %8757 = vrcp.f32 %v617_v29 }
 0x4b9   :  { %8759 = vrcp.f32 %v623_v51  ;;  %v620_v53 = vpop.xlane.xlu1 %619 }
 0x4ba   :  { %8761 = vrcp.f32 %v620_v53 }
 0x4bd   :  { %v635_v38 = vpop.xlane.xlu1 %634 }
 0x4bf   :  { %v629_v54 = vpop.xlane.xlu0 %628 }
 0x4c0   :  { %v8756_v32 = vpop.eup %8755 }
 0x4c1   :  { %v638_v57 = vpop.xlane.xlu1 %637  ;;  %v650_v61 = vmul.f32 %v8756_v32, %v9853_v22 }
 0x4c2   :  { %v8758_v58 = vpop.eup %8757  ;;  %8763 = vrcp.f32 %v638_v57 }
 0x4c3   :  { %v8760_v37 = vpop.eup %8759  ;;  %8765 = vrcp.f32 %v629_v54  ;;  %v647_v10 = vmul.f32 %v8758_v58, %v9857_v12 }
 0x4c4   :  { %v8762_v60 = vpop.eup %8761  ;;  %8767 = vrcp.f32 %v635_v38  ;;  %v649_v3 = vmul.f32 %v8760_v37, %v9848_v17 }
 0x4c5   :  { %v632_v46 = vpop.xlane.xlu1 %631  ;;  %v648_v63 = vmul.f32 %v8762_v60, %v9861_v26 }
 0x4c6   :  { %8769 = vrcp.f32 %v632_v46  ;;  %v656_v8 = vpack.c.bf16 %v650_v61, %v649_v3 }
 0x4c7   :  { %v655_v4 = vpack.c.bf16 %v648_v63, %v647_v10 }
 0x4c9   :  { %7864 = vmatprep.mubr.msk.bf16.mxu0 %vm566_vm2, %v655_v4 }
 0x4ca   :  { %7865 = vmatmul.mubr.msk.bf16.vlgmr.msra.gmra.mrb[16].mxu0 %vm566_vm2, %v656_v8 }
 0x4cb   :  { %7889 = vmatpush3.bf16.msra.mxu0 %v9889_v36 }
 0x4cc   :  { %7890 = vmatprep.subr.bf16.mxu0 %v9918_v62  ;;  %v8764_v22 = vpop.eup %8763 }
 0x4cd   :  { %v8766_v48 = vpop.eup %8765  ;;  %v654_v17 = vmul.f32 %v8764_v22, %v9867_v30 }
 0x4ce   :  { %v8768_v14 = vpop.eup %8767  ;;  %v651_v26 = vmul.f32 %v8766_v48, %v9871_v35 }
 0x4cf   :  { %7891 = vmatpush3.bf16.msra.mxu0 %v9918_v62  ;;  %v653_v23 = vmul.f32 %v8768_v14, %v9865_v15 }
 0x4d0   :  { %v8770_v12 = vpop.eup %8769  ;;  %7892 = vmatprep.subr.bf16.mxu0 %v9920_v11 }
 0x4d1   :  { %v652_v5 = vmul.f32 %v8770_v12, %v9877_v34  ;;  %v658_v20 = vpack.c.bf16 %v654_v17, %v653_v23 }
 0x4d3   :  { %7893 = vmatpush3.bf16.msra.mxu0 %v9920_v11  ;;  %v917_v36 = vpop.xlane.xlu0 %916  ;;  %v657_v27 = vpack.c.bf16 %v652_v5, %v651_v26 }
 0x4d4   :  { %7894 = vmatprep.subr.bf16.mxu0 %v960_v50 }
 0x4d5   :  { %7868 = vmatprep.mubr.msk.bf16.mxu0 %vm566_vm2, %v657_v27 }
 0x4d6   :  { %7869 = vmatmul.mubr.msk.bf16.gmra.mrb[20].mxu0 %vm566_vm2, %v658_v20 }
 0x4d7   :  { %7895 = vmatpush3.bf16.msra.mxu0 %v960_v50  ;;  %v911_v62 = vpop.xlane.xlu1 %910  ;;  %v920_v45 = vpop.xlane.xlu0 %919 }
 0x4d8   :  { %8771 = vrcp.f32 %v920_v45 }
 0x4d9   :  { %8773 = vrcp.f32 %v911_v62 }
 0x4da   :  { %8775 = vrcp.f32 %v917_v36 }
 0x4db   :  { %v914_v30 = vpop.xlane.xlu0 %913  ;;  %v1053_v59 = vpop.permute.xlu1 %1052 }
 0x4dc   :  { %8777 = vrcp.f32 %v914_v30  ;;  %v1074_v53 = vsel %vm468_vm1, %v1053_v59, 0 }
 0x4df   :  { %v929_v16 = vpop.xlane.xlu0 %928  ;;  %v1055_v51 = vpop.permute.xlu1 %1054 }
 0x4e0   :  { %v1077_v10 = vsel %vm468_vm1, %v1055_v51, 0 }
 0x4e2   :  { %v8772_v35 = vpop.eup %8771 }
 0x4e3   :  { %v8774_v15 = vpop.eup %8773  ;;  %v944_v33 = vmul.f32 %v8772_v35, %v9893_v31  ;;  %v923_v50 = vpop.xlane.xlu0 %922 }
 0x4e4   :  { %v8776_v34 = vpop.eup %8775  ;;  %v941_v40 = vmul.f32 %v8774_v15, %v9896_v42 }
 0x4e5   :  { %v943_v55 = vmul.f32 %v8776_v34, %v9887_v39 }
 0x4e6   :  { %v8778_v11 = vpop.eup %8777 }
 0x4e7   :  { %v942_v24 = vmul.f32 %v8778_v11, %v9902_v49  ;;  %v950_v43 = vpack.c.bf16 %v944_v33, %v943_v55 }
 0x4e9   :  { %v949_v28 = vpack.c.bf16 %v942_v24, %v941_v40 }
 0x4eb   :  { %7896 = vmatprep.mubr.msk.bf16.mxu0 %vm566_vm2, %v949_v28 }
 0x4ec   :  { %7897 = vmatmul.mubr.msk.bf16.vlgmr.msra.gmra.mrb[24].mxu0 %vm566_vm2, %v950_v43 }
 0x512   :  { %v932_v52 = vpop.xlane.xlu0 %931 }
 0x513   :  { %8779 = vrcp.f32 %v932_v52 }
 0x514   :  { %8781 = vrcp.f32 %v923_v50 }
 0x515   :  { %8783 = vrcp.f32 %v929_v16 }
 0x516   :  { %v926_v31 = vpop.xlane.xlu1 %925  ;;  %v1051_v42 = vpop.permute.xlu0 %1050 }
 0x517   :  { %8785 = vrcp.f32 %v926_v31  ;;  %8368 = vmatprep.subr.msk.bf16.mxu0 %vm468_vm1, %v1051_v42  ;;  %v1071_v39 = vsel %vm468_vm1, %v1051_v42, 0 }
 0x518   :  { %7905 = vmatpush3.bf16.xpose.msra.mxu0 %v1071_v39 }
 0x519   :  { %8369 = vmatprep.subr.msk.bf16.mxu0 %vm468_vm1, %v1053_v59 }
 0x51a   :  { %v1043_v46 = vpop.permute.xlu0 %1042  ;;  %v1057_v63 = vpop.permute.xlu1 %1056 }
 0x51d   :  { %v8780_v49 = vpop.eup %8779 }
 0x51e   :  { %v8782_v29 = vpop.eup %8781  ;;  %v948_v54 = vmul.f32 %v8780_v49, %v9932_v47  ;;  %v1045_v47 = vpop.permute.xlu1 %1044 }
 0x51f   :  { %v8784_v38 = vpop.eup %8783  ;;  %v945_v57 = vmul.f32 %v8782_v29, %v9910_v56  ;;  %v1080_v56 = vsel %vm468_vm1, %v1057_v63, 0 }
 0x520   :  { %7907 = vmatpush3.bf16.xpose.msra.mxu0 %v1074_v53  ;;  %v947_v37 = vmul.f32 %v8784_v38, %v9906_v0  ;;  %v1047_v0 = vpop.permute.xlu0 %1046 }
 0x521   :  { %v8786_v32 = vpop.eup %8785  ;;  %8370 = vmatprep.subr.msk.bf16.mxu0 %vm468_vm1, %v1055_v51 }
 0x522   :  { %v946_v58 = vmul.f32 %v8786_v32, %v9936_v21  ;;  %v952_v61 = vpack.c.bf16 %v948_v54, %v947_v37  ;;  %v1049_v21 = vpop.permute.xlu1 %1048 }
 0x524   :  { %v951_v60 = vpack.c.bf16 %v946_v58, %v945_v57 }
 0x526   :  { %7900 = vmatprep.mubr.msk.bf16.mxu0 %vm566_vm2, %v951_v60 }
 0x527   :  { %7901 = vmatmul.mubr.msk.bf16.gmra.mrb[28].mxu0 %vm566_vm2, %v952_v61 }
 0x528   :  { %7909 = vmatpush3.bf16.xpose.msra.mxu0 %v1077_v10  ;;  %7912 = vmatprep.mubr.msk.bf16.mxu0 %vm468_vm1, %v1043_v46 }
 0x529   :  { %8371 = vmatprep.subr.msk.bf16.mxu0 %vm468_vm1, %v1057_v63 }
 0x530   :  { %7911 = vmatpush3.bf16.xpose.msra.mxu0 %v1080_v56 }
 0x537   :  { %7913 = vmatmul.mubr.msk.bf16.vlgmr.msra.gmra.mrb[32].mxu0 %vm468_vm1, %v1045_v47 }
 0x538   :  { %7916 = vmatprep.mubr.msk.bf16.mxu0 %vm468_vm1, %v1047_v0 }
 0x53f   :  { %7917 = vmatmul.mubr.msk.bf16.gmra.mrb[36].mxu0 %vm468_vm1, %v1049_v21 }
 0x59d   :  { %v9993_v3 = vpop.f32.mrb[16].mxu0 }
 0x59e   :  { %12948 = vst [vmem:[#allocation3_spill] sm:$0xff] %v9993_v3  ;;  %v9995_v4 = vpop.f32.mrb[17].mxu0 }
 0x59f   :  { %12949 = vst [vmem:[#allocation4_spill] sm:$0xff] %v9995_v4  ;;  %v9997_v8 = vpop.f32.mrb[18].mxu0 }
 0x5a0   :  { %12950 = vst [vmem:[#allocation5_spill] sm:$0xff] %v9997_v8  ;;  %v9999_v22 = vpop.f32.mrb[19].mxu0 }
 0x5a1   :  { %12951 = vst [vmem:[#allocation6_spill] sm:$0xff] %v9999_v22 }
 0x5a9   :  { %v10001_v48 = vpop.f32.mrb[20].mxu0 }
 0x5aa   :  { %12952 = vst [vmem:[#allocation7_spill] sm:$0xff] %v10001_v48  ;;  %v10003_v14 = vpop.f32.mrb[21].mxu0 }
 0x5ab   :  { %12953 = vst [vmem:[#allocation8_spill] sm:$0xff] %v10003_v14  ;;  %v10005_v12 = vpop.f32.mrb[22].mxu0 }
 0x5ac   :  { %12954 = vst [vmem:[#allocation9_spill] sm:$0xff] %v10005_v12  ;;  %v10007_v17 = vpop.f32.mrb[23].mxu0 }
 0x5ad   :  { %12955 = vst [vmem:[#allocation10_spill] sm:$0xff] %v10007_v17 }
 0x5bf   :  { %v10009_v26 = vpop.f32.mrb[24].mxu0 }
 0x5c0   :  { %v10011_v5 = vpop.f32.mrb[25].mxu0 }
 0x5c1   :  { %v10013_v23 = vpop.f32.mrb[26].mxu0 }
 0x5c2   :  { %v10017_v27 = vpop.f32.mrb[27].mxu0 }
 0x5fa   :  { %v10021_v62 = vpop.f32.mrb[28].mxu0 }
 0x5fb   :  { %v10023_v45 = vpop.f32.mrb[29].mxu0 }
 0x5fc   :  { %v10025_v30 = vpop.f32.mrb[30].mxu0 }
 0x5fd   :  { %v10029_v15 = vpop.f32.mrb[31].mxu0 }
 0x60a   :  { %v7914_v11 = vpop.f32.mrb[32].mxu0 }
 0x60b   :  { %v1149_v33 = vmul.f32 0.35355338, %v7914_v11  ;;  %v1116_v40 = vpop.f32.mrb[33].mxu0 }
 0x60c   :  { %v7915_v24 = vpop.f32.mrb[34].mxu0  ;;  %v1147_v55 = vmul.f32 0.35355338, %v1116_v40 }
 0x60d   :  { %v1119_v28 = vpop.f32.mrb[35].mxu0  ;;  %v1161_v43 = vsel %vm566_vm2, %v1149_v33, -inf  ;;  %v1150_v50 = vmul.f32 0.35355338, %v7915_v24 }
 0x60e   :  { %v1148_v16 = vmul.f32 0.35355338, %v1119_v28  ;;  %1162 = vmax.xlane.f32.xlu0 %v1161_v43  ;;  %v1155_v51 = vsel %vm566_vm2, %v1147_v55, -inf }
 0x60f   :  { %v1164_v29 = vsel %vm566_vm2, %v1150_v50, -inf }
 0x610   :  { %v1158_v59 = vsel %vm566_vm2, %v1148_v16, -inf }
 0x611   :  { %1159 = vmax.xlane.f32.xlu1 %v1158_v59 }
 0x612   :  { %1156 = vmax.xlane.f32.xlu0 %v1155_v51  ;;  %v7918_v52 = vpop.f32.mrb[36].mxu0 }
 0x613   :  { %v1132_v31 = vpop.f32.mrb[37].mxu0  ;;  %v1153_v39 = vmul.f32 0.35355338, %v7918_v52 }
 0x614   :  { %v7919_v42 = vpop.f32.mrb[38].mxu0  ;;  %v1151_v53 = vmul.f32 0.35355338, %v1132_v31 }
 0x615   :  { %v1135_v49 = vpop.f32.mrb[39].mxu0  ;;  %v1173_v38 = vsel %vm566_vm2, %v1153_v39, -inf  ;;  %v10045_v54 = vmul.f32 0.35355338, %v7919_v42 }
 0x616   :  { %1165 = vmax.xlane.f32.xlu0 %v1164_v29  ;;  %v1167_v32 = vsel %vm566_vm2, %v1151_v53, -inf  ;;  %v10047_v57 = vmul.f32 0.35355338, %v1135_v49 }
 0x617   :  { %v1176_v58 = vsel %vm566_vm2, %v10045_v54, -inf }
 0x618   :  { %v1170_v37 = vsel %vm566_vm2, %v10047_v57, -inf }
 0x61a   :  { %1174 = vmax.xlane.f32.xlu0 %v1173_v38 }
 0x61e   :  { %1168 = vmax.xlane.f32.xlu0 %v1167_v32 }
 0x622   :  { %1249 = vrot.lane.b32.xlu1 %v9569_v1, %s9388_s13 }
 0x626   :  { %1251 = vrot.lane.b32.xlu1 %v9583_v9, %s9388_s13 }
 0x634   :  { %1247 = vrot.lane.b32.xlu0 %v9571_v2, %s9388_s13 }
 0x64a   :  { %1177 = vmax.xlane.f32.xlu1 %v1176_v58 }
 0x64e   :  { %1171 = vmax.xlane.f32.xlu1 %v1170_v37 }
 0x65f   :  { %1253 = vrot.lane.b32.xlu1 %v9581_v7, %s9388_s13 }
 0x69b   :  { %v1163_v60 = vpop.xlane.xlu0 %1162 }
 0x69c   :  { %v1181_v61 = vsub.f32 %v1149_v33, %v1163_v60 }
 0x69e   :  { %v1191_v46 = vmul.f32 1.442695, %v1181_v61  ;;  %v1160_v10 = vpop.xlane.xlu1 %1159 }
 0x69f   :  { %v1157_v63 = vpop.xlane.xlu0 %1156  ;;  %v1180_v47 = vsub.f32 %v1148_v16, %v1160_v10 }
 0x6a0   :  { %8787 = vpow2.f32 %v1191_v46  ;;  %v1179_v56 = vsub.f32 %v1147_v55, %v1157_v63 }
 0x6a1   :  { %v1189_v40 = vmul.f32 1.442695, %v1180_v47 }
 0x6a2   :  { %v1187_v0 = vmul.f32 1.442695, %v1179_v56 }
 0x6a3   :  { %v1166_v21 = vpop.xlane.xlu0 %1165 }
 0x6a4   :  { %8789 = vpow2.f32 %v1187_v0  ;;  %v1182_v11 = vsub.f32 %v1150_v50, %v1166_v21  ;;  %v1250_v50 = vpop.permute.xlu1 %1249 }
 0x6a6   :  { %v1193_v24 = vmul.f32 1.442695, %v1182_v11 }
 0x6a7   :  { %v1175_v28 = vpop.xlane.xlu0 %1174 }
 0x6a8   :  { %8791 = vpow2.f32 %v1193_v24  ;;  %v1185_v43 = vsub.f32 %v1153_v39, %v1175_v28 }
 0x6a9   :  { %8793 = vpow2.f32 %v1189_v40 }
 0x6aa   :  { %v10055_v59 = vpop.eup %8787  ;;  %v1199_v51 = vmul.f32 1.442695, %v1185_v43 }
 0x6ab   :  { %v1169_v33 = vpop.xlane.xlu0 %1168  ;;  %v1209_v52 = vsel %vm566_vm2, %v10055_v59, 0.0 }
 0x6ac   :  { %8795 = vpow2.f32 %v1199_v51  ;;  %v1183_v55 = vsub.f32 %v1151_v53, %v1169_v33  ;;  %1210 = vadd.xlane.f32.xlu0 %v1209_v52  ;;  %v1252_v53 = vpop.permute.xlu1 %1251 }
 0x6ae   :  { %v10059_v16 = vpop.eup %8789  ;;  %v1195_v31 = vmul.f32 1.442695, %v1183_v55 }
 0x6af   :  { %v1248_v42 = vpop.permute.xlu0 %1247  ;;  %v1203_v49 = vsel %vm566_vm2, %v10059_v16, 0.0 }
 0x6b0   :  { %8797 = vpow2.f32 %v1195_v31  ;;  %1204 = vadd.xlane.f32.xlu0 %v1203_v49  ;;  %7920 = vmatprep.subr.bf16.mxu1 %v1248_v42 }
 0x6b1   :  { %7921 = vmatpush3.bf16.msra.mxu1 %v1248_v42 }
 0x6b2   :  { %v8792_v39 = vpop.eup %8791  ;;  %7922 = vmatprep.subr.bf16.mxu1 %v1250_v50 }
 0x6b3   :  { %v1212_v29 = vsel %vm566_vm2, %v8792_v39, 0.0  ;;  %v8794_v38 = vpop.eup %8793 }
 0x6b4   :  { %1213 = vadd.xlane.f32.xlu1 %v1212_v29  ;;  %v1206_v58 = vsel %vm566_vm2, %v8794_v38, 0.0 }
 0x6b5   :  { %7923 = vmatpush3.bf16.msra.mxu1 %v1250_v50 }
 0x6b6   :  { %v10064_v32 = vpop.eup %8795  ;;  %7924 = vmatprep.subr.bf16.mxu1 %v1252_v53 }
 0x6b7   :  { %v1221_v37 = vsel %vm566_vm2, %v10064_v32, 0.0 }
 0x6b8   :  { %1207 = vadd.xlane.f32.xlu1 %v1206_v58  ;;  %1222 = vadd.xlane.f32.xlu0 %v1221_v37 }
 0x6b9   :  { %7925 = vmatpush3.bf16.msra.mxu1 %v1252_v53 }
 0x6ba   :  { %v10069_v60 = vpop.eup %8797 }
 0x6bb   :  { %v1215_v61 = vsel %vm566_vm2, %v10069_v60, 0.0 }
 0x6bc   :  { %1216 = vadd.xlane.f32.xlu0 %v1215_v61 }
 0x6c9   :  { %1346 = vrot.lane.b32.xlu1 %v9569_v1, %s9389_s14 }
 0x6cd   :  { %1348 = vrot.lane.b32.xlu1 %v9583_v9, %s9389_s14 }
 0x6d7   :  { %v1178_v46 = vpop.xlane.xlu1 %1177 }
 0x6d8   :  { %v1186_v10 = vsub.f32 %v10045_v54, %v1178_v46 }
 0x6da   :  { %v1201_v63 = vmul.f32 1.442695, %v1186_v10 }
 0x6db   :  { %v1172_v56 = vpop.xlane.xlu1 %1171 }
 0x6dc   :  { %8799 = vpow2.f32 %v1201_v63  ;;  %v1184_v47 = vsub.f32 %v10047_v57, %v1172_v56 }
 0x6de   :  { %v1197_v0 = vmul.f32 1.442695, %v1184_v47 }
 0x6df   :  { %v1254_v21 = vpop.permute.xlu1 %1253 }
 0x6e0   :  { %7926 = vmatprep.subr.bf16.mxu1 %v1254_v21  ;;  %8801 = vpow2.f32 %v1197_v0 }
 0x6e1   :  { %7927 = vmatpush3.bf16.msra.mxu1 %v1254_v21 }
 0x6e6   :  { %v8800_v11 = vpop.eup %8799 }
 0x6e7   :  { %v1224_v40 = vsel %vm566_vm2, %v8800_v11, 0.0 }
 0x6e8   :  { %1225 = vadd.xlane.f32.xlu0 %v1224_v40 }
 0x6ea   :  { %v8802_v24 = vpop.eup %8801 }
 0x6eb   :  { %v1218_v28 = vsel %vm566_vm2, %v8802_v24, 0.0 }
 0x6f1   :  { %1219 = vadd.xlane.f32.xlu1 %v1218_v28 }
 0x6fe   :  { %1344 = vrot.lane.b32.xlu0 %v9571_v2, %s9389_s14 }
 0x702   :  { %1350 = vrot.lane.b32.xlu1 %v9581_v7, %s9389_s14  ;;  %1336 = vrot.lane.b32.xlu0 %v9571_v2, %s9390_s15 }
 0x706   :  { %1338 = vrot.lane.b32.xlu1 %v9569_v1, %s9390_s15  ;;  %1340 = vrot.lane.b32.xlu0 %v9583_v9, %s9390_s15 }
 0x70a   :  { %1342 = vrot.lane.b32.xlu1 %v9581_v7, %s9390_s15 }
 0x739   :  { %v1211_v54 = vpop.xlane.xlu0 %1210 }
 0x73d   :  { %v1205_v57 = vpop.xlane.xlu0 %1204 }
 0x741   :  { %v1214_v43 = vpop.xlane.xlu1 %1213 }
 0x742   :  { %8803 = vrcp.f32 %v1214_v43 }
 0x743   :  { %8805 = vrcp.f32 %v1205_v57 }
 0x744   :  { %8807 = vrcp.f32 %v1211_v54 }
 0x745   :  { %v1208_v51 = vpop.xlane.xlu1 %1207  ;;  %v1223_v37 = vpop.xlane.xlu0 %1222 }
 0x746   :  { %8809 = vrcp.f32 %v1208_v51 }
 0x749   :  { %v1217_v61 = vpop.xlane.xlu0 %1216  ;;  %v1347_v46 = vpop.permute.xlu1 %1346 }
 0x74c   :  { %v8804_v33 = vpop.eup %8803 }
 0x74d   :  { %v8806_v52 = vpop.eup %8805  ;;  %v1238_v50 = vmul.f32 %v8804_v33, %v8792_v39  ;;  %v1349_v56 = vpop.permute.xlu1 %1348 }
 0x74e   :  { %v8808_v55 = vpop.eup %8807  ;;  %v1235_v42 = vmul.f32 %v8806_v52, %v10059_v16  ;;  %v1368_v16 = vsel %vm468_vm1, %v1347_v46, 0  ;;  %v1371_v28 = vsel %vm468_vm1, %v1349_v56, 0 }
 0x74f   :  { %v1237_v29 = vmul.f32 %v8808_v55, %v10055_v59 }
 0x750   :  { %v8810_v31 = vpop.eup %8809 }
 0x751   :  { %v1236_v49 = vmul.f32 %v8810_v31, %v8794_v38  ;;  %v1244_v58 = vpack.c.bf16 %v1238_v50, %v1237_v29 }
 0x753   :  { %v1243_v53 = vpack.c.bf16 %v1236_v49, %v1235_v42 }
 0x755   :  { %7928 = vmatprep.mubr.msk.bf16.mxu1 %vm566_vm2, %v1243_v53 }
 0x756   :  { %7929 = vmatmul.mubr.msk.bf16.vlgmr.msra.gmra.mrb[16].mxu1 %vm566_vm2, %v1244_v58 }
 0x775   :  { %v1226_v10 = vpop.xlane.xlu0 %1225 }
 0x776   :  { %8811 = vrcp.f32 %v1226_v10 }
 0x777   :  { %8813 = vrcp.f32 %v1217_v61 }
 0x778   :  { %8815 = vrcp.f32 %v1223_v37 }
 0x779   :  { %v1345_v63 = vpop.permute.xlu0 %1344 }
 0x77a   :  { %8372 = vmatprep.subr.msk.bf16.mxu1 %vm468_vm1, %v1345_v63  ;;  %v1365_v39 = vsel %vm468_vm1, %v1345_v63, 0 }
 0x77b   :  { %7937 = vmatpush3.bf16.xpose.msra.mxu1 %v1365_v39 }
 0x77c   :  { %8373 = vmatprep.subr.msk.bf16.mxu1 %vm468_vm1, %v1347_v46 }
 0x77d   :  { %v1337_v55 = vpop.permute.xlu0 %1336 }
 0x77e   :  { %v1220_v59 = vpop.xlane.xlu1 %1219 }
 0x77f   :  { %8817 = vrcp.f32 %v1220_v59 }
 0x780   :  { %v8812_v38 = vpop.eup %8811 }
 0x781   :  { %v8814_v47 = vpop.eup %8813  ;;  %v1242_v40 = vmul.f32 %v8812_v38, %v8800_v11 }
 0x782   :  { %v8816_v0 = vpop.eup %8815  ;;  %v1239_v54 = vmul.f32 %v8814_v47, %v10069_v60  ;;  %v1351_v43 = vpop.permute.xlu1 %1350 }
 0x783   :  { %7939 = vmatpush3.bf16.xpose.msra.mxu1 %v1368_v16  ;;  %v1241_v51 = vmul.f32 %v8816_v0, %v10064_v32  ;;  %v1374_v11 = vsel %vm468_vm1, %v1351_v43, 0 }
 0x784   :  { %8374 = vmatprep.subr.msk.bf16.mxu1 %vm468_vm1, %v1349_v56 }
 0x785   :  { %v1246_v52 = vpack.c.bf16 %v1242_v40, %v1241_v51 }
 0x786   :  { %v1339_v60 = vpop.permute.xlu1 %1338 }
 0x789   :  { %v8818_v21 = vpop.eup %8817 }
 0x78a   :  { %v1240_v57 = vmul.f32 %v8818_v21, %v8802_v24  ;;  %v1341_v24 = vpop.permute.xlu0 %1340  ;;  %v1343_v32 = vpop.permute.xlu1 %1342 }
 0x78b   :  { %7941 = vmatpush3.bf16.xpose.msra.mxu1 %v1371_v28 }
 0x78c   :  { %8375 = vmatprep.subr.msk.bf16.mxu1 %vm468_vm1, %v1351_v43  ;;  %v1245_v33 = vpack.c.bf16 %v1240_v57, %v1239_v54 }
 0x78e   :  { %7932 = vmatprep.mubr.msk.bf16.mxu1 %vm566_vm2, %v1245_v33 }
 0x78f   :  { %7933 = vmatmul.mubr.msk.bf16.gmra.mrb[20].mxu1 %vm566_vm2, %v1246_v52 }
 0x790   :  { %7944 = vmatprep.mubr.msk.bf16.mxu1 %vm468_vm1, %v1337_v55 }
 0x793   :  { %7943 = vmatpush3.bf16.xpose.msra.mxu1 %v1374_v11 }
 0x79a   :  { %7945 = vmatmul.mubr.msk.bf16.vlgmr.msra.gmra.mrb[24].mxu1 %vm468_vm1, %v1339_v60 }
 0x79b   :  { %7948 = vmatprep.mubr.msk.bf16.mxu1 %vm468_vm1, %v1341_v24 }
 0x7a2   :  { %7949 = vmatmul.mubr.msk.bf16.gmra.mrb[28].mxu1 %vm468_vm1, %v1343_v32 }
 0x829   :  { %v10113_v31 = vpop.f32.mrb[16].mxu1 }
 0x82a   :  { %v10115_v50 = vpop.f32.mrb[17].mxu1 }
 0x82b   :  { %v10117_v42 = vpop.f32.mrb[18].mxu1 }
 0x82c   :  { %v10121_v29 = vpop.f32.mrb[19].mxu1 }
 0x862   :  { %v10125_v58 = vpop.f32.mrb[20].mxu1 }
 0x863   :  { %v10127_v37 = vpop.f32.mrb[21].mxu1 }
 0x864   :  { %v10129_v61 = vpop.f32.mrb[22].mxu1 }
 0x865   :  { %v10133_v10 = vpop.f32.mrb[23].mxu1 }
 0x86d   :  { %v7946_v56 = vpop.f32.mrb[24].mxu1 }
 0x86e   :  { %v1443_v39 = vmul.f32 0.35355338, %v7946_v56  ;;  %v1410_v59 = vpop.f32.mrb[25].mxu1 }
 0x86f   :  { %v7947_v16 = vpop.f32.mrb[26].mxu1  ;;  %v1441_v38 = vmul.f32 0.35355338, %v1410_v59 }
 0x870   :  { %v1413_v47 = vpop.f32.mrb[27].mxu1  ;;  %v1455_v0 = vsel %vm566_vm2, %v1443_v39, -inf  ;;  %v1444_v28 = vmul.f32 0.35355338, %v7947_v16 }
 0x871   :  { %v1442_v21 = vmul.f32 0.35355338, %v1413_v47  ;;  %1456 = vmax.xlane.f32.xlu0 %v1455_v0  ;;  %v1449_v54 = vsel %vm566_vm2, %v1441_v38, -inf }
 0x872   :  { %v1458_v55 = vsel %vm566_vm2, %v1444_v28, -inf }
 0x873   :  { %v1452_v40 = vsel %vm566_vm2, %v1442_v21, -inf }
 0x874   :  { %1453 = vmax.xlane.f32.xlu1 %v1452_v40 }
 0x875   :  { %1450 = vmax.xlane.f32.xlu0 %v1449_v54  ;;  %v7950_v57 = vpop.f32.mrb[28].mxu1 }
 0x876   :  { %v1426_v43 = vpop.f32.mrb[29].mxu1  ;;  %v1447_v33 = vmul.f32 0.35355338, %v7950_v57 }
 0x877   :  { %v7951_v51 = vpop.f32.mrb[30].mxu1  ;;  %v1445_v11 = vmul.f32 0.35355338, %v1426_v43 }
 0x878   :  { %v1429_v52 = vpop.f32.mrb[31].mxu1  ;;  %v1467_v60 = vsel %vm566_vm2, %v1447_v33, -inf  ;;  %v1448_v32 = vmul.f32 0.35355338, %v7951_v51 }
 0x879   :  { %1459 = vmax.xlane.f32.xlu0 %v1458_v55  ;;  %v1461_v24 = vsel %vm566_vm2, %v1445_v11, -inf  ;;  %v10149_v56 = vmul.f32 0.35355338, %v1429_v52 }
 0x87a   :  { %v1470_v59 = vsel %vm566_vm2, %v1448_v32, -inf }
 0x87b   :  { %v1464_v16 = vsel %vm566_vm2, %v10149_v56, -inf }
 0x87d   :  { %1468 = vmax.xlane.f32.xlu0 %v1467_v60 }
 0x881   :  { %1462 = vmax.xlane.f32.xlu0 %v1461_v24 }
 0x885   :  { %1543 = vrot.lane.b32.xlu1 %v9569_v1, %s9391_s16 }
 0x889   :  { %1545 = vrot.lane.b32.xlu1 %v9583_v9, %s9391_s16 }
 0x897   :  { %1541 = vrot.lane.b32.xlu0 %v9571_v2, %s9391_s16 }
 0x8ad   :  { %1471 = vmax.xlane.f32.xlu1 %v1470_v59 }
 0x8b1   :  { %1465 = vmax.xlane.f32.xlu1 %v1464_v16 }
 0x8c2   :  { %1547 = vrot.lane.b32.xlu1 %v9581_v7, %s9391_s16 }
 0x8fe   :  { %v1457_v1 = vpop.xlane.xlu0 %1456 }
 0x8ff   :  { %v1475_v47 = vsub.f32 %v1443_v39, %v1457_v1 }
 0x901   :  { %v1485_v0 = vmul.f32 1.442695, %v1475_v47  ;;  %v1454_v9 = vpop.xlane.xlu1 %1453 }
 0x902   :  { %v1451_v40 = vpop.xlane.xlu0 %1450  ;;  %v1474_v54 = vsub.f32 %v1442_v21, %v1454_v9 }
 0x903   :  { %8819 = vpow2.f32 %v1485_v0  ;;  %v1473_v2 = vsub.f32 %v1441_v38, %v1451_v40 }
 0x904   :  { %v1483_v52 = vmul.f32 1.442695, %v1474_v54 }
 0x905   :  { %v1481_v57 = vmul.f32 1.442695, %v1473_v2  ;;  %v1544_v47 = vpop.permute.xlu1 %1543 }
 0x906   :  { %v1460_v43 = vpop.xlane.xlu0 %1459 }
 0x907   :  { %8821 = vpow2.f32 %v1481_v57  ;;  %v1476_v51 = vsub.f32 %v1444_v28, %v1460_v43 }
 0x909   :  { %v1487_v55 = vmul.f32 1.442695, %v1476_v51  ;;  %v1546_v2 = vpop.permute.xlu1 %1545 }
 0x90a   :  { %v1469_v60 = vpop.xlane.xlu0 %1468 }
 0x90b   :  { %8823 = vpow2.f32 %v1487_v55  ;;  %v1479_v24 = vsub.f32 %v1447_v33, %v1469_v60 }
 0x90c   :  { %8825 = vpow2.f32 %v1483_v52 }
 0x90d   :  { %v10156_v59 = vpop.eup %8819  ;;  %v1493_v7 = vmul.f32 1.442695, %v1479_v24 }
 0x90e   :  { %v1463_v39 = vpop.xlane.xlu0 %1462  ;;  %v1503_v16 = vsel %vm566_vm2, %v10156_v59, 0.0 }
 0x90f   :  { %8827 = vpow2.f32 %v1493_v7  ;;  %v1477_v38 = vsub.f32 %v1445_v11, %v1463_v39  ;;  %1504 = vadd.xlane.f32.xlu0 %v1503_v16 }
 0x911   :  { %v8822_v21 = vpop.eup %8821  ;;  %v1489_v1 = vmul.f32 1.442695, %v1477_v38 }
 0x912   :  { %v1542_v28 = vpop.permute.xlu0 %1541  ;;  %v1497_v0 = vsel %vm566_vm2, %v8822_v21, 0.0 }
 0x913   :  { %8829 = vpow2.f32 %v1489_v1  ;;  %1498 = vadd.xlane.f32.xlu0 %v1497_v0  ;;  %7952 = vmatprep.subr.bf16.mxu0 %v1542_v28 }
 0x914   :  { %7953 = vmatpush3.bf16.msra.mxu0 %v1542_v28 }
 0x915   :  { %v8824_v33 = vpop.eup %8823  ;;  %7954 = vmatprep.subr.bf16.mxu0 %v1544_v47 }
 0x916   :  { %v1506_v9 = vsel %vm566_vm2, %v8824_v33, 0.0  ;;  %v8826_v40 = vpop.eup %8825 }
 0x917   :  { %1507 = vadd.xlane.f32.xlu1 %v1506_v9  ;;  %v1500_v54 = vsel %vm566_vm2, %v8826_v40, 0.0 }
 0x918   :  { %7955 = vmatpush3.bf16.msra.mxu0 %v1544_v47 }
 0x919   :  { %v10162_v11 = vpop.eup %8827  ;;  %7956 = vmatprep.subr.bf16.mxu0 %v1546_v2 }
 0x91a   :  { %v1515_v57 = vsel %vm566_vm2, %v10162_v11, 0.0 }
 0x91b   :  { %1501 = vadd.xlane.f32.xlu1 %v1500_v54  ;;  %1516 = vadd.xlane.f32.xlu0 %v1515_v57 }
 0x91c   :  { %7957 = vmatpush3.bf16.msra.mxu0 %v1546_v2 }
 0x91d   :  { %v10167_v43 = vpop.eup %8829 }
 0x91e   :  { %v1509_v51 = vsel %vm566_vm2, %v10167_v43, 0.0 }
 0x91f   :  { %1510 = vadd.xlane.f32.xlu0 %v1509_v51 }
 0x92c   :  { %1762 = vrot.lane.b32.xlu1 %v9922_v18, %s9381_s30 }
 0x930   :  { %1764 = vrot.lane.b32.xlu1 %v9930_v44, %s9381_s30 }
 0x93a   :  { %v1472_v52 = vpop.xlane.xlu1 %1471 }
 0x93b   :  { %v1480_v55 = vsub.f32 %v1448_v32, %v1472_v52 }
 0x93d   :  { %v1495_v60 = vmul.f32 1.442695, %v1480_v55 }
 0x93e   :  { %v1466_v24 = vpop.xlane.xlu1 %1465 }
 0x93f   :  { %8831 = vpow2.f32 %v1495_v60  ;;  %v1478_v7 = vsub.f32 %v10149_v56, %v1466_v24 }
 0x941   :  { %v1491_v39 = vmul.f32 1.442695, %v1478_v7 }
 0x942   :  { %v1548_v16 = vpop.permute.xlu1 %1547 }
 0x943   :  { %7958 = vmatprep.subr.bf16.mxu0 %v1548_v16  ;;  %8833 = vpow2.f32 %v1491_v39 }
 0x944   :  { %7959 = vmatpush3.bf16.msra.mxu0 %v1548_v16 }
 0x949   :  { %v8832_v38 = vpop.eup %8831 }
 0x94a   :  { %v1518_v1 = vsel %vm566_vm2, %v8832_v38, 0.0 }
 0x94b   :  { %1519 = vadd.xlane.f32.xlu0 %v1518_v1 }
 0x94d   :  { %v8834_v47 = vpop.eup %8833 }
 0x94e   :  { %v1512_v28 = vsel %vm566_vm2, %v8834_v47, 0.0 }
 0x954   :  { %1513 = vadd.xlane.f32.xlu1 %v1512_v28 }
 0x961   :  { %1760 = vrot.lane.b32.xlu0 %v9924_v19, %s9381_s30 }
 0x965   :  { %1766 = vrot.lane.b32.xlu1 %v9928_v41, %s9381_s30 }
 0x99c   :  { %v1505_v32 = vpop.xlane.xlu0 %1504 }
 0x9a0   :  { %v1499_v56 = vpop.xlane.xlu0 %1498 }
 0x9a4   :  { %v1508_v0 = vpop.xlane.xlu1 %1507 }
 0x9a5   :  { %8835 = vrcp.f32 %v1508_v0 }
 0x9a6   :  { %8837 = vrcp.f32 %v1499_v56 }
 0x9a7   :  { %8839 = vrcp.f32 %v1505_v32 }
 0x9a8   :  { %v1502_v9 = vpop.xlane.xlu1 %1501  ;;  %v1517_v16 = vpop.xlane.xlu0 %1516 }
 0x9a9   :  { %8841 = vrcp.f32 %v1502_v9 }
 0x9ac   :  { %v1511_v1 = vpop.xlane.xlu0 %1510  ;;  %v1763_v28 = vpop.permute.xlu1 %1762 }
 0x9af   :  { %v8836_v2 = vpop.eup %8835 }
 0x9b0   :  { %v8838_v54 = vpop.eup %8837  ;;  %v1532_v52 = vmul.f32 %v8836_v2, %v8824_v33  ;;  %v1765_v0 = vpop.permute.xlu1 %1764 }
 0x9b1   :  { %v8840_v57 = vpop.eup %8839  ;;  %v1529_v55 = vmul.f32 %v8838_v54, %v8822_v21  ;;  %v1784_v21 = vsel %vm468_vm1, %v1763_v28, 0 }
 0x9b2   :  { %v1531_v24 = vmul.f32 %v8840_v57, %v10156_v59 }
 0x9b3   :  { %v8842_v51 = vpop.eup %8841 }
 0x9b4   :  { %v1530_v60 = vmul.f32 %v8842_v51, %v8826_v40  ;;  %v1538_v39 = vpack.c.bf16 %v1532_v52, %v1531_v24  ;;  %v1787_v51 = vsel %vm468_vm1, %v1765_v0, 0 }
 0x9b6   :  { %v1537_v7 = vpack.c.bf16 %v1530_v60, %v1529_v55 }
 0x9b8   :  { %7960 = vmatprep.mubr.msk.bf16.mxu0 %vm566_vm2, %v1537_v7 }
 0x9b9   :  { %7961 = vmatmul.mubr.msk.bf16.vlgmr.msra.gmra.mrb[40].mxu0 %vm566_vm2, %v1538_v39 }
 0x9d8   :  { %v1520_v32 = vpop.xlane.xlu0 %1519 }
 0x9d9   :  { %8843 = vrcp.f32 %v1520_v32 }
 0x9da   :  { %8845 = vrcp.f32 %v1511_v1 }
 0x9db   :  { %8847 = vrcp.f32 %v1517_v16 }
 0x9dc   :  { %v1761_v56 = vpop.permute.xlu0 %1760 }
 0x9dd   :  { %8376 = vmatprep.subr.msk.bf16.mxu0 %vm468_vm1, %v1761_v56  ;;  %v1781_v33 = vsel %vm468_vm1, %v1761_v56, 0 }
 0x9de   :  { %7969 = vmatpush3.bf16.xpose.msra.mxu0 %v1781_v33 }
 0x9df   :  { %8377 = vmatprep.subr.msk.bf16.mxu0 %vm468_vm1, %v1763_v28 }
 0x9e1   :  { %v1514_v59 = vpop.xlane.xlu1 %1513 }
 0x9e2   :  { %8849 = vrcp.f32 %v1514_v59 }
 0x9e3   :  { %v8844_v40 = vpop.eup %8843 }
 0x9e4   :  { %v8846_v9 = vpop.eup %8845  ;;  %v1536_v57 = vmul.f32 %v8844_v40, %v8832_v38 }
 0x9e5   :  { %v8848_v2 = vpop.eup %8847  ;;  %v1533_v52 = vmul.f32 %v8846_v9, %v10167_v43  ;;  %v1767_v60 = vpop.permute.xlu1 %1766 }
 0x9e6   :  { %7971 = vmatpush3.bf16.xpose.msra.mxu0 %v1784_v21  ;;  %v1535_v24 = vmul.f32 %v8848_v2, %v10162_v11  ;;  %v1790_v38 = vsel %vm468_vm1, %v1767_v60, 0 }
 0x9e7   :  { %8378 = vmatprep.subr.msk.bf16.mxu0 %vm468_vm1, %v1765_v0 }
 0x9e8   :  { %v1540_v39 = vpack.c.bf16 %v1536_v57, %v1535_v24 }
 0x9ec   :  { %v8850_v54 = vpop.eup %8849 }
 0x9ed   :  { %v1534_v55 = vmul.f32 %v8850_v54, %v8834_v47 }
 0x9ee   :  { %7973 = vmatpush3.bf16.xpose.msra.mxu0 %v1787_v51 }
 0x9ef   :  { %8379 = vmatprep.subr.msk.bf16.mxu0 %vm468_vm1, %v1767_v60  ;;  %v1539_v7 = vpack.c.bf16 %v1534_v55, %v1533_v52 }
 0x9f1   :  { %7964 = vmatprep.mubr.msk.bf16.mxu0 %vm566_vm2, %v1539_v7 }
 0x9f2   :  { %7965 = vmatmul.mubr.msk.bf16.gmra.mrb[44].mxu0 %vm566_vm2, %v1540_v39 }
 0x9f3   :  { %7976 = vmatprep.mubr.msk.bf16.mxu0 %vm468_vm1, %v9924_v19 }
 0x9f6   :  { %7975 = vmatpush3.bf16.xpose.msra.mxu0 %v1790_v38 }
 0x9fd   :  { %7977 = vmatmul.mubr.msk.bf16.vlgmr.msra.gmra.mrb[48].mxu0 %vm468_vm1, %v9922_v18 }
 0x9fe   :  { %7980 = vmatprep.mubr.msk.bf16.mxu0 %vm468_vm1, %v9930_v44 }
 0xa05   :  { %7981 = vmatmul.mubr.msk.bf16.gmra.mrb[52].mxu0 %vm468_vm1, %v9928_v41 }
 0xa8c   :  { %v10205_v11 = vpop.f32.mrb[40].mxu0 }
 0xa8d   :  { %v10207_v43 = vpop.f32.mrb[41].mxu0 }
 0xa8e   :  { %v10209_v47 = vpop.f32.mrb[42].mxu0 }
 0xa8f   :  { %v10213_v1 = vpop.f32.mrb[43].mxu0 }
 0xac5   :  { %v10217_v32 = vpop.f32.mrb[44].mxu0 }
 0xac6   :  { %v10219_v56 = vpop.f32.mrb[45].mxu0 }
 0xac7   :  { %v10221_v0 = vpop.f32.mrb[46].mxu0 }
 0xac8   :  { %v10225_v59 = vpop.f32.mrb[47].mxu0 }
 0xad0   :  { %v7978_v40 = vpop.f32.mrb[48].mxu0 }
 0xad1   :  { %v1859_v9 = vmul.f32 0.35355338, %v7978_v40  ;;  %v1826_v2 = vpop.f32.mrb[49].mxu0 }
 0xad2   :  { %v7979_v54 = vpop.f32.mrb[50].mxu0  ;;  %v1857_v57 = vmul.f32 0.35355338, %v1826_v2 }
 0xad3   :  { %v1829_v51 = vpop.f32.mrb[51].mxu0  ;;  %v1871_v52 = vsel %vm566_vm2, %v1859_v9, -inf  ;;  %v1860_v24 = vmul.f32 0.35355338, %v7979_v54 }
 0xad4   :  { %v1858_v55 = vmul.f32 0.35355338, %v1829_v51  ;;  %1872 = vmax.xlane.f32.xlu0 %v1871_v52  ;;  %v1865_v7 = vsel %vm566_vm2, %v1857_v57, -inf }
 0xad5   :  { %v1874_v33 = vsel %vm566_vm2, %v1860_v24, -inf }
 0xad6   :  { %v1868_v60 = vsel %vm566_vm2, %v1858_v55, -inf }
 0xad7   :  { %1869 = vmax.xlane.f32.xlu1 %v1868_v60 }
 0xad8   :  { %1866 = vmax.xlane.f32.xlu0 %v1865_v7  ;;  %v7982_v39 = vpop.f32.mrb[52].mxu0 }
 0xad9   :  { %v1842_v38 = vpop.f32.mrb[53].mxu0  ;;  %v1863_v25 = vmul.f32 0.35355338, %v7982_v39 }
 0xada   :  { %v7983_v13 = vpop.f32.mrb[54].mxu0  ;;  %v1861_v2 = vmul.f32 0.35355338, %v1842_v38 }
 0xadb   :  { %v1845_v40 = vpop.f32.mrb[55].mxu0  ;;  %v1883_v46 = vsel %vm566_vm2, %v1863_v25, -inf  ;;  %v1864_v54 = vmul.f32 0.35355338, %v7983_v13 }
 0xadc   :  { %1875 = vmax.xlane.f32.xlu0 %v1874_v33  ;;  %v1877_v51 = vsel %vm566_vm2, %v1861_v2, -inf  ;;  %v10241_v52 = vmul.f32 0.35355338, %v1845_v40 }
 0xadd   :  { %v1886_v33 = vsel %vm566_vm2, %v1864_v54, -inf }
 0xae0   :  { %1884 = vmax.xlane.f32.xlu0 %v1883_v46  ;;  %v1880_v46 = vsel %vm566_vm2, %v10241_v52, -inf }
 0xae4   :  { %1878 = vmax.xlane.f32.xlu0 %v1877_v51 }
 0xae8   :  { %1959 = vrot.lane.b32.xlu1 %v9922_v18, %s9384_s28 }
 0xaec   :  { %1961 = vrot.lane.b32.xlu1 %v9930_v44, %s9384_s28 }
 0xafa   :  { %1957 = vrot.lane.b32.xlu0 %v9924_v19, %s9384_s28 }
 0xb10   :  { %1887 = vmax.xlane.f32.xlu1 %v1886_v33 }
 0xb14   :  { %1881 = vmax.xlane.f32.xlu1 %v1880_v46 }
 0xb25   :  { %1963 = vrot.lane.b32.xlu1 %v9928_v41, %s9384_s28 }
 0xb61   :  { %v1873_v60 = vpop.xlane.xlu0 %1872 }
 0xb62   :  { %v1891_v7 = vsub.f32 %v1859_v9, %v1873_v60 }
 0xb64   :  { %v1901_v39 = vmul.f32 1.442695, %v1891_v7  ;;  %v1870_v38 = vpop.xlane.xlu1 %1869 }
 0xb65   :  { %v1867_v51 = vpop.xlane.xlu0 %1866  ;;  %v1890_v13 = vsub.f32 %v1858_v55, %v1870_v38 }
 0xb66   :  { %8851 = vpow2.f32 %v1901_v39  ;;  %v1889_v35 = vsub.f32 %v1857_v57, %v1867_v51 }
 0xb67   :  { %v1899_v33 = vmul.f32 1.442695, %v1890_v13 }
 0xb68   :  { %v1897_v40 = vmul.f32 1.442695, %v1889_v35 }
 0xb69   :  { %v1876_v16 = vpop.xlane.xlu0 %1875 }
 0xb6a   :  { %8853 = vpow2.f32 %v1897_v40  ;;  %v1892_v49 = vsub.f32 %v1860_v24, %v1876_v16  ;;  %v1960_v16 = vpop.permute.xlu1 %1959 }
 0xb6c   :  { %v1903_v36 = vmul.f32 1.442695, %v1892_v49 }
 0xb6d   :  { %v1885_v21 = vpop.xlane.xlu0 %1884 }
 0xb6e   :  { %8855 = vpow2.f32 %v1903_v36  ;;  %v1895_v46 = vsub.f32 %v1863_v25, %v1885_v21 }
 0xb6f   :  { %8857 = vpow2.f32 %v1899_v33 }
 0xb70   :  { %v10248_v63 = vpop.eup %8851  ;;  %v1909_v34 = vmul.f32 1.442695, %v1895_v46 }
 0xb71   :  { %v1879_v9 = vpop.xlane.xlu0 %1878  ;;  %v1919_v60 = vsel %vm566_vm2, %v10248_v63, 0.0 }
 0xb72   :  { %8859 = vpow2.f32 %v1909_v34  ;;  %v1893_v57 = vsub.f32 %v1861_v2, %v1879_v9  ;;  %1920 = vadd.xlane.f32.xlu0 %v1919_v60  ;;  %v1962_v34 = vpop.permute.xlu1 %1961 }
 0xb74   :  { %v10252_v35 = vpop.eup %8853  ;;  %v1905_v55 = vmul.f32 1.442695, %v1893_v57 }
 0xb75   :  { %v1958_v24 = vpop.permute.xlu0 %1957  ;;  %v1913_v36 = vsel %vm566_vm2, %v10252_v35, 0.0 }
 0xb76   :  { %8861 = vpow2.f32 %v1905_v55  ;;  %1914 = vadd.xlane.f32.xlu0 %v1913_v36  ;;  %7984 = vmatprep.subr.bf16.mxu1 %v1958_v24 }
 0xb77   :  { %7985 = vmatpush3.bf16.msra.mxu1 %v1958_v24 }
 0xb78   :  { %v8856_v25 = vpop.eup %8855  ;;  %7986 = vmatprep.subr.bf16.mxu1 %v1960_v16 }
 0xb79   :  { %v1922_v49 = vsel %vm566_vm2, %v8856_v25, 0.0  ;;  %v8858_v21 = vpop.eup %8857 }
 0xb7a   :  { %1923 = vadd.xlane.f32.xlu1 %v1922_v49  ;;  %v1916_v39 = vsel %vm566_vm2, %v8858_v21, 0.0 }
 0xb7b   :  { %7987 = vmatpush3.bf16.msra.mxu1 %v1960_v16 }
 0xb7c   :  { %v10257_v2 = vpop.eup %8859  ;;  %7988 = vmatprep.subr.bf16.mxu1 %v1962_v34 }
 0xb7d   :  { %v1931_v7 = vsel %vm566_vm2, %v10257_v2, 0.0 }
 0xb7e   :  { %1932 = vadd.xlane.f32.xlu0 %v1931_v7  ;;  %1917 = vadd.xlane.f32.xlu1 %v1916_v39 }
 0xb7f   :  { %7989 = vmatpush3.bf16.msra.mxu1 %v1962_v34 }
 0xb80   :  { %v10262_v38 = vpop.eup %8861 }
 0xb81   :  { %v1925_v51 = vsel %vm566_vm2, %v10262_v38, 0.0 }
 0xb82   :  { %1926 = vadd.xlane.f32.xlu0 %v1925_v51 }
 0xb8f   :  { %2056 = vrot.lane.b32.xlu1 %v9922_v18, %s9382_s10 }
 0xb93   :  { %2058 = vrot.lane.b32.xlu1 %v9930_v44, %s9382_s10 }
 0xb9d   :  { %v1888_v13 = vpop.xlane.xlu1 %1887 }
 0xb9e   :  { %v1896_v40 = vsub.f32 %v1864_v54, %v1888_v13 }
 0xba0   :  { %v1911_v33 = vmul.f32 1.442695, %v1896_v40 }
 0xba1   :  { %v1882_v46 = vpop.xlane.xlu1 %1881 }
 0xba2   :  { %8863 = vpow2.f32 %v1911_v33  ;;  %v1894_v9 = vsub.f32 %v10241_v52, %v1882_v46 }
 0xba4   :  { %v1907_v60 = vmul.f32 1.442695, %v1894_v9 }
 0xba5   :  { %v1964_v57 = vpop.permute.xlu1 %1963 }
 0xba6   :  { %7990 = vmatprep.subr.bf16.mxu1 %v1964_v57  ;;  %8865 = vpow2.f32 %v1907_v60 }
 0xba7   :  { %7991 = vmatpush3.bf16.msra.mxu1 %v1964_v57 }
 0xbac   :  { %v8864_v55 = vpop.eup %8863 }
 0xbad   :  { %v1934_v16 = vsel %vm566_vm2, %v8864_v55, 0.0 }
 0xbae   :  { %1935 = vadd.xlane.f32.xlu0 %v1934_v16 }
 0xbb0   :  { %v8866_v24 = vpop.eup %8865 }
 0xbb1   :  { %v1928_v36 = vsel %vm566_vm2, %v8866_v24, 0.0 }
 0xbb7   :  { %1929 = vadd.xlane.f32.xlu1 %v1928_v36 }
 0xbc4   :  { %2054 = vrot.lane.b32.xlu0 %v9924_v19, %s9382_s10 }
 0xbc8   :  { %2046 = vrot.lane.b32.xlu0 %v9924_v19, %s9383_s11  ;;  %2060 = vrot.lane.b32.xlu1 %v9928_v41, %s9382_s10 }
 0xbcc   :  { %2050 = vrot.lane.b32.xlu0 %v9930_v44, %s9383_s11  ;;  %2048 = vrot.lane.b32.xlu1 %v9922_v18, %s9383_s11 }
 0xbd0   :  { %2052 = vrot.lane.b32.xlu1 %v9928_v41, %s9383_s11 }
 0xbff   :  { %v1921_v54 = vpop.xlane.xlu0 %1920 }
 0xc03   :  { %v1915_v49 = vpop.xlane.xlu0 %1914 }
 0xc07   :  { %v1924_v52 = vpop.xlane.xlu1 %1923 }
 0xc08   :  { %8867 = vrcp.f32 %v1924_v52 }
 0xc09   :  { %8869 = vrcp.f32 %v1915_v49 }
 0xc0a   :  { %8871 = vrcp.f32 %v1921_v54 }
 0xc0b   :  { %v1918_v34 = vpop.xlane.xlu1 %1917  ;;  %v1933_v16 = vpop.xlane.xlu0 %1932 }
 0xc0c   :  { %8873 = vrcp.f32 %v1918_v34 }
 0xc0f   :  { %v1927_v36 = vpop.xlane.xlu0 %1926  ;;  %v2057_v54 = vpop.permute.xlu1 %2056 }
 0xc12   :  { %v8868_v7 = vpop.eup %8867 }
 0xc13   :  { %v8870_v39 = vpop.eup %8869  ;;  %v1948_v40 = vmul.f32 %v8868_v7, %v8856_v25  ;;  %v2059_v34 = vpop.permute.xlu1 %2058 }
 0xc14   :  { %v8872_v51 = vpop.eup %8871  ;;  %v1945_v33 = vmul.f32 %v8870_v39, %v10252_v35  ;;  %v2078_v35 = vsel %vm468_vm1, %v2057_v54, 0 }
 0xc15   :  { %v1947_v9 = vmul.f32 %v8872_v51, %v10248_v63 }
 0xc16   :  { %v8874_v13 = vpop.eup %8873 }
 0xc17   :  { %v1946_v46 = vmul.f32 %v8874_v13, %v8858_v21  ;;  %v1954_v57 = vpack.c.bf16 %v1948_v40, %v1947_v9  ;;  %v2081_v40 = vsel %vm468_vm1, %v2059_v34, 0 }
 0xc19   :  { %v1953_v60 = vpack.c.bf16 %v1946_v46, %v1945_v33 }
 0xc1b   :  { %7992 = vmatprep.mubr.msk.bf16.mxu1 %vm566_vm2, %v1953_v60 }
 0xc1c   :  { %7993 = vmatmul.mubr.msk.bf16.vlgmr.msra.gmra.mrb[32].mxu1 %vm566_vm2, %v1954_v57 }
 0xc3b   :  { %v1936_v52 = vpop.xlane.xlu0 %1935 }
 0xc3c   :  { %8875 = vrcp.f32 %v1936_v52 }
 0xc3d   :  { %8877 = vrcp.f32 %v1927_v36 }
 0xc3e   :  { %8879 = vrcp.f32 %v1933_v16 }
 0xc3f   :  { %v2055_v49 = vpop.permute.xlu0 %2054 }
 0xc40   :  { %8380 = vmatprep.subr.msk.bf16.mxu1 %vm468_vm1, %v2055_v49  ;;  %v2075_v25 = vsel %vm468_vm1, %v2055_v49, 0 }
 0xc41   :  { %8001 = vmatpush3.bf16.xpose.msra.mxu1 %v2075_v25 }
 0xc42   :  { %8381 = vmatprep.subr.msk.bf16.mxu1 %vm468_vm1, %v2057_v54 }
 0xc43   :  { %v2047_v36 = vpop.permute.xlu0 %2046 }
 0xc44   :  { %v1930_v63 = vpop.xlane.xlu1 %1929 }
 0xc45   :  { %8881 = vrcp.f32 %v1930_v63 }
 0xc46   :  { %v8876_v21 = vpop.eup %8875 }
 0xc47   :  { %v8878_v7 = vpop.eup %8877  ;;  %v1952_v13 = vmul.f32 %v8876_v21, %v8864_v55 }
 0xc48   :  { %v8880_v39 = vpop.eup %8879  ;;  %v1949_v33 = vmul.f32 %v8878_v7, %v10262_v38  ;;  %v2061_v9 = vpop.permute.xlu1 %2060 }
 0xc49   :  { %8003 = vmatpush3.bf16.xpose.msra.mxu1 %v2078_v35  ;;  %v1951_v60 = vmul.f32 %v8880_v39, %v10257_v2  ;;  %v2084_v55 = vsel %vm468_vm1, %v2061_v9, 0 }
 0xc4a   :  { %8382 = vmatprep.subr.msk.bf16.mxu1 %vm468_vm1, %v2059_v34 }
 0xc4b   :  { %v1956_v16 = vpack.c.bf16 %v1952_v13, %v1951_v60 }
 0xc4c   :  { %v2049_v38 = vpop.permute.xlu1 %2048 }
 0xc4f   :  { %v8882_v51 = vpop.eup %8881 }
 0xc50   :  { %v1950_v46 = vmul.f32 %v8882_v51, %v8866_v24  ;;  %v2051_v24 = vpop.permute.xlu0 %2050  ;;  %v2053_v2 = vpop.permute.xlu1 %2052 }
 0xc51   :  { %8005 = vmatpush3.bf16.xpose.msra.mxu1 %v2081_v40 }
 0xc52   :  { %8383 = vmatprep.subr.msk.bf16.mxu1 %vm468_vm1, %v2061_v9  ;;  %v1955_v57 = vpack.c.bf16 %v1950_v46, %v1949_v33 }
 0xc54   :  { %7996 = vmatprep.mubr.msk.bf16.mxu1 %vm566_vm2, %v1955_v57 }
 0xc55   :  { %7997 = vmatmul.mubr.msk.bf16.gmra.mrb[36].mxu1 %vm566_vm2, %v1956_v16 }
 0xc56   :  { %8008 = vmatprep.mubr.msk.bf16.mxu1 %vm468_vm1, %v2047_v36 }
 0xc59   :  { %8007 = vmatpush3.bf16.xpose.msra.mxu1 %v2084_v55 }
 0xc60   :  { %8009 = vmatmul.mubr.msk.bf16.vlgmr.msra.gmra.mrb[40].mxu1 %vm468_vm1, %v2049_v38 }
 0xc61   :  { %8012 = vmatprep.mubr.msk.bf16.mxu1 %vm468_vm1, %v2051_v24 }
 0xc68   :  { %8013 = vmatmul.mubr.msk.bf16.gmra.mrb[44].mxu1 %vm468_vm1, %v2053_v2 }
 0xcef   :  { %v10305_v54 = vpop.f32.mrb[32].mxu1 }
 0xcf0   :  { %12956 = vst [vmem:[#allocation11_spill] sm:$0xff] %v10305_v54  ;;  %v10307_v52 = vpop.f32.mrb[33].mxu1 }
 0xcf1   :  { %12957 = vst [vmem:[#allocation12_spill] sm:$0xff] %v10307_v52  ;;  %v10309_v49 = vpop.f32.mrb[34].mxu1 }
 0xcf2   :  { %12958 = vst [vmem:[#allocation13_spill] sm:$0xff] %v10309_v49  ;;  %v10311_v34 = vpop.f32.mrb[35].mxu1 }
 0xcf3   :  { %12959 = vst [vmem:[#allocation14_spill] sm:$0xff] %v10311_v34 }
 0xd28   :  { %v10313_v25 = vpop.f32.mrb[36].mxu1 }
 0xd29   :  { %12960 = vst [vmem:[#allocation15_spill] sm:$0xff] %v10313_v25  ;;  %v10315_v63 = vpop.f32.mrb[37].mxu1 }
 0xd2a   :  { %12961 = vst [vmem:[#allocation16_spill] sm:$0xff] %v10315_v63  ;;  %v10317_v35 = vpop.f32.mrb[38].mxu1 }
 0xd2b   :  { %12962 = vst [vmem:[#allocation17_spill] sm:$0xff] %v10317_v35  ;;  %v10319_v21 = vpop.f32.mrb[39].mxu1 }
 0xd2c   :  { %12963 = vst [vmem:[#allocation18_spill] sm:$0xff] %v10319_v21 }
 0xd33   :  { %v8010_v7 = vpop.f32.mrb[40].mxu1 }
 0xd34   :  { %v2153_v39 = vmul.f32 0.35355338, %v8010_v7  ;;  %v2120_v51 = vpop.f32.mrb[41].mxu1 }
 0xd35   :  { %v8011_v13 = vpop.f32.mrb[42].mxu1  ;;  %v2151_v40 = vmul.f32 0.35355338, %v2120_v51 }
 0xd36   :  { %v2123_v33 = vpop.f32.mrb[43].mxu1  ;;  %v2165_v46 = vsel %vm566_vm2, %v2153_v39, -inf  ;;  %v2154_v57 = vmul.f32 0.35355338, %v8011_v13 }
 0xd37   :  { %v2152_v9 = vmul.f32 0.35355338, %v2123_v33  ;;  %2166 = vmax.xlane.f32.xlu0 %v2165_v46  ;;  %v2159_v16 = vsel %vm566_vm2, %v2151_v40, -inf }
 0xd38   :  { %v2168_v7 = vsel %vm566_vm2, %v2154_v57, -inf }
 0xd39   :  { %v2162_v60 = vsel %vm566_vm2, %v2152_v9, -inf }
 0xd3a   :  { %2163 = vmax.xlane.f32.xlu1 %v2162_v60 }
 0xd3b   :  { %2160 = vmax.xlane.f32.xlu0 %v2159_v16  ;;  %v8014_v36 = vpop.f32.mrb[44].mxu1 }
 0xd3c   :  { %v2136_v55 = vpop.f32.mrb[45].mxu1  ;;  %v2157_v24 = vmul.f32 0.35355338, %v8014_v36 }
 0xd3d   :  { %v8015_v38 = vpop.f32.mrb[46].mxu1  ;;  %v2155_v51 = vmul.f32 0.35355338, %v2136_v55 }
 0xd3e   :  { %v2139_v2 = vpop.f32.mrb[47].mxu1  ;;  %v2177_v28 = vsel %vm566_vm2, %v2157_v24, -inf  ;;  %v2158_v13 = vmul.f32 0.35355338, %v8015_v38 }
 0xd3f   :  { %2169 = vmax.xlane.f32.xlu0 %v2168_v7  ;;  %v2171_v33 = vsel %vm566_vm2, %v2155_v51, -inf  ;;  %v10333_v46 = vmul.f32 0.35355338, %v2139_v2 }
 0xd40   :  { %v2180_v60 = vsel %vm566_vm2, %v2158_v13, -inf }
 0xd43   :  { %2178 = vmax.xlane.f32.xlu0 %v2177_v28  ;;  %v2174_v28 = vsel %vm566_vm2, %v10333_v46, -inf }
 0xd47   :  { %2172 = vmax.xlane.f32.xlu0 %v2171_v33 }
 0xd4b   :  { %2253 = vrot.lane.b32.xlu1 %v9922_v18, %s9385_s2 }
 0xd4f   :  { %2255 = vrot.lane.b32.xlu1 %v9930_v44, %s9385_s2 }
 0xd5d   :  { %2251 = vrot.lane.b32.xlu0 %v9924_v19, %s9385_s2 }
 0xd73   :  { %2181 = vmax.xlane.f32.xlu1 %v2180_v60 }
 0xd77   :  { %2175 = vmax.xlane.f32.xlu1 %v2174_v28 }
 0xd88   :  { %2257 = vrot.lane.b32.xlu1 %v9928_v41, %s9385_s2 }
 0xdc4   :  { %v2167_v16 = vpop.xlane.xlu0 %2166 }
 0xdc5   :  { %v2185_v36 = vsub.f32 %v2153_v39, %v2167_v16 }
 0xdc7   :  { %v2195_v55 = vmul.f32 1.442695, %v2185_v36  ;;  %v2164_v7 = vpop.xlane.xlu1 %2163 }
 0xdc8   :  { %v2161_v33 = vpop.xlane.xlu0 %2160  ;;  %v2184_v38 = vsub.f32 %v2152_v9, %v2164_v7 }
 0xdc9   :  { %8883 = vpow2.f32 %v2195_v55  ;;  %v2183_v53 = vsub.f32 %v2151_v40, %v2161_v33 }
 0xdca   :  { %v2193_v60 = vmul.f32 1.442695, %v2184_v38 }
 0xdcb   :  { %v2191_v2 = vmul.f32 1.442695, %v2183_v53 }
 0xdcc   :  { %v2170_v20 = vpop.xlane.xlu0 %2169 }
 0xdcd   :  { %8885 = vpow2.f32 %v2191_v2  ;;  %v2186_v25 = vsub.f32 %v2154_v57, %v2170_v20  ;;  %v2254_v20 = vpop.permute.xlu1 %2253 }
 0xdcf   :  { %v2197_v35 = vmul.f32 1.442695, %v2186_v25 }
 0xdd0   :  { %v2179_v63 = vpop.xlane.xlu0 %2178 }
 0xdd1   :  { %8887 = vpow2.f32 %v2197_v35  ;;  %v2189_v28 = vsub.f32 %v2157_v24, %v2179_v63 }
 0xdd2   :  { %8889 = vpow2.f32 %v2193_v60 }
 0xdd3   :  { %v10340_v21 = vpop.eup %8883  ;;  %v2203_v54 = vmul.f32 1.442695, %v2189_v28 }
 0xdd4   :  { %v2173_v39 = vpop.xlane.xlu0 %2172  ;;  %v2213_v16 = vsel %vm566_vm2, %v10340_v21, 0.0 }
 0xdd5   :  { %8891 = vpow2.f32 %v2203_v54  ;;  %v2187_v40 = vsub.f32 %v2155_v51, %v2173_v39  ;;  %2214 = vadd.xlane.f32.xlu0 %v2213_v16  ;;  %v2256_v54 = vpop.permute.xlu1 %2255 }
 0xdd7   :  { %v10344_v53 = vpop.eup %8885  ;;  %v2199_v9 = vmul.f32 1.442695, %v2187_v40 }
 0xdd8   :  { %v2252_v57 = vpop.permute.xlu0 %2251  ;;  %v2207_v25 = vsel %vm566_vm2, %v10344_v53, 0.0 }
 0xdd9   :  { %8893 = vpow2.f32 %v2199_v9  ;;  %2208 = vadd.xlane.f32.xlu0 %v2207_v25  ;;  %8016 = vmatprep.subr.bf16.mxu0 %v2252_v57 }
 0xdda   :  { %8017 = vmatpush3.bf16.msra.mxu0 %v2252_v57 }
 0xddb   :  { %v8888_v63 = vpop.eup %8887  ;;  %8018 = vmatprep.subr.bf16.mxu0 %v2254_v20 }
 0xddc   :  { %v2216_v35 = vsel %vm566_vm2, %v8888_v63, 0.0  ;;  %v8890_v24 = vpop.eup %8889 }
 0xddd   :  { %2217 = vadd.xlane.f32.xlu1 %v2216_v35  ;;  %v2210_v55 = vsel %vm566_vm2, %v8890_v24, 0.0 }
 0xdde   :  { %8019 = vmatpush3.bf16.msra.mxu0 %v2254_v20 }
 0xddf   :  { %v10349_v51 = vpop.eup %8891  ;;  %8020 = vmatprep.subr.bf16.mxu0 %v2256_v54 }
 0xde0   :  { %v2225_v36 = vsel %vm566_vm2, %v10349_v51, 0.0 }
 0xde1   :  { %2226 = vadd.xlane.f32.xlu0 %v2225_v36  ;;  %2211 = vadd.xlane.f32.xlu1 %v2210_v55 }
 0xde2   :  { %8021 = vmatpush3.bf16.msra.mxu0 %v2256_v54 }
 0xde3   :  { %v10354_v7 = vpop.eup %8893 }
 0xde4   :  { %v2219_v33 = vsel %vm566_vm2, %v10354_v7, 0.0 }
 0xde5   :  { %2220 = vadd.xlane.f32.xlu0 %v2219_v33 }
 0xdf2   :  { %2350 = vrot.lane.b32.xlu1 %v9922_v18, %s9386_s29 }
 0xdf6   :  { %2352 = vrot.lane.b32.xlu1 %v9930_v44, %s9386_s29 }
 0xe00   :  { %v2182_v38 = vpop.xlane.xlu1 %2181 }
 0xe01   :  { %v2190_v2 = vsub.f32 %v2158_v13, %v2182_v38 }
 0xe03   :  { %v2205_v60 = vmul.f32 1.442695, %v2190_v2 }
 0xe04   :  { %v2176_v28 = vpop.xlane.xlu1 %2175 }
 0xe05   :  { %8895 = vpow2.f32 %v2205_v60  ;;  %v2188_v39 = vsub.f32 %v10333_v46, %v2176_v28 }
 0xe07   :  { %v2201_v16 = vmul.f32 1.442695, %v2188_v39 }
 0xe08   :  { %v2258_v40 = vpop.permute.xlu1 %2257 }
 0xe09   :  { %8022 = vmatprep.subr.bf16.mxu0 %v2258_v40  ;;  %8897 = vpow2.f32 %v2201_v16 }
 0xe0a   :  { %8023 = vmatpush3.bf16.msra.mxu0 %v2258_v40 }
 0xe0f   :  { %v8896_v9 = vpop.eup %8895 }
 0xe10   :  { %v2228_v20 = vsel %vm566_vm2, %v8896_v9, 0.0 }
 0xe11   :  { %2229 = vadd.xlane.f32.xlu0 %v2228_v20 }
 0xe13   :  { %v8898_v57 = vpop.eup %8897 }
 0xe14   :  { %v2222_v25 = vsel %vm566_vm2, %v8898_v57, 0.0 }
 0xe1a   :  { %2223 = vadd.xlane.f32.xlu1 %v2222_v25 }
 0xe27   :  { %2348 = vrot.lane.b32.xlu0 %v9924_v19, %s9386_s29 }
 0xe2b   :  { %2340 = vrot.lane.b32.xlu0 %v9924_v19, %s9387_s12  ;;  %2354 = vrot.lane.b32.xlu1 %v9928_v41, %s9386_s29 }
 0xe2f   :  { %2344 = vrot.lane.b32.xlu0 %v9930_v44, %s9387_s12  ;;  %2342 = vrot.lane.b32.xlu1 %v9922_v18, %s9387_s12 }
 0xe33   :  { %2346 = vrot.lane.b32.xlu1 %v9928_v41, %s9387_s12 }
 0xe62   :  { %v2215_v13 = vpop.xlane.xlu0 %2214 }
 0xe66   :  { %v2209_v35 = vpop.xlane.xlu0 %2208 }
 0xe6a   :  { %v2218_v46 = vpop.xlane.xlu1 %2217 }
 0xe6b   :  { %8899 = vrcp.f32 %v2218_v46 }
 0xe6c   :  { %8901 = vrcp.f32 %v2209_v35 }
 0xe6d   :  { %8903 = vrcp.f32 %v2215_v13 }
 0xe6e   :  { %v2212_v54 = vpop.xlane.xlu1 %2211  ;;  %v2227_v20 = vpop.xlane.xlu0 %2226 }
 0xe6f   :  { %8905 = vrcp.f32 %v2212_v54 }
 0xe72   :  { %v2221_v25 = vpop.xlane.xlu0 %2220  ;;  %v2351_v13 = vpop.permute.xlu1 %2350 }
 0xe75   :  { %v8900_v36 = vpop.eup %8899 }
 0xe76   :  { %v8902_v55 = vpop.eup %8901  ;;  %v2242_v2 = vmul.f32 %v8900_v36, %v8888_v63  ;;  %v2353_v54 = vpop.permute.xlu1 %2352 }
 0xe77   :  { %v8904_v33 = vpop.eup %8903  ;;  %v2239_v60 = vmul.f32 %v8902_v55, %v10344_v53  ;;  %v2372_v53 = vsel %vm468_vm1, %v2351_v13, 0 }
 0xe78   :  { %v2241_v39 = vmul.f32 %v8904_v33, %v10340_v21 }
 0xe79   :  { %v8906_v38 = vpop.eup %8905 }
 0xe7a   :  { %v2240_v28 = vmul.f32 %v8906_v38, %v8890_v24  ;;  %v2248_v40 = vpack.c.bf16 %v2242_v2, %v2241_v39  ;;  %v2375_v2 = vsel %vm468_vm1, %v2353_v54, 0 }
 0xe7c   :  { %v2247_v16 = vpack.c.bf16 %v2240_v28, %v2239_v60 }
 0xe7e   :  { %8024 = vmatprep.mubr.msk.bf16.mxu0 %vm566_vm2, %v2247_v16 }
 0xe7f   :  { %8025 = vmatmul.mubr.msk.bf16.vlgmr.msra.gmra.mrb[56].mxu0 %vm566_vm2, %v2248_v40 }
 0xe9e   :  { %v2230_v46 = vpop.xlane.xlu0 %2229 }
 0xe9f   :  { %8907 = vrcp.f32 %v2230_v46 }
 0xea0   :  { %8909 = vrcp.f32 %v2221_v25 }
 0xea1   :  { %8911 = vrcp.f32 %v2227_v20 }
 0xea2   :  { %v2349_v35 = vpop.permute.xlu0 %2348 }
 0xea3   :  { %8384 = vmatprep.subr.msk.bf16.mxu0 %vm468_vm1, %v2349_v35  ;;  %v2369_v63 = vsel %vm468_vm1, %v2349_v35, 0 }
 0xea4   :  { %8033 = vmatpush3.bf16.xpose.msra.mxu0 %v2369_v63 }
 0xea5   :  { %8385 = vmatprep.subr.msk.bf16.mxu0 %vm468_vm1, %v2351_v13 }
 0xea6   :  { %v2341_v25 = vpop.permute.xlu0 %2340 }
 0xea7   :  { %v2224_v21 = vpop.xlane.xlu1 %2223 }
 0xea8   :  { %8913 = vrcp.f32 %v2224_v21 }
 0xea9   :  { %v8908_v24 = vpop.eup %8907 }
 0xeaa   :  { %v8910_v36 = vpop.eup %8909  ;;  %v2246_v38 = vmul.f32 %v8908_v24, %v8896_v9 }
 0xeab   :  { %v8912_v55 = vpop.eup %8911  ;;  %v2243_v60 = vmul.f32 %v8910_v36, %v10354_v7  ;;  %v2355_v39 = vpop.permute.xlu1 %2354 }
 0xeac   :  { %8035 = vmatpush3.bf16.xpose.msra.mxu0 %v2372_v53  ;;  %v2245_v16 = vmul.f32 %v8912_v55, %v10349_v51  ;;  %v2378_v9 = vsel %vm468_vm1, %v2355_v39, 0 }
 0xead   :  { %8386 = vmatprep.subr.msk.bf16.mxu0 %vm468_vm1, %v2353_v54 }
 0xeae   :  { %v2250_v20 = vpack.c.bf16 %v2246_v38, %v2245_v16 }
 0xeaf   :  { %v2343_v7 = vpop.permute.xlu1 %2342 }
 0xeb2   :  { %v8914_v33 = vpop.eup %8913 }
 0xeb3   :  { %v2244_v28 = vmul.f32 %v8914_v33, %v8898_v57  ;;  %v2345_v57 = vpop.permute.xlu0 %2344  ;;  %v2347_v51 = vpop.permute.xlu1 %2346 }
 0xeb4   :  { %8037 = vmatpush3.bf16.xpose.msra.mxu0 %v2375_v2 }
 0xeb5   :  { %8387 = vmatprep.subr.msk.bf16.mxu0 %vm468_vm1, %v2355_v39  ;;  %v2249_v40 = vpack.c.bf16 %v2244_v28, %v2243_v60 }
 0xeb7   :  { %8028 = vmatprep.mubr.msk.bf16.mxu0 %vm566_vm2, %v2249_v40 }
 0xeb8   :  { %8029 = vmatmul.mubr.msk.bf16.gmra.mrb[60].mxu0 %vm566_vm2, %v2250_v20 }
 0xeb9   :  { %8040 = vmatprep.mubr.msk.bf16.mxu0 %vm468_vm1, %v2341_v25 }
 0xebc   :  { %8039 = vmatpush3.bf16.xpose.msra.mxu0 %v2378_v9 }
 0xec3   :  { %8041 = vmatmul.mubr.msk.bf16.vlgmr.msra.gmra.mrb[64].mxu0 %vm468_vm1, %v2343_v7 }
 0xec4   :  { %8044 = vmatprep.mubr.msk.bf16.mxu0 %vm468_vm1, %v2345_v57 }
 0xecb   :  { %8045 = vmatmul.mubr.msk.bf16.gmra.mrb[68].mxu0 %vm468_vm1, %v2347_v51 }
 0xf52   :  { %v10397_v13 = vpop.f32.mrb[56].mxu0 }
 0xf53   :  { %v10399_v46 = vpop.f32.mrb[57].mxu0 }
 0xf54   :  { %v10401_v35 = vpop.f32.mrb[58].mxu0 }
 0xf55   :  { %v10405_v63 = vpop.f32.mrb[59].mxu0 }
 0xf8b   :  { %v10409_v53 = vpop.f32.mrb[60].mxu0 }
 0xf8c   :  { %12964 = vst [vmem:[#allocation19_spill] sm:$0xff] %v10409_v53  ;;  %v10411_v24 = vpop.f32.mrb[61].mxu0 }
 0xf8d   :  { %v10413_v36 = vpop.f32.mrb[62].mxu0 }
 0xf8e   :  { %v10417_v33 = vpop.f32.mrb[63].mxu0 }
 0xf96   :  { %v8042_v2 = vpop.f32.mrb[64].mxu0 }
 0xf97   :  { %v2447_v60 = vmul.f32 0.35355338, %v8042_v2  ;;  %v2414_v28 = vpop.f32.mrb[65].mxu0 }
 0xf98   :  { %v8043_v39 = vpop.f32.mrb[66].mxu0  ;;  %v2445_v16 = vmul.f32 0.35355338, %v2414_v28 }
 0xf99   :  { %v2417_v40 = vpop.f32.mrb[67].mxu0  ;;  %v2459_v20 = vsel %vm566_vm2, %v2447_v60, -inf  ;;  %v2448_v7 = vmul.f32 0.35355338, %v8043_v39 }
 0xf9a   :  { %v2446_v25 = vmul.f32 0.35355338, %v2417_v40  ;;  %2460 = vmax.xlane.f32.xlu0 %v2459_v20  ;;  %v2453_v57 = vsel %vm566_vm2, %v2445_v16, -inf }
 0xf9b   :  { %v2462_v21 = vsel %vm566_vm2, %v2448_v7, -inf }
 0xf9c   :  { %v2456_v9 = vsel %vm566_vm2, %v2446_v25, -inf }
 0xf9d   :  { %2457 = vmax.xlane.f32.xlu1 %v2456_v9 }
 0xf9e   :  { %2454 = vmax.xlane.f32.xlu0 %v2453_v57  ;;  %v8046_v51 = vpop.f32.mrb[68].mxu0 }
 0xf9f   :  { %v2430_v55 = vpop.f32.mrb[69].mxu0  ;;  %v2451_v38 = vmul.f32 0.35355338, %v8046_v51 }
 0xfa0   :  { %v8047_v54 = vpop.f32.mrb[70].mxu0  ;;  %v2449_v28 = vmul.f32 0.35355338, %v2430_v55 }
 0xfa1   :  { %v2433_v2 = vpop.f32.mrb[71].mxu0  ;;  %v2471_v49 = vsel %vm566_vm2, %v2451_v38, -inf  ;;  %v2452_v39 = vmul.f32 0.35355338, %v8047_v54 }
 0xfa2   :  { %2463 = vmax.xlane.f32.xlu0 %v2462_v21  ;;  %v2465_v40 = vsel %vm566_vm2, %v2449_v28, -inf  ;;  %v10433_v20 = vmul.f32 0.35355338, %v2433_v2 }
 0xfa3   :  { %v2474_v21 = vsel %vm566_vm2, %v2452_v39, -inf }
 0xfa6   :  { %2472 = vmax.xlane.f32.xlu0 %v2471_v49  ;;  %v2468_v49 = vsel %vm566_vm2, %v10433_v20, -inf }
 0xfaa   :  { %2466 = vmax.xlane.f32.xlu0 %v2465_v40 }
 0xfae   :  { %2547 = vrot.lane.b32.xlu1 %v9922_v18, %s9388_s13 }
 0xfb2   :  { %2549 = vrot.lane.b32.xlu1 %v9930_v44, %s9388_s13 }
 0xfc0   :  { %2545 = vrot.lane.b32.xlu0 %v9924_v19, %s9388_s13 }
 0xfd6   :  { %2475 = vmax.xlane.f32.xlu1 %v2474_v21 }
 0xfda   :  { %2469 = vmax.xlane.f32.xlu1 %v2468_v49 }
 0xfeb   :  { %2551 = vrot.lane.b32.xlu1 %v9928_v41, %s9388_s13 }
0x1027   :  { %v2461_v55 = vpop.xlane.xlu0 %2460 }
0x1028   :  { %v2479_v9 = vsub.f32 %v2447_v60, %v2461_v55 }
0x102a   :  { %v2489_v57 = vmul.f32 1.442695, %v2479_v9  ;;  %v2458_v51 = vpop.xlane.xlu1 %2457 }
0x102b   :  { %v2455_v40 = vpop.xlane.xlu0 %2454  ;;  %v2478_v54 = vsub.f32 %v2446_v25, %v2458_v51 }
0x102c   :  { %8915 = vpow2.f32 %v2489_v57  ;;  %v2477_v34 = vsub.f32 %v2445_v16, %v2455_v40 }
0x102d   :  { %v2487_v21 = vmul.f32 1.442695, %v2478_v54 }
0x102e   :  { %v2485_v2 = vmul.f32 1.442695, %v2477_v34 }
0x102f   :  { %v2464_v52 = vpop.xlane.xlu0 %2463 }
0x1030   :  { %8917 = vpow2.f32 %v2485_v2  ;;  %v2480_v6 = vsub.f32 %v2448_v7, %v2464_v52  ;;  %v2548_v52 = vpop.permute.xlu1 %2547 }
0x1032   :  { %v2491_v48 = vmul.f32 1.442695, %v2480_v6 }
0x1033   :  { %v2473_v12 = vpop.xlane.xlu0 %2472 }
0x1034   :  { %8919 = vpow2.f32 %v2491_v48  ;;  %v2483_v49 = vsub.f32 %v2451_v38, %v2473_v12 }
0x1035   :  { %8921 = vpow2.f32 %v2487_v21 }
0x1036   :  { %v10440_v3 = vpop.eup %8915  ;;  %v2497_v8 = vmul.f32 1.442695, %v2483_v49 }
0x1037   :  { %v2467_v60 = vpop.xlane.xlu0 %2466  ;;  %v2507_v55 = vsel %vm566_vm2, %v10440_v3, 0.0 }
0x1038   :  { %8923 = vpow2.f32 %v2497_v8  ;;  %v2481_v16 = vsub.f32 %v2449_v28, %v2467_v60  ;;  %2508 = vadd.xlane.f32.xlu0 %v2507_v55  ;;  %v2550_v8 = vpop.permute.xlu1 %2549 }
0x103a   :  { %v10444_v34 = vpop.eup %8917  ;;  %v2493_v25 = vmul.f32 1.442695, %v2481_v16 }
0x103b   :  { %v2546_v7 = vpop.permute.xlu0 %2545  ;;  %v2501_v6 = vsel %vm566_vm2, %v10444_v34, 0.0 }
0x103c   :  { %8925 = vpow2.f32 %v2493_v25  ;;  %2502 = vadd.xlane.f32.xlu0 %v2501_v6  ;;  %8048 = vmatprep.subr.bf16.mxu1 %v2546_v7 }
0x103d   :  { %8049 = vmatpush3.bf16.msra.mxu1 %v2546_v7 }
0x103e   :  { %v8920_v48 = vpop.eup %8919  ;;  %8050 = vmatprep.subr.bf16.mxu1 %v2548_v52 }
0x103f   :  { %v2510_v12 = vsel %vm566_vm2, %v8920_v48, 0.0  ;;  %v8922_v38 = vpop.eup %8921 }
0x1040   :  { %2511 = vadd.xlane.f32.xlu1 %v2510_v12  ;;  %v2504_v57 = vsel %vm566_vm2, %v8922_v38, 0.0 }
0x1041   :  { %8051 = vmatpush3.bf16.msra.mxu1 %v2548_v52 }
0x1042   :  { %v10449_v28 = vpop.eup %8923  ;;  %8052 = vmatprep.subr.bf16.mxu1 %v2550_v8 }
0x1043   :  { %v2519_v9 = vsel %vm566_vm2, %v10449_v28, 0.0 }
0x1044   :  { %2520 = vadd.xlane.f32.xlu0 %v2519_v9  ;;  %2505 = vadd.xlane.f32.xlu1 %v2504_v57 }
0x1045   :  { %8053 = vmatpush3.bf16.msra.mxu1 %v2550_v8 }
0x1046   :  { %v10454_v51 = vpop.eup %8925 }
0x1047   :  { %v2513_v40 = vsel %vm566_vm2, %v10454_v51, 0.0 }
0x1048   :  { %2514 = vadd.xlane.f32.xlu0 %v2513_v40 }
0x1055   :  { %2644 = vrot.lane.b32.xlu1 %v9922_v18, %s9389_s14 }
0x1059   :  { %2646 = vrot.lane.b32.xlu1 %v9930_v44, %s9389_s14 }
0x1063   :  { %v2476_v54 = vpop.xlane.xlu1 %2475 }
0x1064   :  { %v2484_v2 = vsub.f32 %v2452_v39, %v2476_v54 }
0x1066   :  { %v2499_v21 = vmul.f32 1.442695, %v2484_v2 }
0x1067   :  { %v2470_v49 = vpop.xlane.xlu1 %2469 }
0x1068   :  { %8927 = vpow2.f32 %v2499_v21  ;;  %v2482_v60 = vsub.f32 %v10433_v20, %v2470_v49 }
0x106a   :  { %v2495_v55 = vmul.f32 1.442695, %v2482_v60 }
0x106b   :  { %v2552_v16 = vpop.permute.xlu1 %2551 }
0x106c   :  { %8054 = vmatprep.subr.bf16.mxu1 %v2552_v16  ;;  %8929 = vpow2.f32 %v2495_v55 }
0x106d   :  { %8055 = vmatpush3.bf16.msra.mxu1 %v2552_v16 }
0x1072   :  { %v8928_v25 = vpop.eup %8927 }
0x1073   :  { %v2522_v52 = vsel %vm566_vm2, %v8928_v25, 0.0 }
0x1074   :  { %2523 = vadd.xlane.f32.xlu0 %v2522_v52 }
0x1076   :  { %v8930_v7 = vpop.eup %8929 }
0x1077   :  { %v2516_v6 = vsel %vm566_vm2, %v8930_v7, 0.0 }
0x107d   :  { %2517 = vadd.xlane.f32.xlu1 %v2516_v6 }
0x108a   :  { %2642 = vrot.lane.b32.xlu0 %v9924_v19, %s9389_s14 }
0x108e   :  { %2634 = vrot.lane.b32.xlu0 %v9924_v19, %s9390_s15  ;;  %2648 = vrot.lane.b32.xlu1 %v9928_v41, %s9389_s14 }
0x1092   :  { %2638 = vrot.lane.b32.xlu0 %v9930_v44, %s9390_s15  ;;  %2636 = vrot.lane.b32.xlu1 %v9922_v18, %s9390_s15 }
0x1096   :  { %2640 = vrot.lane.b32.xlu1 %v9928_v41, %s9390_s15 }
0x10c5   :  { %v2509_v39 = vpop.xlane.xlu0 %2508 }
0x10c9   :  { %v2503_v12 = vpop.xlane.xlu0 %2502 }
0x10cd   :  { %v2512_v20 = vpop.xlane.xlu1 %2511 }
0x10ce   :  { %8931 = vrcp.f32 %v2512_v20 }
0x10cf   :  { %8933 = vrcp.f32 %v2503_v12 }
0x10d0   :  { %8935 = vrcp.f32 %v2509_v39 }
0x10d1   :  { %v2506_v8 = vpop.xlane.xlu1 %2505  ;;  %v2521_v52 = vpop.xlane.xlu0 %2520 }
0x10d2   :  { %8937 = vrcp.f32 %v2506_v8 }
0x10d5   :  { %v2515_v6 = vpop.xlane.xlu0 %2514  ;;  %v2645_v39 = vpop.permute.xlu1 %2644 }
0x10d8   :  { %v8932_v9 = vpop.eup %8931 }
0x10d9   :  { %v8934_v57 = vpop.eup %8933  ;;  %v2536_v2 = vmul.f32 %v8932_v9, %v8920_v48  ;;  %v2647_v8 = vpop.permute.xlu1 %2646 }
0x10da   :  { %v8936_v40 = vpop.eup %8935  ;;  %v2533_v21 = vmul.f32 %v8934_v57, %v10444_v34  ;;  %v2666_v34 = vsel %vm468_vm1, %v2645_v39, 0 }
0x10db   :  { %v2535_v60 = vmul.f32 %v8936_v40, %v10440_v3 }
0x10dc   :  { %v8938_v54 = vpop.eup %8937 }
0x10dd   :  { %v2534_v49 = vmul.f32 %v8938_v54, %v8922_v38  ;;  %v2542_v16 = vpack.c.bf16 %v2536_v2, %v2535_v60  ;;  %v2669_v2 = vsel %vm468_vm1, %v2647_v8, 0 }
0x10df   :  { %v2541_v55 = vpack.c.bf16 %v2534_v49, %v2533_v21 }
0x10e1   :  { %8056 = vmatprep.mubr.msk.bf16.mxu1 %vm566_vm2, %v2541_v55 }
0x10e2   :  { %8057 = vmatmul.mubr.msk.bf16.vlgmr.msra.gmra.mrb[48].mxu1 %vm566_vm2, %v2542_v16 }
0x1101   :  { %v2524_v20 = vpop.xlane.xlu0 %2523 }
0x1102   :  { %8939 = vrcp.f32 %v2524_v20 }
0x1103   :  { %8941 = vrcp.f32 %v2515_v6 }
0x1104   :  { %8943 = vrcp.f32 %v2521_v52 }
0x1105   :  { %v2643_v12 = vpop.permute.xlu0 %2642 }
0x1106   :  { %8388 = vmatprep.subr.msk.bf16.mxu1 %vm468_vm1, %v2643_v12  ;;  %v2663_v48 = vsel %vm468_vm1, %v2643_v12, 0 }
0x1107   :  { %8065 = vmatpush3.bf16.xpose.msra.mxu1 %v2663_v48 }
0x1108   :  { %8389 = vmatprep.subr.msk.bf16.mxu1 %vm468_vm1, %v2645_v39 }
0x1109   :  { %v2635_v6 = vpop.permute.xlu0 %2634 }
0x110a   :  { %v2518_v3 = vpop.xlane.xlu1 %2517 }
0x110b   :  { %8945 = vrcp.f32 %v2518_v3 }
0x110c   :  { %v8940_v38 = vpop.eup %8939 }
0x110d   :  { %v8942_v9 = vpop.eup %8941  ;;  %v2540_v54 = vmul.f32 %v8940_v38, %v8928_v25 }
0x110e   :  { %v8944_v57 = vpop.eup %8943  ;;  %v2537_v21 = vmul.f32 %v8942_v9, %v10454_v51  ;;  %v2649_v60 = vpop.permute.xlu1 %2648 }
0x110f   :  { %8067 = vmatpush3.bf16.xpose.msra.mxu1 %v2666_v34  ;;  %v2539_v55 = vmul.f32 %v8944_v57, %v10449_v28  ;;  %v2672_v25 = vsel %vm468_vm1, %v2649_v60, 0 }
0x1110   :  { %8390 = vmatprep.subr.msk.bf16.mxu1 %vm468_vm1, %v2647_v8 }
0x1111   :  { %v2544_v52 = vpack.c.bf16 %v2540_v54, %v2539_v55 }
0x1112   :  { %v2637_v51 = vpop.permute.xlu1 %2636 }
0x1115   :  { %v8946_v40 = vpop.eup %8945 }
0x1116   :  { %v2538_v49 = vmul.f32 %v8946_v40, %v8930_v7  ;;  %v2639_v7 = vpop.permute.xlu0 %2638  ;;  %v2641_v28 = vpop.permute.xlu1 %2640 }
0x1117   :  { %8069 = vmatpush3.bf16.xpose.msra.mxu1 %v2669_v2 }
0x1118   :  { %8391 = vmatprep.subr.msk.bf16.mxu1 %vm468_vm1, %v2649_v60  ;;  %v2543_v16 = vpack.c.bf16 %v2538_v49, %v2537_v21 }
0x111a   :  { %8060 = vmatprep.mubr.msk.bf16.mxu1 %vm566_vm2, %v2543_v16 }
0x111b   :  { %8061 = vmatmul.mubr.msk.bf16.gmra.mrb[52].mxu1 %vm566_vm2, %v2544_v52 }
0x111c   :  { %8072 = vmatprep.mubr.msk.bf16.mxu1 %vm468_vm1, %v2635_v6 }
0x111f   :  { %8071 = vmatpush3.bf16.xpose.msra.mxu1 %v2672_v25 }
0x1126   :  { %8073 = vmatmul.mubr.msk.bf16.vlgmr.msra.gmra.mrb[56].mxu1 %vm468_vm1, %v2637_v51 }
0x1127   :  { %8076 = vmatprep.mubr.msk.bf16.mxu1 %vm468_vm1, %v2639_v7 }
0x112e   :  { %8077 = vmatmul.mubr.msk.bf16.gmra.mrb[60].mxu1 %vm468_vm1, %v2641_v28 }
0x11b5   :  { %v10497_v39 = vpop.f32.mrb[48].mxu1 }
0x11b6   :  { %v10499_v20 = vpop.f32.mrb[49].mxu1 }
0x11b7   :  { %v10501_v12 = vpop.f32.mrb[50].mxu1 }
0x11b8   :  { %v10505_v48 = vpop.f32.mrb[51].mxu1 }
0x11ee   :  { %v10509_v34 = vpop.f32.mrb[52].mxu1 }
0x11ef   :  { %12965 = vst [vmem:[#allocation20_spill] sm:$0xff] %v10509_v34  ;;  %v10511_v38 = vpop.f32.mrb[53].mxu1 }
0x11f0   :  { %12966 = vst [vmem:[#allocation21_spill] sm:$0xff] %v10511_v38  ;;  %v10513_v9 = vpop.f32.mrb[54].mxu1 }
0x11f1   :  { %12967 = vst [vmem:[#allocation22_spill] sm:$0xff] %v10513_v9  ;;  %v10517_v40 = vpop.f32.mrb[55].mxu1 }
0x11f2   :  { %12968 = vst [vmem:[#allocation23_spill] sm:$0xff] %v10517_v40 }
0x11f9   :  { %v8074_v2 = vpop.f32.mrb[56].mxu1 }
0x11fa   :  { %v2708_v21 = vpop.f32.mrb[57].mxu1  ;;  %v2741_v16 = vmul.f32 0.35355338, %v8074_v2 }
0x11fb   :  { %v2739_v49 = vmul.f32 0.35355338, %v2708_v21  ;;  %v8075_v60 = vpop.f32.mrb[58].mxu1 }
0x11fc   :  { %v2711_v55 = vpop.f32.mrb[59].mxu1  ;;  %v2742_v51 = vmul.f32 0.35355338, %v8075_v60  ;;  %v2753_v28 = vsel %vm566_vm2, %v2741_v16, -inf }
0x11fd   :  { %v2740_v52 = vmul.f32 0.35355338, %v2711_v55  ;;  %v2747_v6 = vsel %vm566_vm2, %v2739_v49, -inf }
0x11fe   :  { %2748 = vmax.xlane.f32.xlu0 %v2747_v6  ;;  %v2756_v2 = vsel %vm566_vm2, %v2742_v51, -inf }
0x11ff   :  { %v2750_v25 = vsel %vm566_vm2, %v2740_v52, -inf }
0x1200   :  { %2751 = vmax.xlane.f32.xlu1 %v2750_v25 }
0x1201   :  { %v8078_v7 = vpop.f32.mrb[60].mxu1 }
0x1202   :  { %2754 = vmax.xlane.f32.xlu0 %v2753_v28  ;;  %v2724_v57 = vpop.f32.mrb[61].mxu1  ;;  %v2745_v60 = vmul.f32 0.35355338, %v8078_v7 }
0x1203   :  { %v8079_v54 = vpop.f32.mrb[62].mxu1  ;;  %v2743_v3 = vmul.f32 0.35355338, %v2724_v57 }
0x1204   :  { %v2727_v8 = vpop.f32.mrb[63].mxu1  ;;  %v10527_v55 = vmul.f32 0.35355338, %v8079_v54 }
0x1205   :  { %v10524_v21 = vmul.f32 0.35355338, %v2727_v8  ;;  %v2759_v25 = vsel %vm566_vm2, %v2743_v3, -inf  ;;  %v2765_v8 = vsel %vm566_vm2, %v2745_v60, -inf }
0x1206   :  { %2757 = vmax.xlane.f32.xlu0 %v2756_v2  ;;  %v2768_v28 = vsel %vm566_vm2, %v10527_v55, -inf }
0x1207   :  { %v2762_v6 = vsel %vm566_vm2, %v10524_v21, -inf }
0x1208   :  { %2763 = vmax.xlane.f32.xlu1 %v2762_v6 }
0x120a   :  { %2760 = vmax.xlane.f32.xlu0 %v2759_v25 }
0x120c   :  { %2769 = vmax.xlane.f32.xlu1 %v2768_v28 }
0x120e   :  { %2766 = vmax.xlane.f32.xlu0 %v2765_v8 }
0x128b   :  { %v2749_v57 = vpop.xlane.xlu0 %2748 }
0x128c   :  { %v2771_v38 = vsub.f32 %v2739_v49, %v2749_v57 }
0x128d   :  { %v2752_v2 = vpop.xlane.xlu1 %2751 }
0x128e   :  { %v2779_v34 = vmul.f32 1.442695, %v2771_v38  ;;  %v2772_v9 = vsub.f32 %v2740_v52, %v2752_v2  ;;  %v12969_v2 = vpack.i.bf16 %v10017_v27, %v10011_v5  ;;  %v12972_v5 = vpack.i.bf16 %v10029_v15, %v10023_v45 }
0x128f   :  { %v2755_v54 = vpop.xlane.xlu0 %2754  ;;  %v12973_v27 = vpack.i.bf16 %v10133_v10, %v10127_v37  ;;  %v12975_v45 = vpack.i.bf16 %v10405_v63, %v10399_v46  ;;  %v12976_v37 = vpack.i.bf16 %v10505_v48, %v10499_v20  ;;  %v12977_v10 = vpack.i.bf16 %v10417_v33, %v10411_v24 }
0x1290   :  { %v2773_v40 = vsub.f32 %v2741_v16, %v2755_v54  ;;  %v2781_v25 = vmul.f32 1.442695, %v2772_v9  ;;  %v12980_v46 = vpack.i.bf16 %v10209_v47, %v10205_v11  ;;  %v12981_v63 = vpack.i.bf16 %v10025_v30, %v10021_v62  ;;  %v12986_v30 = vld [vmem:[#allocation19_spill] sm:$0xff] }
0x1291   :  { %v12985_v62 = vpack.i.bf16 %v10501_v12, %v10497_v39 }
0x1292   :  { %v2783_v14 = vmul.f32 1.442695, %v2773_v40 }
0x1293   :  { %v2758_v6 = vpop.xlane.xlu0 %2757 }
0x1294   :  { %8947 = vpow2.f32 %v2783_v14  ;;  %v2774_v7 = vsub.f32 %v2742_v51, %v2758_v6 }
0x1295   :  { %8949 = vpow2.f32 %v2779_v34  ;;  %v2764_v51 = vpop.xlane.xlu1 %2763 }
0x1296   :  { %v2785_v17 = vmul.f32 1.442695, %v2774_v7 }
0x1297   :  { %v2761_v4 = vpop.xlane.xlu0 %2760 }
0x1298   :  { %8951 = vpow2.f32 %v2785_v17  ;;  %v2775_v28 = vsub.f32 %v2743_v3, %v2761_v4 }
0x1299   :  { %8953 = vpow2.f32 %v2781_v25 }
0x129a   :  { %v2787_v49 = vmul.f32 1.442695, %v2775_v28 }
0x129b   :  { %v2767_v22 = vpop.xlane.xlu0 %2766 }
0x129c   :  { %v2777_v8 = vsub.f32 %v2745_v60, %v2767_v22  ;;  %v2770_v60 = vpop.xlane.xlu1 %2769 }
0x129d   :  { %v2778_v54 = vsub.f32 %v10527_v55, %v2770_v60 }
0x129e   :  { %v10535_v53 = vpop.eup %8947  ;;  %v2791_v57 = vmul.f32 1.442695, %v2777_v8 }
0x129f   :  { %v2801_v38 = vsel %vm566_vm2, %v10535_v53, 0.0  ;;  %v10539_v40 = vpop.eup %8949  ;;  %v2793_v6 = vmul.f32 1.442695, %v2778_v54 }
0x12a0   :  { %8955 = vpow2.f32 %v2791_v57  ;;  %2802 = vadd.xlane.f32.xlu0 %v2801_v38  ;;  %v2795_v17 = vsel %vm566_vm2, %v10539_v40, 0.0  ;;  %v12989_v38 = vld [vmem:[#allocation4_spill] sm:$0xff] }
0x12a1   :  { %8957 = vpow2.f32 %v2787_v49  ;;  %v12988_v49 = vld [vmem:[#allocation6_spill] sm:$0xff] }
0x12a2   :  { %v10541_v14 = vpop.eup %8951  ;;  %8959 = vpow2.f32 %v2793_v6 }
0x12a3   :  { %v2804_v4 = vsel %vm566_vm2, %v10541_v14, 0.0  ;;  %v10547_v22 = vpop.eup %8953 }
0x12a4   :  { %2796 = vadd.xlane.f32.xlu0 %v2795_v17  ;;  %2805 = vadd.xlane.f32.xlu1 %v2804_v4  ;;  %v2798_v3 = vsel %vm566_vm2, %v10547_v22, 0.0 }
0x12a8   :  { %2799 = vadd.xlane.f32.xlu1 %v2798_v3 }
0x12aa   :  { %v10551_v34 = vpop.eup %8955 }
0x12ab   :  { %v2813_v9 = vsel %vm566_vm2, %v10551_v34, 0.0  ;;  %v10555_v16 = vpop.eup %8957 }
0x12ac   :  { %2814 = vadd.xlane.f32.xlu0 %v2813_v9  ;;  %v2807_v52 = vsel %vm566_vm2, %v10555_v16, 0.0 }
0x12b0   :  { %2808 = vadd.xlane.f32.xlu0 %v2807_v52 }
0x12b9   :  { %2841 = vrot.lane.b32.xlu1 %v9922_v18, %s9391_s16  ;;  %v12970_v18 = vpack.i.bf16 %v10121_v29, %v10115_v50  ;;  %v10587_v50 = vpop.eup %8959  ;;  %v12974_v29 = vpack.i.bf16 %v10225_v59, %v10219_v56  ;;  %v12978_v56 = vpack.i.bf16 %v10013_v23, %v10009_v26  ;;  %v12979_v59 = vpack.i.bf16 %v10117_v42, %v10113_v31 }
0x12ba   :  { %v12983_v26 = vpack.i.bf16 %v10221_v0, %v10217_v32  ;;  %v12984_v23 = vpack.i.bf16 %v10401_v35, %v10397_v13  ;;  %v12987_v31 = vpack.i.bf16 %v10413_v36, %v12986_v30 }
0x12bd   :  { %2843 = vrot.lane.b32.xlu1 %v9930_v44, %s9391_s16  ;;  %v2776_v44 = vsub.f32 %v10524_v21, %v2764_v51 }
0x12bf   :  { %v2789_v7 = vmul.f32 1.442695, %v2776_v44 }
0x12c1   :  { %8961 = vpow2.f32 %v2789_v7  ;;  %v12990_v7 = vld [vmem:[#allocation10_spill] sm:$0xff] }
0x12c6   :  { %2839 = vrot.lane.b32.xlu0 %v9924_v19, %s9391_s16  ;;  %v12971_v19 = vpack.i.bf16 %v10213_v1, %v10207_v43  ;;  %v2816_v43 = vsel %vm566_vm2, %v10587_v50, 0.0 }
0x12ca   :  { %8426 = vrot.lane.b32.xlu0 %v12969_v2, %s9392_s17 }
0x12cb   :  { %v10595_v1 = vpop.eup %8961 }
0x12cc   :  { %v2810_v15 = vsel %vm566_vm2, %v10595_v1, 0.0 }
0x12ce   :  { %8436 = vrot.lane.b32.xlu0 %v12970_v18, %s9393_s18 }
0x12d2   :  { %8446 = vrot.lane.b32.xlu0 %v12971_v19, %s9394_s19 }
0x12d6   :  { %8456 = vrot.lane.b32.xlu0 %v12972_v5, %s9392_s17 }
0x12da   :  { %8466 = vrot.lane.b32.xlu0 %v12973_v27, %s9393_s18  ;;  %v12991_v27 = vld [vmem:[#allocation8_spill] sm:$0xff] }
0x12de   :  { %8476 = vrot.lane.b32.xlu0 %v12974_v29, %s9394_s19 }
0x12e1   :  { %2817 = vadd.xlane.f32.xlu1 %v2816_v43 }
0x12e2   :  { %8486 = vrot.lane.b32.xlu0 %v12975_v45, %s9392_s17 }
0x12e5   :  { %2811 = vadd.xlane.f32.xlu1 %v2810_v15 }
0x12e6   :  { %8496 = vrot.lane.b32.xlu0 %v12976_v37, %s9393_s18 }
0x12ea   :  { %8506 = vrot.lane.b32.xlu0 %v12977_v10, %s9392_s17 }
0x12f6   :  { %2845 = vrot.lane.b32.xlu1 %v9928_v41, %s9391_s16  ;;  %v12982_v41 = vpack.i.bf16 %v10129_v61, %v10125_v58 }
0x12fa   :  { %8431 = vrot.lane.b32.xlu1 %v12978_v56, %s9392_s17 }
0x12fe   :  { %8441 = vrot.lane.b32.xlu1 %v12979_v59, %s9393_s18 }
0x1302   :  { %8451 = vrot.lane.b32.xlu1 %v12980_v46, %s9394_s19 }
0x1306   :  { %8461 = vrot.lane.b32.xlu1 %v12981_v63, %s9392_s17 }
0x130a   :  { %8471 = vrot.lane.b32.xlu1 %v12982_v41, %s9393_s18 }
0x130e   :  { %8481 = vrot.lane.b32.xlu1 %v12983_v26, %s9394_s19 }
0x1312   :  { %8491 = vrot.lane.b32.xlu1 %v12984_v23, %s9392_s17 }
0x1316   :  { %8501 = vrot.lane.b32.xlu1 %v12985_v62, %s9393_s18  ;;  %v8667_v62 = vld [vmem:[%s12887_s3] sm:$0xff]  }
0x131a   :  { %8511 = vrot.lane.b32.xlu1 %v12987_v31, %s9392_s17 }
0x132d   :  { %v2803_v42 = vpop.xlane.xlu0 %2802 }
0x1331   :  { %v2797_v58 = vpop.xlane.xlu0 %2796  ;;  %v2806_v61 = vpop.xlane.xlu1 %2805 }
0x1332   :  { %8963 = vrcp.f32 %v2797_v58  ;;  %v8668_v58 = vld [vmem:[%s12887_s3 + $0x8] sm:$0xff]  }
0x1335   :  { %v2800_v11 = vpop.xlane.xlu1 %2799 }
0x1336   :  { %8965 = vrcp.f32 %v2800_v11 }
0x1337   :  { %8967 = vrcp.f32 %v2806_v61 }
0x1338   :  { %8969 = vrcp.f32 %v2803_v42 }
0x1339   :  { %v2815_v47 = vpop.xlane.xlu0 %2814  ;;  %v2842_v35 = vpop.permute.xlu1 %2841 }
0x133c   :  { %v8964_v0 = vpop.eup %8963 }
0x133d   :  { %v2809_v32 = vpop.xlane.xlu0 %2808  ;;  %v2827_v33 = vmul.f32 %v8964_v0, %v10539_v40  ;;  %v2844_v12 = vpop.permute.xlu1 %2843 }
0x1340   :  { %v8966_v13 = vpop.eup %8965 }
0x1341   :  { %v2840_v24 = vpop.permute.xlu0 %2839  ;;  %v2828_v39 = vmul.f32 %v8966_v13, %v10547_v22  ;;  %v8968_v63 = vpop.eup %8967 }
0x1342   :  { %8080 = vmatprep.subr.bf16.mxu0 %v2840_v24  ;;  %v8970_v26 = vpop.eup %8969  ;;  %v2830_v23 = vmul.f32 %v8968_v63, %v10541_v14 }
0x1343   :  { %8081 = vmatpush3.bf16.msra.mxu0 %v2840_v24  ;;  %v2835_v36 = vpack.c.bf16 %v2828_v39, %v2827_v33  ;;  %v2829_v31 = vmul.f32 %v8970_v26, %v10535_v53  ;;  %v12999_v26 = vld [vmem:[#allocation23_spill] sm:$0xff] }
0x1344   :  { %8082 = vmatprep.subr.bf16.mxu0 %v2842_v35 }
0x1345   :  { %v8427_v20 = vpop.permute.xlu0 %8426  ;;  %8088 = vmatprep.mubr.msk.bf16.mxu0 %vm566_vm2, %v2835_v36  ;;  %v2836_v42 = vpack.c.bf16 %v2830_v23, %v2829_v31  ;;  %v13000_v23 = vld [vmem:[#allocation21_spill] sm:$0xff] }
0x1346   :  { %v8429_v21 = vunpack.i.h.bf16 %v8427_v20  ;;  %v8428_v55 = vunpack.i.l.bf16 %v8427_v20 }
0x1347   :  { %8083 = vmatpush3.bf16.msra.mxu0 %v2842_v35 }
0x1348   :  { %8084 = vmatprep.subr.bf16.mxu0 %v2844_v12  ;;  %v1727_v57 = vsel %vm468_vm1, %v12988_v49, %v8429_v21  ;;  %v1726_v40 = vsel %vm468_vm1, %v12989_v38, %v8428_v55  ;;  %v12992_v55 = vld [vmem:[#allocation5_spill] sm:$0xff] }
0x1349   :  { %v8437_v48 = vpop.permute.xlu0 %8436 }
0x134a   :  { %v8439_v25 = vunpack.i.h.bf16 %v8437_v48  ;;  %v8438_v28 = vunpack.i.l.bf16 %v8437_v48 }
0x134b   :  { %8085 = vmatpush3.bf16.msra.mxu0 %v2844_v12 }
0x134c   :  { %v1735_v22 = vsel %vm1734_vm3, %v1726_v40, %v8438_v28  ;;  %v1736_v3 = vsel %vm1734_vm3, %v1727_v57, %v8439_v25  ;;  %v12993_v25 = vld [vmem:[#allocation3_spill] sm:$0xff] }
0x134d   :  { %v8447_v8 = vpop.permute.xlu0 %8446 }
0x134e   :  { %v8449_v17 = vunpack.i.h.bf16 %v8447_v8  ;;  %v8448_v4 = vunpack.i.l.bf16 %v8447_v8 }
0x1350   :  { %v10659_v9 = vsel %vm1743_vm4, %v1735_v22, %v8448_v4  ;;  %v10662_v52 = vsel %vm1743_vm4, %v1736_v3, %v8449_v17 }
0x1351   :  { %v8457_v51 = vpop.permute.xlu0 %8456  ;;  %v3048_v60 = vpack.c.bf16 %v10662_v52, %v10659_v9  ;;  %v12995_v52 = vld [vmem:[#allocation7_spill] sm:$0xff] }
0x1352   :  { %v8459_v54 = vunpack.i.h.bf16 %v8457_v51  ;;  %v8458_v18 = vunpack.i.l.bf16 %v8457_v51 }
0x1354   :  { %v1731_v5 = vsel %vm468_vm1, %v12990_v7, %v8459_v54  ;;  %v1730_v29 = vsel %vm468_vm1, %v12991_v27, %v8458_v18  ;;  %v12994_v54 = vld [vmem:[#allocation9_spill] sm:$0xff] }
0x1355   :  { %v8467_v2 = vpop.permute.xlu0 %8466 }
0x1356   :  { %v8469_v44 = vunpack.i.h.bf16 %v8467_v2  ;;  %v8468_v6 = vunpack.i.l.bf16 %v8467_v2 }
0x1358   :  { %v1739_v15 = vsel %vm1734_vm3, %v1730_v29, %v8468_v6  ;;  %v1740_v37 = vsel %vm1734_vm3, %v1731_v5, %v8469_v44 }
0x1359   :  { %v8477_v19 = vpop.permute.xlu0 %8476 }
0x135a   :  { %v8479_v43 = vunpack.i.h.bf16 %v8477_v19  ;;  %v8478_v45 = vunpack.i.l.bf16 %v8477_v19 }
0x135c   :  { %v10673_v10 = vsel %vm1743_vm4, %v1739_v15, %v8478_v45  ;;  %v1749_v56 = vsel %vm1743_vm4, %v1740_v37, %v8479_v43 }
0x135d   :  { %v3050_v59 = vpack.c.bf16 %v1749_v56, %v10673_v10 }
0x136e   :  { %v2818_v46 = vpop.xlane.xlu1 %2817 }
0x136f   :  { %8971 = vrcp.f32 %v2818_v46  ;;  %v12997_v46 = vld [vmem:[#allocation20_spill] sm:$0xff] }
0x1370   :  { %8973 = vrcp.f32 %v2809_v32 }
0x1371   :  { %8975 = vrcp.f32 %v2815_v47 }
0x1372   :  { %v2812_v41 = vpop.xlane.xlu1 %2811 }
0x1373   :  { %8977 = vrcp.f32 %v2812_v41 }
0x1376   :  { %v2846_v30 = vpop.permute.xlu1 %2845 }
0x1377   :  { %8086 = vmatprep.subr.bf16.mxu0 %v2846_v30 }
0x1378   :  { %8087 = vmatpush3.bf16.msra.mxu0 %v2846_v30 }
0x1379   :  { %8096 = vmatprep.subr.bf16.mxu0 %v8667_v62  ;;  %v8972_v61 = vpop.eup %8971 }
0x137a   :  { %v8432_v11 = vpop.permute.xlu1 %8431  ;;  %v8974_v47 = vpop.eup %8973  ;;  %v2834_v0 = vmul.f32 %v8972_v61, %v10587_v50 }
0x137b   :  { %8089 = vmatmul.mubr.msk.bf16.vlgmr.msra.gmra.mrb[72].mxu0 %vm566_vm2, %v2836_v42  ;;  %v8976_v14 = vpop.eup %8975  ;;  %v2831_v13 = vmul.f32 %v8974_v47, %v10555_v16  ;;  %v8434_v24 = vunpack.i.h.bf16 %v8432_v11  ;;  %v8433_v33 = vunpack.i.l.bf16 %v8432_v11 }
0x137c   :  { %8097 = vmatpush3.bf16.msra.mxu0 %v8667_v62  ;;  %v2833_v39 = vmul.f32 %v8976_v14, %v10551_v34  ;;  %v13001_v62 = vpack.i.bf16 %v12999_v26, %v13000_v23  ;;  %v13011_v26 = vld [vmem:[#allocation12_spill] sm:$0xff] }
0x137d   :  { %v8978_v32 = vpop.eup %8977  ;;  %8098 = vmatprep.subr.bf16.mxu0 %v8668_v58  ;;  %v1729_v50 = vsel %vm468_vm1, %v12992_v55, %v8434_v24  ;;  %v1728_v16 = vsel %vm468_vm1, %v12993_v25, %v8433_v33  ;;  %v10731_v33 = vld [vmem:[%s12886_s7] sm:$0xff]  ;;  %v9365_v55 = vld [vmem:[%s12884_s0 + $0x10] sm:$0xff] }
0x137e   :  { %v8442_v53 = vpop.permute.xlu1 %8441  ;;  %v2832_v35 = vmul.f32 %v8978_v32, %v10595_v1  ;;  %v2838_v48 = vpack.c.bf16 %v2834_v0, %v2833_v39 }
0x137f   :  { %v8444_v36 = vunpack.i.h.bf16 %v8442_v53  ;;  %v8443_v20 = vunpack.i.l.bf16 %v8442_v53 }
0x1380   :  { %v2837_v12 = vpack.c.bf16 %v2832_v35, %v2831_v13  ;;  %8099 = vmatpush3.bf16.msra.mxu0 %v8668_v58  ;;  %v13002_v13 = vld [vmem:[#allocation2_spill] sm:$0xff] }
0x1381   :  { %v1737_v34 = vsel %vm1734_vm3, %v1728_v16, %v8443_v20  ;;  %v1738_v8 = vsel %vm1734_vm3, %v1729_v50, %v8444_v36  ;;  %v3058_v35 = vsub.s32 2, %v13002_v13  ;;  %v9366_v16 = vld [vmem:[%s12884_s0 + $0x8] sm:$0xff] }
0x1382   :  { %8092 = vmatprep.mubr.msk.bf16.mxu0 %vm566_vm2, %v2837_v12  ;;  %v8452_v21 = vpop.permute.xlu1 %8451  ;;  %v9364_v12 = vld [vmem:[%s12884_s0] sm:$0xff] }
0x1383   :  { %v8454_v28 = vunpack.i.h.bf16 %v8452_v21  ;;  %v8453_v1 = vunpack.i.l.bf16 %v8452_v21  ;;  %8093 = vmatmul.mubr.msk.bf16.gmra.mrb[76].mxu0 %vm566_vm2, %v2838_v48  ;;  %v10734_v39 = vrot.slane %v10731_v33, %v3058_v35 }
0x1384   :  { %8100 = vmatprep.mubr.msk.bf16.mxu0 %vm53_vm0, %v3048_v60 }
0x1385   :  { %v1746_v49 = vsel %vm1743_vm4, %v1737_v34, %v8453_v1  ;;  %v1747_v57 = vsel %vm1743_vm4, %v1738_v8, %v8454_v28  ;;  %v9367_v8 = vld [vmem:[%s12884_s0 + $0x18] sm:$0xff] }
0x1386   :  { %v3049_v38 = vpack.c.bf16 %v1747_v57, %v1746_v49  ;;  %v8462_v40 = vpop.permute.xlu1 %8461 }
0x1387   :  { %v8464_v4 = vunpack.i.h.bf16 %v8462_v40  ;;  %v8463_v22 = vunpack.i.l.bf16 %v8462_v40 }
0x1389   :  { %v1733_v9 = vsel %vm468_vm1, %v12994_v54, %v8464_v4  ;;  %v1732_v60 = vsel %vm468_vm1, %v12995_v52, %v8463_v22 }
0x138a   :  { %v8472_v17 = vpop.permute.xlu1 %8471 }
0x138b   :  { %8101 = vmatmul.mubr.msk.bf16.vlgmr.msra.gmra.mrb[80].mxu0 %vm53_vm0, %v3049_v38  ;;  %v8474_v3 = vunpack.i.h.bf16 %v8472_v17  ;;  %v8473_v51 = vunpack.i.l.bf16 %v8472_v17  ;;  %v9368_v17 = vld [vmem:[%s12884_s0 + $0x28] sm:$0xff] }
0x138c   :  { %8104 = vmatprep.mubr.msk.bf16.mxu0 %vm53_vm0, %v3050_v59  ;;  %v12996_v59 = vld [vmem:[#allocation22_spill] sm:$0xff] }
0x138d   :  { %v1741_v6 = vsel %vm1734_vm3, %v1732_v60, %v8473_v51  ;;  %v1742_v19 = vsel %vm1734_vm3, %v1733_v9, %v8474_v3  ;;  %v12998_v63 = vpack.i.bf16 %v12996_v59, %v12997_v46  ;;  %v9370_v9 = vld [vmem:[%s12884_s0 + $0x38] sm:$0xff] }
0x138e   :  { %v8482_v2 = vpop.permute.xlu1 %8481 }
0x138f   :  { %v8484_v18 = vunpack.i.h.bf16 %v8482_v2  ;;  %v8483_v44 = vunpack.i.l.bf16 %v8482_v2  ;;  %v9369_v2 = vld [vmem:[%s12884_s0 + $0x20] sm:$0xff] }
0x1391   :  { %v1750_v7 = vsel %vm1743_vm4, %v1741_v6, %v8483_v44  ;;  %v1751_v5 = vsel %vm1743_vm4, %v1742_v19, %v8484_v18  ;;  %v9371_v18 = vld [vmem:[%s12884_s0 + $0x30] sm:$0xff] }
0x1392   :  { %v3051_v27 = vpack.c.bf16 %v1751_v5, %v1750_v7  ;;  %v8492_v5 = vpop.permute.xlu1 %8491 }
0x1393   :  { %v8494_v59 = vunpack.i.h.bf16 %v8492_v5  ;;  %v8493_v46 = vunpack.i.l.bf16 %v8492_v5  ;;  %v13017_v5 = vld [vmem:[#allocation17_spill] sm:$0xff] }
0x1394   :  { %8105 = vmatmul.mubr.msk.bf16.gmra.mrb[84].mxu0 %vm53_vm0, %v3051_v27  ;;  %v8487_v27 = vpop.permute.xlu0 %8486 }
0x144e   :  { %v8090_v29 = vpop.f32.mrb[72].mxu0 }
0x144f   :  { %v2897_v43 = vpop.f32.mrb[73].mxu0 }
0x1450   :  { %v8091_v45 = vpop.f32.mrb[74].mxu0 }
0x1451   :  { %v8515_v15 = vpack.i.bf16 %v8091_v45, %v8090_v29  ;;  %v2900_v37 = vpop.f32.mrb[75].mxu0  ;;  %v8502_v29 = vpop.permute.xlu1 %8501  ;;  %v8488_v45 = vunpack.i.l.bf16 %v8487_v27 }
0x1452   :  { %v8520_v10 = vpack.i.bf16 %v2900_v37, %v2897_v43  ;;  %v8497_v43 = vpop.permute.xlu0 %8496 }
0x1453   :  { %8516 = vrot.lane.b32.xlu1 %v8515_v15, %s9394_s19  ;;  %v8489_v15 = vunpack.i.h.bf16 %v8487_v27  ;;  %v8498_v37 = vunpack.i.l.bf16 %v8497_v43  ;;  %v3024_v23 = vsel %vm468_vm1, %v13011_v26, %v8488_v45 }
0x1454   :  { %8521 = vrot.lane.b32.xlu0 %v8520_v10, %s9394_s19 }
0x1455   :  { %v8512_v10 = vpop.permute.xlu1 %8511 }
0x1456   :  { %v8094_v56 = vpop.f32.mrb[76].mxu0 }
0x1457   :  { %8531 = vrot.lane.b32.xlu1 %v12998_v63, %s9393_s18  ;;  %v2913_v41 = vpop.f32.mrb[77].mxu0  ;;  %v8504_v63 = vunpack.i.h.bf16 %v8502_v29 }
0x1458   :  { %8526 = vrot.lane.b32.xlu0 %v13001_v62, %s9393_s18  ;;  %v8095_v30 = vpop.f32.mrb[78].mxu0  ;;  %v8499_v62 = vunpack.i.h.bf16 %v8497_v43 }
0x1459   :  { %v8540_v31 = vpack.i.bf16 %v8095_v30, %v8094_v56  ;;  %v2916_v42 = vpop.f32.mrb[79].mxu0  ;;  %v8507_v56 = vpop.permute.xlu0 %8506  ;;  %v13012_v30 = vld [vmem:[#allocation14_spill] sm:$0xff] }
0x145a   :  { %v8535_v58 = vpack.i.bf16 %v2916_v42, %v2913_v41  ;;  %v8503_v41 = vunpack.i.l.bf16 %v8502_v29  ;;  %v3032_v42 = vsel %vm1734_vm3, %v3024_v23, %v8498_v37  ;;  %v13018_v29 = vld [vmem:[#allocation15_spill] sm:$0xff] }
0x145b   :  { %8541 = vrot.lane.b32.xlu1 %v8540_v31, %s9394_s19  ;;  %v3025_v31 = vsel %vm468_vm1, %v13012_v30, %v8489_v15 }
0x145c   :  { %8536 = vrot.lane.b32.xlu0 %v8535_v58, %s9394_s19 }
0x145e   :  { %v8102_v61 = vpop.f32.mrb[80].mxu0 }
0x145f   :  { %v3130_v11 = vpop.f32.mrb[81].mxu0  ;;  %v3139_v20 = vadd.f32 %v8102_v61, %v10734_v39  ;;  %v13013_v61 = vld [vmem:[#allocation13_spill] sm:$0xff] }
0x1460   :  { %v8103_v47 = vpop.f32.mrb[82].mxu0  ;;  %v3131_v36 = vadd.f32 %v3130_v11, %v10734_v39  ;;  %v3027_v11 = vsel %vm468_vm1, %v13013_v61, %v8494_v59 }
0x1461   :  { %v3133_v14 = vpop.f32.mrb[83].mxu0  ;;  %v10747_v50 = vadd.f32 %v9365_v55, %v3139_v20  ;;  %v3142_v25 = vadd.f32 %v8103_v47, %v10734_v39  ;;  %v13014_v47 = vld [vmem:[#allocation11_spill] sm:$0xff] }
0x1462   :  { %v10741_v48 = vadd.f32 %v9364_v12, %v3131_v36  ;;  %v3134_v21 = vadd.f32 %v3133_v14, %v10734_v39  ;;  %v3026_v14 = vsel %vm468_vm1, %v13014_v47, %v8493_v46  ;;  %v3033_v12 = vsel %vm1734_vm3, %v3025_v31, %v8499_v62 }
0x1463   :  { %13004 = vst [vmem:[#allocation6_spill] sm:$0xff] %v10747_v50  ;;  %v10761_v49 = vadd.f32 %v9367_v8, %v3142_v25  ;;  %v3215_v57 = vsel %vm53_vm0, %v10747_v50, 0.0  ;;  %v3034_v35 = vsel %vm1734_vm3, %v3026_v14, %v8503_v41 }
0x1464   :  { %13003 = vst [vmem:[#allocation19_spill] sm:$0xff] %v10741_v48  ;;  %v10753_v28 = vadd.f32 %v9366_v16, %v3134_v21  ;;  %v3209_v34 = vsel %vm53_vm0, %v10741_v48, 0.0  ;;  %v8509_v21 = vunpack.i.h.bf16 %v8507_v56  ;;  %v8508_v16 = vunpack.i.l.bf16 %v8507_v56 }
0x1465   :  { %13006 = vst [vmem:[#allocation10_spill] sm:$0xff] %v10761_v49  ;;  %v3218_v3 = vsel %vm53_vm0, %v10761_v49, 0.0 }
0x1466   :  { %13005 = vst [vmem:[#allocation4_spill] sm:$0xff] %v10753_v28  ;;  %v3212_v22 = vsel %vm53_vm0, %v10753_v28, 0.0 }
0x1467   :  { %v8106_v32 = vpop.f32.mrb[84].mxu0 }
0x1468   :  { %v3146_v0 = vpop.f32.mrb[85].mxu0  ;;  %v3155_v51 = vadd.f32 %v8106_v32, %v10734_v39 }
0x1469   :  { %v8107_v53 = vpop.f32.mrb[86].mxu0  ;;  %v3147_v38 = vadd.f32 %v3146_v0, %v10734_v39 }
0x146a   :  { %v3149_v24 = vpop.f32.mrb[87].mxu0  ;;  %v3158_v40 = vadd.f32 %v8107_v53, %v10734_v39  ;;  %v10792_v44 = vadd.f32 %v9371_v18, %v3155_v51 }
0x146b   :  { %v3150_v1 = vadd.f32 %v3149_v24, %v10734_v39  ;;  %v10780_v54 = vadd.f32 %v9369_v2, %v3147_v38  ;;  %v3035_v24 = vsel %vm1734_vm3, %v3027_v11, %v8504_v63  ;;  %v8514_v38 = vunpack.i.h.bf16 %v8512_v10 }
0x146c   :  { %v10785_v52 = vadd.f32 %v9370_v9, %v3158_v40  ;;  %13010 = vst [vmem:[#allocation9_spill] sm:$0xff] %v10792_v44  ;;  %v3227_v7 = vsel %vm53_vm0, %v10792_v44, 0.0  ;;  %v8513_v40 = vunpack.i.l.bf16 %v8512_v10 }
0x146d   :  { %v10770_v4 = vadd.f32 %v9368_v17, %v3150_v1  ;;  %13008 = vst [vmem:[#allocation5_spill] sm:$0xff] %v10780_v54  ;;  %v3221_v19 = vsel %vm53_vm0, %v10780_v54, 0.0  ;;  %v3031_v27 = vsel %vm468_vm1, %v13017_v5, %v8514_v38 }
0x146e   :  { %13009 = vst [vmem:[#allocation3_spill] sm:$0xff] %v10785_v52  ;;  %v3230_v6 = vsel %vm53_vm0, %v10785_v52, 0.0  ;;  %v3030_v43 = vsel %vm468_vm1, %v13018_v29, %v8513_v40 }
0x146f   :  { %13007 = vst [vmem:[#allocation8_spill] sm:$0xff] %v10770_v4  ;;  %v3224_v60 = vsel %vm53_vm0, %v10770_v4, 0.0 }
0x147b   :  { %3210 = vadd.xlane.f32.xlu0 %v3209_v34 }
0x147f   :  { %3213 = vadd.xlane.f32.xlu1 %v3212_v22  ;;  %3216 = vadd.xlane.f32.xlu0 %v3215_v57 }
0x1483   :  { %3225 = vadd.xlane.f32.xlu1 %v3224_v60  ;;  %3219 = vadd.xlane.f32.xlu0 %v3218_v3  ;;  %v13015_v60 = vld [vmem:[#allocation18_spill] sm:$0xff] }
0x1484   :  { %v3029_v18 = vsel %vm468_vm1, %v13015_v60, %v8509_v21 }
0x1487   :  { %3231 = vadd.xlane.f32.xlu1 %v3230_v6  ;;  %3222 = vadd.xlane.f32.xlu0 %v3221_v19  ;;  %v13016_v6 = vld [vmem:[#allocation16_spill] sm:$0xff] }
0x1488   :  { %v3028_v19 = vsel %vm468_vm1, %v13016_v6, %v8508_v16 }
0x148b   :  { %3228 = vadd.xlane.f32.xlu0 %v3227_v7 }
0x14c5   :  { %v8517_v58 = vpop.permute.xlu1 %8516 }
0x14c6   :  { %v8519_v32 = vunpack.i.h.bf16 %v8517_v58  ;;  %v8518_v0 = vunpack.i.l.bf16 %v8517_v58  ;;  %v8522_v53 = vpop.permute.xlu0 %8521 }
0x14c7   :  { %v8524_v36 = vunpack.i.h.bf16 %v8522_v53  ;;  %v8523_v20 = vunpack.i.l.bf16 %v8522_v53  ;;  %v9372_v53 = vld [vmem:[%s12884_s0 + $0x50] sm:$0xff] }
0x14c8   :  { %v3042_v55 = vsel %vm1743_vm4, %v3034_v35, %v8518_v0  ;;  %v3043_v25 = vsel %vm1743_vm4, %v3035_v24, %v8519_v32 }
0x14c9   :  { %v3041_v1 = vsel %vm1743_vm4, %v3033_v12, %v8524_v36  ;;  %v3040_v34 = vsel %vm1743_vm4, %v3032_v42, %v8523_v20  ;;  %v8532_v8 = vpop.permute.xlu1 %8531  ;;  %v3053_v57 = vpack.c.bf16 %v3043_v25, %v3042_v55  ;;  %v9373_v12 = vld [vmem:[%s12884_s0 + $0x40] sm:$0xff]  ;;  %v9374_v55 = vld [vmem:[%s12884_s0 + $0x58] sm:$0xff] }
0x14ca   :  { %v8527_v17 = vpop.permute.xlu0 %8526  ;;  %v3052_v22 = vpack.c.bf16 %v3041_v1, %v3040_v34  ;;  %v8534_v3 = vunpack.i.h.bf16 %v8532_v8  ;;  %v8533_v51 = vunpack.i.l.bf16 %v8532_v8  ;;  %v9375_v34 = vld [vmem:[%s12884_s0 + $0x48] sm:$0xff] }
0x14cb   :  { %v8529_v2 = vunpack.i.h.bf16 %v8527_v17  ;;  %v8528_v9 = vunpack.i.l.bf16 %v8527_v17 }
0x14cc   :  { %8108 = vmatprep.mubr.msk.bf16.mxu0 %vm53_vm0, %v3052_v22  ;;  %v3038_v10 = vsel %vm1734_vm3, %v3030_v43, %v8533_v51  ;;  %v3039_v56 = vsel %vm1734_vm3, %v3031_v27, %v8534_v3 }
0x14cd   :  { %v8542_v7 = vpop.permute.xlu1 %8541  ;;  %8109 = vmatmul.mubr.msk.bf16.gmra.mrb[88].mxu0 %vm53_vm0, %v3053_v57  ;;  %v3037_v63 = vsel %vm1734_vm3, %v3029_v18, %v8529_v2  ;;  %v3036_v41 = vsel %vm1734_vm3, %v3028_v19, %v8528_v9  ;;  %v9376_v18 = vld [vmem:[%s12884_s0 + $0x70] sm:$0xff] }
0x14ce   :  { %v8544_v45 = vunpack.i.h.bf16 %v8542_v7  ;;  %v8543_v15 = vunpack.i.l.bf16 %v8542_v7  ;;  %v8537_v37 = vpop.permute.xlu0 %8536 }
0x14cf   :  { %v8539_v59 = vunpack.i.h.bf16 %v8537_v37  ;;  %v8538_v46 = vunpack.i.l.bf16 %v8537_v37 }
0x14d0   :  { %v3046_v26 = vsel %vm1743_vm4, %v3038_v10, %v8543_v15  ;;  %v3047_v23 = vsel %vm1743_vm4, %v3039_v56, %v8544_v45  ;;  %v9377_v15 = vld [vmem:[%s12884_s0 + $0x60] sm:$0xff]  ;;  %v9378_v10 = vld [vmem:[%s12884_s0 + $0x78] sm:$0xff] }
0x14d1   :  { %v3045_v62 = vsel %vm1743_vm4, %v3037_v63, %v8539_v59  ;;  %v3044_v30 = vsel %vm1743_vm4, %v3036_v41, %v8538_v46  ;;  %v3055_v31 = vpack.c.bf16 %v3047_v23, %v3046_v26  ;;  %v9379_v41 = vld [vmem:[%s12884_s0 + $0x68] sm:$0xff] }
0x14d2   :  { %v3054_v42 = vpack.c.bf16 %v3045_v62, %v3044_v30 }
0x14d4   :  { %8112 = vmatprep.mubr.msk.bf16.mxu0 %vm53_vm0, %v3054_v42 }
0x14d5   :  { %8113 = vmatmul.mubr.msk.bf16.gmra.mrb[92].mxu0 %vm53_vm0, %v3055_v31 }
0x1508   :  { %v3211_v58 = vpop.xlane.xlu0 %3210 }
0x1509   :  { %v3257_v38 = vmul.f32 0.03125, %v3211_v58 }
0x150b   :  { %v10877_v27 = vsub.f32 %v10741_v48, %v3257_v38 }
0x150c   :  { %v3217_v61 = vpop.xlane.xlu0 %3216  ;;  %v3214_v40 = vpop.xlane.xlu1 %3213 }
0x150d   :  { %v3258_v60 = vmul.f32 0.03125, %v3214_v40  ;;  %v3259_v45 = vmul.f32 0.03125, %v3217_v61  ;;  %v3289_v42 = vmul.f32 %v10877_v27, %v10877_v27 }
0x150f   :  { %v10903_v62 = vsub.f32 %v10747_v50, %v3259_v45  ;;  %v49_v45 = vld [vmem:[%s12889_s1] sm:$0xff] }
0x1510   :  { %v3220_v1 = vpop.xlane.xlu0 %3219  ;;  %v3226_v46 = vpop.xlane.xlu1 %3225 }
0x1511   :  { %v3260_v63 = vmul.f32 0.03125, %v3220_v1  ;;  %v3262_v61 = vmul.f32 0.03125, %v3226_v46 }
0x1514   :  { %v3223_v29 = vpop.xlane.xlu0 %3222 }
0x1515   :  { %v3261_v30 = vmul.f32 0.03125, %v3223_v29  ;;  %v8672_v29 = vld [vmem:[%s12887_s3 + $0x10] sm:$0xff]  }
0x1516   :  { %8116 = vmatprep.subr.bf16.mxu1 %v8672_v29 }
0x1517   :  { %8117 = vmatpush3.bf16.msra.mxu1 %v8672_v29 }
0x1518   :  { %v3229_v58 = vpop.xlane.xlu0 %3228 }
0x15a0   :  { %v8110_v11 = vpop.f32.mrb[88].mxu0 }
0x15a1   :  { %v3171_v47 = vadd.f32 %v8110_v11, %v10734_v39  ;;  %v3162_v14 = vpop.f32.mrb[89].mxu0  ;;  %v10910_v11 = vsub.f32 %v10761_v49, %v3260_v63 }
0x15a2   :  { %v3163_v32 = vadd.f32 %v3162_v14, %v10734_v39  ;;  %v8111_v0 = vpop.f32.mrb[90].mxu0 }
0x15a3   :  { %v10841_v35 = vadd.f32 %v9372_v53, %v3171_v47  ;;  %v3174_v24 = vadd.f32 %v8111_v0, %v10734_v39  ;;  %v3165_v36 = vpop.f32.mrb[91].mxu0  ;;  %v10917_v0 = vsub.f32 %v10780_v54, %v3261_v30  ;;  %v3263_v53 = vmul.f32 0.03125, %v3229_v58 }
0x15a4   :  { %v3166_v20 = vadd.f32 %v3165_v36, %v10734_v39  ;;  %v10848_v21 = vadd.f32 %v9373_v12, %v3163_v32  ;;  %v3232_v32 = vpop.xlane.xlu1 %3231  ;;  %v3291_v36 = vmul.f32 %v10903_v62, %v10903_v62 }
0x15a5   :  { %13019 = vst [vmem:[#allocation7_spill] sm:$0xff] %v10841_v35  ;;  %v10853_v25 = vadd.f32 %v9374_v55, %v3174_v24  ;;  %v3239_v16 = vsel %vm53_vm0, %v10841_v35, 0.0  ;;  %v3305_v24 = vsel %vm53_vm0, %v3289_v42, 0.0  ;;  %v3264_v12 = vmul.f32 0.03125, %v3232_v32 }
0x15a6   :  { %13020 = vst [vmem:[#allocation22_spill] sm:$0xff] %v10848_v21  ;;  %3240 = vadd.xlane.f32.xlu0 %v3239_v16  ;;  %v10860_v8 = vadd.f32 %v9375_v34, %v3166_v20  ;;  %v3233_v51 = vsel %vm53_vm0, %v10848_v21, 0.0  ;;  %v10923_v20 = vsub.f32 %v10770_v4, %v3262_v61  ;;  %v3292_v16 = vmul.f32 %v10910_v11, %v10910_v11 }
0x15a7   :  { %13021 = vst [vmem:[#allocation20_spill] sm:$0xff] %v10853_v25  ;;  %v3242_v57 = vsel %vm53_vm0, %v10853_v25, 0.0  ;;  %v10929_v1 = vsub.f32 %v10792_v44, %v3263_v53  ;;  %v3311_v34 = vsel %vm53_vm0, %v3291_v36, 0.0  ;;  %v10935_v38 = vsub.f32 %v10785_v52, %v3264_v12 }
0x15a8   :  { %13022 = vst [vmem:[#allocation23_spill] sm:$0xff] %v10860_v8  ;;  %v8114_v17 = vpop.f32.mrb[92].mxu0  ;;  %3243 = vadd.xlane.f32.xlu1 %v3242_v57  ;;  %v3236_v5 = vsel %vm53_vm0, %v10860_v8, 0.0  ;;  %v3293_v57 = vmul.f32 %v10917_v0, %v10917_v0  ;;  %v3314_v40 = vsel %vm53_vm0, %v3292_v16, 0.0 }
0x15a9   :  { %v3187_v22 = vadd.f32 %v8114_v17, %v10734_v39  ;;  %v3178_v3 = vpop.f32.mrb[93].mxu0  ;;  %v3294_v17 = vmul.f32 %v10923_v20, %v10923_v20 }
0x15aa   :  { %v3179_v2 = vadd.f32 %v3178_v3, %v10734_v39  ;;  %v8115_v9 = vpop.f32.mrb[94].mxu0  ;;  %3234 = vadd.xlane.f32.xlu0 %v3233_v51  ;;  %v3295_v3 = vmul.f32 %v10929_v1, %v10929_v1 }
0x15ab   :  { %v10871_v6 = vadd.f32 %v9376_v18, %v3187_v22  ;;  %v3190_v19 = vadd.f32 %v8115_v9, %v10734_v39  ;;  %v3181_v7 = vpop.f32.mrb[95].mxu0  ;;  %v3317_v22 = vsel %vm53_vm0, %v3293_v57, 0.0  ;;  %v3320_v51 = vsel %vm53_vm0, %v3294_v17, 0.0  ;;  %v8669_v18 = vld [vmem:[%s12888_s4] sm:$0xff]  }
0x15ac   :  { %v3182_v43 = vadd.f32 %v3181_v7, %v10734_v39  ;;  %3237 = vadd.xlane.f32.xlu1 %v3236_v5  ;;  %v10883_v37 = vadd.f32 %v9377_v15, %v3179_v2  ;;  %v10893_v39 = vsub.f32 %v10753_v28, %v3258_v60  ;;  %v3296_v2 = vmul.f32 %v10935_v38, %v10935_v38  ;;  %v8670_v7 = vld [vmem:[%s12888_s4 + $0x8] sm:$0xff]   ;;  %v8671_v5 = vld [vmem:[%s12888_s4 + $0x10] sm:$0xff]  }
0x15ad   :  { %13023 = vst [vmem:[#allocation21_spill] sm:$0xff] %v10871_v6  ;;  %v10888_v56 = vadd.f32 %v9378_v10, %v3190_v19  ;;  %v3251_v59 = vsel %vm53_vm0, %v10871_v6, 0.0  ;;  %v3323_v9 = vsel %vm53_vm0, %v3295_v3, 0.0  ;;  %v9395_v19 = vmov 0.0   ;;  %v50_v15 = vld [vmem:[%s12889_s1 + $0x8] sm:$0xff]  ;;  %v8674_v10 = vld [vmem:[%s12887_s3 + $0x18] sm:$0xff]  }
0x15ae   :  { %13024 = vst [vmem:[#allocation12_spill] sm:$0xff] %v10883_v37  ;;  %3252 = vadd.xlane.f32.xlu0 %v3251_v59  ;;  %v10898_v26 = vadd.f32 %v9379_v41, %v3182_v43  ;;  %v3245_v31 = vsel %vm53_vm0, %v10883_v37, 0.0  ;;  %v3290_v14 = vmul.f32 %v10893_v39, %v10893_v39  ;;  %v3326_v60 = vsel %vm53_vm0, %v3296_v2, 0.0  ;;  %8136 = vmatprep.subr.bf16.mxu0 %v9395_v19  ;;  %v8673_v43 = vld [vmem:[%s12888_s4 + $0x18] sm:$0xff]  }
0x15af   :  { %13025 = vst [vmem:[#allocation14_spill] sm:$0xff] %v10888_v56  ;;  %v3254_v23 = vsel %vm53_vm0, %v10888_v56, 0.0  ;;  %8137 = vmatpush3.bf16.msra.mxu0 %v8669_v18  ;;  %v3603_v59 = vpack.c.bf16 %v50_v15, %v49_v45  ;;  %8144 = vmatprep.mubr.msk.bf16.mxu0 %vm9396_vm5, %v9395_v19 }
0x15b0   :  { %13026 = vst [vmem:[#allocation13_spill] sm:$0xff] %v10898_v26  ;;  %3255 = vadd.xlane.f32.xlu1 %v3254_v23  ;;  %v3248_v47 = vsel %vm53_vm0, %v10898_v26, 0.0  ;;  %v3308_v55 = vsel %vm53_vm0, %v3290_v14, 0.0  ;;  %8138 = vmatprep.subr.bf16.mxu0 %v9395_v19 }
0x15b1   :  { %8118 = vmatprep.subr.bf16.mxu1 %v8674_v10 }
0x15b2   :  { %3246 = vadd.xlane.f32.xlu0 %v3245_v31  ;;  %8119 = vmatpush3.bf16.msra.mxu1 %v8674_v10 }
0x15b3   :  { %8139 = vmatpush3.bf16.msra.mxu0 %v8670_v7 }
0x15b4   :  { %3249 = vadd.xlane.f32.xlu1 %v3248_v47  ;;  %8140 = vmatprep.subr.bf16.mxu0 %v9395_v19 }
0x15b6   :  { %3306 = vadd.xlane.f32.xlu0 %v3305_v24 }
0x15b7   :  { %8141 = vmatpush3.bf16.msra.mxu0 %v8671_v5 }
0x15b8   :  { %3309 = vadd.xlane.f32.xlu1 %v3308_v55  ;;  %8142 = vmatprep.subr.bf16.mxu0 %v9395_v19 }
0x15ba   :  { %3312 = vadd.xlane.f32.xlu0 %v3311_v34 }
0x15bb   :  { %8143 = vmatpush3.bf16.msra.mxu0 %v8673_v43 }
0x15bc   :  { %3315 = vadd.xlane.f32.xlu1 %v3314_v40 }
0x15be   :  { %3318 = vadd.xlane.f32.xlu0 %v3317_v22  ;;  %8145 = vmatmul.mubr.msk.bf16.vlgmr.msra.gmra.mrb[96].mxu0 %vm566_vm2, %v3603_v59 }
0x15c0   :  { %3321 = vadd.xlane.f32.xlu1 %v3320_v51 }
0x15c2   :  { %3324 = vadd.xlane.f32.xlu0 %v3323_v9 }
0x15c4   :  { %3327 = vadd.xlane.f32.xlu1 %v3326_v60 }
0x1633   :  { %v3241_v46 = vpop.xlane.xlu0 %3240 }
0x1634   :  { %v3267_v41 = vmul.f32 0.03125, %v3241_v46 }
0x1635   :  { %v3244_v63 = vpop.xlane.xlu1 %3243 }
0x1636   :  { %v3268_v30 = vmul.f32 0.03125, %v3244_v63  ;;  %v10974_v58 = vsub.f32 %v10841_v35, %v3267_v41 }
0x1637   :  { %v3235_v23 = vpop.xlane.xlu0 %3234 }
0x1638   :  { %v3265_v31 = vmul.f32 0.03125, %v3235_v23  ;;  %v10980_v32 = vsub.f32 %v10853_v25, %v3268_v30  ;;  %v3299_v34 = vmul.f32 %v10974_v58, %v10974_v58 }
0x1639   :  { %v3238_v42 = vpop.xlane.xlu1 %3237 }
0x163a   :  { %v10977_v61 = vsub.f32 %v10848_v21, %v3265_v31  ;;  %v3266_v47 = vmul.f32 0.03125, %v3238_v42  ;;  %v3300_v3 = vmul.f32 %v10980_v32, %v10980_v32  ;;  %v3335_v18 = vsel %vm53_vm0, %v3299_v34, 0.0 }
0x163b   :  { %v3253_v14 = vpop.xlane.xlu0 %3252 }
0x163c   :  { %v10983_v53 = vsub.f32 %v10860_v8, %v3266_v47  ;;  %v3297_v24 = vmul.f32 %v10977_v61, %v10977_v61  ;;  %v3271_v36 = vmul.f32 0.03125, %v3253_v14  ;;  %v3338_v43 = vsel %vm53_vm0, %v3300_v3, 0.0 }
0x163d   :  { %v3256_v12 = vpop.xlane.xlu1 %3255 }
0x163e   :  { %v3329_v55 = vsel %vm53_vm0, %v3297_v24, 0.0  ;;  %v3298_v16 = vmul.f32 %v10983_v53, %v10983_v53  ;;  %v3272_v57 = vmul.f32 0.03125, %v3256_v12  ;;  %v10996_v51 = vsub.f32 %v10871_v6, %v3271_v36 }
0x163f   :  { %3330 = vadd.xlane.f32.xlu0 %v3329_v55  ;;  %v3247_v40 = vpop.xlane.xlu0 %3246 }
0x1640   :  { %v3269_v17 = vmul.f32 0.03125, %v3247_v40  ;;  %v3332_v22 = vsel %vm53_vm0, %v3298_v16, 0.0  ;;  %v11003_v19 = vsub.f32 %v10888_v56, %v3272_v57  ;;  %v3303_v10 = vmul.f32 %v10996_v51, %v10996_v51 }
0x1641   :  { %v3250_v2 = vpop.xlane.xlu1 %3249  ;;  %3333 = vadd.xlane.f32.xlu1 %v3332_v22  ;;  %v3419_v40 = vsub.s32 3, %v13002_v13 }
0x1642   :  { %v10999_v9 = vsub.f32 %v10883_v37, %v3269_v17  ;;  %v3270_v60 = vmul.f32 0.03125, %v3250_v2  ;;  %v3304_v30 = vmul.f32 %v11003_v19, %v11003_v19  ;;  %v3347_v12 = vsel %vm53_vm0, %v3303_v10, 0.0 }
0x1643   :  { %3336 = vadd.xlane.f32.xlu0 %v3335_v18  ;;  %v3307_v7 = vpop.xlane.xlu0 %3306 }
0x1644   :  { %v11006_v5 = vsub.f32 %v10898_v26, %v3270_v60  ;;  %v3353_v29 = vmul.f32 0.03125, %v3307_v7  ;;  %v3301_v45 = vmul.f32 %v10999_v9, %v10999_v9  ;;  %v3350_v57 = vsel %vm53_vm0, %v3304_v30, 0.0 }
0x1645   :  { %v3310_v15 = vpop.xlane.xlu1 %3309  ;;  %3339 = vadd.xlane.f32.xlu1 %v3338_v43  ;;  %v11023_v7 = vrot.slane %v10731_v33, %v3419_v40 }
0x1646   :  { %v3369_v59 = vadd.f32 1e-05, %v3353_v29  ;;  %v3354_v46 = vmul.f32 0.03125, %v3310_v15  ;;  %v3341_v63 = vsel %vm53_vm0, %v3301_v45, 0.0  ;;  %v3302_v41 = vmul.f32 %v11006_v5, %v11006_v5 }
0x1647   :  { %3342 = vadd.xlane.f32.xlu0 %v3341_v63  ;;  %v3313_v23 = vpop.xlane.xlu0 %3312  ;;  %v3439_v29 = vsub.s32 4, %v13002_v13 }
0x1648   :  { %8979 = vrsqrt.f32 %v3369_v59  ;;  %v3370_v31 = vadd.f32 1e-05, %v3354_v46  ;;  %v3355_v42 = vmul.f32 0.03125, %v3313_v23  ;;  %v3344_v47 = vsel %vm53_vm0, %v3302_v41, 0.0 }
0x1649   :  { %3345 = vadd.xlane.f32.xlu1 %v3344_v47  ;;  %v3316_v14 = vpop.xlane.xlu1 %3315  ;;  %v11028_v41 = vrot.slane %v10731_v33, %v3439_v29 }
0x164a   :  { %8981 = vrsqrt.f32 %v3370_v31  ;;  %v3371_v24 = vadd.f32 1e-05, %v3355_v42  ;;  %v3356_v36 = vmul.f32 0.03125, %v3316_v14 }
0x164b   :  { %3348 = vadd.xlane.f32.xlu0 %v3347_v12  ;;  %v3319_v55 = vpop.xlane.xlu0 %3318 }
0x164c   :  { %8983 = vrsqrt.f32 %v3371_v24  ;;  %v3372_v16 = vadd.f32 1e-05, %v3356_v36  ;;  %v3357_v34 = vmul.f32 0.03125, %v3319_v55 }
0x164d   :  { %3351 = vadd.xlane.f32.xlu1 %v3350_v57  ;;  %v3322_v17 = vpop.xlane.xlu1 %3321 }
0x164e   :  { %8985 = vrsqrt.f32 %v3372_v16  ;;  %v3373_v22 = vadd.f32 1e-05, %v3357_v34  ;;  %v3358_v3 = vmul.f32 0.03125, %v3322_v17 }
0x164f   :  { %v3325_v2 = vpop.xlane.xlu0 %3324 }
0x1650   :  { %8987 = vrsqrt.f32 %v3373_v22  ;;  %v3374_v60 = vadd.f32 1e-05, %v3358_v3  ;;  %v3359_v18 = vmul.f32 0.03125, %v3325_v2 }
0x1651   :  { %v3328_v43 = vpop.xlane.xlu1 %3327 }
0x1652   :  { %v8980_v45 = vpop.eup %8979  ;;  %8989 = vrsqrt.f32 %v3374_v60  ;;  %v3375_v15 = vadd.f32 1e-05, %v3359_v18  ;;  %v3360_v10 = vmul.f32 0.03125, %v3328_v43 }
0x1653   :  { %v3401_v59 = vmul.f32 %v8980_v45, %v10877_v27 }
0x1654   :  { %v8982_v46 = vpop.eup %8981  ;;  %8991 = vrsqrt.f32 %v3375_v15  ;;  %v3376_v63 = vadd.f32 1e-05, %v3360_v10 }
0x1655   :  { %v3402_v23 = vmul.f32 %v8982_v46, %v10893_v39  ;;  %v3421_v30 = vmul.f32 %v11023_v7, %v3401_v59 }
0x1656   :  { %v8984_v31 = vpop.eup %8983  ;;  %8993 = vrsqrt.f32 %v3376_v63 }
0x1657   :  { %v3403_v42 = vmul.f32 %v8984_v31, %v10903_v62  ;;  %v3422_v47 = vmul.f32 %v11023_v7, %v3402_v23  ;;  %v3441_v36 = vadd.f32 %v11028_v41, %v3421_v30 }
0x1658   :  { %v8986_v14 = vpop.eup %8985 }
0x1659   :  { %v3423_v24 = vmul.f32 %v11023_v7, %v3403_v42  ;;  %v3404_v27 = vmul.f32 %v8986_v14, %v10910_v11  ;;  %v3442_v33 = vadd.f32 %v11028_v41, %v3422_v47 }
0x165a   :  { %v8988_v12 = vpop.eup %8987 }
0x165b   :  { %v3424_v39 = vmul.f32 %v11023_v7, %v3404_v27  ;;  %v3457_v55 = vpack.c.bf16 %v3442_v33, %v3441_v36  ;;  %v3405_v16 = vmul.f32 %v8988_v12, %v10917_v0  ;;  %v3443_v62 = vadd.f32 %v11028_v41, %v3423_v24 }
0x165c   :  { %v8990_v34 = vpop.eup %8989 }
0x165d   :  { %v3444_v57 = vadd.f32 %v11028_v41, %v3424_v39  ;;  %8120 = vmatprep.mubr.msk.bf16.mxu1 %vm53_vm0, %v3457_v55  ;;  %v3406_v40 = vmul.f32 %v8990_v34, %v10923_v20  ;;  %v3425_v11 = vmul.f32 %v11023_v7, %v3405_v16 }
0x165e   :  { %v8992_v17 = vpop.eup %8991 }
0x165f   :  { %v3458_v22 = vpack.c.bf16 %v3444_v57, %v3443_v62  ;;  %v3426_v3 = vmul.f32 %v11023_v7, %v3406_v40  ;;  %v3407_v2 = vmul.f32 %v8992_v17, %v10929_v1  ;;  %v3445_v0 = vadd.f32 %v11028_v41, %v3425_v11 }
0x1660   :  { %v8994_v60 = vpop.eup %8993 }
0x1661   :  { %8121 = vmatmul.mubr.msk.bf16.vlgmr.msra.gmra.mrb[64].mxu1 %vm53_vm0, %v3458_v22  ;;  %v3446_v18 = vadd.f32 %v11028_v41, %v3426_v3  ;;  %v3408_v29 = vmul.f32 %v8994_v60, %v10935_v38  ;;  %v3427_v43 = vmul.f32 %v11023_v7, %v3407_v2 }
0x1663   :  { %v3459_v20 = vpack.c.bf16 %v3446_v18, %v3445_v0  ;;  %v3428_v45 = vmul.f32 %v11023_v7, %v3408_v29  ;;  %v3447_v15 = vadd.f32 %v11028_v41, %v3427_v43 }
0x1665   :  { %8124 = vmatprep.mubr.msk.bf16.mxu1 %vm53_vm0, %v3459_v20  ;;  %v3448_v1 = vadd.f32 %v11028_v41, %v3428_v45 }
0x1667   :  { %v3460_v10 = vpack.c.bf16 %v3448_v1, %v3447_v15 }
0x1669   :  { %8125 = vmatmul.mubr.msk.bf16.gmra.mrb[68].mxu1 %vm53_vm0, %v3460_v10 }
0x1691   :  { %v3673_v59 = vpop.f32.mrb[96].mxu0 }
0x1692   :  { %v11057_v46 = vpack.c.bf16 %v3673_v59, %v3673_v59  ;;  %v8146_v63 = vpop.f32.mrb[97].mxu0 }
0x1693   :  { %v11059_v23 = vpop.f32.mrb[98].mxu0 }
0x1694   :  { %v8147_v38 = vpop.f32.mrb[99].mxu0  ;;  %8392 = vmatprep.subr.msk.bf16.mxu0 %vm468_vm1, %v11057_v46  ;;  %v3703_v30 = vsel %vm468_vm1, %v11057_v46, 0  ;;  %3966 = vrot.lane.b32.xlu0 %v11057_v46, %s9383_s11 }
0x1695   :  { %8149 = vmatpush3.bf16.xpose.msra.mxu0 %v3703_v30 }
0x16cc   :  { %v3331_v31 = vpop.xlane.xlu0 %3330 }
0x16cd   :  { %v3361_v42 = vmul.f32 0.03125, %v3331_v31 }
0x16ce   :  { %v3334_v47 = vpop.xlane.xlu1 %3333 }
0x16cf   :  { %v3377_v14 = vadd.f32 1e-05, %v3361_v42  ;;  %v3362_v24 = vmul.f32 0.03125, %v3334_v47 }
0x16d0   :  { %v3337_v27 = vpop.xlane.xlu0 %3336 }
0x16d1   :  { %8995 = vrsqrt.f32 %v3377_v14  ;;  %v3378_v36 = vadd.f32 1e-05, %v3362_v24  ;;  %v3363_v33 = vmul.f32 0.03125, %v3337_v27 }
0x16d2   :  { %v3340_v12 = vpop.xlane.xlu1 %3339 }
0x16d3   :  { %8997 = vrsqrt.f32 %v3378_v36  ;;  %v3379_v39 = vadd.f32 1e-05, %v3363_v33  ;;  %v3364_v55 = vmul.f32 0.03125, %v3340_v12 }
0x16d4   :  { %v3343_v16 = vpop.xlane.xlu0 %3342 }
0x16d5   :  { %8999 = vrsqrt.f32 %v3379_v39  ;;  %v3380_v34 = vadd.f32 1e-05, %v3364_v55  ;;  %v3365_v62 = vmul.f32 0.03125, %v3343_v16 }
0x16d6   :  { %v3346_v57 = vpop.xlane.xlu1 %3345 }
0x16d7   :  { %9001 = vrsqrt.f32 %v3380_v34  ;;  %v3381_v40 = vadd.f32 1e-05, %v3365_v62  ;;  %v3366_v11 = vmul.f32 0.03125, %v3346_v57 }
0x16d8   :  { %v3349_v17 = vpop.xlane.xlu0 %3348 }
0x16d9   :  { %9003 = vrsqrt.f32 %v3381_v40  ;;  %v3382_v22 = vadd.f32 1e-05, %v3366_v11  ;;  %v3367_v3 = vmul.f32 0.03125, %v3349_v17 }
0x16da   :  { %v3352_v2 = vpop.xlane.xlu1 %3351 }
0x16db   :  { %v8996_v60 = vpop.eup %8995  ;;  %9005 = vrsqrt.f32 %v3382_v22  ;;  %v3383_v0 = vadd.f32 1e-05, %v3367_v3  ;;  %v3368_v18 = vmul.f32 0.03125, %v3352_v2 }
0x16dc   :  { %v3409_v29 = vmul.f32 %v8996_v60, %v10977_v61 }
0x16dd   :  { %v8998_v43 = vpop.eup %8997  ;;  %9007 = vrsqrt.f32 %v3383_v0  ;;  %v3384_v20 = vadd.f32 1e-05, %v3368_v18 }
0x16de   :  { %v3410_v45 = vmul.f32 %v8998_v43, %v10983_v53  ;;  %v3429_v15 = vmul.f32 %v11023_v7, %v3409_v29 }
0x16df   :  { %v9000_v1 = vpop.eup %8999  ;;  %9009 = vrsqrt.f32 %v3384_v20 }
0x16e0   :  { %v3430_v10 = vmul.f32 %v11023_v7, %v3410_v45  ;;  %v3411_v59 = vmul.f32 %v9000_v1, %v10974_v58  ;;  %v3449_v38 = vadd.f32 %v11028_v41, %v3429_v15  ;;  %v11119_v1 = vpack.c.bf16 %v11059_v23, %v11059_v23 }
0x16e1   :  { %v9002_v63 = vpop.eup %9001 }
0x16e2   :  { %v3450_v30 = vadd.f32 %v11028_v41, %v3430_v10  ;;  %v3412_v61 = vmul.f32 %v9002_v63, %v10980_v32  ;;  %v3431_v31 = vmul.f32 %v11023_v7, %v3411_v59  ;;  %13027 = vst [vmem:[#allocation11_spill] sm:$0xff] %v11119_v1 }
0x16e3   :  { %v9004_v42 = vpop.eup %9003 }
0x16e4   :  { %v3461_v47 = vpack.c.bf16 %v3450_v30, %v3449_v38  ;;  %v3432_v53 = vmul.f32 %v11023_v7, %v3412_v61  ;;  %v3413_v14 = vmul.f32 %v9004_v42, %v10999_v9  ;;  %v3451_v58 = vadd.f32 %v11028_v41, %v3431_v31 }
0x16e5   :  { %v9006_v24 = vpop.eup %9005 }
0x16e6   :  { %8128 = vmatprep.mubr.msk.bf16.mxu1 %vm53_vm0, %v3461_v47  ;;  %v3452_v27 = vadd.f32 %v11028_v41, %v3432_v53  ;;  %v3414_v36 = vmul.f32 %v9006_v24, %v11006_v5  ;;  %v3433_v33 = vmul.f32 %v11023_v7, %v3413_v14 }
0x16e7   :  { %v9008_v32 = vpop.eup %9007 }
0x16e8   :  { %v3462_v12 = vpack.c.bf16 %v3452_v27, %v3451_v58  ;;  %v3434_v39 = vmul.f32 %v11023_v7, %v3414_v36  ;;  %v3415_v55 = vmul.f32 %v9008_v32, %v10996_v51  ;;  %v3453_v9 = vadd.f32 %v11028_v41, %v3433_v33 }
0x16e9   :  { %v9010_v16 = vpop.eup %9009 }
0x16ea   :  { %8129 = vmatmul.mubr.msk.bf16.gmra.mrb[72].mxu1 %vm53_vm0, %v3462_v12  ;;  %v3454_v34 = vadd.f32 %v11028_v41, %v3434_v39  ;;  %v3416_v62 = vmul.f32 %v9010_v16, %v11003_v19  ;;  %v3435_v57 = vmul.f32 %v11023_v7, %v3415_v55 }
0x16ec   :  { %v3463_v5 = vpack.c.bf16 %v3454_v34, %v3453_v9  ;;  %v3436_v40 = vmul.f32 %v11023_v7, %v3416_v62  ;;  %v3455_v11 = vadd.f32 %v11028_v41, %v3435_v57 }
0x16ee   :  { %8132 = vmatprep.mubr.msk.bf16.mxu1 %vm53_vm0, %v3463_v5  ;;  %v3456_v51 = vadd.f32 %v11028_v41, %v3436_v40  ;;  %v4912_v40 = vsel %vm468_vm1, %v11119_v1, 0 }
0x16f0   :  { %v3464_v17 = vpack.c.bf16 %v3456_v51, %v3455_v11 }
0x16f2   :  { %8133 = vmatmul.mubr.msk.bf16.gmra.mrb[76].mxu1 %vm53_vm0, %v3464_v17 }
0x1706   :  { %v3967_v22 = vpop.permute.xlu0 %3966 }
0x1707   :  { %8394 = vmatprep.subr.msk.bf16.mxu0 %vm468_vm1, %v3967_v22  ;;  %v3981_v7 = vsel %vm468_vm1, %v3967_v22, 0 }
0x1734   :  { %v8122_v3 = vpop.f32.mrb[64].mxu1 }
0x1735   :  { %v3540_v2 = vpop.f32.mrb[65].mxu1 }
0x1736   :  { %v8123_v19 = vpop.f32.mrb[66].mxu1 }
0x1737   :  { %v3686_v60 = vpack.c.bf16 %v8123_v19, %v8122_v3  ;;  %v3543_v0 = vpop.f32.mrb[67].mxu1 }
0x1738   :  { %v3685_v18 = vpack.c.bf16 %v3543_v0, %v3540_v2 }
0x173a   :  { %3958 = vrot.lane.b32.xlu1 %v3685_v18, %s9383_s11  ;;  %8150 = vmatprep.mubr.msk.bf16.mxu0 %vm468_vm1, %v3685_v18 }
0x173b   :  { %8151 = vmatmul.mubr.msk.bf16.vlgmr.msra.gmra.mrb[100].mxu0 %vm468_vm1, %v3686_v60 }
0x173c   :  { %v8126_v41 = vpop.f32.mrb[68].mxu1  ;;  %8169 = vmatpush3.bf16.xpose.msra.mxu0 %v3981_v7 }
0x173d   :  { %v3556_v29 = vpop.f32.mrb[69].mxu1 }
0x173e   :  { %3960 = vrot.lane.b32.xlu1 %v3686_v60, %s9383_s11  ;;  %v8127_v43 = vpop.f32.mrb[70].mxu1 }
0x173f   :  { %v3688_v20 = vpack.c.bf16 %v8127_v43, %v8126_v41  ;;  %v3559_v45 = vpop.f32.mrb[71].mxu1 }
0x1740   :  { %v3687_v15 = vpack.c.bf16 %v3559_v45, %v3556_v29 }
0x1741   :  { %3964 = vrot.lane.b32.xlu0 %v3688_v20, %s9383_s11 }
0x1742   :  { %3962 = vrot.lane.b32.xlu1 %v3687_v15, %s9383_s11  ;;  %8154 = vmatprep.mubr.msk.bf16.mxu0 %vm468_vm1, %v3687_v15 }
0x1743   :  { %8155 = vmatmul.mubr.msk.bf16.gmra.mrb[104].mxu0 %vm468_vm1, %v3688_v20 }
0x1745   :  { %4230 = vrot.lane.b32.xlu0 %v3685_v18, %s9387_s12 }
0x1746   :  { %4238 = vrot.lane.b32.xlu1 %v11057_v46, %s9387_s12 }
0x1749   :  { %4234 = vrot.lane.b32.xlu0 %v3687_v15, %s9387_s12 }
0x174a   :  { %4232 = vrot.lane.b32.xlu1 %v3686_v60, %s9387_s12 }
0x174d   :  { %4510 = vrot.lane.b32.xlu0 %v11057_v46, %s9390_s15 }
0x174e   :  { %4236 = vrot.lane.b32.xlu1 %v3688_v20, %s9387_s12 }
0x1751   :  { %4504 = vrot.lane.b32.xlu0 %v3686_v60, %s9390_s15 }
0x1752   :  { %4502 = vrot.lane.b32.xlu1 %v3685_v18, %s9390_s15 }
0x1755   :  { %4508 = vrot.lane.b32.xlu0 %v3688_v20, %s9390_s15 }
0x1756   :  { %4506 = vrot.lane.b32.xlu1 %v3687_v15, %s9390_s15 }
0x175a   :  { %5174 = vrot.lane.b32.xlu1 %v11119_v1, %s9383_s11 }
0x17ac   :  { %v3959_v10 = vpop.permute.xlu1 %3958 }
0x17ad   :  { %8170 = vmatprep.mubr.msk.bf16.mxu0 %vm468_vm1, %v3959_v10 }
0x17b0   :  { %v3961_v59 = vpop.permute.xlu1 %3960 }
0x17b1   :  { %8171 = vmatmul.mubr.msk.bf16.vlgmr.msra.gmra.mrb[108].mxu0 %vm468_vm1, %v3961_v59 }
0x17b3   :  { %v3965_v63 = vpop.permute.xlu0 %3964 }
0x17b4   :  { %v3963_v38 = vpop.permute.xlu1 %3962 }
0x17b5   :  { %8174 = vmatprep.mubr.msk.bf16.mxu0 %vm468_vm1, %v3963_v38 }
0x17b7   :  { %v4231_v30 = vpop.permute.xlu0 %4230 }
0x17b8   :  { %v4239_v61 = vpop.permute.xlu1 %4238 }
0x17b9   :  { %8175 = vmatmul.mubr.msk.bf16.gmra.mrb[112].mxu0 %vm468_vm1, %v3965_v63  ;;  %8396 = vmatprep.subr.msk.bf16.mxu0 %vm468_vm1, %v4239_v61  ;;  %v4253_v23 = vsel %vm468_vm1, %v4239_v61, 0 }
0x17ba   :  { %8189 = vmatpush3.bf16.xpose.msra.mxu0 %v4253_v23  ;;  %8190 = vmatprep.mubr.msk.bf16.mxu0 %vm468_vm1, %v4231_v30 }
0x17bb   :  { %v4235_v31 = vpop.permute.xlu0 %4234 }
0x17bc   :  { %v4233_v42 = vpop.permute.xlu1 %4232 }
0x17bd   :  { %v8130_v47 = vpop.f32.mrb[72].mxu1 }
0x17be   :  { %v3572_v53 = vpop.f32.mrb[73].mxu1 }
0x17bf   :  { %v8131_v14 = vpop.f32.mrb[74].mxu1  ;;  %v4511_v24 = vpop.permute.xlu0 %4510 }
0x17c0   :  { %v4895_v58 = vpack.c.bf16 %v8131_v14, %v8130_v47  ;;  %v4237_v27 = vpop.permute.xlu1 %4236  ;;  %v3575_v36 = vpop.f32.mrb[75].mxu1  ;;  %8398 = vmatprep.subr.msk.bf16.mxu0 %vm468_vm1, %v4511_v24  ;;  %v4525_v33 = vsel %vm468_vm1, %v4511_v24, 0 }
0x17c1   :  { %v4894_v32 = vpack.c.bf16 %v3575_v36, %v3572_v53  ;;  %8191 = vmatmul.mubr.msk.bf16.vlgmr.msra.gmra.mrb[116].mxu0 %vm468_vm1, %v4233_v42 }
0x17c2   :  { %5168 = vrot.lane.b32.xlu1 %v4895_v58, %s9383_s11  ;;  %8194 = vmatprep.mubr.msk.bf16.mxu0 %vm468_vm1, %v4235_v31 }
0x17c3   :  { %8209 = vmatpush3.bf16.xpose.msra.mxu0 %v4525_v33  ;;  %5166 = vrot.lane.b32.xlu0 %v4894_v32, %s9383_s11  ;;  %v4505_v5 = vpop.permute.xlu0 %4504 }
0x17c4   :  { %8400 = vmatprep.subr.msk.bf16.mxu0 %vm468_vm1, %v11119_v1  ;;  %v4503_v39 = vpop.permute.xlu1 %4502 }
0x17c5   :  { %v8134_v12 = vpop.f32.mrb[76].mxu1 }
0x17c6   :  { %v3588_v55 = vpop.f32.mrb[77].mxu1 }
0x17c7   :  { %v8135_v16 = vpop.f32.mrb[78].mxu1  ;;  %v4509_v51 = vpop.permute.xlu0 %4508 }
0x17c8   :  { %v4897_v9 = vpack.c.bf16 %v8135_v16, %v8134_v12  ;;  %v3591_v34 = vpop.f32.mrb[79].mxu1  ;;  %v4507_v57 = vpop.permute.xlu1 %4506 }
0x17c9   :  { %v4896_v62 = vpack.c.bf16 %v3591_v34, %v3588_v55  ;;  %8195 = vmatmul.mubr.msk.bf16.gmra.mrb[120].mxu0 %vm468_vm1, %v4237_v27 }
0x17ca   :  { %5172 = vrot.lane.b32.xlu1 %v4897_v9, %s9383_s11  ;;  %8210 = vmatprep.mubr.msk.bf16.mxu0 %vm468_vm1, %v4503_v39 }
0x17cb   :  { %5170 = vrot.lane.b32.xlu0 %v4896_v62, %s9383_s11 }
0x17cc   :  { %v5175_v11 = vpop.permute.xlu1 %5174 }
0x17cd   :  { %v5189_v17 = vsel %vm468_vm1, %v5175_v11, 0 }
0x17ce   :  { %5438 = vrot.lane.b32.xlu1 %v4894_v32, %s9387_s12 }
0x17cf   :  { %5446 = vrot.lane.b32.xlu0 %v11119_v1, %s9387_s12 }
0x17d1   :  { %8211 = vmatmul.mubr.msk.bf16.vlgmr.msra.gmra.mrb[124].mxu0 %vm468_vm1, %v4505_v5 }
0x17d2   :  { %8229 = vmatpush3.bf16.xpose.msra.mxu0 %v4912_v40  ;;  %5442 = vrot.lane.b32.xlu1 %v4896_v62, %s9387_s12 }
0x17d3   :  { %8214 = vmatprep.mubr.msk.bf16.mxu0 %vm468_vm1, %v4507_v57  ;;  %8402 = vmatprep.subr.msk.bf16.mxu0 %vm468_vm1, %v5175_v11 }
0x17d4   :  { %5440 = vrot.lane.b32.xlu0 %v4895_v58, %s9387_s12 }
0x17d6   :  { %5718 = vrot.lane.b32.xlu1 %v11119_v1, %s9390_s15 }
0x17d8   :  { %5444 = vrot.lane.b32.xlu0 %v4897_v9, %s9387_s12 }
0x17d9   :  { %8215 = vmatmul.mubr.msk.bf16.gmra.mrb[128].mxu0 %vm468_vm1, %v4509_v51 }
0x17da   :  { %5712 = vrot.lane.b32.xlu1 %v4895_v58, %s9390_s15  ;;  %8230 = vmatprep.mubr.msk.bf16.mxu0 %vm468_vm1, %v4894_v32 }
0x17dc   :  { %5710 = vrot.lane.b32.xlu0 %v4894_v32, %s9390_s15 }
0x17de   :  { %5716 = vrot.lane.b32.xlu1 %v4897_v9, %s9390_s15 }
0x17e0   :  { %5714 = vrot.lane.b32.xlu0 %v4896_v62, %s9390_s15 }
0x17e1   :  { %8231 = vmatmul.mubr.msk.bf16.vlgmr.msra.gmra.mrb[132].mxu0 %vm468_vm1, %v4895_v58 }
0x17e2   :  { %8249 = vmatpush3.bf16.xpose.msra.mxu0 %v5189_v17  ;;  %8234 = vmatprep.mubr.msk.bf16.mxu0 %vm468_vm1, %v4896_v62 }
0x17e9   :  { %8235 = vmatmul.mubr.msk.bf16.gmra.mrb[136].mxu0 %vm468_vm1, %v4897_v9 }
0x180e   :  { %v8152_v22 = vpop.f32.mrb[100].mxu0 }
0x180f   :  { %v3739_v3 = vpop.f32.mrb[101].mxu0  ;;  %v11167_v0 = vmul.f32 0.35355338, %v8152_v22 }
0x1810   :  { %v11165_v2 = vmul.f32 0.35355338, %v3739_v3  ;;  %v8153_v19 = vpop.f32.mrb[102].mxu0 }
0x1811   :  { %v3742_v60 = vpop.f32.mrb[103].mxu0  ;;  %v11175_v29 = vmul.f32 0.35355338, %v8153_v19  ;;  %v3784_v20 = vsel %vm468_vm1, %v11167_v0, -inf }
0x1812   :  { %v11169_v18 = vmul.f32 0.35355338, %v3742_v60  ;;  %v3778_v7 = vsel %vm468_vm1, %v11165_v2, -inf }
0x1813   :  { %3779 = vmax.xlane.f32.xlu0 %v3778_v7  ;;  %v3787_v38 = vsel %vm468_vm1, %v11175_v29, -inf }
0x1814   :  { %v3781_v41 = vsel %vm468_vm1, %v11169_v18, -inf }
0x1815   :  { %3782 = vmax.xlane.f32.xlu1 %v3781_v41 }
0x1816   :  { %v8156_v43 = vpop.f32.mrb[104].mxu0 }
0x1817   :  { %v3755_v45 = vpop.f32.mrb[105].mxu0  ;;  %3785 = vmax.xlane.f32.xlu0 %v3784_v20  ;;  %v11189_v23 = vmul.f32 0.35355338, %v8156_v43 }
0x1818   :  { %v8157_v15 = vpop.f32.mrb[106].mxu0  ;;  %v11179_v59 = vmul.f32 0.35355338, %v3755_v45 }
0x1819   :  { %v3758_v10 = vpop.f32.mrb[107].mxu0  ;;  %v11185_v30 = vmul.f32 0.35355338, %v8157_v15  ;;  %v3796_v47 = vsel %vm468_vm1, %v11189_v23, -inf }
0x181a   :  { %v11181_v63 = vmul.f32 0.35355338, %v3758_v10  ;;  %v3790_v31 = vsel %vm468_vm1, %v11179_v59, -inf }
0x181b   :  { %3788 = vmax.xlane.f32.xlu0 %v3787_v38  ;;  %v3799_v42 = vsel %vm468_vm1, %v11185_v30, -inf }
0x181c   :  { %v3793_v61 = vsel %vm468_vm1, %v11181_v63, -inf }
0x181d   :  { %3794 = vmax.xlane.f32.xlu1 %v3793_v61 }
0x181f   :  { %3791 = vmax.xlane.f32.xlu0 %v3790_v31 }
0x1821   :  { %3800 = vmax.xlane.f32.xlu1 %v3799_v42 }
0x1823   :  { %3797 = vmax.xlane.f32.xlu0 %v3796_v47 }
0x1832   :  { %4148 = vrot.lane.b32.xlu1 %v11057_v46, %s9382_s10 }
0x1834   :  { %v5169_v14 = vpop.permute.xlu1 %5168 }
0x1835   :  { %v5167_v53 = vpop.permute.xlu0 %5166 }
0x1836   :  { %4692 = vrot.lane.b32.xlu1 %v11057_v46, %s9389_s14  ;;  %8250 = vmatprep.mubr.msk.bf16.mxu0 %vm468_vm1, %v5167_v53 }
0x1837   :  { %8251 = vmatmul.mubr.msk.bf16.vlgmr.msra.gmra.mrb[140].mxu0 %vm468_vm1, %v5169_v14 }
0x1839   :  { %3871 = vrot.lane.b32.xlu0 %v11057_v46, %s9381_s30 }
0x183a   :  { %5356 = vrot.lane.b32.xlu1 %v11119_v1, %s9382_s10 }
0x183c   :  { %v5173_v24 = vpop.permute.xlu1 %5172 }
0x183d   :  { %4420 = vrot.lane.b32.xlu0 %v11057_v46, %s9386_s29  ;;  %v5171_v58 = vpop.permute.xlu0 %5170 }
0x183e   :  { %8254 = vmatprep.mubr.msk.bf16.mxu0 %vm468_vm1, %v5171_v58 }
0x183f   :  { %8255 = vmatmul.mubr.msk.bf16.gmra.mrb[144].mxu0 %vm468_vm1, %v5173_v24 }
0x1840   :  { %v5439_v27 = vpop.permute.xlu1 %5438 }
0x1841   :  { %5080 = vrot.lane.b32.xlu0 %v11119_v1, %s9381_s30  ;;  %8270 = vmatprep.mubr.msk.bf16.mxu0 %vm468_vm1, %v5439_v27  ;;  %v5447_v36 = vpop.permute.xlu0 %5446 }
0x1842   :  { %8404 = vmatprep.subr.msk.bf16.mxu0 %vm468_vm1, %v5447_v36  ;;  %v5461_v33 = vsel %vm468_vm1, %v5447_v36, 0 }
0x1843   :  { %8269 = vmatpush3.bf16.xpose.msra.mxu0 %v5461_v33 }
0x1844   :  { %v5443_v32 = vpop.permute.xlu1 %5442 }
0x1846   :  { %v5441_v12 = vpop.permute.xlu0 %5440 }
0x1848   :  { %v5719_v46 = vpop.permute.xlu1 %5718 }
0x1849   :  { %8406 = vmatprep.subr.msk.bf16.mxu0 %vm468_vm1, %v5719_v46  ;;  %v5733_v39 = vsel %vm468_vm1, %v5719_v46, 0 }
0x184a   :  { %8271 = vmatmul.mubr.msk.bf16.vlgmr.msra.gmra.mrb[148].mxu0 %vm468_vm1, %v5441_v12  ;;  %v5445_v55 = vpop.permute.xlu0 %5444 }
0x184b   :  { %8274 = vmatprep.mubr.msk.bf16.mxu0 %vm468_vm1, %v5443_v32  ;;  %8289 = vmatpush3.bf16.xpose.msra.mxu0 %v5733_v39 }
0x184c   :  { %v5713_v9 = vpop.permute.xlu1 %5712 }
0x184e   :  { %v5711_v16 = vpop.permute.xlu0 %5710 }
0x1850   :  { %v5717_v62 = vpop.permute.xlu1 %5716 }
0x1852   :  { %8275 = vmatmul.mubr.msk.bf16.gmra.mrb[152].mxu0 %vm468_vm1, %v5445_v55  ;;  %v5715_v34 = vpop.permute.xlu0 %5714 }
0x1853   :  { %8290 = vmatprep.mubr.msk.bf16.mxu0 %vm468_vm1, %v5711_v16 }
0x185a   :  { %8291 = vmatmul.mubr.msk.bf16.vlgmr.msra.gmra.mrb[156].mxu0 %vm468_vm1, %v5713_v9 }
0x185b   :  { %8294 = vmatprep.mubr.msk.bf16.mxu0 %vm468_vm1, %v5715_v34 }
0x1862   :  { %8295 = vmatmul.mubr.msk.bf16.gmra.mrb[160].mxu0 %vm468_vm1, %v5717_v62 }
0x1884   :  { %v8172_v57 = vpop.f32.mrb[108].mxu0 }
0x1885   :  { %v11225_v5 = vmul.f32 0.35355338, %v8172_v57  ;;  %v4017_v40 = vpop.f32.mrb[109].mxu0 }
0x1886   :  { %v8173_v11 = vpop.f32.mrb[110].mxu0  ;;  %v11227_v51 = vmul.f32 0.35355338, %v4017_v40 }
0x1887   :  { %v11229_v17 = vmul.f32 0.35355338, %v8173_v11  ;;  %v4020_v22 = vpop.f32.mrb[111].mxu0  ;;  %v4062_v3 = vsel %vm468_vm1, %v11225_v5, -inf }
0x1888   :  { %4063 = vmax.xlane.f32.xlu0 %v4062_v3  ;;  %v11233_v19 = vmul.f32 0.35355338, %v4020_v22  ;;  %v4056_v7 = vsel %vm468_vm1, %v11227_v51, -inf }
0x1889   :  { %v4065_v60 = vsel %vm468_vm1, %v11229_v17, -inf }
0x188a   :  { %4066 = vmax.xlane.f32.xlu1 %v4065_v60  ;;  %v4059_v45 = vsel %vm468_vm1, %v11233_v19, -inf }
0x188c   :  { %4057 = vmax.xlane.f32.xlu0 %v4056_v7  ;;  %v8176_v41 = vpop.f32.mrb[112].mxu0 }
0x188d   :  { %v11239_v43 = vmul.f32 0.35355338, %v8176_v41  ;;  %v4033_v20 = vpop.f32.mrb[113].mxu0 }
0x188e   :  { %4060 = vmax.xlane.f32.xlu1 %v4059_v45  ;;  %v8177_v15 = vpop.f32.mrb[114].mxu0  ;;  %v11243_v10 = vmul.f32 0.35355338, %v4033_v20 }
0x188f   :  { %v11245_v38 = vmul.f32 0.35355338, %v8177_v15  ;;  %v4036_v61 = vpop.f32.mrb[115].mxu0  ;;  %v4074_v31 = vsel %vm468_vm1, %v11239_v43, -inf }
0x1890   :  { %4075 = vmax.xlane.f32.xlu0 %v4074_v31  ;;  %v11249_v42 = vmul.f32 0.35355338, %v4036_v61  ;;  %v4068_v53 = vsel %vm468_vm1, %v11243_v10, -inf }
0x1891   :  { %v4077_v47 = vsel %vm468_vm1, %v11245_v38, -inf }
0x1892   :  { %4078 = vmax.xlane.f32.xlu1 %v4077_v47  ;;  %v4071_v27 = vsel %vm468_vm1, %v11249_v42, -inf }
0x1894   :  { %4069 = vmax.xlane.f32.xlu0 %v4068_v53  ;;  %v8192_v14 = vpop.f32.mrb[116].mxu0 }
0x1895   :  { %v11255_v24 = vmul.f32 0.35355338, %v8192_v14  ;;  %v4289_v58 = vpop.f32.mrb[117].mxu0 }
0x1896   :  { %4072 = vmax.xlane.f32.xlu1 %v4071_v27  ;;  %v8193_v36 = vpop.f32.mrb[118].mxu0  ;;  %v11259_v33 = vmul.f32 0.35355338, %v4289_v58 }
0x1897   :  { %v11261_v32 = vmul.f32 0.35355338, %v8193_v36  ;;  %v4292_v12 = vpop.f32.mrb[119].mxu0  ;;  %v4334_v46 = vsel %vm468_vm1, %v11255_v24, -inf }
0x1898   :  { %4335 = vmax.xlane.f32.xlu0 %v4334_v46  ;;  %v11265_v39 = vmul.f32 0.35355338, %v4292_v12  ;;  %v4328_v16 = vsel %vm468_vm1, %v11259_v33, -inf }
0x1899   :  { %v4337_v55 = vsel %vm468_vm1, %v11261_v32, -inf }
0x189a   :  { %4338 = vmax.xlane.f32.xlu1 %v4337_v55  ;;  %v4331_v57 = vsel %vm468_vm1, %v11265_v39, -inf }
0x189c   :  { %4329 = vmax.xlane.f32.xlu0 %v4328_v16  ;;  %v8196_v9 = vpop.f32.mrb[120].mxu0 }
0x189d   :  { %v11271_v34 = vmul.f32 0.35355338, %v8196_v9  ;;  %v4305_v62 = vpop.f32.mrb[121].mxu0 }
0x189e   :  { %4332 = vmax.xlane.f32.xlu1 %v4331_v57  ;;  %v8197_v40 = vpop.f32.mrb[122].mxu0  ;;  %v11275_v11 = vmul.f32 0.35355338, %v4305_v62 }
0x189f   :  { %v11277_v22 = vmul.f32 0.35355338, %v8197_v40  ;;  %v4308_v3 = vpop.f32.mrb[123].mxu0  ;;  %v4346_v60 = vsel %vm468_vm1, %v11271_v34, -inf }
0x18a0   :  { %4347 = vmax.xlane.f32.xlu0 %v4346_v60  ;;  %v3780_v7 = vpop.xlane.xlu0 %3779  ;;  %v11281_v41 = vmul.f32 0.35355338, %v4308_v3  ;;  %v4340_v45 = vsel %vm468_vm1, %v11275_v11, -inf }
0x18a1   :  { %v4349_v20 = vsel %vm468_vm1, %v11277_v22, -inf  ;;  %v3802_v12 = vsub.f32 %v11165_v2, %v3780_v7 }
0x18a2   :  { %4350 = vmax.xlane.f32.xlu1 %v4349_v20  ;;  %v3783_v31 = vpop.xlane.xlu1 %3782  ;;  %v4343_v58 = vsel %vm468_vm1, %v11281_v41, -inf }
0x18a3   :  { %v3803_v62 = vsub.f32 %v11169_v18, %v3783_v31  ;;  %v3810_v2 = vmul.f32 1.442695, %v3802_v12 }
0x18a4   :  { %4341 = vmax.xlane.f32.xlu0 %v4340_v45  ;;  %v8212_v15 = vpop.f32.mrb[124].mxu0  ;;  %v3786_v61 = vpop.xlane.xlu0 %3785 }
0x18a5   :  { %v11287_v47 = vmul.f32 0.35355338, %v8212_v15  ;;  %v3804_v53 = vsub.f32 %v11167_v0, %v3786_v61  ;;  %v4561_v14 = vpop.f32.mrb[125].mxu0  ;;  %v3812_v45 = vmul.f32 1.442695, %v3803_v62 }
0x18a6   :  { %v11292_v27 = vmul.f32 0.35355338, %v4561_v14  ;;  %4344 = vmax.xlane.f32.xlu1 %v4343_v58  ;;  %v8213_v36 = vpop.f32.mrb[126].mxu0 }
0x18a7   :  { %v3814_v46 = vmul.f32 1.442695, %v3804_v53  ;;  %v11295_v55 = vmul.f32 0.35355338, %v8213_v36  ;;  %v4564_v16 = vpop.f32.mrb[127].mxu0  ;;  %v4606_v9 = vsel %vm468_vm1, %v11287_v47, -inf }
0x18a8   :  { %4607 = vmax.xlane.f32.xlu0 %v4606_v9  ;;  %v3789_v0 = vpop.xlane.xlu0 %3788  ;;  %v11300_v57 = vmul.f32 0.35355338, %v4564_v16  ;;  %v4600_v20 = vsel %vm468_vm1, %v11292_v27, -inf }
0x18a9   :  { %v3805_v40 = vsub.f32 %v11175_v29, %v3789_v0  ;;  %v4609_v3 = vsel %vm468_vm1, %v11295_v55, -inf  ;;  %9011 = vpow2.f32 %v3814_v46 }
0x18aa   :  { %v3795_v60 = vpop.xlane.xlu1 %3794  ;;  %4610 = vmax.xlane.f32.xlu1 %v4609_v3  ;;  %v4603_v29 = vsel %vm468_vm1, %v11300_v57, -inf }
0x18ab   :  { %v3816_v7 = vmul.f32 1.442695, %v3805_v40  ;;  %v3807_v16 = vsub.f32 %v11181_v63, %v3795_v60 }
0x18ac   :  { %4601 = vmax.xlane.f32.xlu0 %v4600_v20  ;;  %v8216_v18 = vpop.f32.mrb[128].mxu0  ;;  %v3792_v15 = vpop.xlane.xlu0 %3791 }
0x18ad   :  { %9013 = vpow2.f32 %v3816_v7  ;;  %v11307_v61 = vmul.f32 0.35355338, %v8216_v18  ;;  %v4577_v31 = vpop.f32.mrb[129].mxu0  ;;  %v3806_v58 = vsub.f32 %v11179_v59, %v3792_v15  ;;  %v3820_v20 = vmul.f32 1.442695, %v3807_v16 }
0x18ae   :  { %v3801_v53 = vpop.xlane.xlu1 %3800  ;;  %4604 = vmax.xlane.f32.xlu1 %v4603_v29  ;;  %v8217_v14 = vpop.f32.mrb[130].mxu0  ;;  %9015 = vpow2.f32 %v3810_v2  ;;  %v11316_v9 = vmul.f32 0.35355338, %v4577_v31 }
0x18af   :  { %v3809_v36 = vsub.f32 %v11185_v30, %v3801_v53  ;;  %v11313_v12 = vmul.f32 0.35355338, %v8217_v14  ;;  %v4580_v46 = vpop.f32.mrb[131].mxu0  ;;  %9017 = vpow2.f32 %v3812_v45  ;;  %v4618_v62 = vsel %vm468_vm1, %v11307_v61, -inf }
0x18b0   :  { %v3798_v0 = vpop.xlane.xlu0 %3797  ;;  %v11320_v3 = vmul.f32 0.35355338, %v4580_v46  ;;  %4619 = vmax.xlane.f32.xlu0 %v4618_v62  ;;  %v3818_v2 = vmul.f32 1.442695, %v3806_v58  ;;  %v4612_v63 = vsel %vm468_vm1, %v11316_v9, -inf }
0x18b1   :  { %v3824_v40 = vmul.f32 1.442695, %v3809_v36  ;;  %v3808_v59 = vsub.f32 %v11189_v23, %v3798_v0  ;;  %v4621_v30 = vsel %vm468_vm1, %v11313_v12, -inf }
0x18b2   :  { %4622 = vmax.xlane.f32.xlu1 %v4621_v30  ;;  %v4615_v15 = vsel %vm468_vm1, %v11320_v3, -inf  ;;  %v11337_v29 = vpop.permute.xlu1 %4148 }
0x18b3   :  { %v3822_v7 = vmul.f32 1.442695, %v3808_v59  ;;  %9019 = vpow2.f32 %v3824_v40  ;;  %v11329_v18 = vpop.eup %9011 }
0x18b4   :  { %v11327_v60 = vpop.f32.mrb[132].mxu0  ;;  %v3872_v45 = vpop.permute.xlu0 %3871  ;;  %4613 = vmax.xlane.f32.xlu0 %v4612_v63  ;;  %v3832_v36 = vsel %vm468_vm1, %v11329_v18, 0.0 }
0x18b5   :  { %9021 = vpow2.f32 %v3822_v7  ;;  %8393 = vmatprep.subr.msk.bf16.mxu1 %vm3885_vm6, %v3872_v45  ;;  %v11332_v23 = vpop.f32.mrb[133].mxu0  ;;  %v3887_v31 = vsel %vm3885_vm6, %v3872_v45, 0 }
0x18b6   :  { %v11339_v53 = vpop.f32.mrb[134].mxu0  ;;  %4616 = vmax.xlane.f32.xlu1 %v4615_v15  ;;  %8159 = vmatpush3.bf16.msra.mxu1 %v3887_v31  ;;  %9023 = vpow2.f32 %v3818_v2  ;;  %v11391_v6 = vpop.permute.xlu1 %4692 }
0x18b7   :  { %v11341_v14 = vpop.eup %9013  ;;  %8395 = vmatprep.subr.msk.bf16.mxu1 %vm3885_vm6, %v11337_v29  ;;  %v11345_v58 = vpop.f32.mrb[135].mxu0  ;;  %9025 = vpow2.f32 %v3820_v20  ;;  %13028 = vst [vmem:[#allocation18_spill] sm:$0xff] %v11391_v6 }
0x18b8   :  { %v3835_v46 = vsel %vm468_vm1, %v11341_v14, 0.0  ;;  %v11351_v16 = vpop.eup %9015  ;;  %3833 = vadd.xlane.f32.xlu0 %v3832_v36  ;;  %v11385_v56 = vpop.permute.xlu0 %4420 }
0x18b9   :  { %v11353_v62 = vpop.eup %9017  ;;  %v3826_v40 = vsel %vm468_vm1, %v11351_v16, 0.0 }
0x18ba   :  { %3836 = vadd.xlane.f32.xlu1 %v3835_v46  ;;  %v3829_v30 = vsel %vm468_vm1, %v11353_v62, 0.0 }
0x18bc   :  { %v11355_v0 = vpop.f32.mrb[136].mxu0  ;;  %3827 = vadd.xlane.f32.xlu0 %v3826_v40 }
0x18bd   :  { %v11359_v59 = vpop.f32.mrb[137].mxu0  ;;  %v11363_v2 = vpop.eup %9019 }
0x18be   :  { %v11365_v7 = vpop.f32.mrb[138].mxu0  ;;  %3830 = vadd.xlane.f32.xlu1 %v3829_v30  ;;  %v3847_v31 = vsel %vm468_vm1, %v11363_v2, 0.0 }
0x18bf   :  { %v11367_v20 = vpop.eup %9021  ;;  %v11369_v63 = vpop.f32.mrb[139].mxu0 }
0x18c0   :  { %v3844_v45 = vsel %vm468_vm1, %v11367_v20, 0.0  ;;  %v11373_v15 = vpop.eup %9023 }
0x18c1   :  { %3845 = vadd.xlane.f32.xlu0 %v3844_v45  ;;  %v11377_v36 = vpop.eup %9025  ;;  %v3838_v46 = vsel %vm468_vm1, %v11373_v15, 0.0 }
0x18c2   :  { %3848 = vadd.xlane.f32.xlu1 %v3847_v31  ;;  %v3841_v40 = vsel %vm468_vm1, %v11377_v36, 0.0  ;;  %v11395_v31 = vpop.permute.xlu0 %5080 }
0x18c3   :  { %13029 = vst [vmem:[#allocation16_spill] sm:$0xff] %v11395_v31 }
0x18c5   :  { %3839 = vadd.xlane.f32.xlu0 %v3838_v46  ;;  %v11399_v46 = vpop.permute.xlu1 %5356 }
0x18c6   :  { %3842 = vadd.xlane.f32.xlu1 %v3841_v40  ;;  %13030 = vst [vmem:[#allocation17_spill] sm:$0xff] %v11399_v46 }
0x190a   :  { %v11383_v30 = vpop.f32.mrb[140].mxu0 }
0x190b   :  { %v11387_v26 = vpop.f32.mrb[141].mxu0 }
0x190c   :  { %v11389_v45 = vpop.f32.mrb[142].mxu0 }
0x190d   :  { %v11393_v37 = vpop.f32.mrb[143].mxu0 }
0x1912   :  { %v11397_v25 = vpop.f32.mrb[144].mxu0 }
0x1913   :  { %v11401_v8 = vpop.f32.mrb[145].mxu0 }
0x1914   :  { %v11403_v40 = vpop.f32.mrb[146].mxu0 }
0x1915   :  { %v11405_v35 = vpop.f32.mrb[147].mxu0  ;;  %v4064_v21 = vpop.xlane.xlu0 %4063 }
0x1916   :  { %v4082_v52 = vsub.f32 %v11225_v5, %v4064_v21 }
0x1917   :  { %v4067_v44 = vpop.xlane.xlu1 %4066 }
0x1918   :  { %v4092_v4 = vmul.f32 1.442695, %v4082_v52  ;;  %v4083_v54 = vsub.f32 %v11229_v17, %v4067_v44 }
0x1919   :  { %v4058_v50 = vpop.xlane.xlu0 %4057 }
0x191a   :  { %9027 = vpow2.f32 %v4092_v4  ;;  %v4094_v28 = vmul.f32 1.442695, %v4083_v54  ;;  %v4080_v49 = vsub.f32 %v11227_v51, %v4058_v50 }
0x191b   :  { %v4061_v48 = vpop.xlane.xlu1 %4060 }
0x191c   :  { %9029 = vpow2.f32 %v4094_v28  ;;  %v4088_v13 = vmul.f32 1.442695, %v4080_v49  ;;  %v4081_v1 = vsub.f32 %v11233_v19, %v4061_v48 }
0x191d   :  { %v11411_v46 = vpop.f32.mrb[148].mxu0  ;;  %v4076_v31 = vpop.xlane.xlu0 %4075 }
0x191e   :  { %9031 = vpow2.f32 %v4088_v13  ;;  %v4090_v6 = vmul.f32 1.442695, %v4081_v1  ;;  %v4086_v21 = vsub.f32 %v11239_v43, %v4076_v31  ;;  %v11414_v52 = vpop.f32.mrb[149].mxu0 }
0x191f   :  { %v4079_v44 = vpop.xlane.xlu1 %4078  ;;  %v11416_v5 = vpop.f32.mrb[150].mxu0 }
0x1920   :  { %9033 = vpow2.f32 %v4090_v6  ;;  %v4100_v4 = vmul.f32 1.442695, %v4086_v21  ;;  %v4087_v50 = vsub.f32 %v11245_v38, %v4079_v44  ;;  %v11419_v28 = vpop.f32.mrb[151].mxu0 }
0x1921   :  { %v4070_v49 = vpop.xlane.xlu0 %4069 }
0x1922   :  { %9035 = vpow2.f32 %v4100_v4  ;;  %v4102_v48 = vmul.f32 1.442695, %v4087_v50  ;;  %v4084_v54 = vsub.f32 %v11243_v10, %v4070_v49 }
0x1923   :  { %v4073_v13 = vpop.xlane.xlu1 %4072 }
0x1924   :  { %v11422_v1 = vpop.eup %9027  ;;  %9037 = vpow2.f32 %v4102_v48  ;;  %v4096_v51 = vmul.f32 1.442695, %v4084_v54  ;;  %v4085_v17 = vsub.f32 %v11249_v42, %v4073_v13 }
0x1925   :  { %13031 = vst [vmem:[#allocation15_spill] sm:$0xff] %v11422_v1  ;;  %v11425_v19 = vpop.f32.mrb[152].mxu0  ;;  %v4336_v6 = vpop.xlane.xlu0 %4335  ;;  %v4110_v43 = vsel %vm468_vm1, %v11422_v1, 0.0 }
0x1926   :  { %v11429_v38 = vpop.eup %9029  ;;  %9039 = vpow2.f32 %v4096_v51  ;;  %v4098_v31 = vmul.f32 1.442695, %v4085_v17  ;;  %v4354_v21 = vsub.f32 %v11255_v24, %v4336_v6  ;;  %v11432_v10 = vpop.f32.mrb[153].mxu0  ;;  %4111 = vadd.xlane.f32.xlu0 %v4110_v43 }
0x1927   :  { %13032 = vst [vmem:[#allocation24_spill] sm:$0xff] %v11429_v38  ;;  %v4339_v44 = vpop.xlane.xlu1 %4338  ;;  %v11434_v4 = vpop.f32.mrb[154].mxu0  ;;  %v4113_v42 = vsel %vm468_vm1, %v11429_v38, 0.0 }
0x1928   :  { %v11438_v50 = vpop.eup %9031  ;;  %9041 = vpow2.f32 %v4098_v31  ;;  %v4364_v49 = vmul.f32 1.442695, %v4354_v21  ;;  %v11440_v48 = vpop.f32.mrb[155].mxu0  ;;  %4114 = vadd.xlane.f32.xlu1 %v4113_v42  ;;  %v4355_v51 = vsub.f32 %v11261_v32, %v4339_v44 }
0x1929   :  { %13033 = vst [vmem:[#allocation25_spill] sm:$0xff] %v11438_v50  ;;  %v4330_v54 = vpop.xlane.xlu0 %4329  ;;  %v4104_v24 = vsel %vm468_vm1, %v11438_v50, 0.0 }
0x192a   :  { %v11444_v13 = vpop.eup %9033  ;;  %9043 = vpow2.f32 %v4364_v49  ;;  %v4352_v17 = vsub.f32 %v11259_v33, %v4330_v54  ;;  %4105 = vadd.xlane.f32.xlu0 %v4104_v24  ;;  %v4366_v32 = vmul.f32 1.442695, %v4355_v51 }
0x192b   :  { %13034 = vst [vmem:[#allocation26_spill] sm:$0xff] %v11444_v13  ;;  %v4333_v6 = vpop.xlane.xlu1 %4332  ;;  %v4107_v43 = vsel %vm468_vm1, %v11444_v13, 0.0 }
0x192c   :  { %v11450_v31 = vpop.eup %9035  ;;  %v4360_v21 = vmul.f32 1.442695, %v4352_v17  ;;  %4108 = vadd.xlane.f32.xlu1 %v4107_v43  ;;  %v4353_v33 = vsub.f32 %v11265_v39, %v4333_v6 }
0x192d   :  { %13035 = vst [vmem:[#allocation27_spill] sm:$0xff] %v11450_v31  ;;  %v11452_v42 = vpop.f32.mrb[156].mxu0  ;;  %v4348_v1 = vpop.xlane.xlu0 %4347  ;;  %v4122_v50 = vsel %vm468_vm1, %v11450_v31, 0.0 }
0x192e   :  { %13036 = vst [vmem:[#allocation28_spill] sm:$0xff] %v11452_v42  ;;  %v11456_v49 = vpop.eup %9037  ;;  %9045 = vpow2.f32 %v4360_v21  ;;  %v11459_v44 = vpop.f32.mrb[157].mxu0  ;;  %4123 = vadd.xlane.f32.xlu0 %v4122_v50  ;;  %v4358_v31 = vsub.f32 %v11271_v34, %v4348_v1  ;;  %v4362_v50 = vmul.f32 1.442695, %v4353_v33 }
0x192f   :  { %13037 = vst [vmem:[#allocation29_spill] sm:$0xff] %v11456_v49  ;;  %13038 = vst [vmem:[#allocation30_spill] sm:$0xff] %v11459_v44  ;;  %v4351_v54 = vpop.xlane.xlu1 %4350  ;;  %v11461_v24 = vpop.f32.mrb[158].mxu0  ;;  %v4125_v17 = vsel %vm468_vm1, %v11456_v49, 0.0  ;;  %9047 = vpow2.f32 %v4366_v32 }
0x1930   :  { %v11465_v43 = vpop.eup %9039  ;;  %v11467_v13 = vpop.f32.mrb[159].mxu0  ;;  %4126 = vadd.xlane.f32.xlu1 %v4125_v17  ;;  %v4372_v44 = vmul.f32 1.442695, %v4358_v31  ;;  %9049 = vpow2.f32 %v4362_v50  ;;  %v4359_v50 = vsub.f32 %v11277_v22, %v4351_v54 }
0x1931   :  { %13039 = vst [vmem:[#allocation31_spill] sm:$0xff] %v11465_v43  ;;  %v4342_v51 = vpop.xlane.xlu0 %4341  ;;  %v4116_v39 = vsel %vm468_vm1, %v11465_v43, 0.0 }
0x1932   :  { %v11472_v6 = vpop.eup %9041  ;;  %4117 = vadd.xlane.f32.xlu0 %v4116_v39  ;;  %v4356_v17 = vsub.f32 %v11275_v11, %v4342_v51  ;;  %9051 = vpow2.f32 %v4372_v44 }
0x1933   :  { %13040 = vst [vmem:[#allocation32_spill] sm:$0xff] %v11472_v6  ;;  %v4345_v21 = vpop.xlane.xlu1 %4344  ;;  %v4119_v49 = vsel %vm468_vm1, %v11472_v6, 0.0 }
0x1934   :  { %v11476_v38 = vpop.eup %9043  ;;  %4120 = vadd.xlane.f32.xlu1 %v4119_v49  ;;  %v4368_v11 = vmul.f32 1.442695, %v4356_v17  ;;  %v4357_v44 = vsub.f32 %v11281_v41, %v4345_v21  ;;  %v4374_v17 = vmul.f32 1.442695, %v4359_v50 }
0x1935   :  { %13041 = vst [vmem:[#allocation33_spill] sm:$0xff] %v11476_v38  ;;  %v11479_v34 = vpop.f32.mrb[160].mxu0  ;;  %v4608_v1 = vpop.xlane.xlu0 %4607  ;;  %v4382_v39 = vsel %vm468_vm1, %v11476_v38, 0.0 }
0x1936   :  { %v4626_v43 = vsub.f32 %v11287_v47, %v4608_v1  ;;  %v11482_v42 = vpop.f32.mrb[161].mxu0 }
0x1937   :  { %13042 = vst [vmem:[#allocation34_spill] sm:$0xff] %v11482_v42  ;;  %v4611_v32 = vpop.xlane.xlu1 %4610  ;;  %v11484_v33 = vpop.f32.mrb[162].mxu0 }
0x1938   :  { %13043 = vst [vmem:[#allocation35_spill] sm:$0xff] %v11484_v33  ;;  %v11488_v6 = vpop.eup %9045  ;;  %v4636_v49 = vmul.f32 1.442695, %v4626_v43  ;;  %v11490_v31 = vpop.f32.mrb[163].mxu0  ;;  %4383 = vadd.xlane.f32.xlu1 %v4382_v39  ;;  %v4627_v39 = vsub.f32 %v11295_v55, %v4611_v32 }
0x1939   :  { %13044 = vst [vmem:[#allocation36_spill] sm:$0xff] %v11488_v6  ;;  %v4602_v51 = vpop.xlane.xlu0 %4601  ;;  %v4376_v42 = vsel %vm468_vm1, %v11488_v6, 0.0  ;;  %v11496_v33 = vpop.eup %9047 }
0x193a   :  { %9053 = vpow2.f32 %v4636_v49  ;;  %v4624_v47 = vsub.f32 %v11292_v27, %v4602_v51  ;;  %v4385_v51 = vsel %vm468_vm1, %v11496_v33, 0.0  ;;  %v11504_v6 = vpop.eup %9049  ;;  %v4638_v21 = vmul.f32 1.442695, %v4627_v39 }
0x193b   :  { %v4605_v1 = vpop.xlane.xlu1 %4604  ;;  %9055 = vpow2.f32 %v4368_v11  ;;  %v4379_v50 = vsel %vm468_vm1, %v11504_v6, 0.0 }
0x193c   :  { %v4632_v38 = vmul.f32 1.442695, %v4624_v47  ;;  %v4625_v43 = vsub.f32 %v11300_v57, %v4605_v1  ;;  %4377 = vadd.xlane.f32.xlu1 %v4376_v42  ;;  %v4370_v42 = vmul.f32 1.442695, %v4357_v44 }
0x193d   :  { %v4620_v54 = vpop.xlane.xlu0 %4619 }
0x193e   :  { %9057 = vpow2.f32 %v4632_v38  ;;  %v4634_v22 = vmul.f32 1.442695, %v4625_v43  ;;  %v4630_v27 = vsub.f32 %v11307_v61, %v4620_v54  ;;  %v11507_v38 = vpop.eup %9051 }
0x193f   :  { %v4623_v49 = vpop.xlane.xlu1 %4622  ;;  %v4394_v39 = vsel %vm468_vm1, %v11507_v38, 0.0 }
0x1940   :  { %9059 = vpow2.f32 %v4634_v22  ;;  %v4631_v57 = vsub.f32 %v11313_v12, %v4623_v49  ;;  %4386 = vadd.xlane.f32.xlu1 %v4385_v51  ;;  %v4644_v41 = vmul.f32 1.442695, %v4630_v27 }
0x1941   :  { %9061 = vpow2.f32 %v4374_v17  ;;  %v4614_v55 = vpop.xlane.xlu0 %4613 }
0x1942   :  { %v4646_v32 = vmul.f32 1.442695, %v4631_v57  ;;  %v4628_v61 = vsub.f32 %v11316_v9, %v4614_v55  ;;  %9063 = vpow2.f32 %v4644_v41 }
0x1943   :  { %v4617_v11 = vpop.xlane.xlu1 %4616  ;;  %9065 = vpow2.f32 %v4370_v42 }
0x1944   :  { %v11512_v47 = vpop.eup %9053  ;;  %4380 = vadd.xlane.f32.xlu1 %v4379_v50  ;;  %v4640_v12 = vmul.f32 1.442695, %v4628_v61  ;;  %9067 = vpow2.f32 %v4638_v21  ;;  %v4629_v9 = vsub.f32 %v11320_v3, %v4617_v11 }
0x1945   :  { %v4654_v1 = vsel %vm468_vm1, %v11512_v47, 0.0  ;;  %v3834_v43 = vpop.xlane.xlu0 %3833  ;;  %v11516_v44 = vpop.eup %9055  ;;  %9069 = vpow2.f32 %v4646_v32 }
0x1946   :  { %4655 = vadd.xlane.f32.xlu0 %v4654_v1  ;;  %9071 = vpow2.f32 %v4640_v12  ;;  %v4642_v51 = vmul.f32 1.442695, %v4629_v9  ;;  %v4388_v57 = vsel %vm468_vm1, %v11516_v44, 0.0 }
0x1947   :  { %v3837_v17 = vpop.xlane.xlu1 %3836  ;;  %9073 = vrcp.f32 %v3834_v43 }
0x1948   :  { %v11521_v22 = vpop.eup %9057  ;;  %4395 = vadd.xlane.f32.xlu1 %v4394_v39  ;;  %9075 = vrcp.f32 %v3837_v17 }
0x1949   :  { %v4648_v54 = vsel %vm468_vm1, %v11521_v22, 0.0  ;;  %v3828_v49 = vpop.xlane.xlu0 %3827 }
0x194a   :  { %v11525_v27 = vpop.eup %9059  ;;  %4649 = vadd.xlane.f32.xlu0 %v4648_v54  ;;  %9077 = vrcp.f32 %v3828_v49 }
0x194b   :  { %v3831_v3 = vpop.xlane.xlu1 %3830  ;;  %v11529_v42 = vpop.eup %9061  ;;  %v4651_v41 = vsel %vm468_vm1, %v11525_v27, 0.0 }
0x194c   :  { %9079 = vrcp.f32 %v3831_v3  ;;  %4389 = vadd.xlane.f32.xlu1 %v4388_v57  ;;  %v11533_v21 = vpop.eup %9063  ;;  %v4397_v11 = vsel %vm468_vm1, %v11529_v42, 0.0 }
0x194d   :  { %13045 = vst [vmem:[#allocation37_spill] sm:$0xff] %v11533_v21  ;;  %v11535_v32 = vpop.eup %9065  ;;  %9081 = vpow2.f32 %v4642_v51  ;;  %v4666_v1 = vsel %vm468_vm1, %v11533_v21, 0.0  ;;  %v11565_v21 = vmul.f32 0.35355338, %v11345_v58 }
0x194e   :  { %4652 = vadd.xlane.f32.xlu0 %v4651_v41  ;;  %v3846_v55 = vpop.xlane.xlu0 %3845  ;;  %v11539_v50 = vpop.eup %9067  ;;  %v4391_v54 = vsel %vm468_vm1, %v11535_v32, 0.0 }
0x194f   :  { %v3849_v61 = vpop.xlane.xlu1 %3848  ;;  %9083 = vrcp.f32 %v3846_v55  ;;  %v11541_v12 = vpop.eup %9069  ;;  %v11553_v55 = vmul.f32 0.35355338, %v11339_v53 }
0x1950   :  { %4398 = vadd.xlane.f32.xlu1 %v4397_v11  ;;  %9085 = vrcp.f32 %v3849_v61  ;;  %v11545_v43 = vpop.eup %9071  ;;  %v4657_v61 = vsel %vm468_vm1, %v11539_v50, 0.0 }
0x1951   :  { %v9074_v17 = vpop.eup %9073  ;;  %v4660_v3 = vsel %vm468_vm1, %v11545_v43, 0.0 }
0x1952   :  { %4667 = vadd.xlane.f32.xlu0 %v4666_v1  ;;  %v3840_v9 = vpop.xlane.xlu0 %3839  ;;  %v9076_v49 = vpop.eup %9075 }
0x1953   :  { %9087 = vrcp.f32 %v3840_v9  ;;  %v3843_v39 = vpop.xlane.xlu1 %3842  ;;  %v3861_v41 = vmul.f32 %v9076_v49, %v11341_v14  ;;  %v3860_v9 = vmul.f32 %v9074_v17, %v11329_v18  ;;  %v4163_v18 = vsel %vm3885_vm6, %v11337_v29, 0 }
0x1954   :  { %9089 = vrcp.f32 %v3843_v39  ;;  %4392 = vadd.xlane.f32.xlu1 %v4391_v54  ;;  %v9078_v51 = vpop.eup %9077  ;;  %v4669_v54 = vsel %vm468_vm1, %v11541_v12, 0.0  ;;  %v11574_v17 = vmul.f32 0.35355338, %v11327_v60  ;;  %v11584_v29 = vmul.f32 0.35355338, %v11365_v7 }
0x1955   :  { %v3858_v11 = vmul.f32 %v9078_v51, %v11351_v16  ;;  %v4996_v16 = vsel %vm468_vm1, %v11553_v55, -inf  ;;  %v4990_v60 = vsel %vm468_vm1, %v11565_v21, -inf }
0x1956   :  { %v9080_v57 = vpop.eup %9079  ;;  %4661 = vadd.xlane.f32.xlu0 %v4660_v3  ;;  %v3867_v3 = vpack.c.bf16 %v3861_v41, %v3860_v9  ;;  %v4993_v9 = vsel %vm468_vm1, %v11574_v17, -inf  ;;  %v5008_v7 = vsel %vm468_vm1, %v11584_v29, -inf }
0x1957   :  { %v3859_v1 = vmul.f32 %v9080_v57, %v11353_v62  ;;  %v11560_v39 = vpop.eup %9081 }
0x1958   :  { %4658 = vadd.xlane.f32.xlu1 %v4657_v61  ;;  %v4663_v58 = vsel %vm468_vm1, %v11560_v39, 0.0 }
0x1959   :  { %v3866_v14 = vpack.c.bf16 %v3859_v1, %v3858_v11  ;;  %v9084_v49 = vpop.eup %9083  ;;  %v11590_v1 = vmul.f32 0.35355338, %v11332_v23  ;;  %v11602_v23 = vmul.f32 0.35355338, %v11355_v0  ;;  %v11617_v0 = vmul.f32 0.35355338, %v11393_v37 }
0x195a   :  { %4670 = vadd.xlane.f32.xlu0 %v4669_v54  ;;  %v9086_v53 = vpop.eup %9085  ;;  %v3864_v41 = vmul.f32 %v9084_v49, %v11367_v20  ;;  %v11607_v54 = vmul.f32 0.35355338, %v11389_v45  ;;  %v11622_v45 = vmul.f32 0.35355338, %v11383_v30  ;;  %v11632_v37 = vmul.f32 0.35355338, %v11387_v26 }
0x195b   :  { %8160 = vmatprep.mubr.msk.bf16.mxu1 %vm468_vm1, %v3866_v14  ;;  %v3865_v61 = vmul.f32 %v9086_v53, %v11363_v2  ;;  %v11595_v2 = vmul.f32 0.35355338, %v11369_v63  ;;  %v11612_v14 = vmul.f32 0.35355338, %v11359_v59  ;;  %v5005_v49 = vsel %vm468_vm1, %v11602_v23, -inf }
0x195c   :  { %4997 = vmax.xlane.f32.xlu1 %v4996_v16  ;;  %8161 = vmatmul.mubr.msk.bf16.vlgmr.msra.gmra.mrb[80].mxu1 %vm468_vm1, %v3867_v3  ;;  %v5273_v3 = vsel %vm468_vm1, %v11607_v54, -inf  ;;  %v11627_v59 = vmul.f32 0.35355338, %v11403_v40  ;;  %v5267_v16 = vsel %vm468_vm1, %v11617_v0, -inf  ;;  %v11637_v30 = vmul.f32 0.35355338, %v11405_v35 }
0x195d   :  { %v9088_v62 = vpop.eup %9087  ;;  %8179 = vmatpush3.bf16.msra.mxu1 %v4163_v18  ;;  %v3869_v20 = vpack.c.bf16 %v3865_v61, %v3864_v41  ;;  %v5002_v63 = vsel %vm468_vm1, %v11595_v2, -inf  ;;  %v4999_v53 = vsel %vm468_vm1, %v11612_v14, -inf  ;;  %v5270_v18 = vsel %vm468_vm1, %v11622_v45, -inf }
0x195e   :  { %v9090_v51 = vpop.eup %9089  ;;  %8397 = vmatprep.subr.msk.bf16.mxu1 %vm3885_vm6, %v11385_v56  ;;  %4664 = vadd.xlane.f32.xlu0 %v4663_v58  ;;  %v3862_v57 = vmul.f32 %v9088_v62, %v11373_v15  ;;  %v5285_v62 = vsel %vm468_vm1, %v11627_v59, -inf  ;;  %v11642_v40 = vmul.f32 0.35355338, %v11397_v25  ;;  %v5264_v58 = vsel %vm468_vm1, %v11632_v37, -inf }
0x195f   :  { %v3863_v11 = vmul.f32 %v9090_v51, %v11377_v36  ;;  %v4987_v36 = vsel %vm468_vm1, %v11590_v1, -inf  ;;  %v11647_v26 = vmul.f32 0.35355338, %v11416_v5  ;;  %v5279_v51 = vsel %vm468_vm1, %v11637_v30, -inf }
0x1960   :  { %4991 = vmax.xlane.f32.xlu1 %v4990_v60  ;;  %v11652_v35 = vmul.f32 0.35355338, %v11401_v8  ;;  %v11657_v25 = vmul.f32 0.35355338, %v11419_v28  ;;  %v11662_v5 = vmul.f32 0.35355338, %v11411_v46 }
0x1961   :  { %v3868_v15 = vpack.c.bf16 %v3863_v11, %v3862_v57  ;;  %v5282_v57 = vsel %vm468_vm1, %v11642_v40, -inf  ;;  %v5545_v41 = vsel %vm468_vm1, %v11647_v26, -inf  ;;  %v11667_v8 = vmul.f32 0.35355338, %v11434_v4 }
0x1962   :  { %4994 = vmax.xlane.f32.xlu0 %v4993_v9  ;;  %v5276_v61 = vsel %vm468_vm1, %v11652_v35, -inf  ;;  %v5539_v60 = vsel %vm468_vm1, %v11657_v25, -inf  ;;  %v11672_v28 = vmul.f32 0.35355338, %v11414_v52  ;;  %v5542_v11 = vsel %vm468_vm1, %v11662_v5, -inf }
0x1963   :  { %8164 = vmatprep.mubr.msk.bf16.mxu1 %vm468_vm1, %v3868_v15  ;;  %v11677_v46 = vmul.f32 0.35355338, %v11440_v48  ;;  %v5557_v9 = vsel %vm468_vm1, %v11667_v8, -inf  ;;  %v11682_v4 = vmul.f32 0.35355338, %v11425_v19 }
0x1964   :  { %5009 = vmax.xlane.f32.xlu1 %v5008_v7  ;;  %8165 = vmatmul.mubr.msk.bf16.gmra.mrb[84].mxu1 %vm468_vm1, %v3869_v20  ;;  %v5536_v15 = vsel %vm468_vm1, %v11672_v28, -inf  ;;  %v11687_v52 = vmul.f32 0.35355338, %v11461_v24  ;;  %v11692_v48 = vmul.f32 0.35355338, %v11432_v10  ;;  %v13046_v24 = vld [vmem:[#allocation28_spill] sm:$0xff] }
0x1965   :  { %v5551_v20 = vsel %vm468_vm1, %v11677_v46, -inf  ;;  %v5554_v7 = vsel %vm468_vm1, %v11682_v4, -inf  ;;  %v11697_v19 = vmul.f32 0.35355338, %v11467_v13  ;;  %v11707_v10 = vmul.f32 0.35355338, %v11479_v34 }
0x1966   :  { %4988 = vmax.xlane.f32.xlu0 %v4987_v36  ;;  %v5817_v36 = vsel %vm468_vm1, %v11687_v52, -inf  ;;  %v13047_v13 = vld [vmem:[#allocation30_spill] sm:$0xff] }
0x1967   :  { %v13049_v34 = vld [vmem:[#allocation34_spill] sm:$0xff] }
0x1968   :  { %5003 = vmax.xlane.f32.xlu1 %v5002_v63  ;;  %v11702_v63 = vmul.f32 0.35355338, %v13046_v24 }
0x196a   :  { %5006 = vmax.xlane.f32.xlu0 %v5005_v49  ;;  %v5548_v49 = vsel %vm468_vm1, %v11692_v48, -inf }
0x196c   :  { %5274 = vmax.xlane.f32.xlu1 %v5273_v3  ;;  %v5811_v3 = vsel %vm468_vm1, %v11697_v19, -inf }
0x196e   :  { %5000 = vmax.xlane.f32.xlu0 %v4999_v53  ;;  %v11712_v53 = vmul.f32 0.35355338, %v13047_v13 }
0x1970   :  { %5268 = vmax.xlane.f32.xlu1 %v5267_v16  ;;  %v5814_v16 = vsel %vm468_vm1, %v11702_v63, -inf }
0x1972   :  { %5271 = vmax.xlane.f32.xlu0 %v5270_v18  ;;  %v13048_v18 = vld [vmem:[#allocation35_spill] sm:$0xff] }
0x1974   :  { %5286 = vmax.xlane.f32.xlu1 %v5285_v62  ;;  %v11717_v62 = vmul.f32 0.35355338, %v13048_v18 }
0x1976   :  { %5265 = vmax.xlane.f32.xlu0 %v5264_v58  ;;  %v5826_v58 = vsel %vm468_vm1, %v11707_v10, -inf }
0x1978   :  { %5280 = vmax.xlane.f32.xlu1 %v5279_v51  ;;  %v11722_v51 = vmul.f32 0.35355338, %v13049_v34 }
0x197a   :  { %5283 = vmax.xlane.f32.xlu0 %v5282_v57  ;;  %13050 = vst [vmem:[#allocation28_spill] sm:$0xff] %v11722_v51  ;;  %v5808_v57 = vsel %vm468_vm1, %v11712_v53, -inf }
0x197c   :  { %5546 = vmax.xlane.f32.xlu1 %v5545_v41  ;;  %v11727_v41 = vmul.f32 0.35355338, %v11490_v31 }
0x197e   :  { %5277 = vmax.xlane.f32.xlu0 %v5276_v61  ;;  %13051 = vst [vmem:[#allocation30_spill] sm:$0xff] %v11727_v41  ;;  %v5829_v61 = vsel %vm468_vm1, %v11717_v62, -inf }
0x1980   :  { %5540 = vmax.xlane.f32.xlu1 %v5539_v60  ;;  %v5820_v60 = vsel %vm468_vm1, %v11722_v51, -inf }
0x1982   :  { %5543 = vmax.xlane.f32.xlu0 %v5542_v11  ;;  %v5823_v11 = vsel %vm468_vm1, %v11727_v41, -inf }
0x1984   :  { %5558 = vmax.xlane.f32.xlu1 %v5557_v9 }
0x1986   :  { %5537 = vmax.xlane.f32.xlu0 %v5536_v15 }
0x1988   :  { %5552 = vmax.xlane.f32.xlu1 %v5551_v20 }
0x198a   :  { %5555 = vmax.xlane.f32.xlu0 %v5554_v7 }
0x198c   :  { %5818 = vmax.xlane.f32.xlu1 %v5817_v36 }
0x198e   :  { %5549 = vmax.xlane.f32.xlu0 %v5548_v49 }
0x1990   :  { %5812 = vmax.xlane.f32.xlu1 %v5811_v3 }
0x1992   :  { %5815 = vmax.xlane.f32.xlu0 %v5814_v16 }
0x1994   :  { %5827 = vmax.xlane.f32.xlu1 %v5826_v58  ;;  %v13052_v58 = vld [vmem:[#allocation24_spill] sm:$0xff] }
0x1996   :  { %5809 = vmax.xlane.f32.xlu0 %v5808_v57 }
0x1998   :  { %5830 = vmax.xlane.f32.xlu1 %v5829_v61  ;;  %v13053_v61 = vld [vmem:[#allocation25_spill] sm:$0xff] }
0x199a   :  { %5821 = vmax.xlane.f32.xlu0 %v5820_v60 }
0x199c   :  { %5824 = vmax.xlane.f32.xlu1 %v5823_v11  ;;  %v13054_v11 = vld [vmem:[#allocation26_spill] sm:$0xff] }
0x19b3   :  { %v4112_v9 = vpop.xlane.xlu0 %4111 }
0x19b5   :  { %v4115_v15 = vpop.xlane.xlu1 %4114 }
0x19b6   :  { %9091 = vrcp.f32 %v4115_v15  ;;  %v13055_v15 = vld [vmem:[#allocation15_spill] sm:$0xff] }
0x19b7   :  { %v4106_v20 = vpop.xlane.xlu0 %4105 }
0x19b8   :  { %9093 = vrcp.f32 %v4106_v20 }
0x19b9   :  { %9095 = vrcp.f32 %v4112_v9  ;;  %v4109_v31 = vpop.xlane.xlu1 %4108 }
0x19ba   :  { %9097 = vrcp.f32 %v4109_v31 }
0x19bb   :  { %v4124_v7 = vpop.xlane.xlu0 %4123 }
0x19bd   :  { %v4127_v36 = vpop.xlane.xlu1 %4126 }
0x19be   :  { %9099 = vrcp.f32 %v4127_v36 }
0x19bf   :  { %v4118_v24 = vpop.xlane.xlu0 %4117 }
0x19c0   :  { %9101 = vrcp.f32 %v4118_v24  ;;  %v9092_v49 = vpop.eup %9091 }
0x19c1   :  { %9103 = vrcp.f32 %v4124_v7  ;;  %v4121_v3 = vpop.xlane.xlu1 %4120  ;;  %v4139_v34 = vmul.f32 %v9092_v49, %v13052_v58 }
0x19c2   :  { %v9094_v13 = vpop.eup %9093  ;;  %9105 = vrcp.f32 %v4121_v3  ;;  %v4435_v3 = vsel %vm3885_vm6, %v11385_v56, 0 }
0x19c3   :  { %v9096_v16 = vpop.eup %9095  ;;  %v4136_v60 = vmul.f32 %v9094_v13, %v13053_v61  ;;  %v13056_v13 = vld [vmem:[#allocation18_spill] sm:$0xff] }
0x19c4   :  { %v9098_v18 = vpop.eup %9097  ;;  %v4138_v20 = vmul.f32 %v9096_v16, %v13055_v15  ;;  %v13060_v15 = vld [vmem:[#allocation27_spill] sm:$0xff] }
0x19c5   :  { %v4384_v57 = vpop.xlane.xlu1 %4383  ;;  %v4137_v9 = vmul.f32 %v9098_v18, %v13054_v11  ;;  %v13057_v18 = vld [vmem:[#allocation29_spill] sm:$0xff]  ;;  %v13059_v11 = vld [vmem:[#allocation32_spill] sm:$0xff] }
0x19c6   :  { %v4145_v36 = vpack.c.bf16 %v4139_v34, %v4138_v20  ;;  %v13058_v34 = vld [vmem:[#allocation31_spill] sm:$0xff] }
0x19c7   :  { %v4144_v31 = vpack.c.bf16 %v4137_v9, %v4136_v60 }
0x19c8   :  { %v9100_v51 = vpop.eup %9099 }
0x19c9   :  { %v4378_v24 = vpop.xlane.xlu1 %4377  ;;  %8180 = vmatprep.mubr.msk.bf16.mxu1 %vm468_vm1, %v4144_v31  ;;  %v4143_v16 = vmul.f32 %v9100_v51, %v13057_v18 }
0x19ca   :  { %v9102_v7 = vpop.eup %9101  ;;  %8181 = vmatmul.mubr.msk.bf16.vlgmr.msra.gmra.mrb[88].mxu1 %vm468_vm1, %v4145_v36 }
0x19cb   :  { %v9104_v49 = vpop.eup %9103  ;;  %8199 = vmatpush3.bf16.msra.mxu1 %v4435_v3  ;;  %v4140_v60 = vmul.f32 %v9102_v7, %v13058_v34 }
0x19cc   :  { %v9106_v58 = vpop.eup %9105  ;;  %8399 = vmatprep.subr.msk.bf16.mxu1 %vm3885_vm6, %v13056_v13  ;;  %v4142_v20 = vmul.f32 %v9104_v49, %v13060_v15 }
0x19cd   :  { %v4387_v61 = vpop.xlane.xlu1 %4386  ;;  %v4141_v9 = vmul.f32 %v9106_v58, %v13059_v11 }
0x19ce   :  { %9107 = vrcp.f32 %v4387_v61  ;;  %v4147_v36 = vpack.c.bf16 %v4143_v16, %v4142_v20 }
0x19cf   :  { %v4146_v31 = vpack.c.bf16 %v4141_v9, %v4140_v60  ;;  %9109 = vrcp.f32 %v4378_v24  ;;  %v13062_v9 = vld [vmem:[#allocation33_spill] sm:$0xff] }
0x19d0   :  { %9111 = vrcp.f32 %v4384_v57  ;;  %v13061_v57 = vld [vmem:[#allocation36_spill] sm:$0xff] }
0x19d1   :  { %v4381_v56 = vpop.xlane.xlu1 %4380  ;;  %8184 = vmatprep.mubr.msk.bf16.mxu1 %vm468_vm1, %v4146_v31 }
0x19d2   :  { %9113 = vrcp.f32 %v4381_v56  ;;  %8185 = vmatmul.mubr.msk.bf16.gmra.mrb[92].mxu1 %vm468_vm1, %v4147_v36 }
0x19d3   :  { %v4656_v3 = vpop.xlane.xlu0 %4655 }
0x19d5   :  { %v4396_v51 = vpop.xlane.xlu1 %4395 }
0x19d6   :  { %9115 = vrcp.f32 %v4396_v51 }
0x19d7   :  { %v4650_v18 = vpop.xlane.xlu0 %4649 }
0x19d8   :  { %v9108_v41 = vpop.eup %9107 }
0x19d9   :  { %v4390_v7 = vpop.xlane.xlu1 %4389  ;;  %v9110_v34 = vpop.eup %9109  ;;  %v4411_v61 = vmul.f32 %v9108_v41, %v11496_v33  ;;  %v4707_v33 = vsel %vm3885_vm6, %v13056_v13, 0  ;;  %v13063_v41 = vld [vmem:[#allocation16_spill] sm:$0xff] }
0x19da   :  { %v9112_v58 = vpop.eup %9111  ;;  %v4408_v16 = vmul.f32 %v9110_v34, %v13061_v57  ;;  %9117 = vrcp.f32 %v4390_v7 }
0x19db   :  { %v4653_v11 = vpop.xlane.xlu0 %4652  ;;  %v4410_v15 = vmul.f32 %v9112_v58, %v13062_v9 }
0x19dc   :  { %v9114_v49 = vpop.eup %9113 }
0x19dd   :  { %v4399_v24 = vpop.xlane.xlu1 %4398  ;;  %v4409_v60 = vmul.f32 %v9114_v49, %v11504_v6  ;;  %v4417_v36 = vpack.c.bf16 %v4411_v61, %v4410_v15 }
0x19de   :  { %9119 = vrcp.f32 %v4399_v24 }
0x19df   :  { %v4668_v20 = vpop.xlane.xlu0 %4667  ;;  %v4416_v31 = vpack.c.bf16 %v4409_v60, %v4408_v16  ;;  %9121 = vrcp.f32 %v4653_v11 }
0x19e0   :  { %9123 = vrcp.f32 %v4650_v18  ;;  %v9116_v7 = vpop.eup %9115 }
0x19e1   :  { %v4393_v56 = vpop.xlane.xlu1 %4392  ;;  %8200 = vmatprep.mubr.msk.bf16.mxu1 %vm468_vm1, %v4416_v31  ;;  %v4414_v31 = vmul.f32 %v9116_v7, %v11507_v38 }
0x19e2   :  { %9125 = vrcp.f32 %v4393_v56  ;;  %8201 = vmatmul.mubr.msk.bf16.vlgmr.msra.gmra.mrb[96].mxu1 %vm468_vm1, %v4417_v36 }
0x19e3   :  { %8219 = vmatpush3.bf16.msra.mxu1 %v4707_v33  ;;  %v4662_v6 = vpop.xlane.xlu0 %4661 }
0x19e4   :  { %8401 = vmatprep.subr.msk.bf16.mxu1 %vm3885_vm6, %v13063_v41  ;;  %v9118_v58 = vpop.eup %9117 }
0x19e5   :  { %v4659_v51 = vpop.xlane.xlu1 %4658  ;;  %v4412_v60 = vmul.f32 %v9118_v58, %v11516_v44 }
0x19e6   :  { %9127 = vrcp.f32 %v4659_v51 }
0x19e7   :  { %v4671_v34 = vpop.xlane.xlu0 %4670  ;;  %9129 = vrcp.f32 %v4656_v3 }
0x19e8   :  { %v9120_v18 = vpop.eup %9119  ;;  %9131 = vrcp.f32 %v4662_v6 }
0x19e9   :  { %v4998_v11 = vpop.xlane.xlu1 %4997  ;;  %v9122_v49 = vpop.eup %9121  ;;  %v4415_v13 = vmul.f32 %v9120_v18, %v11529_v42 }
0x19ea   :  { %v9124_v61 = vpop.eup %9123  ;;  %v4681_v15 = vmul.f32 %v9122_v49, %v11525_v27 }
0x19eb   :  { %v4665_v24 = vpop.xlane.xlu0 %4664  ;;  %v4680_v56 = vmul.f32 %v9124_v61, %v11521_v22  ;;  %v4419_v6 = vpack.c.bf16 %v4415_v13, %v4414_v31 }
0x19ec   :  { %v9126_v57 = vpop.eup %9125  ;;  %9133 = vrcp.f32 %v4665_v24 }
0x19ed   :  { %v4992_v16 = vpop.xlane.xlu1 %4991  ;;  %v4413_v9 = vmul.f32 %v9126_v57, %v11535_v32  ;;  %9135 = vrcp.f32 %v4671_v34  ;;  %v4688_v44 = vpack.c.bf16 %v4681_v15, %v4680_v56  ;;  %v5014_v32 = vsub.f32 %v11553_v55, %v4998_v11  ;;  %v13065_v56 = vld [vmem:[#allocation37_spill] sm:$0xff] }
0x19ee   :  { %9137 = vrcp.f32 %v4668_v20  ;;  %v5012_v55 = vsub.f32 %v11565_v21, %v4992_v16 }
0x19ef   :  { %v4995_v3 = vpop.xlane.xlu0 %4994  ;;  %v4418_v36 = vpack.c.bf16 %v4413_v9, %v4412_v60  ;;  %v5025_v49 = vmul.f32 1.442695, %v5014_v32 }
0x19f0   :  { %v5013_v33 = vsub.f32 %v11574_v17, %v4995_v3  ;;  %v9128_v51 = vpop.eup %9127 }
0x19f1   :  { %v11768_v42 = vpop.xlane.xlu1 %5009  ;;  %8204 = vmatprep.mubr.msk.bf16.mxu1 %vm468_vm1, %v4418_v36  ;;  %v9130_v38 = vpop.eup %9129  ;;  %v4683_v17 = vmul.f32 %v9128_v51, %v11539_v50 }
0x19f2   :  { %v5023_v27 = vmul.f32 1.442695, %v5013_v33  ;;  %8205 = vmatmul.mubr.msk.bf16.gmra.mrb[100].mxu1 %vm468_vm1, %v4419_v6  ;;  %v9132_v22 = vpop.eup %9131  ;;  %v4682_v18 = vmul.f32 %v9130_v38, %v11512_v47  ;;  %v5095_v47 = vsel %vm3885_vm6, %v13063_v41, 0 }
0x19f3   :  { %8220 = vmatprep.mubr.msk.bf16.mxu1 %vm468_vm1, %v4688_v44  ;;  %v4989_v7 = vpop.xlane.xlu0 %4988  ;;  %v4684_v24 = vmul.f32 %v9132_v22, %v11545_v43 }
0x19f4   :  { %9139 = vpow2.f32 %v5023_v27  ;;  %v5011_v20 = vsub.f32 %v11590_v1, %v4989_v7  ;;  %v4689_v13 = vpack.c.bf16 %v4683_v17, %v4682_v18  ;;  %v5021_v1 = vmul.f32 1.442695, %v5012_v55 }
0x19f5   :  { %v11776_v34 = vpop.xlane.xlu1 %5003 }
0x19f6   :  { %v9134_v58 = vpop.eup %9133  ;;  %v5019_v11 = vmul.f32 1.442695, %v5011_v20 }
0x19f7   :  { %v5007_v61 = vpop.xlane.xlu0 %5006  ;;  %v4685_v57 = vmul.f32 %v9134_v58, %v11560_v39  ;;  %v9136_v50 = vpop.eup %9135  ;;  %v13064_v39 = vld [vmem:[#allocation17_spill] sm:$0xff] }
0x19f8   :  { %9141 = vpow2.f32 %v5019_v11  ;;  %v5017_v15 = vsub.f32 %v11602_v23, %v5007_v61  ;;  %v9138_v21 = vpop.eup %9137  ;;  %v4687_v16 = vmul.f32 %v9136_v50, %v11541_v12  ;;  %v5018_v12 = vsub.f32 %v11584_v29, %v11768_v42 }
0x19f9   :  { %v5275_v60 = vpop.xlane.xlu1 %5274  ;;  %v4690_v9 = vpack.c.bf16 %v4685_v57, %v4684_v24  ;;  %9143 = vpow2.f32 %v5025_v49  ;;  %v4686_v33 = vmul.f32 %v9138_v21, %v13065_v56  ;;  %v5016_v42 = vsub.f32 %v11595_v2, %v11776_v34 }
0x19fa   :  { %8221 = vmatmul.mubr.msk.bf16.vlgmr.msra.gmra.mrb[104].mxu1 %vm468_vm1, %v4689_v13  ;;  %9145 = vpow2.f32 %v5021_v1  ;;  %v5031_v23 = vmul.f32 1.442695, %v5017_v15  ;;  %v5033_v29 = vmul.f32 1.442695, %v5018_v12  ;;  %v5291_v24 = vsub.f32 %v11607_v54, %v5275_v60 }
0x19fb   :  { %8239 = vmatpush3.bf16.msra.mxu1 %v5095_v47  ;;  %8224 = vmatprep.mubr.msk.bf16.mxu1 %vm468_vm1, %v4690_v9  ;;  %v5001_v43 = vpop.xlane.xlu0 %5000  ;;  %v4691_v44 = vpack.c.bf16 %v4687_v16, %v4686_v33 }
0x19fc   :  { %8403 = vmatprep.subr.msk.bf16.mxu1 %vm3885_vm6, %v13064_v39  ;;  %v5015_v36 = vsub.f32 %v11612_v14, %v5001_v43  ;;  %9147 = vpow2.f32 %v5031_v23  ;;  %v5302_v1 = vmul.f32 1.442695, %v5291_v24 }
0x19fd   :  { %v5269_v31 = vpop.xlane.xlu1 %5268 }
0x19fe   :  { %v11790_v3 = vpop.eup %9139  ;;  %v5027_v38 = vmul.f32 1.442695, %v5015_v36  ;;  %v5289_v14 = vsub.f32 %v11617_v0, %v5269_v31 }
0x19ff   :  { %v5272_v41 = vpop.xlane.xlu0 %5271  ;;  %v5041_v6 = vsel %vm468_vm1, %v11790_v3, 0.0 }
0x1a00   :  { %v5290_v51 = vsub.f32 %v11622_v45, %v5272_v41  ;;  %5042 = vadd.xlane.f32.xlu0 %v5041_v6  ;;  %v5298_v0 = vmul.f32 1.442695, %v5289_v14 }
0x1a01   :  { %v5287_v32 = vpop.xlane.xlu1 %5286 }
0x1a02   :  { %v11799_v27 = vpop.eup %9141  ;;  %v5300_v7 = vmul.f32 1.442695, %v5290_v51  ;;  %8225 = vmatmul.mubr.msk.bf16.gmra.mrb[108].mxu1 %vm468_vm1, %v4691_v44  ;;  %v5295_v47 = vsub.f32 %v11627_v59, %v5287_v32 }
0x1a03   :  { %v5266_v22 = vpop.xlane.xlu0 %5265  ;;  %v5035_v17 = vsel %vm468_vm1, %v11799_v27, 0.0  ;;  %v11805_v45 = vpop.eup %9143 }
0x1a04   :  { %9149 = vpow2.f32 %v5300_v7  ;;  %v5288_v20 = vsub.f32 %v11632_v37, %v5266_v22  ;;  %5036 = vadd.xlane.f32.xlu1 %v5035_v17  ;;  %v5044_v55 = vsel %vm468_vm1, %v11805_v45, 0.0  ;;  %v11812_v11 = vpop.eup %9145  ;;  %v5029_v37 = vmul.f32 1.442695, %v5016_v42 }
0x1a05   :  { %v5281_v58 = vpop.xlane.xlu1 %5280  ;;  %9151 = vpow2.f32 %v5027_v38  ;;  %v5038_v13 = vsel %vm468_vm1, %v11812_v11, 0.0  ;;  %v5310_v59 = vmul.f32 1.442695, %v5295_v47 }
0x1a06   :  { %v5296_v18 = vmul.f32 1.442695, %v5288_v20  ;;  %v11818_v50 = vpop.eup %9147 }
0x1a07   :  { %v5284_v49 = vpop.xlane.xlu0 %5283  ;;  %v5053_v21 = vsel %vm468_vm1, %v11818_v50, 0.0 }
0x1a08   :  { %9153 = vpow2.f32 %v5296_v18  ;;  %v5294_v61 = vsub.f32 %v11642_v40, %v5284_v49  ;;  %5045 = vadd.xlane.f32.xlu1 %v5044_v55 }
0x1a09   :  { %9155 = vpow2.f32 %v5033_v29  ;;  %v5547_v57 = vpop.xlane.xlu1 %5546 }
0x1a0a   :  { %9157 = vpow2.f32 %v5298_v0  ;;  %v5308_v2 = vmul.f32 1.442695, %v5294_v61  ;;  %v5563_v36 = vsub.f32 %v11647_v26, %v5547_v57 }
0x1a0b   :  { %v5278_v34 = vpop.xlane.xlu0 %5277  ;;  %9159 = vpow2.f32 %v5029_v37 }
0x1a0c   :  { %v5292_v9 = vsub.f32 %v11652_v35, %v5278_v34  ;;  %5039 = vadd.xlane.f32.xlu1 %v5038_v13  ;;  %9161 = vpow2.f32 %v5308_v2  ;;  %v5293_v35 = vsub.f32 %v11637_v30, %v5281_v58  ;;  %v5574_v32 = vmul.f32 1.442695, %v5563_v36 }
0x1a0d   :  { %v5541_v40 = vpop.xlane.xlu1 %5540  ;;  %9163 = vpow2.f32 %v5302_v1 }
0x1a0e   :  { %v11821_v15 = vpop.eup %9149  ;;  %v5304_v54 = vmul.f32 1.442695, %v5292_v9  ;;  %v5306_v44 = vmul.f32 1.442695, %v5293_v35  ;;  %v5561_v12 = vsub.f32 %v11657_v25, %v5541_v40 }
0x1a0f   :  { %v5544_v60 = vpop.xlane.xlu0 %5543  ;;  %v5318_v43 = vsel %vm468_vm1, %v11821_v15, 0.0  ;;  %v11828_v16 = vpop.eup %9151 }
0x1a10   :  { %5054 = vadd.xlane.f32.xlu1 %v5053_v21  ;;  %5319 = vadd.xlane.f32.xlu0 %v5318_v43  ;;  %9165 = vpow2.f32 %v5304_v54  ;;  %v5047_v41 = vsel %vm468_vm1, %v11828_v16, 0.0  ;;  %v5562_v38 = vsub.f32 %v11662_v5, %v5544_v60  ;;  %v5570_v25 = vmul.f32 1.442695, %v5561_v12 }
0x1a11   :  { %v11831_v31 = vpop.xlane.xlu1 %5558  ;;  %9167 = vpow2.f32 %v5310_v59 }
0x1a12   :  { %v11833_v23 = vpop.eup %9153  ;;  %v5572_v5 = vmul.f32 1.442695, %v5562_v38  ;;  %v5567_v9 = vsub.f32 %v11667_v8, %v11831_v31 }
0x1a13   :  { %v11836_v56 = vpop.eup %9155  ;;  %v5538_v33 = vpop.xlane.xlu0 %5537  ;;  %v5312_v6 = vsel %vm468_vm1, %v11833_v23, 0.0 }
0x1a14   :  { %v11842_v51 = vpop.eup %9157  ;;  %v5560_v30 = vsub.f32 %v11672_v28, %v5538_v33  ;;  %5048 = vadd.xlane.f32.xlu1 %v5047_v41  ;;  %5313 = vadd.xlane.f32.xlu0 %v5312_v6  ;;  %v5056_v17 = vsel %vm468_vm1, %v11836_v56, 0.0  ;;  %v5582_v35 = vmul.f32 1.442695, %v5567_v9 }
0x1a15   :  { %v11846_v26 = vpop.xlane.xlu1 %5552  ;;  %v11849_v7 = vpop.eup %9159  ;;  %v5315_v28 = vsel %vm468_vm1, %v11842_v51, 0.0 }
0x1a16   :  { %v5568_v14 = vmul.f32 1.442695, %v5560_v30  ;;  %v11855_v20 = vpop.eup %9161  ;;  %v5050_v18 = vsel %vm468_vm1, %v11849_v7, 0.0 }
0x1a17   :  { %v5556_v22 = vpop.xlane.xlu0 %5555  ;;  %v11860_v58 = vpop.eup %9163  ;;  %v5330_v49 = vsel %vm468_vm1, %v11855_v20, 0.0 }
0x1a18   :  { %9169 = vpow2.f32 %v5568_v14  ;;  %5057 = vadd.xlane.f32.xlu1 %v5056_v17  ;;  %5316 = vadd.xlane.f32.xlu0 %v5315_v28  ;;  %v5566_v42 = vsub.f32 %v11682_v4, %v5556_v22  ;;  %v5321_v57 = vsel %vm468_vm1, %v11860_v58, 0.0 }
0x1a19   :  { %9171 = vpow2.f32 %v5306_v44  ;;  %v11857_v29 = vpop.xlane.xlu1 %5818 }
0x1a1a   :  { %9173 = vpow2.f32 %v5574_v32  ;;  %v11866_v55 = vpop.eup %9165  ;;  %v5580_v61 = vmul.f32 1.442695, %v5566_v42 }
0x1a1b   :  { %v5550_v0 = vpop.xlane.xlu0 %5549  ;;  %9175 = vpow2.f32 %v5570_v25  ;;  %v5324_v2 = vsel %vm468_vm1, %v11866_v55, 0.0  ;;  %v11873_v34 = vpop.eup %9167 }
0x1a1c   :  { %5051 = vadd.xlane.f32.xlu1 %v5050_v18  ;;  %5331 = vadd.xlane.f32.xlu0 %v5330_v49  ;;  %9177 = vpow2.f32 %v5572_v5  ;;  %v5564_v37 = vsub.f32 %v11692_v48, %v5550_v0  ;;  %v5333_v21 = vsel %vm468_vm1, %v11873_v34, 0.0 }
0x1a1d   :  { %v5813_v24 = vpop.xlane.xlu1 %5812  ;;  %9179 = vpow2.f32 %v5580_v61 }
0x1a1e   :  { %v5576_v48 = vmul.f32 1.442695, %v5564_v37  ;;  %v5833_v40 = vsub.f32 %v11697_v19, %v5813_v24  ;;  %v5565_v19 = vsub.f32 %v11677_v46, %v11846_v26  ;;  %v5835_v46 = vsub.f32 %v11687_v52, %v11857_v29 }
0x1a1f   :  { %v5816_v4 = vpop.xlane.xlu0 %5815 }
0x1a20   :  { %v5834_v13 = vsub.f32 %v11702_v63, %v5816_v4  ;;  %5322 = vadd.xlane.f32.xlu1 %v5321_v57  ;;  %5325 = vadd.xlane.f32.xlu0 %v5324_v2  ;;  %v5842_v31 = vmul.f32 1.442695, %v5833_v40  ;;  %v5846_v14 = vmul.f32 1.442695, %v5835_v46  ;;  %v13066_v2 = vld [vmem:[#allocation30_spill] sm:$0xff]  ;;  %v13067_v46 = vld [vmem:[#allocation11_spill] sm:$0xff] }
0x1a21   :  { %v5828_v33 = vpop.xlane.xlu1 %5827 }
0x1a22   :  { %v11878_v1 = vpop.eup %9169  ;;  %v5844_v47 = vmul.f32 1.442695, %v5834_v13  ;;  %v5838_v22 = vsub.f32 %v11707_v10, %v5828_v33 }
0x1a23   :  { %v11881_v54 = vpop.eup %9171  ;;  %v5810_v60 = vpop.xlane.xlu0 %5809  ;;  %v5584_v63 = vsel %vm468_vm1, %v11878_v1, 0.0 }
0x1a24   :  { %v11887_v43 = vpop.eup %9173  ;;  %9181 = vpow2.f32 %v5844_v47  ;;  %v5832_v8 = vsub.f32 %v11712_v53, %v5810_v60  ;;  %5334 = vadd.xlane.f32.xlu0 %v5333_v21  ;;  %5585 = vadd.xlane.f32.xlu1 %v5584_v63  ;;  %v5327_v41 = vsel %vm468_vm1, %v11881_v54, 0.0  ;;  %v5578_v53 = vmul.f32 1.442695, %v5565_v19 }
0x1a25   :  { %9183 = vpow2.f32 %v5576_v48  ;;  %v11892_v36 = vpop.eup %9175  ;;  %v5593_v6 = vsel %vm468_vm1, %v11887_v43, 0.0  ;;  %v5831_v32 = vpop.xlane.xlu1 %5830  ;;  %v5852_v10 = vmul.f32 1.442695, %v5838_v22 }
0x1a26   :  { %v5840_v59 = vmul.f32 1.442695, %v5832_v8  ;;  %v11898_v30 = vpop.eup %9177  ;;  %v5587_v12 = vsel %vm468_vm1, %v11892_v36, 0.0  ;;  %v5839_v0 = vsub.f32 %v11717_v62, %v5831_v32 }
0x1a27   :  { %v5590_v44 = vsel %vm468_vm1, %v11898_v30, 0.0  ;;  %v11906_v26 = vpop.eup %9179 }
0x1a28   :  { %9185 = vpow2.f32 %v5840_v59  ;;  %5328 = vadd.xlane.f32.xlu0 %v5327_v41  ;;  %5594 = vadd.xlane.f32.xlu1 %v5593_v6  ;;  %v5602_v52 = vsel %vm468_vm1, %v11906_v26, 0.0  ;;  %v5854_v57 = vmul.f32 1.442695, %v5839_v0 }
0x1a29   :  { %9187 = vpow2.f32 %v5582_v35  ;;  %v5825_v61 = vpop.xlane.xlu1 %5824 }
0x1a2a   :  { %9189 = vpow2.f32 %v5842_v31  ;;  %v5837_v13 = vsub.f32 %v13066_v2, %v5825_v61 }
0x1a2b   :  { %9191 = vpow2.f32 %v5578_v53 }
0x1a2c   :  { %5591 = vadd.xlane.f32.xlu0 %v5590_v44  ;;  %5588 = vadd.xlane.f32.xlu1 %v5587_v12  ;;  %9193 = vpow2.f32 %v5846_v14  ;;  %v5850_v21 = vmul.f32 1.442695, %v5837_v13  ;;  %v5822_v44 = vpop.xlane.xlu0 %5821  ;;  %v13068_v12 = vld [vmem:[#allocation28_spill] sm:$0xff] }
0x1a2d   :  { %9195 = vpow2.f32 %v5852_v10  ;;  %v5836_v32 = vsub.f32 %v13068_v12, %v5822_v44 }
0x1a2e   :  { %v11908_v38 = vpop.eup %9181  ;;  %9197 = vpow2.f32 %v5854_v57 }
0x1a2f   :  { %v11911_v17 = vpop.f32.mrb[80].mxu1  ;;  %v5862_v28 = vsel %vm468_vm1, %v11908_v38, 0.0  ;;  %v11917_v25 = vpop.eup %9183  ;;  %9199 = vpow2.f32 %v5850_v21  ;;  %v5848_v14 = vmul.f32 1.442695, %v5836_v32 }
0x1a30   :  { %v11919_v29 = vpop.f32.mrb[81].mxu1  ;;  %5603 = vadd.xlane.f32.xlu1 %v5602_v52  ;;  %5863 = vadd.xlane.f32.xlu0 %v5862_v28  ;;  %v5596_v37 = vsel %vm468_vm1, %v11917_v25, 0.0 }
0x1a31   :  { %v11921_v5 = vpop.f32.mrb[82].mxu1  ;;  %9201 = vpow2.f32 %v5848_v14 }
0x1a32   :  { %v11923_v42 = vpop.eup %9185  ;;  %v11926_v18 = vpop.f32.mrb[83].mxu1 }
0x1a33   :  { %v11928_v49 = vpop.eup %9187  ;;  %v5856_v24 = vsel %vm468_vm1, %v11923_v42, 0.0 }
0x1a34   :  { %v11934_v4 = vpop.eup %9189  ;;  %5597 = vadd.xlane.f32.xlu1 %v5596_v37  ;;  %5857 = vadd.xlane.f32.xlu0 %v5856_v24  ;;  %v5605_v9 = vsel %vm468_vm1, %v11928_v49, 0.0 }
0x1a35   :  { %v5859_v48 = vsel %vm468_vm1, %v11934_v4, 0.0  ;;  %v11943_v40 = vpop.eup %9191 }
0x1a36   :  { %v5599_v8 = vsel %vm468_vm1, %v11943_v40, 0.0  ;;  %v11953_v35 = vpop.eup %9193 }
0x1a37   :  { %v11937_v62 = vpop.f32.mrb[84].mxu1  ;;  %v5865_v19 = vsel %vm468_vm1, %v11953_v35, 0.0  ;;  %v11957_v31 = vpop.eup %9195 }
0x1a38   :  { %v11945_v47 = vpop.f32.mrb[85].mxu1  ;;  %5606 = vadd.xlane.f32.xlu1 %v5605_v9  ;;  %5860 = vadd.xlane.f32.xlu0 %v5859_v48  ;;  %v5874_v59 = vsel %vm468_vm1, %v11957_v31, 0.0  ;;  %v11961_v33 = vpop.eup %9197 }
0x1a39   :  { %v11947_v60 = vpop.f32.mrb[86].mxu1  ;;  %v5877_v41 = vsel %vm468_vm1, %v11961_v33, 0.0  ;;  %v11965_v6 = vpop.eup %9199 }
0x1a3a   :  { %v11949_v63 = vpop.f32.mrb[87].mxu1  ;;  %v5871_v53 = vsel %vm468_vm1, %v11965_v6, 0.0 }
0x1a3b   :  { %v11974_v22 = vpop.eup %9201 }
0x1a3c   :  { %5600 = vadd.xlane.f32.xlu1 %v5599_v8  ;;  %v5868_v52 = vsel %vm468_vm1, %v11974_v22, 0.0 }
0x1a40   :  { %5866 = vadd.xlane.f32.xlu1 %v5865_v19 }
0x1a44   :  { %5875 = vadd.xlane.f32.xlu1 %v5874_v59 }
0x1a48   :  { %5878 = vadd.xlane.f32.xlu1 %v5877_v41 }
0x1a4c   :  { %5872 = vadd.xlane.f32.xlu1 %v5871_v53 }
0x1a4e   :  { %5628 = vrot.lane.b32.xlu0 %v13067_v46, %s9386_s29 }
0x1a5d   :  { %5900 = vrot.lane.b32.xlu1 %v13067_v46, %s9389_s14 }
0x1a6d   :  { %5869 = vadd.xlane.f32.xlu0 %v5868_v52 }
0x1a8d   :  { %v5043_v0 = vpop.xlane.xlu0 %5042 }
0x1a91   :  { %v5037_v28 = vpop.xlane.xlu1 %5036 }
0x1a95   :  { %v5046_v10 = vpop.xlane.xlu1 %5045 }
0x1a96   :  { %9203 = vrcp.f32 %v5046_v10 }
0x1a97   :  { %9205 = vrcp.f32 %v5037_v28 }
0x1a98   :  { %9207 = vrcp.f32 %v5043_v0 }
0x1a99   :  { %v5040_v61 = vpop.xlane.xlu1 %5039 }
0x1a9a   :  { %9209 = vrcp.f32 %v5040_v61 }
0x1a9d   :  { %v8182_v37 = vpop.f32.mrb[88].mxu1  ;;  %v5055_v24 = vpop.xlane.xlu1 %5054 }
0x1a9e   :  { %v5320_v57 = vpop.xlane.xlu0 %5319  ;;  %v4199_v2 = vpop.f32.mrb[89].mxu1  ;;  %9211 = vrcp.f32 %v5055_v24 }
0x1a9f   :  { %v8183_v13 = vpop.f32.mrb[90].mxu1 }
0x1aa0   :  { %v8545_v9 = vpack.i.bf16 %v8183_v13, %v8182_v37  ;;  %v4202_v48 = vpop.f32.mrb[91].mxu1  ;;  %v9204_v21 = vpop.eup %9203  ;;  %v5371_v13 = vsel %vm3885_vm6, %v13064_v39, 0 }
0x1aa1   :  { %v8550_v8 = vpack.i.bf16 %v4202_v48, %v4199_v2  ;;  %v5049_v19 = vpop.xlane.xlu1 %5048  ;;  %v9206_v59 = vpop.eup %9205  ;;  %v5070_v44 = vmul.f32 %v9204_v21, %v11805_v45 }
0x1aa2   :  { %v5314_v41 = vpop.xlane.xlu0 %5313  ;;  %8546 = vrot.lane.b32.xlu1 %v8545_v9, %s9392_s17  ;;  %v9208_v53 = vpop.eup %9207  ;;  %v5067_v14 = vmul.f32 %v9206_v59, %v11799_v27  ;;  %9213 = vrcp.f32 %v5049_v19 }
0x1aa3   :  { %8551 = vrot.lane.b32.xlu0 %v8550_v8, %s9392_s17  ;;  %v5069_v28 = vmul.f32 %v9208_v53, %v11790_v3 }
0x1aa4   :  { %v9210_v46 = vpop.eup %9209 }
0x1aa5   :  { %v11981_v12 = vpop.f32.mrb[92].mxu1  ;;  %v5058_v32 = vpop.xlane.xlu1 %5057  ;;  %v5068_v52 = vmul.f32 %v9210_v46, %v11812_v11  ;;  %v5076_v2 = vpack.c.bf16 %v5070_v44, %v5069_v28  ;;  %v8675_v44 = vld [vmem:[%s12887_s3 + $0x20] sm:$0xff]  }
0x1aa6   :  { %v5317_v10 = vpop.xlane.xlu0 %5316  ;;  %v11986_v0 = vpop.f32.mrb[93].mxu1  ;;  %9215 = vrcp.f32 %v5058_v32  ;;  %8308 = vmatprep.subr.bf16.mxu0 %v8675_v44 }
0x1aa7   :  { %v11988_v61 = vpop.f32.mrb[94].mxu1  ;;  %v5075_v37 = vpack.c.bf16 %v5068_v52, %v5067_v14  ;;  %9217 = vrcp.f32 %v5317_v10  ;;  %8309 = vmatpush3.bf16.msra.mxu0 %v8675_v44 }
0x1aa8   :  { %v8580_v45 = vpack.i.bf16 %v11988_v61, %v11981_v12  ;;  %v11992_v24 = vpop.f32.mrb[95].mxu1  ;;  %9219 = vrcp.f32 %v5314_v41  ;;  %v9212_v21 = vpop.eup %9211 }
0x1aa9   :  { %v8575_v27 = vpack.i.bf16 %v11992_v24, %v11986_v0  ;;  %8240 = vmatprep.mubr.msk.bf16.mxu1 %vm468_vm1, %v5075_v37  ;;  %v5052_v3 = vpop.xlane.xlu1 %5051 }
0x1aaa   :  { %9221 = vrcp.f32 %v5052_v3  ;;  %v5332_v11 = vpop.xlane.xlu0 %5331  ;;  %8241 = vmatmul.mubr.msk.bf16.vlgmr.msra.gmra.mrb[112].mxu1 %vm468_vm1, %v5076_v2  ;;  %v5073_v3 = vmul.f32 %v9212_v21, %v11818_v50 }
0x1aab   :  { %8259 = vmatpush3.bf16.msra.mxu1 %v5371_v13 }
0x1aac   :  { %v9214_v8 = vpop.eup %9213 }
0x1aad   :  { %v5323_v9 = vpop.xlane.xlu1 %5322  ;;  %v5071_v28 = vmul.f32 %v9214_v8, %v11828_v16 }
0x1aae   :  { %v5326_v48 = vpop.xlane.xlu0 %5325  ;;  %9223 = vrcp.f32 %v5323_v9 }
0x1aaf   :  { %9225 = vrcp.f32 %v5320_v57 }
0x1ab0   :  { %v9216_v19 = vpop.eup %9215  ;;  %9227 = vrcp.f32 %v5326_v48 }
0x1ab1   :  { %v5586_v59 = vpop.xlane.xlu1 %5585  ;;  %v9218_v41 = vpop.eup %9217  ;;  %v5074_v14 = vmul.f32 %v9216_v19, %v11836_v56 }
0x1ab2   :  { %v5335_v53 = vpop.xlane.xlu0 %5334  ;;  %v9220_v46 = vpop.eup %9219  ;;  %v5345_v57 = vmul.f32 %v9218_v41, %v11842_v51 }
0x1ab3   :  { %9229 = vrcp.f32 %v5335_v53  ;;  %v5344_v56 = vmul.f32 %v9220_v46, %v11833_v23  ;;  %v5078_v16 = vpack.c.bf16 %v5074_v14, %v5073_v3 }
0x1ab4   :  { %v9222_v32 = vpop.eup %9221 }
0x1ab5   :  { %v8202_v39 = vpop.f32.mrb[96].mxu1  ;;  %v5595_v52 = vpop.xlane.xlu1 %5594  ;;  %v5072_v10 = vmul.f32 %v9222_v32, %v11849_v7  ;;  %v5352_v41 = vpack.c.bf16 %v5345_v57, %v5344_v56 }
0x1ab6   :  { %v5329_v37 = vpop.xlane.xlu0 %5328  ;;  %v4471_v2 = vpop.f32.mrb[97].mxu1 }
0x1ab7   :  { %9231 = vrcp.f32 %v5329_v37  ;;  %v8203_v13 = vpop.f32.mrb[98].mxu1  ;;  %v5077_v9 = vpack.c.bf16 %v5072_v10, %v5071_v28 }
0x1ab8   :  { %9233 = vrcp.f32 %v5332_v11  ;;  %v8555_v48 = vpack.i.bf16 %v8203_v13, %v8202_v39  ;;  %v4474_v19 = vpop.f32.mrb[99].mxu1  ;;  %v9224_v8 = vpop.eup %9223 }
0x1ab9   :  { %9235 = vrcp.f32 %v5586_v59  ;;  %v8560_v7 = vpack.i.bf16 %v4474_v19, %v4471_v2  ;;  %v5589_v51 = vpop.xlane.xlu1 %5588  ;;  %8244 = vmatprep.mubr.msk.bf16.mxu1 %vm468_vm1, %v5077_v9  ;;  %v9226_v50 = vpop.eup %9225  ;;  %v5347_v23 = vmul.f32 %v9224_v8, %v11860_v58 }
0x1aba   :  { %9237 = vrcp.f32 %v5589_v51  ;;  %v5592_v53 = vpop.xlane.xlu0 %5591  ;;  %8556 = vrot.lane.b32.xlu1 %v8555_v48, %s9393_s18  ;;  %8245 = vmatmul.mubr.msk.bf16.gmra.mrb[116].mxu1 %vm468_vm1, %v5078_v16  ;;  %v5346_v21 = vmul.f32 %v9226_v50, %v11821_v15  ;;  %v9228_v46 = vpop.eup %9227 }
0x1abb   :  { %8260 = vmatprep.mubr.msk.bf16.mxu1 %vm468_vm1, %v5352_v41  ;;  %9239 = vrcp.f32 %v5592_v53  ;;  %v5348_v57 = vmul.f32 %v9228_v46, %v11866_v55 }
0x1abc   :  { %v5353_v32 = vpack.c.bf16 %v5347_v23, %v5346_v21  ;;  %9241 = vrcp.f32 %v5595_v52 }
0x1abd   :  { %v5604_v11 = vpop.xlane.xlu1 %5603  ;;  %v9230_v44 = vpop.eup %9229 }
0x1abe   :  { %v5864_v59 = vpop.xlane.xlu0 %5863  ;;  %8561 = vrot.lane.b32.xlu1 %v8560_v7, %s9393_s18  ;;  %v5351_v3 = vmul.f32 %v9230_v44, %v11873_v34  ;;  %9243 = vrcp.f32 %v5604_v11 }
0x1ac1   :  { %v9232_v14 = vpop.eup %9231  ;;  %v5598_v39 = vpop.xlane.xlu1 %5597 }
0x1ac2   :  { %v9234_v28 = vpop.eup %9233  ;;  %v5858_v10 = vpop.xlane.xlu0 %5857  ;;  %8261 = vmatmul.mubr.msk.bf16.vlgmr.msra.gmra.mrb[120].mxu1 %vm468_vm1, %v5353_v32  ;;  %v5349_v58 = vmul.f32 %v9232_v14, %v11881_v54  ;;  %9245 = vrcp.f32 %v5598_v39 }
0x1ac3   :  { %v9236_v37 = vpop.eup %9235  ;;  %v5350_v55 = vmul.f32 %v9234_v28, %v11855_v20  ;;  %v8676_v20 = vld [vmem:[%s12887_s3 + $0x28] sm:$0xff]  }
0x1ac4   :  { %v9238_v15 = vpop.eup %9237  ;;  %v5354_v2 = vpack.c.bf16 %v5349_v58, %v5348_v57  ;;  %v5616_v19 = vmul.f32 %v9236_v37, %v11878_v1  ;;  %8310 = vmatprep.subr.bf16.mxu0 %v8676_v20 }
0x1ac5   :  { %v12020_v13 = vpop.f32.mrb[100].mxu1  ;;  %v5607_v9 = vpop.xlane.xlu1 %5606  ;;  %v5617_v52 = vmul.f32 %v9238_v15, %v11892_v36  ;;  %v5355_v36 = vpack.c.bf16 %v5351_v3, %v5350_v55  ;;  %8311 = vmatpush3.bf16.msra.mxu0 %v8676_v20 }
0x1ac6   :  { %8264 = vmatprep.mubr.msk.bf16.mxu1 %vm468_vm1, %v5354_v2  ;;  %v5861_v56 = vpop.xlane.xlu0 %5860  ;;  %v12024_v48 = vpop.f32.mrb[101].mxu1  ;;  %9247 = vrcp.f32 %v5607_v9 }
0x1ac7   :  { %v12027_v54 = vpop.f32.mrb[102].mxu1  ;;  %9249 = vrcp.f32 %v5861_v56  ;;  %v9240_v8 = vpop.eup %9239  ;;  %v5624_v41 = vpack.c.bf16 %v5617_v52, %v5616_v19 }
0x1ac8   :  { %v8590_v34 = vpack.i.bf16 %v12027_v54, %v12020_v13  ;;  %v12032_v16 = vpop.f32.mrb[103].mxu1  ;;  %9251 = vrcp.f32 %v5858_v10  ;;  %v9242_v53 = vpop.eup %9241  ;;  %v5618_v23 = vmul.f32 %v9240_v8, %v11898_v30 }
0x1ac9   :  { %v8585_v7 = vpack.i.bf16 %v12032_v16, %v12024_v48  ;;  %v5601_v51 = vpop.xlane.xlu1 %5600  ;;  %v5619_v46 = vmul.f32 %v9242_v53, %v11887_v43  ;;  %v9244_v32 = vpop.eup %9243 }
0x1aca   :  { %9253 = vrcp.f32 %v5601_v51  ;;  %v5629_v1 = vpop.permute.xlu0 %5628  ;;  %8265 = vmatmul.mubr.msk.bf16.gmra.mrb[124].mxu1 %vm468_vm1, %v5355_v36  ;;  %v5622_v55 = vmul.f32 %v9244_v32, %v11906_v26 }
0x1acb   :  { %v5643_v50 = vsel %vm3885_vm6, %v5629_v1, 0  ;;  %8405 = vmatprep.subr.msk.bf16.mxu1 %vm3885_vm6, %v5629_v1  ;;  %8280 = vmatprep.mubr.msk.bf16.mxu1 %vm468_vm1, %v5624_v41  ;;  %v5625_v28 = vpack.c.bf16 %v5619_v46, %v5618_v23 }
0x1acc   :  { %8279 = vmatpush3.bf16.msra.mxu1 %v5643_v50  ;;  %v9246_v39 = vpop.eup %9245 }
0x1acd   :  { %v8222_v11 = vpop.f32.mrb[104].mxu1  ;;  %v5867_v21 = vpop.xlane.xlu1 %5866  ;;  %v5620_v52 = vmul.f32 %v9246_v39, %v11917_v25 }
0x1ace   :  { %v4743_v44 = vpop.f32.mrb[105].mxu1  ;;  %9255 = vrcp.f32 %v5867_v21 }
0x1acf   :  { %v8223_v14 = vpop.f32.mrb[106].mxu1  ;;  %9257 = vrcp.f32 %v5864_v59 }
0x1ad0   :  { %v8570_v10 = vpack.i.bf16 %v8223_v14, %v8222_v11  ;;  %v4746_v57 = vpop.f32.mrb[107].mxu1  ;;  %v9248_v58 = vpop.eup %9247 }
0x1ad1   :  { %v8565_v37 = vpack.i.bf16 %v4746_v57, %v4743_v44  ;;  %v5876_v15 = vpop.xlane.xlu1 %5875  ;;  %v9250_v30 = vpop.eup %9249  ;;  %v5623_v3 = vmul.f32 %v9248_v58, %v11928_v49 }
0x1ad2   :  { %8571 = vrot.lane.b32.xlu0 %v8570_v10, %s9394_s19  ;;  %8281 = vmatmul.mubr.msk.bf16.vlgmr.msra.gmra.mrb[128].mxu1 %vm468_vm1, %v5625_v28  ;;  %v9252_v2 = vpop.eup %9251  ;;  %v5889_v59 = vmul.f32 %v9250_v30, %v11934_v4 }
0x1ad3   :  { %8566 = vrot.lane.b32.xlu1 %v8565_v37, %s9394_s19  ;;  %v5888_v25 = vmul.f32 %v9252_v2, %v11923_v42  ;;  %v5627_v4 = vpack.c.bf16 %v5623_v3, %v5622_v55 }
0x1ad4   :  { %v9254_v43 = vpop.eup %9253 }
0x1ad5   :  { %v8226_v13 = vpop.f32.mrb[108].mxu1  ;;  %v5879_v9 = vpop.xlane.xlu1 %5878  ;;  %v5621_v56 = vmul.f32 %v9254_v43, %v11943_v40  ;;  %v5896_v12 = vpack.c.bf16 %v5889_v59, %v5888_v25 }
0x1ad6   :  { %v4759_v48 = vpop.f32.mrb[109].mxu1  ;;  %8581 = vrot.lane.b32.xlu0 %v8580_v45, %s9392_s17  ;;  %9259 = vrcp.f32 %v5879_v9 }
0x1ad7   :  { %v8227_v54 = vpop.f32.mrb[110].mxu1  ;;  %8576 = vrot.lane.b32.xlu1 %v8575_v27, %s9392_s17  ;;  %v5626_v49 = vpack.c.bf16 %v5621_v56, %v5620_v52 }
0x1ad8   :  { %v8600_v40 = vpack.i.bf16 %v8227_v54, %v8226_v13  ;;  %v4762_v19 = vpop.f32.mrb[111].mxu1  ;;  %v9256_v16 = vpop.eup %9255 }
0x1ad9   :  { %v8595_v36 = vpack.i.bf16 %v4762_v19, %v4759_v48  ;;  %v5873_v8 = vpop.xlane.xlu1 %5872  ;;  %8284 = vmatprep.mubr.msk.bf16.mxu1 %vm468_vm1, %v5626_v49  ;;  %v9258_v26 = vpop.eup %9257  ;;  %v5891_v42 = vmul.f32 %v9256_v16, %v11953_v35 }
0x1ada   :  { %8591 = vrot.lane.b32.xlu0 %v8590_v34, %s9393_s18  ;;  %8285 = vmatmul.mubr.msk.bf16.gmra.mrb[132].mxu1 %vm468_vm1, %v5627_v4  ;;  %v5890_v61 = vmul.f32 %v9258_v26, %v11908_v38  ;;  %9261 = vrcp.f32 %v5873_v8 }
0x1adb   :  { %8586 = vrot.lane.b32.xlu1 %v8585_v7, %s9393_s18  ;;  %8300 = vmatprep.mubr.msk.bf16.mxu1 %vm468_vm1, %v5896_v12  ;;  %9263 = vrcp.f32 %v5876_v15 }
0x1adc   :  { %v5897_v24 = vpack.c.bf16 %v5891_v42, %v5890_v61 }
0x1add   :  { %v5901_v0 = vpop.permute.xlu1 %5900 }
0x1ade   :  { %v5915_v45 = vsel %vm3885_vm6, %v5901_v0, 0  ;;  %8601 = vrot.lane.b32.xlu0 %v8600_v40, %s9394_s19  ;;  %8407 = vmatprep.subr.msk.bf16.mxu1 %vm3885_vm6, %v5901_v0 }
0x1adf   :  { %8596 = vrot.lane.b32.xlu1 %v8595_v36, %s9394_s19  ;;  %8299 = vmatpush3.bf16.msra.mxu1 %v5915_v45 }
0x1ae0   :  { %v9260_v35 = vpop.eup %9259 }
0x1ae1   :  { %v5895_v51 = vmul.f32 %v9260_v35, %v11961_v33 }
0x1ae2   :  { %8301 = vmatmul.mubr.msk.bf16.vlgmr.msra.gmra.mrb[136].mxu1 %vm468_vm1, %v5897_v24 }
0x1ae4   :  { %v9262_v34 = vpop.eup %9261 }
0x1ae5   :  { %v9264_v38 = vpop.eup %9263  ;;  %v5893_v20 = vmul.f32 %v9262_v34, %v11965_v6 }
0x1ae6   :  { %v5894_v1 = vmul.f32 %v9264_v38, %v11957_v31 }
0x1ae8   :  { %v5899_v50 = vpack.c.bf16 %v5895_v51, %v5894_v1 }
0x1afa   :  { %v5870_v27 = vpop.xlane.xlu0 %5869 }
0x1afb   :  { %9265 = vrcp.f32 %v5870_v27 }
0x1b05   :  { %v9266_v7 = vpop.eup %9265 }
0x1b06   :  { %v5892_v41 = vmul.f32 %v9266_v7, %v11974_v22 }
0x1b08   :  { %v5898_v53 = vpack.c.bf16 %v5893_v20, %v5892_v41 }
0x1b0a   :  { %8304 = vmatprep.mubr.msk.bf16.mxu1 %vm468_vm1, %v5898_v53 }
0x1b0b   :  { %8305 = vmatmul.mubr.msk.bf16.gmra.mrb[140].mxu1 %vm468_vm1, %v5899_v50 }
0x1b14   :  { %v8547_v23 = vpop.permute.xlu1 %8546 }
0x1b15   :  { %v8552_v21 = vpop.permute.xlu0 %8551  ;;  %v8549_v46 = vunpack.i.h.bf16 %v8547_v23  ;;  %v8548_v44 = vunpack.i.l.bf16 %v8547_v23 }
0x1b16   :  { %v8554_v14 = vunpack.i.h.bf16 %v8552_v21  ;;  %v8553_v33 = vunpack.i.l.bf16 %v8552_v21 }
0x1b17   :  { %v4873_v31 = vsel %vm468_vm1, %v11921_v5, %v8549_v46  ;;  %v4872_v10 = vsel %vm468_vm1, %v11911_v17, %v8548_v44 }
0x1b18   :  { %v4871_v58 = vsel %vm468_vm1, %v11926_v18, %v8554_v14  ;;  %v4870_v37 = vsel %vm468_vm1, %v11919_v29, %v8553_v33 }
0x1b2c   :  { %v8557_v11 = vpop.permute.xlu1 %8556 }
0x1b2d   :  { %v8559_v39 = vunpack.i.h.bf16 %v8557_v11  ;;  %v8558_v22 = vunpack.i.l.bf16 %v8557_v11 }
0x1b2f   :  { %v4880_v43 = vsel %vm1734_vm3, %v4872_v10, %v8558_v22  ;;  %v4881_v3 = vsel %vm1734_vm3, %v4873_v31, %v8559_v39 }
0x1b30   :  { %v8562_v32 = vpop.permute.xlu1 %8561 }
0x1b31   :  { %v8564_v28 = vunpack.i.h.bf16 %v8562_v32  ;;  %v8563_v6 = vunpack.i.l.bf16 %v8562_v32 }
0x1b33   :  { %v4878_v5 = vsel %vm1734_vm3, %v4870_v37, %v8563_v6  ;;  %v4879_v17 = vsel %vm1734_vm3, %v4871_v58, %v8564_v28 }
0x1b44   :  { %v8572_v57 = vpop.permute.xlu0 %8571 }
0x1b45   :  { %v8574_v15 = vunpack.i.h.bf16 %v8572_v57  ;;  %v8573_v30 = vunpack.i.l.bf16 %v8572_v57  ;;  %v8567_v2 = vpop.permute.xlu1 %8566 }
0x1b46   :  { %v8569_v13 = vunpack.i.h.bf16 %v8567_v2  ;;  %v8568_v9 = vunpack.i.l.bf16 %v8567_v2 }
0x1b47   :  { %v4889_v52 = vsel %vm1743_vm4, %v4881_v3, %v8574_v15  ;;  %v4888_v18 = vsel %vm1743_vm4, %v4880_v43, %v8573_v30 }
0x1b48   :  { %v6103_v56 = vpack.c.bf16 %v4889_v52, %v4888_v18  ;;  %v4886_v29 = vsel %vm1743_vm4, %v4878_v5, %v8568_v9  ;;  %v4887_v59 = vsel %vm1743_vm4, %v4879_v17, %v8569_v13  ;;  %v8582_v48 = vpop.permute.xlu0 %8581 }
0x1b49   :  { %v6102_v55 = vpack.c.bf16 %v4887_v59, %v4886_v29  ;;  %v8577_v54 = vpop.permute.xlu1 %8576  ;;  %v8584_v49 = vunpack.i.h.bf16 %v8582_v48  ;;  %v8583_v25 = vunpack.i.l.bf16 %v8582_v48 }
0x1b4a   :  { %v8579_v19 = vunpack.i.h.bf16 %v8577_v54  ;;  %v8578_v4 = vunpack.i.l.bf16 %v8577_v54 }
0x1b4b   :  { %8312 = vmatprep.mubr.msk.bf16.mxu0 %vm53_vm0, %v6102_v55  ;;  %v4877_v42 = vsel %vm468_vm1, %v11947_v60, %v8584_v49  ;;  %v4876_v0 = vsel %vm468_vm1, %v11937_v62, %v8583_v25 }
0x1b4c   :  { %v8592_v40 = vpop.permute.xlu0 %8591  ;;  %8313 = vmatmul.mubr.msk.bf16.vlgmr.msra.gmra.mrb[164].mxu0 %vm53_vm0, %v6103_v56  ;;  %v4875_v45 = vsel %vm468_vm1, %v11949_v63, %v8579_v19  ;;  %v4874_v24 = vsel %vm468_vm1, %v11945_v47, %v8578_v4 }
0x1b4d   :  { %v8587_v16 = vpop.permute.xlu1 %8586  ;;  %v8594_v36 = vunpack.i.h.bf16 %v8592_v40  ;;  %v8593_v8 = vunpack.i.l.bf16 %v8592_v40 }
0x1b4e   :  { %v8589_v12 = vunpack.i.h.bf16 %v8587_v16  ;;  %v8588_v26 = vunpack.i.l.bf16 %v8587_v16 }
0x1b4f   :  { %v4884_v38 = vsel %vm1734_vm3, %v4876_v0, %v8593_v8  ;;  %v4885_v7 = vsel %vm1734_vm3, %v4877_v42, %v8594_v36  ;;  %v13069_v42 = vld [vmem:[#allocation2_spill] sm:$0xff] }
0x1b50   :  { %v8602_v61 = vpop.permute.xlu0 %8601  ;;  %v4882_v60 = vsel %vm1734_vm3, %v4874_v24, %v8588_v26  ;;  %v4883_v62 = vsel %vm1734_vm3, %v4875_v45, %v8589_v12  ;;  %v6112_v0 = vsub.s32 5, %v13069_v42 }
0x1b51   :  { %v8604_v27 = vunpack.i.h.bf16 %v8602_v61  ;;  %v8603_v35 = vunpack.i.l.bf16 %v8602_v61  ;;  %v8597_v34 = vpop.permute.xlu1 %8596  ;;  %v12148_v61 = vld [vmem:[%s12886_s7] sm:$0xff] }
0x1b52   :  { %v8599_v51 = vunpack.i.h.bf16 %v8597_v34  ;;  %v8598_v41 = vunpack.i.l.bf16 %v8597_v34  ;;  %v12151_v45 = vrot.slane %v12148_v61, %v6112_v0 }
0x1b53   :  { %v4892_v20 = vsel %vm1743_vm4, %v4884_v38, %v8603_v35  ;;  %v4893_v63 = vsel %vm1743_vm4, %v4885_v7, %v8604_v27 }
0x1b54   :  { %v6105_v1 = vpack.c.bf16 %v4893_v63, %v4892_v20  ;;  %v4890_v47 = vsel %vm1743_vm4, %v4882_v60, %v8598_v41  ;;  %v4891_v53 = vsel %vm1743_vm4, %v4883_v62, %v8599_v51  ;;  %v13070_v62 = vld [vmem:[#allocation19_spill] sm:$0xff] }
0x1b55   :  { %v6104_v50 = vpack.c.bf16 %v4891_v53, %v4890_v47  ;;  %v13071_v53 = vld [vmem:[#allocation10_spill] sm:$0xff] }
0x1b57   :  { %8316 = vmatprep.mubr.msk.bf16.mxu0 %vm53_vm0, %v6104_v50 }
0x1b58   :  { %8317 = vmatmul.mubr.msk.bf16.gmra.mrb[168].mxu0 %vm53_vm0, %v6105_v1 }
0x1b7d   :  { %v12116_v23 = vpop.f32.mrb[112].mxu1 }
0x1b7e   :  { %v12118_v11 = vpop.f32.mrb[113].mxu1 }
0x1b7f   :  { %v12120_v21 = vpop.f32.mrb[114].mxu1 }
0x1b80   :  { %v12122_v46 = vpop.f32.mrb[115].mxu1 }
0x1b8d   :  { %v12124_v44 = vpop.f32.mrb[116].mxu1 }
0x1b8e   :  { %v12126_v32 = vpop.f32.mrb[117].mxu1 }
0x1b8f   :  { %v12128_v14 = vpop.f32.mrb[118].mxu1 }
0x1b90   :  { %v12130_v33 = vpop.f32.mrb[119].mxu1 }
0x1b95   :  { %v8262_v39 = vpop.f32.mrb[120].mxu1 }
0x1b96   :  { %v5407_v22 = vpop.f32.mrb[121].mxu1 }
0x1b97   :  { %v8263_v28 = vpop.f32.mrb[122].mxu1 }
0x1b98   :  { %v8605_v6 = vpack.i.bf16 %v8263_v28, %v8262_v39  ;;  %v5410_v31 = vpop.f32.mrb[123].mxu1  ;;  %v13072_v39 = vld [vmem:[#allocation4_spill] sm:$0xff] }
0x1b99   :  { %v8610_v10 = vpack.i.bf16 %v5410_v31, %v5407_v22 }
0x1b9a   :  { %8606 = vrot.lane.b32.xlu0 %v8605_v6, %s9392_s17 }
0x1b9b   :  { %8611 = vrot.lane.b32.xlu1 %v8610_v10, %s9392_s17 }
0x1b9d   :  { %v8266_v57 = vpop.f32.mrb[124].mxu1 }
0x1b9e   :  { %v5423_v58 = vpop.f32.mrb[125].mxu1 }
0x1b9f   :  { %v8267_v37 = vpop.f32.mrb[126].mxu1 }
0x1ba0   :  { %v8640_v15 = vpack.i.bf16 %v8267_v37, %v8266_v57  ;;  %v5426_v30 = vpop.f32.mrb[127].mxu1  ;;  %v13073_v57 = vld [vmem:[#allocation6_spill] sm:$0xff] }
0x1ba1   :  { %v8635_v2 = vpack.i.bf16 %v5426_v30, %v5423_v58 }
0x1ba5   :  { %v8282_v43 = vpop.f32.mrb[128].mxu1 }
0x1ba6   :  { %v5679_v3 = vpop.f32.mrb[129].mxu1 }
0x1ba7   :  { %v8283_v13 = vpop.f32.mrb[130].mxu1 }
0x1ba8   :  { %v8615_v9 = vpack.i.bf16 %v8283_v13, %v8282_v43  ;;  %v5682_v5 = vpop.f32.mrb[131].mxu1 }
0x1ba9   :  { %v8620_v17 = vpack.i.bf16 %v5682_v5, %v5679_v3 }
0x1baa   :  { %8616 = vrot.lane.b32.xlu0 %v8615_v9, %s9393_s18 }
0x1bab   :  { %8621 = vrot.lane.b32.xlu1 %v8620_v17, %s9393_s18 }
0x1bad   :  { %v8286_v52 = vpop.f32.mrb[132].mxu1 }
0x1bae   :  { %v5695_v18 = vpop.f32.mrb[133].mxu1 }
0x1baf   :  { %v8287_v56 = vpop.f32.mrb[134].mxu1 }
0x1bb0   :  { %v8650_v29 = vpack.i.bf16 %v8287_v56, %v8286_v52  ;;  %v5698_v59 = vpop.f32.mrb[135].mxu1 }
0x1bb1   :  { %v8645_v48 = vpack.i.bf16 %v5698_v59, %v5695_v18 }
0x1bb5   :  { %v8302_v55 = vpop.f32.mrb[136].mxu1 }
0x1bb6   :  { %v5951_v54 = vpop.f32.mrb[137].mxu1 }
0x1bb7   :  { %v8303_v49 = vpop.f32.mrb[138].mxu1 }
0x1bb8   :  { %v8630_v25 = vpack.i.bf16 %v8303_v49, %v8302_v55  ;;  %v5954_v40 = vpop.f32.mrb[139].mxu1 }
0x1bb9   :  { %v8625_v19 = vpack.i.bf16 %v5954_v40, %v5951_v54 }
0x1bba   :  { %8631 = vrot.lane.b32.xlu0 %v8630_v25, %s9394_s19 }
0x1bbb   :  { %8626 = vrot.lane.b32.xlu1 %v8625_v19, %s9394_s19 }
0x1bbe   :  { %8641 = vrot.lane.b32.xlu0 %v8640_v15, %s9392_s17 }
0x1bbf   :  { %8636 = vrot.lane.b32.xlu1 %v8635_v2, %s9392_s17 }
0x1bc2   :  { %8651 = vrot.lane.b32.xlu0 %v8650_v29, %s9393_s18 }
0x1bc3   :  { %8646 = vrot.lane.b32.xlu1 %v8645_v48, %s9393_s18 }
0x1bde   :  { %v8306_v4 = vpop.f32.mrb[140].mxu1 }
0x1bdf   :  { %v5967_v16 = vpop.f32.mrb[141].mxu1 }
0x1be0   :  { %v8307_v36 = vpop.f32.mrb[142].mxu1 }
0x1be1   :  { %v8660_v8 = vpack.i.bf16 %v8307_v36, %v8306_v4  ;;  %v5970_v12 = vpop.f32.mrb[143].mxu1 }
0x1be2   :  { %v8655_v26 = vpack.i.bf16 %v5970_v12, %v5967_v16 }
0x1be3   :  { %8661 = vrot.lane.b32.xlu0 %v8660_v8, %s9394_s19 }
0x1be4   :  { %8656 = vrot.lane.b32.xlu1 %v8655_v26, %s9394_s19  ;;  %v13074_v26 = vld [vmem:[#allocation5_spill] sm:$0xff] }
0x1c0c   :  { %v8607_v27 = vpop.permute.xlu0 %8606 }
0x1c0d   :  { %v8612_v34 = vpop.permute.xlu1 %8611  ;;  %v8609_v6 = vunpack.i.h.bf16 %v8607_v27  ;;  %v8608_v31 = vunpack.i.l.bf16 %v8607_v27 }
0x1c0e   :  { %v8614_v10 = vunpack.i.h.bf16 %v8612_v34  ;;  %v8613_v15 = vunpack.i.l.bf16 %v8612_v34 }
0x1c0f   :  { %v6081_v9 = vsel %vm468_vm1, %v12120_v21, %v8609_v6  ;;  %v6080_v5 = vsel %vm468_vm1, %v12116_v23, %v8608_v31 }
0x1c10   :  { %v6079_v17 = vsel %vm468_vm1, %v12122_v46, %v8614_v10  ;;  %v6078_v56 = vsel %vm468_vm1, %v12118_v11, %v8613_v15 }
0x1c1c   :  { %v8617_v1 = vpop.permute.xlu0 %8616 }
0x1c1d   :  { %v8622_v47 = vpop.permute.xlu1 %8621  ;;  %v8619_v30 = vunpack.i.h.bf16 %v8617_v1  ;;  %v8618_v2 = vunpack.i.l.bf16 %v8617_v1 }
0x1c1e   :  { %v8624_v43 = vunpack.i.h.bf16 %v8622_v47  ;;  %v8623_v3 = vunpack.i.l.bf16 %v8622_v47 }
0x1c1f   :  { %v8314_v24 = vpop.f32.mrb[164].mxu0  ;;  %v6088_v29 = vsel %vm1734_vm3, %v6080_v5, %v8618_v2  ;;  %v6089_v59 = vsel %vm1734_vm3, %v6081_v9, %v8619_v30 }
0x1c20   :  { %v6184_v35 = vpop.f32.mrb[165].mxu0  ;;  %v6193_v60 = vadd.f32 %v8314_v24, %v12151_v45  ;;  %v6087_v48 = vsel %vm1734_vm3, %v6079_v17, %v8624_v43  ;;  %v6086_v23 = vsel %vm1734_vm3, %v6078_v56, %v8623_v3 }
0x1c21   :  { %v6185_v38 = vadd.f32 %v6184_v35, %v12151_v45  ;;  %v8315_v7 = vpop.f32.mrb[166].mxu0 }
0x1c22   :  { %v6196_v51 = vadd.f32 %v8315_v7, %v12151_v45  ;;  %v6187_v41 = vpop.f32.mrb[167].mxu0  ;;  %v12169_v58 = vadd.f32 %v6193_v60, %v13073_v57  ;;  %v13075_v7 = vld [vmem:[#allocation8_spill] sm:$0xff] }
0x1c23   :  { %v12157_v20 = vadd.f32 %v6185_v38, %v13070_v62  ;;  %v6188_v63 = vadd.f32 %v6187_v41, %v12151_v45  ;;  %v13077_v41 = vld [vmem:[#allocation9_spill] sm:$0xff] }
0x1c24   :  { %v12161_v50 = vadd.f32 %v6196_v51, %v13071_v53  ;;  %v6269_v18 = vsel %vm53_vm0, %v12169_v58, 0.0 }
0x1c25   :  { %v12164_v22 = vadd.f32 %v6188_v63, %v13072_v39  ;;  %v6263_v28 = vsel %vm53_vm0, %v12157_v20, 0.0  ;;  %v13078_v63 = vld [vmem:[#allocation3_spill] sm:$0xff] }
0x1c26   :  { %6264 = vadd.xlane.f32.xlu1 %v6263_v28  ;;  %v6272_v13 = vsel %vm53_vm0, %v12161_v50, 0.0 }
0x1c27   :  { %v6266_v37 = vsel %vm53_vm0, %v12164_v22, 0.0 }
0x1c28   :  { %6267 = vadd.xlane.f32.xlu0 %v6266_v37 }
0x1c2a   :  { %6273 = vadd.xlane.f32.xlu1 %v6272_v13 }
0x1c2b   :  { %v8318_v52 = vpop.f32.mrb[168].mxu0 }
0x1c2c   :  { %v8632_v21 = vpop.permute.xlu0 %8631  ;;  %v6200_v55 = vpop.f32.mrb[169].mxu0  ;;  %6270 = vadd.xlane.f32.xlu0 %v6269_v18  ;;  %v6209_v19 = vadd.f32 %v8318_v52, %v12151_v45 }
0x1c2d   :  { %v8634_v54 = vunpack.i.h.bf16 %v8632_v21  ;;  %v8633_v46 = vunpack.i.l.bf16 %v8632_v21  ;;  %v6201_v49 = vadd.f32 %v6200_v55, %v12151_v45  ;;  %v8627_v25 = vpop.permute.xlu1 %8626  ;;  %v8319_v40 = vpop.f32.mrb[170].mxu0 }
0x1c2e   :  { %v8629_v11 = vunpack.i.h.bf16 %v8627_v25  ;;  %v8628_v4 = vunpack.i.l.bf16 %v8627_v25  ;;  %v6212_v16 = vadd.f32 %v8319_v40, %v12151_v45  ;;  %v6203_v36 = vpop.f32.mrb[171].mxu0  ;;  %v12204_v60 = vadd.f32 %v6209_v19, %v13077_v41  ;;  %v13085_v41 = vld [vmem:[#allocation20_spill] sm:$0xff] }
0x1c2f   :  { %v6096_v8 = vsel %vm1743_vm4, %v6088_v29, %v8633_v46  ;;  %v6097_v12 = vsel %vm1743_vm4, %v6089_v59, %v8634_v54  ;;  %v12195_v0 = vadd.f32 %v6201_v49, %v13074_v26  ;;  %v6204_v24 = vadd.f32 %v6203_v36, %v12151_v45 }
0x1c30   :  { %v6107_v27 = vpack.c.bf16 %v6097_v12, %v6096_v8  ;;  %v6095_v35 = vsel %vm1743_vm4, %v6087_v48, %v8629_v11  ;;  %v6094_v34 = vsel %vm1743_vm4, %v6086_v23, %v8628_v4  ;;  %v12209_v1 = vadd.f32 %v6212_v16, %v13078_v63  ;;  %v8642_v28 = vpop.permute.xlu0 %8641  ;;  %v13079_v8 = vld [vmem:[#allocation22_spill] sm:$0xff] }
0x1c31   :  { %v6106_v38 = vpack.c.bf16 %v6095_v35, %v6094_v34  ;;  %v12201_v51 = vadd.f32 %v6204_v24, %v13075_v7  ;;  %v6275_v62 = vsel %vm53_vm0, %v12195_v0, 0.0  ;;  %v6281_v53 = vsel %vm53_vm0, %v12204_v60, 0.0  ;;  %v8637_v6 = vpop.permute.xlu1 %8636  ;;  %v13083_v34 = vld [vmem:[#allocation23_spill] sm:$0xff] }
0x1c32   :  { %6276 = vadd.xlane.f32.xlu0 %v6275_v62  ;;  %v6284_v39 = vsel %vm53_vm0, %v12209_v1, 0.0  ;;  %v8644_v10 = vunpack.i.h.bf16 %v8642_v28  ;;  %v8643_v57 = vunpack.i.l.bf16 %v8642_v28  ;;  %v8639_v15 = vunpack.i.h.bf16 %v8637_v6 }
0x1c33   :  { %13076 = vst [vmem:[#allocation35_spill] sm:$0xff] %v12201_v51  ;;  %8320 = vmatprep.mubr.msk.bf16.mxu0 %vm53_vm0, %v6106_v38  ;;  %v6278_v47 = vsel %vm53_vm0, %v12201_v51, 0.0  ;;  %v8638_v30 = vunpack.i.l.bf16 %v8637_v6 }
0x1c34   :  { %8321 = vmatmul.mubr.msk.bf16.gmra.mrb[172].mxu0 %vm53_vm0, %v6107_v27  ;;  %6279 = vadd.xlane.f32.xlu1 %v6278_v47  ;;  %v8652_v31 = vpop.permute.xlu0 %8651  ;;  %v6085_v9 = vsel %vm468_vm1, %v12128_v14, %v8644_v10  ;;  %v6084_v5 = vsel %vm468_vm1, %v12124_v44, %v8643_v57  ;;  %v6083_v52 = vsel %vm468_vm1, %v12130_v33, %v8639_v15  ;;  %v13081_v27 = vld [vmem:[#allocation7_spill] sm:$0xff] }
0x1c35   :  { %v8647_v37 = vpop.permute.xlu1 %8646  ;;  %v8654_v2 = vunpack.i.h.bf16 %v8652_v31  ;;  %v8653_v43 = vunpack.i.l.bf16 %v8652_v31  ;;  %v6082_v18 = vsel %vm468_vm1, %v12126_v32, %v8638_v30 }
0x1c36   :  { %6282 = vadd.xlane.f32.xlu0 %v6281_v53  ;;  %v8649_v3 = vunpack.i.h.bf16 %v8647_v37  ;;  %v8648_v13 = vunpack.i.l.bf16 %v8647_v37 }
0x1c37   :  { %v6092_v48 = vsel %vm1734_vm3, %v6084_v5, %v8653_v43  ;;  %v6093_v21 = vsel %vm1734_vm3, %v6085_v9, %v8654_v2 }
0x1c38   :  { %6285 = vadd.xlane.f32.xlu1 %v6284_v39  ;;  %v6090_v14 = vsel %vm1734_vm3, %v6082_v18, %v8648_v13  ;;  %v6091_v44 = vsel %vm1734_vm3, %v6083_v52, %v8649_v3  ;;  %v13087_v13 = vld [vmem:[#allocation12_spill] sm:$0xff] }
0x1c55   :  { %v8662_v17 = vpop.permute.xlu0 %8661 }
0x1c56   :  { %v8664_v56 = vunpack.i.h.bf16 %v8662_v17  ;;  %v8663_v29 = vunpack.i.l.bf16 %v8662_v17  ;;  %v8657_v59 = vpop.permute.xlu1 %8656 }
0x1c57   :  { %v8659_v55 = vunpack.i.h.bf16 %v8657_v59  ;;  %v8658_v23 = vunpack.i.l.bf16 %v8657_v59 }
0x1c58   :  { %v6100_v54 = vsel %vm1743_vm4, %v6092_v48, %v8663_v29  ;;  %v6101_v33 = vsel %vm1743_vm4, %v6093_v21, %v8664_v56  ;;  %v13089_v29 = vld [vmem:[#allocation21_spill] sm:$0xff] }
0x1c59   :  { %v6109_v46 = vpack.c.bf16 %v6101_v33, %v6100_v54  ;;  %v6099_v32 = vsel %vm1743_vm4, %v6091_v44, %v8659_v55  ;;  %v6098_v49 = vsel %vm1743_vm4, %v6090_v14, %v8658_v23  ;;  %v13091_v48 = vld [vmem:[#allocation13_spill] sm:$0xff]  ;;  %v13093_v44 = vld [vmem:[#allocation14_spill] sm:$0xff] }
0x1c5a   :  { %v6108_v25 = vpack.c.bf16 %v6099_v32, %v6098_v49 }
0x1c5c   :  { %8324 = vmatprep.mubr.msk.bf16.mxu0 %vm53_vm0, %v6108_v25 }
0x1c5d   :  { %8325 = vmatmul.mubr.msk.bf16.gmra.mrb[176].mxu0 %vm53_vm0, %v6109_v46 }
0x1cb3   :  { %v6265_v28 = vpop.xlane.xlu1 %6264 }
0x1cb4   :  { %v6311_v31 = vmul.f32 0.03125, %v6265_v28 }
0x1cb5   :  { %v6268_v39 = vpop.xlane.xlu0 %6267 }
0x1cb6   :  { %v6312_v3 = vmul.f32 0.03125, %v6268_v39  ;;  %v12269_v52 = vsub.f32 %v12157_v20, %v6311_v31 }
0x1cb7   :  { %v6274_v2 = vpop.xlane.xlu1 %6273 }
0x1cb8   :  { %v12280_v14 = vsub.f32 %v12164_v22, %v6312_v3  ;;  %v6343_v25 = vmul.f32 %v12269_v52, %v12269_v52  ;;  %v8677_v3 = vld [vmem:[%s12890_s5] ss:$8 sps:$4 sm:$0xff]  }
0x1cb9   :  { %v6271_v10 = vpop.xlane.xlu0 %6270 }
0x1cba   :  { %v6313_v56 = vmul.f32 0.03125, %v6271_v10 }
0x1cbc   :  { %v12288_v46 = vsub.f32 %v12169_v58, %v6313_v56 }
0x1cbf   :  { %v6277_v18 = vpop.xlane.xlu0 %6276 }
0x1cc0   :  { %v6315_v32 = vmul.f32 0.03125, %v6277_v18 }
0x1cc1   :  { %v6280_v23 = vpop.xlane.xlu1 %6279 }
0x1d07   :  { %v8322_v40 = vpop.f32.mrb[172].mxu0 }
0x1d08   :  { %v6216_v19 = vpop.f32.mrb[173].mxu0  ;;  %v6225_v11 = vadd.f32 %v8322_v40, %v12151_v45  ;;  %v6283_v40 = vpop.xlane.xlu0 %6282 }
0x1d09   :  { %v6217_v4 = vadd.f32 %v6216_v19, %v12151_v45  ;;  %v8323_v16 = vpop.f32.mrb[174].mxu0 }
0x1d0a   :  { %v6219_v36 = vpop.f32.mrb[175].mxu0  ;;  %v6228_v26 = vadd.f32 %v8323_v16, %v12151_v45  ;;  %v12245_v35 = vadd.f32 %v6225_v11, %v13081_v27  ;;  %v6316_v11 = vmul.f32 0.03125, %v6280_v23  ;;  %v6344_v16 = vmul.f32 %v12280_v14, %v12280_v14 }
0x1d0b   :  { %v12240_v12 = vadd.f32 %v6217_v4, %v13079_v8  ;;  %v6220_v24 = vadd.f32 %v6219_v36, %v12151_v45  ;;  %v6286_v36 = vpop.xlane.xlu1 %6285  ;;  %v12302_v8 = vsub.f32 %v12195_v0, %v6315_v32  ;;  %v6345_v27 = vmul.f32 %v12288_v46, %v12288_v46 }
0x1d0c   :  { %13082 = vst [vmem:[#allocation24_spill] sm:$0xff] %v12245_v35  ;;  %v12253_v62 = vadd.f32 %v6228_v26, %v13085_v41  ;;  %v6293_v47 = vsel %vm53_vm0, %v12245_v35, 0.0  ;;  %v6317_v26 = vmul.f32 0.03125, %v6283_v40  ;;  %v6362_v41 = vsel %vm53_vm0, %v6344_v16, 0.0 }
0x1d0d   :  { %13080 = vst [vmem:[#allocation34_spill] sm:$0xff] %v12240_v12  ;;  %v12248_v38 = vadd.f32 %v6220_v24, %v13083_v34  ;;  %v6287_v7 = vsel %vm53_vm0, %v12240_v12, 0.0  ;;  %v6359_v24 = vsel %vm53_vm0, %v6343_v25, 0.0  ;;  %v12308_v34 = vsub.f32 %v12201_v51, %v6316_v11 }
0x1d0e   :  { %6288 = vadd.xlane.f32.xlu0 %v6287_v7  ;;  %13086 = vst [vmem:[#allocation26_spill] sm:$0xff] %v12253_v62  ;;  %v6296_v53 = vsel %vm53_vm0, %v12253_v62, 0.0  ;;  %v6318_v7 = vmul.f32 0.03125, %v6286_v36  ;;  %v6347_v39 = vmul.f32 %v12302_v8, %v12302_v8 }
0x1d0f   :  { %13084 = vst [vmem:[#allocation25_spill] sm:$0xff] %v12248_v38  ;;  %v6290_v63 = vsel %vm53_vm0, %v12248_v38, 0.0  ;;  %v6348_v31 = vmul.f32 %v12308_v34, %v12308_v34 }
0x1d10   :  { %6291 = vadd.xlane.f32.xlu1 %v6290_v63  ;;  %v12320_v28 = vsub.f32 %v12209_v1, %v6318_v7  ;;  %v6371_v10 = vsel %vm53_vm0, %v6347_v39, 0.0 }
0x1d12   :  { %6294 = vadd.xlane.f32.xlu0 %v6293_v47  ;;  %v12314_v47 = vsub.f32 %v12204_v60, %v6317_v26 }
0x1d14   :  { %6297 = vadd.xlane.f32.xlu1 %v6296_v53  ;;  %v6365_v53 = vsel %vm53_vm0, %v6345_v27, 0.0 }
0x1d30   :  { %v8326_v6 = vpop.f32.mrb[176].mxu0 }
0x1d31   :  { %v6232_v57 = vpop.f32.mrb[177].mxu0  ;;  %v6241_v37 = vadd.f32 %v8326_v6, %v12151_v45 }
0x1d32   :  { %v6233_v15 = vadd.f32 %v6232_v57, %v12151_v45  ;;  %v8327_v30 = vpop.f32.mrb[178].mxu0  ;;  %v6349_v57 = vmul.f32 %v12314_v47, %v12314_v47 }
0x1d33   :  { %v6235_v43 = vpop.f32.mrb[179].mxu0  ;;  %v6244_v5 = vadd.f32 %v8327_v30, %v12151_v45  ;;  %v12272_v59 = vadd.f32 %v6241_v37, %v13089_v29  ;;  %v6374_v37 = vsel %vm53_vm0, %v6348_v31, 0.0 }
0x1d34   :  { %v12264_v9 = vadd.f32 %v6233_v15, %v13087_v13  ;;  %v6236_v17 = vadd.f32 %v6235_v43, %v12151_v45  ;;  %v6314_v45 = vmul.f32 0.03125, %v6274_v2  ;;  %v6350_v15 = vmul.f32 %v12320_v28, %v12320_v28  ;;  %v8679_v43 = vld [vmem:[%s12890_s5 + $0x4] ss:$8 sps:$4 sm:$0xff]   ;;  %v8682_v13 = vld [vmem:[%s12890_s5 + $0x14] ss:$8 sps:$4 sm:$0xff]  }
0x1d35   :  { %13090 = vst [vmem:[#allocation18_spill] sm:$0xff] %v12272_v59  ;;  %v12283_v54 = vadd.f32 %v6244_v5, %v13093_v44  ;;  %v6305_v49 = vsel %vm53_vm0, %v12272_v59, 0.0  ;;  %v6377_v30 = vsel %vm53_vm0, %v6349_v57, 0.0  ;;  %6579 = vmatprep.subr.bf16.mxu1 %v8679_v43  ;;  %v8680_v5 = vld [vmem:[%s12890_s5 + $0x10] ss:$8 sps:$4 sm:$0xff]  }
0x1d36   :  { %13088 = vst [vmem:[#allocation15_spill] sm:$0xff] %v12264_v9  ;;  %v12275_v21 = vadd.f32 %v6236_v17, %v13091_v48  ;;  %v6299_v55 = vsel %vm53_vm0, %v12264_v9, 0.0  ;;  %v12295_v19 = vsub.f32 %v12161_v50, %v6314_v45  ;;  %v6380_v2 = vsel %vm53_vm0, %v6350_v15, 0.0  ;;  %6580 = vmatpush1.bf16.msra.mxu1 %v8677_v3 }
0x1d37   :  { %6300 = vadd.xlane.f32.xlu0 %v6299_v55  ;;  %13094 = vst [vmem:[#allocation31_spill] sm:$0xff] %v12283_v54  ;;  %v6308_v4 = vsel %vm53_vm0, %v12283_v54, 0.0  ;;  %6581 = vmatprep.subr.bf16.mxu1 %v8682_v13  ;;  %v9397_v17 = vmov 0  }
0x1d38   :  { %13092 = vst [vmem:[#allocation29_spill] sm:$0xff] %v12275_v21  ;;  %v6302_v33 = vsel %vm53_vm0, %v12275_v21, 0.0  ;;  %v6346_v63 = vmul.f32 %v12295_v19, %v12295_v19  ;;  %6611 = vmatprep.mubr.bf16.mxu1 %v9397_v17 }
0x1d39   :  { %6303 = vadd.xlane.f32.xlu1 %v6302_v33 }
0x1d3a   :  { %v6368_v6 = vsel %vm53_vm0, %v6346_v63, 0.0  ;;  %6582 = vmatpush1.bf16.msra.mxu1 %v8680_v5 }
0x1d3b   :  { %6306 = vadd.xlane.f32.xlu0 %v6305_v49 }
0x1d3d   :  { %6309 = vadd.xlane.f32.xlu1 %v6308_v4 }
0x1d3f   :  { %6360 = vadd.xlane.f32.xlu0 %v6359_v24 }
0x1d41   :  { %6363 = vadd.xlane.f32.xlu1 %v6362_v41 }
0x1d43   :  { %6366 = vadd.xlane.f32.xlu0 %v6365_v53 }
0x1d45   :  { %6369 = vadd.xlane.f32.xlu1 %v6368_v6 }
0x1d47   :  { %6372 = vadd.xlane.f32.xlu0 %v6371_v10 }
0x1d49   :  { %6375 = vadd.xlane.f32.xlu1 %v6374_v37 }
0x1d4b   :  { %6378 = vadd.xlane.f32.xlu0 %v6377_v30 }
0x1d4d   :  { %6381 = vadd.xlane.f32.xlu1 %v6380_v2 }
0x1d9b   :  { %v6289_v18 = vpop.xlane.xlu0 %6288 }
0x1d9c   :  { %v6319_v56 = vmul.f32 0.03125, %v6289_v18 }
0x1d9d   :  { %v6292_v29 = vpop.xlane.xlu1 %6291 }
0x1d9e   :  { %v12347_v48 = vsub.f32 %v12240_v12, %v6319_v56  ;;  %v6320_v55 = vmul.f32 0.03125, %v6292_v29 }
0x1d9f   :  { %v6295_v23 = vpop.xlane.xlu0 %6294 }
0x1da0   :  { %v12350_v45 = vsub.f32 %v12248_v38, %v6320_v55  ;;  %v6321_v44 = vmul.f32 0.03125, %v6295_v23  ;;  %v6351_v33 = vmul.f32 %v12347_v48, %v12347_v48 }
0x1da1   :  { %v6298_v32 = vpop.xlane.xlu1 %6297 }
0x1da2   :  { %v12355_v49 = vsub.f32 %v12245_v35, %v6321_v44  ;;  %v6322_v25 = vmul.f32 0.03125, %v6298_v32  ;;  %v6383_v40 = vsel %vm53_vm0, %v6351_v33, 0.0  ;;  %v6352_v11 = vmul.f32 %v12350_v45, %v12350_v45 }
0x1da3   :  { %6384 = vadd.xlane.f32.xlu0 %v6383_v40 }
0x1da4   :  { %v12361_v4 = vsub.f32 %v12253_v62, %v6322_v25  ;;  %v6386_v16 = vsel %vm53_vm0, %v6352_v11, 0.0  ;;  %v6353_v36 = vmul.f32 %v12355_v49, %v12355_v49 }
0x1da5   :  { %6387 = vadd.xlane.f32.xlu1 %v6386_v16 }
0x1da6   :  { %v6389_v26 = vsel %vm53_vm0, %v6353_v36, 0.0  ;;  %v6354_v24 = vmul.f32 %v12361_v4, %v12361_v4 }
0x1da7   :  { %6390 = vadd.xlane.f32.xlu0 %v6389_v26 }
0x1da8   :  { %v6392_v27 = vsel %vm53_vm0, %v6354_v24, 0.0 }
0x1da9   :  { %6393 = vadd.xlane.f32.xlu1 %v6392_v27 }
0x1dc4   :  { %v6301_v7 = vpop.xlane.xlu0 %6300 }
0x1dc5   :  { %v6323_v41 = vmul.f32 0.03125, %v6301_v7 }
0x1dc6   :  { %v6304_v63 = vpop.xlane.xlu1 %6303 }
0x1dc7   :  { %v12371_v53 = vsub.f32 %v12264_v9, %v6323_v41  ;;  %v6324_v39 = vmul.f32 0.03125, %v6304_v63  ;;  %v6473_v41 = vsub.s32 6, %v13069_v42 }
0x1dc8   :  { %v6307_v6 = vpop.xlane.xlu0 %6306 }
0x1dc9   :  { %v12374_v31 = vsub.f32 %v12275_v21, %v6324_v39  ;;  %v6325_v10 = vmul.f32 0.03125, %v6307_v6  ;;  %v6355_v57 = vmul.f32 %v12371_v53, %v12371_v53 }
0x1dca   :  { %v6310_v37 = vpop.xlane.xlu1 %6309 }
0x1dcb   :  { %v12379_v15 = vsub.f32 %v12272_v59, %v6325_v10  ;;  %v6326_v30 = vmul.f32 0.03125, %v6310_v37  ;;  %v6395_v2 = vsel %vm53_vm0, %v6355_v57, 0.0  ;;  %v6356_v43 = vmul.f32 %v12374_v31, %v12374_v31 }
0x1dcc   :  { %6396 = vadd.xlane.f32.xlu0 %v6395_v2  ;;  %v6361_v3 = vpop.xlane.xlu0 %6360  ;;  %v12396_v57 = vrot.slane %v12148_v61, %v6473_v41  ;;  %v6493_v37 = vsub.s32 7, %v13069_v42 }
0x1dcd   :  { %v12385_v13 = vsub.f32 %v12283_v54, %v6326_v30  ;;  %v6407_v5 = vmul.f32 0.03125, %v6361_v3  ;;  %v6398_v18 = vsel %vm53_vm0, %v6356_v43, 0.0  ;;  %v6357_v56 = vmul.f32 %v12379_v15, %v12379_v15 }
0x1dce   :  { %6399 = vadd.xlane.f32.xlu1 %v6398_v18  ;;  %v6364_v29 = vpop.xlane.xlu1 %6363 }
0x1dcf   :  { %v6423_v55 = vadd.f32 1e-05, %v6407_v5  ;;  %v6408_v23 = vmul.f32 0.03125, %v6364_v29  ;;  %v6401_v44 = vsel %vm53_vm0, %v6357_v56, 0.0  ;;  %v6358_v33 = vmul.f32 %v12385_v13, %v12385_v13 }
0x1dd0   :  { %6402 = vadd.xlane.f32.xlu0 %v6401_v44  ;;  %v6367_v32 = vpop.xlane.xlu0 %6366  ;;  %v12401_v29 = vrot.slane %v12148_v61, %v6493_v37 }
0x1dd1   :  { %9267 = vrsqrt.f32 %v6423_v55  ;;  %v6424_v25 = vadd.f32 1e-05, %v6408_v23  ;;  %v6409_v40 = vmul.f32 0.03125, %v6367_v32  ;;  %v6404_v11 = vsel %vm53_vm0, %v6358_v33, 0.0 }
0x1dd2   :  { %6405 = vadd.xlane.f32.xlu1 %v6404_v11  ;;  %v6370_v16 = vpop.xlane.xlu1 %6369 }
0x1dd3   :  { %9269 = vrsqrt.f32 %v6424_v25  ;;  %v6425_v36 = vadd.f32 1e-05, %v6409_v40  ;;  %v6410_v26 = vmul.f32 0.03125, %v6370_v16 }
0x1dd4   :  { %v6373_v24 = vpop.xlane.xlu0 %6372 }
0x1dd5   :  { %9271 = vrsqrt.f32 %v6425_v36  ;;  %v6426_v27 = vadd.f32 1e-05, %v6410_v26  ;;  %v6411_v7 = vmul.f32 0.03125, %v6373_v24 }
0x1dd6   :  { %v6376_v63 = vpop.xlane.xlu1 %6375 }
0x1dd7   :  { %9273 = vrsqrt.f32 %v6426_v27  ;;  %v6412_v39 = vmul.f32 0.03125, %v6376_v63  ;;  %v6427_v6 = vadd.f32 1e-05, %v6411_v7 }
0x1dd8   :  { %v6379_v30 = vpop.xlane.xlu0 %6378 }
0x1dd9   :  { %v6428_v10 = vadd.f32 1e-05, %v6412_v39  ;;  %v6413_v56 = vmul.f32 0.03125, %v6379_v30 }
0x1dda   :  { %v6382_v2 = vpop.xlane.xlu1 %6381 }
0x1ddb   :  { %v9268_v43 = vpop.eup %9267  ;;  %9275 = vrsqrt.f32 %v6428_v10  ;;  %v6414_v3 = vmul.f32 0.03125, %v6382_v2  ;;  %v6429_v40 = vadd.f32 1e-05, %v6413_v56 }
0x1ddc   :  { %v6455_v5 = vmul.f32 %v9268_v43, %v12269_v52  ;;  %9277 = vrsqrt.f32 %v6427_v6 }
0x1ddd   :  { %v9270_v18 = vpop.eup %9269  ;;  %v6430_v33 = vadd.f32 1e-05, %v6414_v3 }
0x1dde   :  { %v6475_v55 = vmul.f32 %v12396_v57, %v6455_v5  ;;  %v6456_v23 = vmul.f32 %v9270_v18, %v12280_v14 }
0x1ddf   :  { %v9272_v44 = vpop.eup %9271  ;;  %9279 = vrsqrt.f32 %v6430_v33 }
0x1de0   :  { %v6476_v32 = vmul.f32 %v12396_v57, %v6456_v23  ;;  %v6495_v11 = vadd.f32 %v12401_v29, %v6475_v55  ;;  %v6457_v16 = vmul.f32 %v9272_v44, %v12288_v46  ;;  %9281 = vrsqrt.f32 %v6429_v40 }
0x1de1   :  { %v9274_v25 = vpop.eup %9273 }
0x1de2   :  { %v6496_v52 = vadd.f32 %v12401_v29, %v6476_v32  ;;  %v6458_v36 = vmul.f32 %v9274_v25, %v12295_v19  ;;  %v6477_v14 = vmul.f32 %v12396_v57, %v6457_v16 }
0x1de4   :  { %v6511_v61 = vpack.c.bf16 %v6496_v52, %v6495_v11  ;;  %v6478_v26 = vmul.f32 %v12396_v57, %v6458_v36  ;;  %v6497_v19 = vadd.f32 %v12401_v29, %v6477_v14 }
0x1de5   :  { %v9276_v24 = vpop.eup %9275 }
0x1de6   :  { %7534 = vmatmul.mubr.msk.bf16.vlgmr.msra.gmra.mrb[144].mxu1 %vm53_vm0, %v6511_v61  ;;  %v9278_v27 = vpop.eup %9277  ;;  %v6460_v7 = vmul.f32 %v9276_v24, %v12308_v34  ;;  %v6498_v41 = vadd.f32 %v12401_v29, %v6478_v26 }
0x1de7   :  { %6621 = vmatprep.mubr.bf16.mxu1 %v9397_v17  ;;  %v6459_v46 = vmul.f32 %v9278_v27, %v12302_v8 }
0x1de8   :  { %v6512_v63 = vpack.c.bf16 %v6498_v41, %v6497_v19  ;;  %v6480_v39 = vmul.f32 %v12396_v57, %v6460_v7 }
0x1de9   :  { %v9280_v6 = vpop.eup %9279  ;;  %v6479_v10 = vmul.f32 %v12396_v57, %v6459_v46 }
0x1dea   :  { %v9282_v37 = vpop.eup %9281  ;;  %v6462_v30 = vmul.f32 %v9280_v6, %v12320_v28  ;;  %v6500_v34 = vadd.f32 %v12401_v29, %v6480_v39 }
0x1deb   :  { %v6461_v2 = vmul.f32 %v9282_v37, %v12314_v47  ;;  %v6499_v8 = vadd.f32 %v12401_v29, %v6479_v10 }
0x1dec   :  { %v6482_v3 = vmul.f32 %v12396_v57, %v6462_v30 }
0x1ded   :  { %v6513_v43 = vpack.c.bf16 %v6500_v34, %v6499_v8  ;;  %v6481_v5 = vmul.f32 %v12396_v57, %v6461_v2 }
0x1dee   :  { %7535 = vmatmul.mubr.msk.bf16.gmra.mrb[148].mxu1 %vm53_vm0, %v6512_v63  ;;  %v6502_v18 = vadd.f32 %v12401_v29, %v6482_v3 }
0x1def   :  { %6631 = vmatprep.mubr.bf16.mxu1 %v9397_v17  ;;  %v6501_v56 = vadd.f32 %v12401_v29, %v6481_v5 }
0x1df1   :  { %v6514_v28 = vpack.c.bf16 %v6502_v18, %v6501_v56 }
0x1df6   :  { %7536 = vmatmul.mubr.msk.bf16.gmra.mrb[152].mxu1 %vm53_vm0, %v6513_v43 }
0x1df7   :  { %6641 = vmatprep.mubr.bf16.mxu1 %v9397_v17 }
0x1dfe   :  { %7537 = vmatmul.mubr.msk.bf16.gmra.mrb[156].mxu1 %vm53_vm0, %v6514_v28 }
0x1dff   :  { %6651 = vmatprep.mubr.bf16.mxu1 %v9397_v17 }
0x1e30   :  { %v6385_v47 = vpop.xlane.xlu0 %6384 }
0x1e31   :  { %v6415_v55 = vmul.f32 0.03125, %v6385_v47 }
0x1e32   :  { %v6388_v23 = vpop.xlane.xlu1 %6387 }
0x1e33   :  { %v6431_v44 = vadd.f32 1e-05, %v6415_v55  ;;  %v6416_v33 = vmul.f32 0.03125, %v6388_v23  ;;  %v8683_v23 = vld [vmem:[%s12891_s6] sm:$0xff]  }
0x1e34   :  { %v6391_v32 = vpop.xlane.xlu0 %6390  ;;  %8328 = vmatprep.subr.bf16.mxu0 %v8683_v23 }
0x1e35   :  { %9283 = vrsqrt.f32 %v6431_v44  ;;  %v6432_v25 = vadd.f32 1e-05, %v6416_v33  ;;  %v6417_v40 = vmul.f32 0.03125, %v6391_v32  ;;  %8329 = vmatpush3.bf16.msra.mxu0 %v8683_v23 }
0x1e36   :  { %v6394_v11 = vpop.xlane.xlu1 %6393 }
0x1e37   :  { %9285 = vrsqrt.f32 %v6432_v25  ;;  %v6433_v52 = vadd.f32 1e-05, %v6417_v40  ;;  %v6418_v16 = vmul.f32 0.03125, %v6394_v11  ;;  %v8684_v25 = vld [vmem:[%s12891_s6 + $0x8] sm:$0xff]  }
0x1e38   :  { %8330 = vmatprep.subr.bf16.mxu0 %v8684_v25 }
0x1e39   :  { %9287 = vrsqrt.f32 %v6433_v52  ;;  %v6434_v36 = vadd.f32 1e-05, %v6418_v16  ;;  %8331 = vmatpush3.bf16.msra.mxu0 %v8684_v25 }
0x1e3b   :  { %9289 = vrsqrt.f32 %v6434_v36 }
0x1e3f   :  { %v9284_v61 = vpop.eup %9283 }
0x1e40   :  { %v6463_v26 = vmul.f32 %v9284_v61, %v12347_v48 }
0x1e41   :  { %v9286_v24 = vpop.eup %9285 }
0x1e42   :  { %v6464_v14 = vmul.f32 %v9286_v24, %v12350_v45  ;;  %v6483_v27 = vmul.f32 %v12396_v57, %v6463_v26 }
0x1e43   :  { %v9288_v7 = vpop.eup %9287 }
0x1e44   :  { %v6484_v41 = vmul.f32 %v12396_v57, %v6464_v14  ;;  %v6465_v19 = vmul.f32 %v9288_v7, %v12355_v49  ;;  %v6503_v39 = vadd.f32 %v12401_v29, %v6483_v27  ;;  %v8686_v7 = vld [vmem:[%s12891_s6 + $0x18] sm:$0xff]  }
0x1e45   :  { %v9290_v46 = vpop.eup %9289 }
0x1e46   :  { %v6466_v63 = vmul.f32 %v9290_v46, %v12361_v4  ;;  %v6504_v6 = vadd.f32 %v12401_v29, %v6484_v41  ;;  %v6485_v45 = vmul.f32 %v12396_v57, %v6465_v19 }
0x1e48   :  { %v6515_v10 = vpack.c.bf16 %v6504_v6, %v6503_v39  ;;  %v6486_v48 = vmul.f32 %v12396_v57, %v6466_v63  ;;  %v6505_v30 = vadd.f32 %v12401_v29, %v6485_v45  ;;  %v8688_v63 = vld [vmem:[%s12891_s6 + $0x28] sm:$0xff]   ;;  %v13095_v39 = vsub.s32 1, %v13069_v42 }
0x1e4a   :  { %7538 = vmatmul.mubr.msk.bf16.gmra.mrb[160].mxu1 %vm53_vm0, %v6515_v10  ;;  %v6506_v37 = vadd.f32 %v12401_v29, %v6486_v48 }
0x1e4b   :  { %6661 = vmatprep.mubr.bf16.mxu1 %v9397_v17 }
0x1e4c   :  { %v6516_v49 = vpack.c.bf16 %v6506_v37, %v6505_v30 }
0x1e52   :  { %7539 = vmatmul.mubr.msk.bf16.gmra.mrb[164].mxu1 %vm53_vm0, %v6516_v49 }
0x1e53   :  { %6671 = vmatprep.mubr.bf16.mxu1 %v9397_v17 }
0x1e59   :  { %v6397_v4 = vpop.xlane.xlu0 %6396 }
0x1e5a   :  { %v6419_v34 = vmul.f32 0.03125, %v6397_v4 }
0x1e5b   :  { %v6400_v2 = vpop.xlane.xlu1 %6399 }
0x1e5c   :  { %v6435_v8 = vadd.f32 1e-05, %v6419_v34  ;;  %v6420_v43 = vmul.f32 0.03125, %v6400_v2 }
0x1e5d   :  { %v6403_v3 = vpop.xlane.xlu0 %6402 }
0x1e5e   :  { %9291 = vrsqrt.f32 %v6435_v8  ;;  %v6436_v5 = vadd.f32 1e-05, %v6420_v43  ;;  %v6421_v18 = vmul.f32 0.03125, %v6403_v3 }
0x1e5f   :  { %v6406_v56 = vpop.xlane.xlu1 %6405 }
0x1e60   :  { %9293 = vrsqrt.f32 %v6436_v5  ;;  %v6437_v28 = vadd.f32 1e-05, %v6421_v18  ;;  %v6422_v47 = vmul.f32 0.03125, %v6406_v56 }
0x1e62   :  { %9295 = vrsqrt.f32 %v6437_v28  ;;  %v6438_v55 = vadd.f32 1e-05, %v6422_v47 }
0x1e64   :  { %9297 = vrsqrt.f32 %v6438_v55 }
0x1e68   :  { %v9292_v44 = vpop.eup %9291 }
0x1e69   :  { %v6467_v33 = vmul.f32 %v9292_v44, %v12371_v53  ;;  %v8685_v53 = vld [vmem:[%s12891_s6 + $0x10] sm:$0xff]  }
0x1e6a   :  { %v9294_v32 = vpop.eup %9293  ;;  %8332 = vmatprep.subr.bf16.mxu0 %v8685_v53 }
0x1e6b   :  { %v6468_v40 = vmul.f32 %v9294_v32, %v12374_v31  ;;  %v6487_v11 = vmul.f32 %v12396_v57, %v6467_v33  ;;  %8333 = vmatpush3.bf16.msra.mxu0 %v8685_v53 }
0x1e6c   :  { %v9296_v52 = vpop.eup %9295  ;;  %8334 = vmatprep.subr.bf16.mxu0 %v8686_v7 }
0x1e6d   :  { %v6488_v16 = vmul.f32 %v12396_v57, %v6468_v40  ;;  %v6469_v61 = vmul.f32 %v9296_v52, %v12379_v15  ;;  %v6507_v24 = vadd.f32 %v12401_v29, %v6487_v11 }
0x1e6e   :  { %v9298_v36 = vpop.eup %9297 }
0x1e6f   :  { %v6470_v26 = vmul.f32 %v9298_v36, %v12385_v13  ;;  %v6508_v31 = vadd.f32 %v12401_v29, %v6488_v16  ;;  %v6489_v41 = vmul.f32 %v12396_v57, %v6469_v61  ;;  %8335 = vmatpush3.bf16.msra.mxu0 %v8686_v7  ;;  %v8687_v13 = vld [vmem:[%s12891_s6 + $0x20] sm:$0xff]  }
0x1e70   :  { %8336 = vmatprep.subr.bf16.mxu0 %v8687_v13 }
0x1e71   :  { %v6517_v14 = vpack.c.bf16 %v6508_v31, %v6507_v24  ;;  %v6490_v27 = vmul.f32 %v12396_v57, %v6470_v26  ;;  %v6509_v46 = vadd.f32 %v12401_v29, %v6489_v41  ;;  %v8690_v57 = vld [vmem:[%s12891_s6 + $0x38] sm:$0xff]   ;;  %v13096_v31 = vsub.s32 0, %v13069_v42 }
0x1e73   :  { %7540 = vmatmul.mubr.msk.bf16.gmra.mrb[168].mxu1 %vm53_vm0, %v6517_v14  ;;  %v6510_v15 = vadd.f32 %v12401_v29, %v6490_v27  ;;  %8337 = vmatpush3.bf16.msra.mxu0 %v8687_v13  ;;  %v6523_v29 = vld [vmem:[%s12892_s8] sm:$0x3] }
0x1e74   :  { %6681 = vmatprep.mubr.bf16.mxu1 %v9397_v17  ;;  %8338 = vmatprep.subr.bf16.mxu0 %v8688_v63  ;;  %v8689_v17 = vld [vmem:[%s12891_s6 + $0x30] sm:$0xff]   ;;  %v12494_v6 = vrot.slane %v6523_v29, %v13095_v39  ;;  %v12528_v14 = vrot.slane %v6523_v29, %v13096_v31 }
0x1e75   :  { %v6518_v19 = vpack.c.bf16 %v6510_v15, %v6509_v46 }
0x1e77   :  { %8339 = vmatpush3.bf16.msra.mxu0 %v8688_v63 }
0x1e78   :  { %8340 = vmatprep.subr.bf16.mxu0 %v8689_v17 }
0x1e7b   :  { %7541 = vmatmul.mubr.msk.bf16.gmra.mrb[172].mxu1 %vm53_vm0, %v6518_v19  ;;  %8341 = vmatpush3.bf16.msra.mxu0 %v8689_v17 }
0x1e7c   :  { %8342 = vmatprep.subr.bf16.mxu0 %v8690_v57 }
0x1e7f   :  { %8343 = vmatpush3.bf16.msra.mxu0 %v8690_v57 }
0x1eb9   :  { %v6613_v10 = vpop.f32.mrb[144].mxu1 }
0x1eba   :  { %v6615_v48 = vpop.f32.mrb[145].mxu1  ;;  %v12544_v29 = vadd.f32 %v6613_v10, %v12528_v14 }
0x1ebb   :  { %v6616_v45 = vadd.f32 %v6615_v48, %v12494_v6  ;;  %v6617_v37 = vpop.f32.mrb[146].mxu1 }
0x1ebc   :  { %v6619_v30 = vpop.f32.mrb[147].mxu1  ;;  %v12547_v39 = vadd.f32 %v6617_v37, %v12528_v14 }
0x1ebd   :  { %v12497_v49 = vmul.f32 0.70710677, %v6616_v45  ;;  %v6620_v4 = vadd.f32 %v6619_v30, %v12494_v6 }
0x1ebf   :  { %v6724_v34 = vand.u32 2147483647, %v12497_v49  ;;  %v12501_v2 = vmul.f32 0.70710677, %v6620_v4  ;;  %vm7028_vm7 = vcmp.lt.f32.partialorder %v12497_v49, 0.0 }
0x1ec1   :  { %v6740_v8 = vmul.f32 0.3275911, %v6724_v34  ;;  %v6725_v43 = vand.u32 2147483647, %v12501_v2  ;;  %v12504_v3 = vpop.f32.mrb[148].mxu1  ;;  %v6932_v16 = vsub.f32 0.0, %v6724_v34 }
0x1ec2   :  { %v6625_v56 = vpop.f32.mrb[149].mxu1  ;;  %vm7029_vm8 = vcmp.lt.f32.partialorder %v12501_v2, 0.0 }
0x1ec3   :  { %v6756_v5 = vadd.f32 1.0, %v6740_v8  ;;  %v6741_v18 = vmul.f32 0.3275911, %v6725_v43  ;;  %v6626_v28 = vadd.f32 %v6625_v56, %v12494_v6  ;;  %v12507_v47 = vpop.f32.mrb[150].mxu1  ;;  %v6933_v41 = vsub.f32 0.0, %v6725_v43 }
0x1ec4   :  { %v6629_v23 = vpop.f32.mrb[151].mxu1  ;;  %v6948_v46 = vmul.f32 %v6932_v16, %v6724_v34  ;;  %v12559_v16 = vmul.f32 0.5, %v6616_v45 }
0x1ec5   :  { %9299 = vrcp.f32 %v6756_v5  ;;  %v6757_v55 = vadd.f32 1.0, %v6741_v18  ;;  %v12509_v44 = vmul.f32 0.70710677, %v6626_v28  ;;  %v12512_v33 = vadd.f32 %v6629_v23, %v12494_v6 }
0x1ec6   :  { %v6949_v5 = vmul.f32 %v6933_v41, %v6725_v43  ;;  %v6964_v23 = vmul.f32 1.442695, %v6948_v46  ;;  %v12568_v46 = vmul.f32 0.5, %v6626_v28 }
0x1ec7   :  { %9301 = vrcp.f32 %v6757_v55  ;;  %v6726_v32 = vand.u32 2147483647, %v12509_v44  ;;  %v12516_v25 = vmul.f32 0.70710677, %v12512_v33  ;;  %vm7030_vm9 = vcmp.lt.f32.partialorder %v12509_v44, 0.0 }
0x1ec9   :  { %v12518_v40 = vpop.f32.mrb[152].mxu1  ;;  %v6742_v11 = vmul.f32 0.3275911, %v6726_v32  ;;  %v6727_v36 = vand.u32 2147483647, %v12516_v25  ;;  %v6934_v19 = vsub.f32 0.0, %v6726_v32 }
0x1eca   :  { %v6635_v52 = vpop.f32.mrb[153].mxu1  ;;  %vm7031_vm10 = vcmp.lt.f32.partialorder %v12516_v25, 0.0 }
0x1ecb   :  { %v12522_v53 = vadd.f32 %v6635_v52, %v12494_v6  ;;  %v12524_v61 = vpop.f32.mrb[154].mxu1  ;;  %v6758_v26 = vadd.f32 1.0, %v6742_v11  ;;  %v6743_v27 = vmul.f32 0.3275911, %v6727_v36  ;;  %v6935_v18 = vsub.f32 0.0, %v6727_v36 }
0x1ecc   :  { %v6639_v24 = vpop.f32.mrb[155].mxu1  ;;  %v6950_v11 = vmul.f32 %v6934_v19, %v6726_v32  ;;  %v6966_v19 = vmul.f32 1.442695, %v6949_v5 }
0x1ecd   :  { %v12531_v7 = vmul.f32 0.70710677, %v12522_v53  ;;  %9303 = vrcp.f32 %v6758_v26  ;;  %v12534_v15 = vadd.f32 %v6639_v24, %v12494_v6  ;;  %v6759_v63 = vadd.f32 1.0, %v6743_v27 }
0x1ece   :  { %v12566_v27 = vmul.f32 0.5, %v6620_v4 }
0x1ecf   :  { %v12536_v13 = vpop.eup %9299  ;;  %v6728_v17 = vand.u32 2147483647, %v12531_v7  ;;  %v12541_v57 = vmul.f32 0.70710677, %v12534_v15  ;;  %9305 = vrcp.f32 %v6759_v63  ;;  %v6951_v63 = vmul.f32 %v6935_v18, %v6727_v36 }
0x1ed0   :  { %v6788_v42 = vmul.f32 1.0614054, %v12536_v13  ;;  %v12582_v36 = vadd.f32 %v12504_v3, %v12528_v14  ;;  %vm7032_vm11 = vcmp.lt.f32.partialorder %v12531_v7, 0.0 }
0x1ed1   :  { %v6744_v48 = vmul.f32 0.3275911, %v6728_v17  ;;  %v12549_v30 = vpop.f32.mrb[156].mxu1  ;;  %v12551_v34 = vpop.eup %9301  ;;  %v12554_v56 = vand.u32 2147483647, %v12541_v57  ;;  %v6936_v21 = vsub.f32 0.0, %v6728_v17 }
0x1ed2   :  { %v6804_v8 = vadd.f32 -1.4531521, %v6788_v42  ;;  %v6645_v55 = vpop.f32.mrb[157].mxu1  ;;  %v6789_v10 = vmul.f32 1.0614054, %v12551_v34  ;;  %vm7033_vm12 = vcmp.lt.f32.partialorder %v12541_v57, 0.0 }
0x1ed3   :  { %v6760_v52 = vadd.f32 1.0, %v6744_v48  ;;  %v12557_v37 = vpop.f32.mrb[158].mxu1  ;;  %v6745_v24 = vmul.f32 0.3275911, %v12554_v56  ;;  %v12564_v43 = vadd.f32 %v6645_v55, %v12494_v6  ;;  %v6968_v48 = vmul.f32 1.442695, %v6950_v11 }
0x1ed4   :  { %v6820_v26 = vmul.f32 %v12536_v13, %v6804_v8  ;;  %v6649_v31 = vpop.f32.mrb[159].mxu1  ;;  %v6805_v41 = vadd.f32 -1.4531521, %v6789_v10  ;;  %v12588_v11 = vadd.f32 %v12507_v47, %v12528_v14 }
0x1ed5   :  { %9307 = vrcp.f32 %v6760_v52  ;;  %v6761_v42 = vadd.f32 1.0, %v6745_v24  ;;  %v12572_v8 = vmul.f32 0.70710677, %v12564_v43  ;;  %v12578_v28 = vadd.f32 %v6649_v31, %v12494_v6 }
0x1ed6   :  { %v6836_v32 = vadd.f32 1.4214138, %v6820_v26  ;;  %9309 = vpow2.f32 %v6964_v23  ;;  %v6821_v45 = vmul.f32 %v12551_v34, %v6805_v41  ;;  %v6970_v52 = vmul.f32 1.442695, %v6951_v63 }
0x1ed7   :  { %v12574_v55 = vpop.eup %9303  ;;  %9311 = vrcp.f32 %v6761_v42  ;;  %v6730_v18 = vand.u32 2147483647, %v12572_v8  ;;  %v6952_v42 = vmul.f32 %v6936_v21, %v6728_v17  ;;  %v6937_v63 = vsub.f32 0.0, %v12554_v56 }
0x1ed8   :  { %v6852_v4 = vmul.f32 %v12536_v13, %v6836_v32  ;;  %v6837_v10 = vadd.f32 1.4214138, %v6821_v45  ;;  %v6790_v5 = vmul.f32 1.0614054, %v12574_v55  ;;  %9313 = vpow2.f32 %v6966_v19 }
0x1ed9   :  { %v12590_v26 = vpop.eup %9305  ;;  %9315 = vpow2.f32 %v6968_v48  ;;  %v6746_v41 = vmul.f32 0.3275911, %v6730_v18  ;;  %v12596_v45 = vmul.f32 0.70710677, %v12578_v28  ;;  %v6972_v59 = vmul.f32 1.442695, %v6952_v42 }
0x1eda   :  { %v6868_v23 = vadd.f32 -0.28449672, %v6852_v4  ;;  %v6853_v24 = vmul.f32 %v12551_v34, %v6837_v10  ;;  %v6806_v31 = vadd.f32 -1.4531521, %v6790_v5  ;;  %v6791_v32 = vmul.f32 1.0614054, %v12590_v26 }
0x1edb   :  { %v6762_v4 = vadd.f32 1.0, %v6746_v41  ;;  %9317 = vpow2.f32 %v6970_v52  ;;  %v12601_v48 = vand.u32 2147483647, %v12596_v45  ;;  %v6938_v5 = vsub.f32 0.0, %v6730_v18 }
0x1edc   :  { %v6884_v3 = vmul.f32 %v12536_v13, %v6868_v23  ;;  %v6869_v19 = vadd.f32 -0.28449672, %v6853_v24  ;;  %v6822_v47 = vmul.f32 %v12574_v55, %v6806_v31  ;;  %v6807_v9 = vadd.f32 -1.4531521, %v6791_v32 }
0x1edd   :  { %9319 = vrcp.f32 %v6762_v4  ;;  %v6747_v52 = vmul.f32 0.3275911, %v12601_v48  ;;  %v6953_v38 = vmul.f32 %v6937_v63, %v12554_v56  ;;  %v6954_v35 = vmul.f32 %v6938_v5, %v6730_v18 }
0x1ede   :  { %v6900_v54 = vadd.f32 0.2548296, %v6884_v3  ;;  %v6885_v21 = vmul.f32 %v12551_v34, %v6869_v19  ;;  %v6838_v17 = vadd.f32 1.4214138, %v6822_v47  ;;  %v6823_v24 = vmul.f32 %v12590_v26, %v6807_v9 }
0x1edf   :  { %v12603_v10 = vpop.eup %9307  ;;  %v6976_v5 = vmul.f32 1.442695, %v6954_v35  ;;  %vm7034_vm13 = vcmp.lt.f32.partialorder %v12572_v8, 0.0  ;;  %vm7035_vm14 = vcmp.lt.f32.partialorder %v12596_v45, 0.0 }
0x1ee0   :  { %v6916_v23 = vmul.f32 %v12536_v13, %v6900_v54  ;;  %v6792_v31 = vmul.f32 1.0614054, %v12603_v10  ;;  %v9310_v41 = vpop.eup %9309  ;;  %v6901_v3 = vadd.f32 0.2548296, %v6885_v21  ;;  %v6854_v32 = vmul.f32 %v12574_v55, %v6838_v17 }
0x1ee1   :  { %v12613_v62 = vpop.eup %9311  ;;  %v6839_v47 = vadd.f32 1.4214138, %v6823_v24  ;;  %v6763_v13 = vadd.f32 1.0, %v6747_v52 }
0x1ee2   :  { %v6996_v19 = vmul.f32 %v9310_v41, %v6916_v23  ;;  %v6808_v54 = vadd.f32 -1.4531521, %v6792_v31  ;;  %v6917_v9 = vmul.f32 %v12551_v34, %v6901_v3  ;;  %v6870_v4 = vadd.f32 -0.28449672, %v6854_v32  ;;  %v9314_v21 = vpop.eup %9313 }
0x1ee3   :  { %v6793_v12 = vmul.f32 1.0614054, %v12613_v62  ;;  %v6855_v42 = vmul.f32 %v12590_v26, %v6839_v47  ;;  %9321 = vrcp.f32 %v6763_v13  ;;  %v9316_v63 = vpop.eup %9315  ;;  %v6974_v31 = vmul.f32 1.442695, %v6953_v38 }
0x1ee4   :  { %v7012_v51 = vsub.f32 1.0, %v6996_v19  ;;  %v6824_v56 = vmul.f32 %v12603_v10, %v6808_v54  ;;  %v6997_v17 = vmul.f32 %v9314_v21, %v6917_v9  ;;  %v6886_v23 = vmul.f32 %v12574_v55, %v6870_v4 }
0x1ee5   :  { %v6809_v24 = vadd.f32 -1.4531521, %v6793_v12  ;;  %v6871_v41 = vadd.f32 -0.28449672, %v6855_v42  ;;  %9323 = vpow2.f32 %v6972_v59  ;;  %v9318_v19 = vpop.eup %9317  ;;  %v6939_v38 = vsub.f32 0.0, %v12601_v48 }
0x1ee6   :  { %v7044_v52 = vsub.f32 0.0, %v7012_v51  ;;  %v6840_v34 = vadd.f32 1.4214138, %v6824_v56  ;;  %v7013_v3 = vsub.f32 1.0, %v6997_v17  ;;  %v6902_v32 = vadd.f32 0.2548296, %v6886_v23 }
0x1ee7   :  { %v6825_v18 = vmul.f32 %v12613_v62, %v6809_v24  ;;  %v6887_v54 = vmul.f32 %v12590_v26, %v6871_v41  ;;  %v12628_v13 = vpop.eup %9319  ;;  %9325 = vpow2.f32 %v6974_v31  ;;  %v6955_v31 = vmul.f32 %v6939_v38, %v12601_v48 }
0x1ee8   :  { %v7060_v47 = vsel %vm7028_vm7, %v7044_v52, %v7012_v51  ;;  %v6856_v12 = vmul.f32 %v12603_v10, %v6840_v34  ;;  %v7045_v9 = vsub.f32 0.0, %v7013_v3  ;;  %v6918_v4 = vmul.f32 %v12574_v55, %v6902_v32 }
0x1ee9   :  { %v7076_v59 = vadd.f32 1.0, %v7060_v47  ;;  %v6841_v21 = vadd.f32 1.4214138, %v6825_v18  ;;  %v6903_v35 = vadd.f32 0.2548296, %v6887_v54  ;;  %9327 = vpow2.f32 %v6976_v5 }
0x1eea   :  { %v6872_v42 = vadd.f32 -0.28449672, %v6856_v12  ;;  %v6794_v51 = vmul.f32 1.0614054, %v12628_v13  ;;  %v7061_v56 = vsel %vm7029_vm8, %v7045_v9, %v7013_v3  ;;  %v6998_v17 = vmul.f32 %v9316_v63, %v6918_v4 }
0x1eeb   :  { %v7092_v49 = vmul.f32 %v7076_v59, %v12559_v16  ;;  %v6857_v23 = vmul.f32 %v12613_v62, %v6841_v21  ;;  %v7077_v24 = vadd.f32 1.0, %v7061_v56  ;;  %v6919_v52 = vmul.f32 %v12590_v26, %v6903_v35 }
0x1eec   :  { %v6888_v41 = vmul.f32 %v12603_v10, %v6872_v42  ;;  %v6810_v55 = vadd.f32 -1.4531521, %v6794_v51  ;;  %v7014_v34 = vsub.f32 1.0, %v6998_v17  ;;  %v6978_v21 = vmul.f32 1.442695, %v6955_v31 }
0x1eed   :  { %v6873_v32 = vadd.f32 -0.28449672, %v6857_v23  ;;  %v7108_v18 = vmul.f32 %v7092_v49, %v12544_v29  ;;  %v12640_v47 = vpop.eup %9321  ;;  %v7093_v2 = vmul.f32 %v7077_v24, %v12566_v27  ;;  %v6999_v16 = vmul.f32 %v9318_v19, %v6919_v52 }
0x1eee   :  { %v6904_v63 = vadd.f32 0.2548296, %v6888_v41  ;;  %v6826_v3 = vmul.f32 %v12628_v13, %v6810_v55  ;;  %v7046_v54 = vsub.f32 0.0, %v7014_v34  ;;  %v6795_v12 = vmul.f32 1.0614054, %v12640_v47 }
0x1eef   :  { %v6889_v26 = vmul.f32 %v12613_v62, %v6873_v32  ;;  %v9324_v59 = vpop.eup %9323  ;;  %v7015_v9 = vsub.f32 1.0, %v6999_v16  ;;  %v7109_v29 = vmul.f32 %v7093_v2, %v12547_v39  ;;  %v6695_v52 = vmul.f32 0.5, %v12512_v33 }
0x1ef0   :  { %v6920_v48 = vmul.f32 %v12603_v10, %v6904_v63  ;;  %v6842_v38 = vadd.f32 1.4214138, %v6826_v3  ;;  %v7062_v27 = vsel %vm7030_vm9, %v7046_v54, %v7014_v34  ;;  %v6811_v4 = vadd.f32 -1.4531521, %v6795_v12 }
0x1ef1   :  { %v6905_v19 = vadd.f32 0.2548296, %v6889_v26  ;;  %v7078_v35 = vadd.f32 1.0, %v7062_v27  ;;  %v7047_v42 = vsub.f32 0.0, %v7015_v9  ;;  %v7124_v56 = vpack.c.bf16 %v7109_v29, %v7108_v18  ;;  %v9326_v17 = vpop.eup %9325 }
0x1ef2   :  { %v7000_v51 = vmul.f32 %v9324_v59, %v6920_v48  ;;  %v6858_v5 = vmul.f32 %v12628_v13, %v6842_v38  ;;  %v6827_v10 = vmul.f32 %v12640_v47, %v6811_v4  ;;  %9329 = vpow2.f32 %v6978_v21 }
0x1ef3   :  { %v6921_v49 = vmul.f32 %v12613_v62, %v6905_v19  ;;  %v7094_v39 = vmul.f32 %v7078_v35, %v12568_v46  ;;  %v7063_v44 = vsel %vm7031_vm10, %v7047_v42, %v7015_v9  ;;  %8344 = vmatprep.mubr.bf16.mxu0 %v7124_v56  ;;  %v6696_v2 = vmul.f32 0.5, %v12522_v53  ;;  %v9328_v63 = vpop.eup %9327 }
0x1ef4   :  { %v7016_v23 = vsub.f32 1.0, %v7000_v51  ;;  %v6874_v24 = vadd.f32 -0.28449672, %v6858_v5  ;;  %v7079_v41 = vadd.f32 1.0, %v7063_v44  ;;  %v6843_v34 = vadd.f32 1.4214138, %v6827_v10 }
0x1ef5   :  { %v7001_v55 = vmul.f32 %v9326_v17, %v6921_v49  ;;  %v7110_v32 = vmul.f32 %v7094_v39, %v12582_v36  ;;  %v6634_v12 = vadd.f32 %v12518_v40, %v12528_v14  ;;  %v6697_v38 = vmul.f32 0.5, %v12534_v15 }
0x1ef6   :  { %v7048_v25 = vsub.f32 0.0, %v7016_v23  ;;  %v6890_v62 = vmul.f32 %v12628_v13, %v6874_v24  ;;  %v7095_v31 = vmul.f32 %v7079_v41, %v6695_v52  ;;  %v6859_v46 = vmul.f32 %v12640_v47, %v6843_v34 }
0x1ef7   :  { %v7017_v18 = vsub.f32 1.0, %v7001_v55  ;;  %v6638_v4 = vadd.f32 %v12524_v61, %v12528_v14  ;;  %v6698_v49 = vmul.f32 0.5, %v12564_v43  ;;  %v6644_v61 = vadd.f32 %v12549_v30, %v12528_v14 }
0x1ef8   :  { %v7064_v16 = vsel %vm7032_vm11, %v7048_v25, %v7016_v23  ;;  %v6906_v33 = vadd.f32 0.2548296, %v6890_v62  ;;  %v7111_v3 = vmul.f32 %v7095_v31, %v12588_v11  ;;  %v6875_v36 = vadd.f32 -0.28449672, %v6859_v46 }
0x1ef9   :  { %v7080_v54 = vadd.f32 1.0, %v7064_v16  ;;  %v7049_v26 = vsub.f32 0.0, %v7017_v18  ;;  %v6699_v23 = vmul.f32 0.5, %v12578_v28  ;;  %v6648_v24 = vadd.f32 %v12557_v37, %v12528_v14 }
0x1efa   :  { %v6922_v7 = vmul.f32 %v12628_v13, %v6906_v33  ;;  %v7125_v59 = vpack.c.bf16 %v7111_v3, %v7110_v32  ;;  %v6891_v53 = vmul.f32 %v12640_v47, %v6875_v36 }
0x1efb   :  { %v7096_v9 = vmul.f32 %v7080_v54, %v6696_v2  ;;  %v7065_v48 = vsel %vm7033_vm12, %v7049_v26, %v7017_v18 }
0x1efc   :  { %v7081_v29 = vadd.f32 1.0, %v7065_v48  ;;  %v7002_v27 = vmul.f32 %v9328_v63, %v6922_v7  ;;  %v6907_v11 = vadd.f32 0.2548296, %v6891_v53  ;;  %8345 = vmatmul.mubr.bf16.vlgmr.msra.gmra.mrb[180].mxu0 %v7125_v59  ;;  %v9330_v13 = vpop.eup %9329 }
0x1efd   :  { %v7112_v19 = vmul.f32 %v7096_v9, %v6634_v12 }
0x1efe   :  { %v7097_v40 = vmul.f32 %v7081_v29, %v6697_v38  ;;  %v7018_v21 = vsub.f32 1.0, %v7002_v27  ;;  %v6923_v57 = vmul.f32 %v12640_v47, %v6907_v11 }
0x1f00   :  { %v7050_v35 = vsub.f32 0.0, %v7018_v21  ;;  %v7113_v42 = vmul.f32 %v7097_v40, %v6638_v4  ;;  %v7003_v51 = vmul.f32 %v9330_v13, %v6923_v57 }
0x1f02   :  { %v7066_v5 = vsel %vm7034_vm13, %v7050_v35, %v7018_v21  ;;  %v7126_v15 = vpack.c.bf16 %v7113_v42, %v7112_v19  ;;  %v7019_v56 = vsub.f32 1.0, %v7003_v51 }
0x1f03   :  { %v7082_v10 = vadd.f32 1.0, %v7066_v5 }
0x1f04   :  { %8348 = vmatprep.mubr.bf16.mxu0 %v7126_v15  ;;  %v7051_v39 = vsub.f32 0.0, %v7019_v56 }
0x1f05   :  { %v7098_v17 = vmul.f32 %v7082_v10, %v6698_v49 }
0x1f06   :  { %v7067_v47 = vsel %vm7035_vm14, %v7051_v39, %v7019_v56 }
0x1f07   :  { %v7114_v44 = vmul.f32 %v7098_v17, %v6644_v61  ;;  %v7083_v8 = vadd.f32 1.0, %v7067_v47 }
0x1f09   :  { %v7099_v52 = vmul.f32 %v7083_v8, %v6699_v23 }
0x1f0b   :  { %v7115_v43 = vmul.f32 %v7099_v52, %v6648_v24 }
0x1f0d   :  { %v7127_v41 = vpack.c.bf16 %v7115_v43, %v7114_v44 }
0x1f0f   :  { %8349 = vmatmul.mubr.bf16.gmra.mrb[184].mxu0 %v7127_v41 }
0x1f1d   :  { %v12679_v55 = vpop.f32.mrb[160].mxu1 }
0x1f1e   :  { %v6655_v34 = vpop.f32.mrb[161].mxu1 }
0x1f1f   :  { %v12682_v30 = vadd.f32 %v6655_v34, %v12494_v6  ;;  %v12684_v32 = vpop.f32.mrb[162].mxu1 }
0x1f20   :  { %v6659_v45 = vpop.f32.mrb[163].mxu1 }
0x1f21   :  { %v12687_v25 = vmul.f32 0.70710677, %v12682_v30  ;;  %v12690_v28 = vadd.f32 %v6659_v45, %v12494_v6 }
0x1f23   :  { %v6732_v37 = vand.u32 2147483647, %v12687_v25  ;;  %v12694_v62 = vmul.f32 0.70710677, %v12690_v28  ;;  %vm7036_vm15 = vcmp.lt.f32.partialorder %v12687_v25, 0.0 }
0x1f25   :  { %v6748_v31 = vmul.f32 0.3275911, %v6732_v37  ;;  %v6733_v18 = vand.u32 2147483647, %v12694_v62  ;;  %v12697_v46 = vpop.f32.mrb[164].mxu1  ;;  %v6940_v48 = vsub.f32 0.0, %v6732_v37 }
0x1f26   :  { %v6665_v33 = vpop.f32.mrb[165].mxu1  ;;  %vm7037_vm1 = vcmp.lt.f32.partialorder %v12694_v62, 0.0  ;;  %v6700_v62 = vmul.f32 0.5, %v12682_v30 }
0x1f27   :  { %v6764_v2 = vadd.f32 1.0, %v6748_v31  ;;  %v6749_v16 = vmul.f32 0.3275911, %v6733_v18  ;;  %v12700_v63 = vadd.f32 %v6665_v33, %v12494_v6  ;;  %v12702_v3 = vpop.f32.mrb[166].mxu1  ;;  %v6941_v27 = vsub.f32 0.0, %v6733_v18 }
0x1f28   :  { %v6669_v26 = vpop.f32.mrb[167].mxu1  ;;  %v6956_v19 = vmul.f32 %v6940_v48, %v6732_v37 }
0x1f29   :  { %9331 = vrcp.f32 %v6764_v2  ;;  %v6765_v54 = vadd.f32 1.0, %v6749_v16  ;;  %v12705_v36 = vmul.f32 0.70710677, %v12700_v63  ;;  %v12708_v12 = vadd.f32 %v6669_v26, %v12494_v6 }
0x1f2a   :  { %v6957_v13 = vmul.f32 %v6941_v27, %v6733_v18  ;;  %v6980_v35 = vmul.f32 1.442695, %v6956_v19 }
0x1f2b   :  { %9333 = vrcp.f32 %v6765_v54  ;;  %v6734_v7 = vand.u32 2147483647, %v12705_v36  ;;  %v12712_v59 = vmul.f32 0.70710677, %v12708_v12  ;;  %vm7038_vm2 = vcmp.lt.f32.partialorder %v12705_v36, 0.0 }
0x1f2c   :  { %v6982_v10 = vmul.f32 1.442695, %v6957_v13 }
0x1f2d   :  { %v6750_v9 = vmul.f32 0.3275911, %v6734_v7  ;;  %v6735_v53 = vand.u32 2147483647, %v12712_v59  ;;  %v6942_v5 = vsub.f32 0.0, %v6734_v7  ;;  %vm7039_vm3 = vcmp.lt.f32.partialorder %v12712_v59, 0.0 }
0x1f2e   :  { %v6668_v59 = vadd.f32 %v12702_v3, %v12528_v14 }
0x1f2f   :  { %v6766_v38 = vadd.f32 1.0, %v6750_v9  ;;  %v6751_v29 = vmul.f32 0.3275911, %v6735_v53  ;;  %v6943_v61 = vsub.f32 0.0, %v6735_v53  ;;  %v6958_v47 = vmul.f32 %v6942_v5, %v6734_v7 }
0x1f31   :  { %9335 = vrcp.f32 %v6766_v38  ;;  %v6767_v4 = vadd.f32 1.0, %v6751_v29  ;;  %v6959_v41 = vmul.f32 %v6943_v61, %v6735_v53  ;;  %v6984_v45 = vmul.f32 1.442695, %v6958_v47 }
0x1f33   :  { %v9332_v11 = vpop.eup %9331  ;;  %9337 = vrcp.f32 %v6767_v4  ;;  %v6986_v26 = vmul.f32 1.442695, %v6959_v41 }
0x1f34   :  { %v6796_v40 = vmul.f32 1.0614054, %v9332_v11  ;;  %9339 = vpow2.f32 %v6980_v35 }
0x1f35   :  { %v9334_v21 = vpop.eup %9333  ;;  %9341 = vpow2.f32 %v6982_v10 }
0x1f36   :  { %v6812_v57 = vadd.f32 -1.4531521, %v6796_v40  ;;  %v6797_v42 = vmul.f32 1.0614054, %v9334_v21  ;;  %9343 = vpow2.f32 %v6984_v45 }
0x1f37   :  { %9345 = vpow2.f32 %v6986_v26 }
0x1f38   :  { %v6828_v51 = vmul.f32 %v9332_v11, %v6812_v57  ;;  %v6813_v15 = vadd.f32 -1.4531521, %v6797_v42 }
0x1f3a   :  { %v6844_v49 = vadd.f32 1.4214138, %v6828_v51  ;;  %v6829_v56 = vmul.f32 %v9334_v21, %v6813_v15 }
0x1f3b   :  { %v9336_v17 = vpop.eup %9335 }
0x1f3c   :  { %v6860_v39 = vmul.f32 %v9332_v11, %v6844_v49  ;;  %v6845_v44 = vadd.f32 1.4214138, %v6829_v56  ;;  %v6798_v23 = vmul.f32 1.0614054, %v9336_v17 }
0x1f3d   :  { %v9338_v24 = vpop.eup %9337 }
0x1f3e   :  { %v6876_v8 = vadd.f32 -0.28449672, %v6860_v39  ;;  %v6861_v52 = vmul.f32 %v9334_v21, %v6845_v44  ;;  %v6814_v43 = vadd.f32 -1.4531521, %v6798_v23  ;;  %v6799_v37 = vmul.f32 1.0614054, %v9338_v24  ;;  %v9340_v48 = vpop.eup %9339 }
0x1f3f   :  { %v9342_v13 = vpop.eup %9341 }
0x1f40   :  { %v6892_v34 = vmul.f32 %v9332_v11, %v6876_v8  ;;  %v6877_v31 = vadd.f32 -0.28449672, %v6861_v52  ;;  %v6830_v18 = vmul.f32 %v9336_v17, %v6814_v43  ;;  %v6815_v16 = vadd.f32 -1.4531521, %v6799_v37  ;;  %v9344_v41 = vpop.eup %9343 }
0x1f42   :  { %v6908_v2 = vadd.f32 0.2548296, %v6892_v34  ;;  %v6893_v33 = vmul.f32 %v9334_v21, %v6877_v31  ;;  %v6846_v54 = vadd.f32 1.4214138, %v6830_v18  ;;  %v6831_v7 = vmul.f32 %v9338_v24, %v6815_v16 }
0x1f44   :  { %v6924_v9 = vmul.f32 %v9332_v11, %v6908_v2  ;;  %v6909_v38 = vadd.f32 0.2548296, %v6893_v33  ;;  %v6862_v29 = vmul.f32 %v9336_v17, %v6846_v54  ;;  %v6847_v19 = vadd.f32 1.4214138, %v6831_v7 }
0x1f46   :  { %v7004_v27 = vmul.f32 %v9340_v48, %v6924_v9  ;;  %v12715_v4 = vpop.f32.mrb[168].mxu1  ;;  %v6925_v53 = vmul.f32 %v9334_v21, %v6909_v38  ;;  %v6878_v40 = vadd.f32 -0.28449672, %v6862_v29  ;;  %v6863_v42 = vmul.f32 %v9338_v24, %v6847_v19  ;;  %v9346_v9 = vpop.eup %9345 }
0x1f47   :  { %v6675_v57 = vpop.f32.mrb[169].mxu1  ;;  %v6658_v29 = vadd.f32 %v12684_v32, %v12528_v14  ;;  %v6664_v32 = vadd.f32 %v12697_v46, %v12528_v14 }
0x1f48   :  { %v7020_v35 = vsub.f32 1.0, %v7004_v27  ;;  %v12718_v51 = vadd.f32 %v6675_v57, %v12494_v6  ;;  %v12720_v11 = vpop.f32.mrb[170].mxu1  ;;  %v7005_v5 = vmul.f32 %v9342_v13, %v6925_v53  ;;  %v6894_v15 = vmul.f32 %v9336_v17, %v6878_v40 }
0x1f49   :  { %v6679_v49 = vpop.f32.mrb[171].mxu1  ;;  %v6879_v56 = vadd.f32 -0.28449672, %v6863_v42 }
0x1f4a   :  { %v7052_v10 = vsub.f32 0.0, %v7020_v35  ;;  %v12723_v61 = vmul.f32 0.70710677, %v12718_v51  ;;  %v7021_v21 = vsub.f32 1.0, %v7005_v5  ;;  %v6910_v39 = vadd.f32 0.2548296, %v6894_v15 }
0x1f4b   :  { %v12727_v47 = vadd.f32 %v6679_v49, %v12494_v6  ;;  %v6895_v23 = vmul.f32 %v9338_v24, %v6879_v56 }
0x1f4c   :  { %v7068_v44 = vsel %vm7036_vm15, %v7052_v10, %v7020_v35  ;;  %v6736_v8 = vand.u32 2147483647, %v12723_v61  ;;  %v7053_v52 = vsub.f32 0.0, %v7021_v21  ;;  %v6926_v43 = vmul.f32 %v9336_v17, %v6910_v39 }
0x1f4d   :  { %v6911_v34 = vadd.f32 0.2548296, %v6895_v23  ;;  %v7084_v31 = vadd.f32 1.0, %v7068_v44  ;;  %v12734_v2 = vmul.f32 0.70710677, %v12727_v47  ;;  %v6654_v17 = vadd.f32 %v12679_v55, %v12528_v14 }
0x1f4e   :  { %v6752_v45 = vmul.f32 0.3275911, %v6736_v8  ;;  %v12731_v37 = vpop.f32.mrb[172].mxu1  ;;  %v7069_v25 = vsel %vm7037_vm1, %v7053_v52, %v7021_v21  ;;  %v7006_v18 = vmul.f32 %v9344_v41, %v6926_v43  ;;  %v6701_v55 = vmul.f32 0.5, %v12690_v28 }
0x1f4f   :  { %v6685_v16 = vpop.f32.mrb[173].mxu1  ;;  %v6927_v33 = vmul.f32 %v9338_v24, %v6911_v34  ;;  %v6737_v48 = vand.u32 2147483647, %v12734_v2  ;;  %v7085_v27 = vadd.f32 1.0, %v7069_v25  ;;  %v7100_v24 = vmul.f32 %v7084_v31, %v6700_v62 }
0x1f50   :  { %v6768_v54 = vadd.f32 1.0, %v6752_v45  ;;  %v12736_v26 = vpop.f32.mrb[174].mxu1  ;;  %v7022_v7 = vsub.f32 1.0, %v7006_v18  ;;  %v12745_v57 = vadd.f32 %v6685_v16, %v12494_v6  ;;  %v6702_v35 = vmul.f32 0.5, %v12700_v63 }
0x1f51   :  { %v6689_v38 = vpop.f32.mrb[175].mxu1  ;;  %v7007_v19 = vmul.f32 %v9346_v9, %v6927_v33  ;;  %v6753_v40 = vmul.f32 0.3275911, %v6737_v48  ;;  %v7101_v15 = vmul.f32 %v7085_v27, %v6701_v55  ;;  %v6944_v46 = vsub.f32 0.0, %v6736_v8 }
0x1f52   :  { %9347 = vrcp.f32 %v6768_v54  ;;  %v7054_v53 = vsub.f32 0.0, %v7022_v7  ;;  %v12750_v13 = vadd.f32 %v6689_v38, %v12494_v6  ;;  %v12756_v56 = vmul.f32 0.70710677, %v12745_v57 }
0x1f53   :  { %v7023_v30 = vsub.f32 1.0, %v7007_v19  ;;  %v6769_v5 = vadd.f32 1.0, %v6753_v40  ;;  %v7116_v6 = vmul.f32 %v7100_v24, %v6654_v17  ;;  %v6703_v39 = vmul.f32 0.5, %v12708_v12 }
0x1f54   :  { %v7070_v42 = vsel %vm7038_vm2, %v7054_v53, %v7022_v7  ;;  %v12760_v28 = vmul.f32 0.70710677, %v12750_v13  ;;  %v6738_v63 = vand.u32 2147483647, %v12756_v56  ;;  %v7117_v43 = vmul.f32 %v7101_v15, %v6658_v29 }
0x1f55   :  { %v7086_v49 = vadd.f32 1.0, %v7070_v42  ;;  %v7055_v10 = vsub.f32 0.0, %v7023_v30  ;;  %9349 = vrcp.f32 %v6769_v5  ;;  %v6960_v25 = vmul.f32 %v6944_v46, %v6736_v8 }
0x1f56   :  { %v6739_v23 = vand.u32 2147483647, %v12760_v28  ;;  %v6754_v52 = vmul.f32 0.3275911, %v6738_v63  ;;  %v7128_v16 = vpack.c.bf16 %v7117_v43, %v7116_v6  ;;  %v6945_v54 = vsub.f32 0.0, %v6737_v48 }
0x1f57   :  { %v7102_v36 = vmul.f32 %v7086_v49, %v6702_v35  ;;  %v7071_v21 = vsel %vm7039_vm3, %v7055_v10, %v7023_v30  ;;  %v6988_v7 = vmul.f32 1.442695, %v6960_v25  ;;  %v6946_v24 = vsub.f32 0.0, %v6738_v63 }
0x1f58   :  { %v7087_v44 = vadd.f32 1.0, %v7071_v21  ;;  %v6755_v45 = vmul.f32 0.3275911, %v6739_v23  ;;  %v6770_v18 = vadd.f32 1.0, %v6754_v52  ;;  %8352 = vmatprep.mubr.bf16.mxu0 %v7128_v16  ;;  %v6961_v27 = vmul.f32 %v6945_v54, %v6737_v48 }
0x1f59   :  { %v7118_v41 = vmul.f32 %v7102_v36, %v6664_v32  ;;  %v6947_v55 = vsub.f32 0.0, %v6739_v23  ;;  %v6962_v5 = vmul.f32 %v6946_v24, %v6738_v63  ;;  %vm7040_vm4 = vcmp.lt.f32.partialorder %v12723_v61, 0.0 }
0x1f5a   :  { %v7103_v34 = vmul.f32 %v7087_v44, %v6703_v39  ;;  %v6771_v9 = vadd.f32 1.0, %v6755_v45  ;;  %9351 = vrcp.f32 %v6770_v18  ;;  %v6990_v40 = vmul.f32 1.442695, %v6961_v27 }
0x1f5b   :  { %v6963_v6 = vmul.f32 %v6947_v55, %v6739_v23  ;;  %v6992_v44 = vmul.f32 1.442695, %v6962_v5  ;;  %v6674_v55 = vadd.f32 %v12715_v4, %v12528_v14  ;;  %vm7041_vm5 = vcmp.lt.f32.partialorder %v12734_v2, 0.0 }
0x1f5c   :  { %v9348_v31 = vpop.eup %9347  ;;  %v7119_v17 = vmul.f32 %v7103_v34, %v6668_v59  ;;  %9353 = vrcp.f32 %v6771_v9  ;;  %vm7042_vm6 = vcmp.lt.f32.partialorder %v12756_v56, 0.0  ;;  %vm7043_vm7 = vcmp.lt.f32.partialorder %v12760_v28, 0.0 }
0x1f5d   :  { %v6800_v33 = vmul.f32 1.0614054, %v9348_v31  ;;  %9355 = vpow2.f32 %v6988_v7  ;;  %v6994_v59 = vmul.f32 1.442695, %v6963_v6  ;;  %v6688_v56 = vadd.f32 %v12736_v26, %v12528_v14 }
0x1f5e   :  { %v7129_v62 = vpack.c.bf16 %v7119_v17, %v7118_v41  ;;  %9357 = vpow2.f32 %v6990_v40 }
0x1f5f   :  { %v6816_v12 = vadd.f32 -1.4531521, %v6800_v33  ;;  %v9350_v38 = vpop.eup %9349  ;;  %9359 = vpow2.f32 %v6992_v44 }
0x1f60   :  { %8353 = vmatmul.mubr.bf16.gmra.mrb[188].mxu0 %v7129_v62  ;;  %v6801_v3 = vmul.f32 1.0614054, %v9350_v38  ;;  %9361 = vpow2.f32 %v6994_v59 }
0x1f61   :  { %v6832_v29 = vmul.f32 %v9348_v31, %v6816_v12 }
0x1f62   :  { %v6817_v8 = vadd.f32 -1.4531521, %v6801_v3 }
0x1f63   :  { %v6848_v19 = vadd.f32 1.4214138, %v6832_v29 }
0x1f64   :  { %v6833_v30 = vmul.f32 %v9350_v38, %v6817_v8  ;;  %v9352_v35 = vpop.eup %9351 }
0x1f65   :  { %v6864_v53 = vmul.f32 %v9348_v31, %v6848_v19  ;;  %v6802_v10 = vmul.f32 1.0614054, %v9352_v35  ;;  %v6704_v19 = vmul.f32 0.5, %v12718_v51  ;;  %v6705_v51 = vmul.f32 0.5, %v12727_v47 }
0x1f66   :  { %v6849_v42 = vadd.f32 1.4214138, %v6833_v30  ;;  %v9354_v15 = vpop.eup %9353  ;;  %v6706_v47 = vmul.f32 0.5, %v12745_v57  ;;  %v12786_v57 = vld [vmem:[%s12886_s7 + $0x8] ss:$0 sm:$0xff] }
0x1f67   :  { %v6880_v32 = vadd.f32 -0.28449672, %v6864_v53  ;;  %v6803_v36 = vmul.f32 1.0614054, %v9354_v15  ;;  %v6818_v46 = vadd.f32 -1.4531521, %v6802_v10  ;;  %v9356_v34 = vpop.eup %9355 }
0x1f68   :  { %v6865_v48 = vmul.f32 %v9350_v38, %v6849_v42  ;;  %v9358_v12 = vpop.eup %9357 }
0x1f69   :  { %v6896_v49 = vmul.f32 %v9348_v31, %v6880_v32  ;;  %v6819_v52 = vadd.f32 -1.4531521, %v6803_v36  ;;  %v6834_v41 = vmul.f32 %v9352_v35, %v6818_v46  ;;  %v9360_v61 = vpop.eup %9359  ;;  %v6678_v46 = vadd.f32 %v12720_v11, %v12528_v14 }
0x1f6a   :  { %v6881_v39 = vadd.f32 -0.28449672, %v6865_v48  ;;  %v9362_v6 = vpop.eup %9361  ;;  %v6684_v11 = vadd.f32 %v12731_v37, %v12528_v14 }
0x1f6b   :  { %v6912_v21 = vadd.f32 0.2548296, %v6896_v49  ;;  %v6835_v25 = vmul.f32 %v9354_v15, %v6819_v52  ;;  %v6850_v63 = vadd.f32 1.4214138, %v6834_v41 }
0x1f6c   :  { %v6897_v45 = vmul.f32 %v9350_v38, %v6881_v39 }
0x1f6d   :  { %v6928_v43 = vmul.f32 %v9348_v31, %v6912_v21  ;;  %v6851_v33 = vadd.f32 1.4214138, %v6835_v25  ;;  %v6866_v23 = vmul.f32 %v9352_v35, %v6850_v63 }
0x1f6e   :  { %v6913_v16 = vadd.f32 0.2548296, %v6897_v45 }
0x1f6f   :  { %v7008_v18 = vmul.f32 %v9356_v34, %v6928_v43  ;;  %v6867_v17 = vmul.f32 %v9354_v15, %v6851_v33  ;;  %v6882_v7 = vadd.f32 -0.28449672, %v6866_v23  ;;  %v6707_v34 = vmul.f32 0.5, %v12750_v13 }
0x1f70   :  { %v6929_v9 = vmul.f32 %v9350_v38, %v6913_v16 }
0x1f71   :  { %v7024_v54 = vsub.f32 1.0, %v7008_v18  ;;  %v6883_v29 = vadd.f32 -0.28449672, %v6867_v17  ;;  %v6898_v3 = vmul.f32 %v9352_v35, %v6882_v7 }
0x1f72   :  { %v7009_v31 = vmul.f32 %v9358_v12, %v6929_v9 }
0x1f73   :  { %v7056_v62 = vsub.f32 0.0, %v7024_v54  ;;  %v6899_v53 = vmul.f32 %v9354_v15, %v6883_v29  ;;  %v6914_v40 = vadd.f32 0.2548296, %v6898_v3 }
0x1f74   :  { %v7025_v24 = vsub.f32 1.0, %v7009_v31 }
0x1f75   :  { %v7072_v27 = vsel %vm7040_vm4, %v7056_v62, %v7024_v54  ;;  %v6915_v32 = vadd.f32 0.2548296, %v6899_v53  ;;  %v6930_v42 = vmul.f32 %v9352_v35, %v6914_v40  ;;  %v13098_v53 = vld [vmem:[#allocation24_spill] sm:$0xff] }
0x1f76   :  { %v7088_v8 = vadd.f32 1.0, %v7072_v27  ;;  %v7057_v30 = vsub.f32 0.0, %v7025_v24 }
0x1f77   :  { %v6931_v49 = vmul.f32 %v9354_v15, %v6915_v32  ;;  %v7010_v36 = vmul.f32 %v9360_v61, %v6930_v42  ;;  %v13100_v61 = vld [vmem:[#allocation26_spill] sm:$0xff] }
0x1f78   :  { %v7104_v38 = vmul.f32 %v7088_v8, %v6704_v19  ;;  %v7073_v5 = vsel %vm7041_vm5, %v7057_v30, %v7025_v24  ;;  %v13097_v8 = vld [vmem:[#allocation35_spill] sm:$0xff] }
0x1f79   :  { %v7089_v48 = vadd.f32 1.0, %v7073_v5  ;;  %v7011_v21 = vmul.f32 %v9362_v6, %v6931_v49  ;;  %v7026_v39 = vsub.f32 1.0, %v7010_v36  ;;  %v13101_v6 = vld [vmem:[#allocation25_spill] sm:$0xff] }
0x1f7a   :  { %v7120_v10 = vmul.f32 %v7104_v38, %v6674_v55  ;;  %v13099_v38 = vld [vmem:[#allocation34_spill] sm:$0xff] }
0x1f7b   :  { %v7105_v4 = vmul.f32 %v7089_v48, %v6705_v51  ;;  %v7027_v44 = vsub.f32 1.0, %v7011_v21  ;;  %v7058_v52 = vsub.f32 0.0, %v7026_v39 }
0x1f7d   :  { %v7121_v43 = vmul.f32 %v7105_v4, %v6678_v46  ;;  %v7059_v2 = vsub.f32 0.0, %v7027_v44  ;;  %v7074_v35 = vsel %vm7042_vm6, %v7058_v52, %v7026_v39  ;;  %v13102_v46 = vld [vmem:[#allocation18_spill] sm:$0xff] }
0x1f7e   :  { %v7090_v41 = vadd.f32 1.0, %v7074_v35  ;;  %v13104_v35 = vld [vmem:[#allocation31_spill] sm:$0xff] }
0x1f7f   :  { %v7130_v15 = vpack.c.bf16 %v7121_v43, %v7120_v10  ;;  %v7075_v59 = vsel %vm7043_vm7, %v7059_v2, %v7027_v44  ;;  %v13103_v44 = vld [vmem:[#allocation15_spill] sm:$0xff] }
0x1f80   :  { %v7091_v45 = vadd.f32 1.0, %v7075_v59  ;;  %v7106_v25 = vmul.f32 %v7090_v41, %v6706_v47  ;;  %v13105_v59 = vld [vmem:[#allocation29_spill] sm:$0xff] }
0x1f81   :  { %8356 = vmatprep.mubr.bf16.mxu0 %v7130_v15 }
0x1f82   :  { %v7107_v18 = vmul.f32 %v7091_v45, %v6707_v34  ;;  %v7122_v63 = vmul.f32 %v7106_v25, %v6684_v11 }
0x1f84   :  { %v7123_v16 = vmul.f32 %v7107_v18, %v6688_v56 }
0x1f86   :  { %v7131_v28 = vpack.c.bf16 %v7123_v16, %v7122_v63 }
0x1f88   :  { %8357 = vmatmul.mubr.bf16.gmra.mrb[192].mxu0 %v7131_v28 }
0x1fcf   :  { %v8346_v13 = vpop.f32.mrb[180].mxu0 }
0x1fd0   :  { %v7295_v33 = vadd.f32 %v8346_v13, %v12169_v58  ;;  %v7230_v54 = vpop.f32.mrb[181].mxu0 }
0x1fd1   :  { %v7293_v37 = vadd.f32 %v7230_v54, %v12157_v20  ;;  %v8347_v23 = vpop.f32.mrb[182].mxu0 }
0x1fd2   :  { %v7315_v9 = vadd.f32 %v12786_v57, %v7295_v33  ;;  %v7296_v14 = vadd.f32 %v8347_v23, %v12161_v50  ;;  %v7233_v26 = vpop.f32.mrb[183].mxu0 }
0x1fd3   :  { %v7313_v17 = vadd.f32 %v12786_v57, %v7293_v37  ;;  %v7294_v12 = vadd.f32 %v7233_v26, %v12164_v22 }
0x1fd4   :  { %7331 = vst.msk [vmem:[%s12893_s9 + $0x10] sm:$0xff] %vm53_vm0, %v7315_v9  ;;  %v7316_v58 = vadd.f32 %v12786_v57, %v7296_v14 }
0x1fd5   :  { %7329 = vst.msk [vmem:[%s12893_s9] sm:$0xff] %vm53_vm0, %v7313_v17  ;;  %v7314_v20 = vadd.f32 %v12786_v57, %v7294_v12 }
0x1fd6   :  { %7332 = vst.msk [vmem:[%s12893_s9 + $0x18] sm:$0xff] %vm53_vm0, %v7316_v58 }
0x1fd7   :  { %7330 = vst.msk [vmem:[%s12893_s9 + $0x8] sm:$0xff] %vm53_vm0, %v7314_v20 }
0x1fe2   :  { %v8350_v50 = vpop.f32.mrb[184].mxu0 }
0x1fe3   :  { %v7299_v22 = vadd.f32 %v8350_v50, %v12204_v60  ;;  %v7246_v62 = vpop.f32.mrb[185].mxu0 }
0x1fe4   :  { %v7297_v7 = vadd.f32 %v7246_v62, %v12195_v0  ;;  %v8351_v31 = vpop.f32.mrb[186].mxu0 }
0x1fe5   :  { %v7319_v29 = vadd.f32 %v12786_v57, %v7299_v22  ;;  %v7300_v27 = vadd.f32 %v8351_v31, %v12209_v1  ;;  %v7249_v3 = vpop.f32.mrb[187].mxu0 }
0x1fe6   :  { %v7317_v19 = vadd.f32 %v12786_v57, %v7297_v7  ;;  %v7298_v24 = vadd.f32 %v7249_v3, %v13097_v8 }
0x1fe7   :  { %7335 = vst.msk [vmem:[%s12893_s9 + $0x30] sm:$0xff] %vm53_vm0, %v7319_v29  ;;  %v7320_v60 = vadd.f32 %v12786_v57, %v7300_v27 }
0x1fe8   :  { %7333 = vst.msk [vmem:[%s12893_s9 + $0x20] sm:$0xff] %vm53_vm0, %v7317_v19  ;;  %v7318_v0 = vadd.f32 %v12786_v57, %v7298_v24 }
0x1fe9   :  { %7336 = vst.msk [vmem:[%s12893_s9 + $0x38] sm:$0xff] %vm53_vm0, %v7320_v60 }
0x1fea   :  { %7334 = vst.msk [vmem:[%s12893_s9 + $0x28] sm:$0xff] %vm53_vm0, %v7318_v0 }
0x2033   :  { %v8354_v1 = vpop.f32.mrb[188].mxu0 }
0x2034   :  { %v7303_v40 = vadd.f32 %v8354_v1, %v13098_v53  ;;  %v7262_v55 = vpop.f32.mrb[189].mxu0 }
0x2035   :  { %v7301_v30 = vadd.f32 %v7262_v55, %v13099_v38  ;;  %v8355_v32 = vpop.f32.mrb[190].mxu0 }
0x2036   :  { %v7323_v42 = vadd.f32 %v12786_v57, %v7303_v40  ;;  %v7304_v5 = vadd.f32 %v8355_v32, %v13100_v61  ;;  %v7265_v49 = vpop.f32.mrb[191].mxu0 }
0x2037   :  { %v7321_v10 = vadd.f32 %v12786_v57, %v7301_v30  ;;  %v7302_v51 = vadd.f32 %v7265_v49, %v13101_v6 }
0x2038   :  { %7339 = vst.msk [vmem:[%s12893_s9 + $0x50] sm:$0xff] %vm53_vm0, %v7323_v42  ;;  %v7324_v48 = vadd.f32 %v12786_v57, %v7304_v5 }
0x2039   :  { %7337 = vst.msk [vmem:[%s12893_s9 + $0x40] sm:$0xff] %vm53_vm0, %v7321_v10  ;;  %v7322_v36 = vadd.f32 %v12786_v57, %v7302_v51 }
0x203a   :  { %7340 = vst.msk [vmem:[%s12893_s9 + $0x58] sm:$0xff] %vm53_vm0, %v7324_v48 }
0x203b   :  { %7338 = vst.msk [vmem:[%s12893_s9 + $0x48] sm:$0xff] %vm53_vm0, %v7322_v36 }
0x205b   :  { %v8358_v21 = vpop.f32.mrb[192].mxu0 }
0x205c   :  { %v7307_v4 = vadd.f32 %v8358_v21, %v13102_v46  ;;  %v7278_v39 = vpop.f32.mrb[193].mxu0 }
0x205d   :  { %v7305_v52 = vadd.f32 %v7278_v39, %v13103_v44  ;;  %v8359_v43 = vpop.f32.mrb[194].mxu0 }
0x205e   :  { %v7327_v2 = vadd.f32 %v12786_v57, %v7307_v4  ;;  %v7308_v15 = vadd.f32 %v8359_v43, %v13104_v35  ;;  %v7281_v47 = vpop.f32.mrb[195].mxu0 }
0x205f   :  { %v7325_v41 = vadd.f32 %v12786_v57, %v7305_v52  ;;  %v7306_v34 = vadd.f32 %v7281_v47, %v13105_v59 }
0x2060   :  { %7343 = vst.msk [vmem:[%s12893_s9 + $0x70] sm:$0xff] %vm53_vm0, %v7327_v2  ;;  %v7328_v45 = vadd.f32 %v12786_v57, %v7308_v15 }
0x2061   :  { %7341 = vst.msk [vmem:[%s12893_s9 + $0x60] sm:$0xff] %vm53_vm0, %v7325_v41  ;;  %v7326_v11 = vadd.f32 %v12786_v57, %v7306_v34 }
0x2062   :  { %7344 = vst.msk [vmem:[%s12893_s9 + $0x78] sm:$0xff] %vm53_vm0, %v7328_v45 }
0x2063   :  { %7342 = vst.msk [vmem:[%s12893_s9 + $0x68] sm:$0xff] %vm53_vm0, %v7326_v11 }

</bundles_post_ra>
